<compile_context>
chip_gen: v6e
topology: v6e:2x2x1
jax: 0.10.0
libtpu: 0.0.40
codegen_flags: <defaults>
</compile_context>

<pallas_src>
import functools

import jax
import jax.numpy as jnp
from jax.experimental import pallas as pl
from jax.experimental.pallas import tpu as pltpu


# ---------------------------------------------------------------------------
# Fused forward kernel (TB batch elements per grid step)
# ---------------------------------------------------------------------------
def _classifier_kernel(x_ref, w1_ref, b1_ref, w2_ref, b2_ref, w3_ref, b3_ref,
                       w4_ref, b4_ref, w5_ref, b5_ref, out_ref,
                       s1, s2, s3, s4, *, dims, alpha, tb):
    (K, L_in, L1, L2, L3, L4, L5, C1, C2, C3, H) = dims

    def leaky(v):
        return jnp.where(v >= 0, v, alpha * v)

    # Static unroll over the TB samples handled by this grid step.
    for s in range(tb):
        base = s * L_in

        # --- Conv1d(1, C1, k=K, s=1): Cin=1 -> K VPU broadcast-FMAs (MXU stays free)
        acc1 = jnp.zeros((L1, C1), jnp.float32)
        for t in range(K):
            xt = x_ref[pl.ds(base + t, L1), :]          # (L1, 1) shifted input slice
            wt = w1_ref[pl.ds(t, 1), :]                 # (1, C1) tap-t weights
            acc1 = acc1 + xt * wt
        s1[...] = leaky(acc1 + b1_ref[...])             # (L1, C1)

        # --- MaxPool1d(2,2): max of two stride-2 VMEM reads (floor mode) ----------
        s2[...] = jnp.maximum(s1[pl.ds(0, L2, stride=2), :],
                              s1[pl.ds(1, L2, stride=2), :])        # (L2, C1)

        # --- Conv1d(C1, C2, k=K, s=2): K MXU matmuls, contraction dim = C1 --------
        acc2 = jnp.zeros((L3, C2), jnp.float32)
        for t in range(K):
            xt = s2[pl.ds(t, L3, stride=2), :]          # (L3, C1)
            acc2 = acc2 + jnp.dot(xt, w2_ref[t], preferred_element_type=jnp.float32)
        s3[...] = leaky(acc2 + b2_ref[...])             # (L3, C2)

        # --- MaxPool1d(2,2) --------------------------------------------------------
        s4[...] = jnp.maximum(s3[pl.ds(0, L4, stride=2), :],
                              s3[pl.ds(1, L4, stride=2), :])        # (L4, C2)

        # --- Conv1d(C2, C3, k=K, s=2): K MXU matmuls, contraction dim = C2 --------
        acc3 = jnp.zeros((L5, C3), jnp.float32)
        for t in range(K):
            xt = s4[pl.ds(t, L5, stride=2), :]          # (L5, C2)
            acc3 = acc3 + jnp.dot(xt, w3_ref[t], preferred_element_type=jnp.float32)
        y3 = leaky(acc3 + b3_ref[...])                  # (L5, C3)  NLC layout

        # --- Flatten (channel-major == nn.Flatten on a PyTorch NCL tensor) fused
        #     into fc1:  h = sum_l  y3[l, :] @ w4r[l]  with w4r[l, c, j] = w4[c*L5+l, j]
        h = jnp.zeros((1, H), jnp.float32)
        for l in range(L5):
            h = h + jnp.dot(y3[l:l + 1, :], w4_ref[l],
                            preferred_element_type=jnp.float32)
        h = leaky(h + b4_ref[...])                      # (1, H)

        # --- fc2 -> logits (only HBM store of the whole network) ------------------
        out = jnp.dot(h, w5_ref[...], preferred_element_type=jnp.float32) + b5_ref[...]
        out_ref[s] = out.astype(out_ref.dtype)          # (1, type_count)


def _samples_per_step(batch, cap=8):
    """Largest TB dividing batch with batch//TB >= 2 (keeps megacore busy)."""
    for t in (8, 4, 2):
        if t <= cap and batch % t == 0 and batch // t >= 2:
            return t
    return 1


# ---------------------------------------------------------------------------
# Wrapper
# ---------------------------------------------------------------------------
def classifier_forward(params, x_ncl, *, alpha=0.02):
    """x_ncl: (B, 1, MTU_LENGTH) float32 -> logits (B, type_count)."""
    B, cin, L_in = x_ncl.shape
    assert cin == 1
    K = params["w1"].shape[2]            # 5
    C1 = params["w1"].shape[0]           # 32
    C2 = params["w2"].shape[0]           # 128
    C3 = params["w3"].shape[0]           # 64
    H = params["w4"].shape[1]            # 64
    TC = params["w5"].shape[1]           # type_count
    L1 = L_in - K + 1                    # conv1 (s=1)
    L2 = L1 // 2                         # pool1
    L3 = (L2 - K) // 2 + 1               # conv2 (s=2)
    L4 = L3 // 2                         # pool2
    L5 = (L4 - K) // 2 + 1               # conv3 (s=2)
    assert params["w4"].shape[0] == C3 * L5

    TB = _samples_per_step(B)            # samples per grid step
    n_steps = B // TB

    # One-time weight re-layouts (tiny XLA ops on parameters, not activations).
    x2 = x_ncl.reshape(B * L_in, 1)                               # Cin=1, NCL==flat
    w1t = jnp.transpose(params["w1"], (2, 1, 0)).reshape(K, C1)   # (K, C1)
    w2t = jnp.transpose(params["w2"], (2, 1, 0))                  # (K, C1, C2)
    w3t = jnp.transpose(params["w3"], (2, 1, 0))                  # (K, C2, C3)
    w4r = params["w4"].reshape(C3, L5, H).transpose(1, 0, 2)      # (L5, C3, H)
    b1 = params["b1"].reshape(1, C1)
    b2 = params["b2"].reshape(1, C2)
    b3 = params["b3"].reshape(1, C3)
    b4 = params["b4"].reshape(1, H)
    b5 = params["b5"].reshape(1, TC)

    dims = (K, L_in, L1, L2, L3, L4, L5, C1, C2, C3, H)
    kernel = functools.partial(_classifier_kernel, dims=dims, alpha=alpha, tb=TB)

    out = pl.pallas_call(
        kernel,
        out_shape=jax.ShapeDtypeStruct((B, 1, TC), jnp.float32),
        grid=(n_steps,),
        in_specs=[
            pl.BlockSpec((TB * L_in, 1), lambda i: (i, 0)),       # TB samples of input
            pl.BlockSpec((K, C1), lambda i: (0, 0)),              # conv1 taps
            pl.BlockSpec((1, C1), lambda i: (0, 0)),              # b1
            pl.BlockSpec((K, C1, C2), lambda i: (0, 0, 0)),       # conv2 taps
            pl.BlockSpec((1, C2), lambda i: (0, 0)),              # b2
            pl.BlockSpec((K, C2, C3), lambda i: (0, 0, 0)),       # conv3 taps
            pl.BlockSpec((1, C3), lambda i: (0, 0)),              # b3
            pl.BlockSpec((L5, C3, H), lambda i: (0, 0, 0)),       # fc1 (position-split)
            pl.BlockSpec((1, H), lambda i: (0, 0)),               # b4
            pl.BlockSpec((H, TC), lambda i: (0, 0)),              # fc2
            pl.BlockSpec((1, TC), lambda i: (0, 0)),              # b5
        ],
        out_specs=pl.BlockSpec((TB, 1, TC), lambda i: (i, 0, 0)),
        scratch_shapes=[
            pltpu.VMEM((L1, C1), jnp.float32),   # conv1 out (pre-pool)
            pltpu.VMEM((L2, C1), jnp.float32),   # pool1 out
            pltpu.VMEM((L3, C2), jnp.float32),   # conv2 out (pre-pool)
            pltpu.VMEM((L4, C2), jnp.float32),   # pool2 out
        ],
        compiler_params=pltpu.CompilerParams(
            dimension_semantics=("parallel",)),   # batch steps sharded over 2 TCs
    )(x2, w1t, b1, w2t, b2, w3t, b3, w4r, b4, params["w5"], b5)
    return out.reshape(B, TC)


# ---------------------------------------------------------------------------
# Pure-JAX reference (for correctness check)
# ---------------------------------------------------------------------------
def _reference_forward(params, x_ncl, alpha=0.02):
    def leaky(v):
        return jnp.where(v >= 0, v, alpha * v)

    def conv1d_ref(x_nlc, w, b, stride):
        B, L, Cin = x_nlc.shape
        Cout, _, K = w.shape
        Lout = (L - K) // stride + 1
        idx = jnp.arange(Lout)[:, None] * stride + jnp.arange(K)[None, :]
        patches = x_nlc[:, idx, :].reshape(B, Lout, K * Cin)
        w_mat = jnp.transpose(w, (2, 1, 0)).reshape(K * Cin, Cout)
        return patches @ w_mat + b

    def pool2(x_nlc):
        B, L, C = x_nlc.shape
        Lo = L // 2
        return jnp.max(x_nlc[:, :2 * Lo, :].reshape(B, Lo, 2, C), axis=2)

    x = jnp.transpose(x_ncl, (0, 2, 1))
    x = pool2(leaky(conv1d_ref(x, params["w1"], params["b1"], 1)))
    x = pool2(leaky(conv1d_ref(x, params["w2"], params["b2"], 2)))
    x = leaky(conv1d_ref(x, params["w3"], params["b3"], 2))
    feat = jnp.transpose(x, (0, 2, 1)).reshape(x.shape[0], -1)   # channel-major flatten
    h = leaky(feat @ params["w4"] + params["b4"])
    return h @ params["w5"] + params["b5"]


# ---------------------------------------------------------------------------
# Deterministic parameter init (shapes follow the PyTorch module)
# ---------------------------------------------------------------------------
def init_params(key, mtu_length, type_count):
    l1 = mtu_length - 4
    l2 = l1 // 2
    l3 = (l2 - 5) // 2 + 1
    l4 = l3 // 2
    l5 = (l4 - 5) // 2 + 1
    flat = 64 * l5

    ks = jax.random.split(key, 10)
    scale = 0.05
    return {
        "w1": scale * jax.random.normal(ks[0], (32, 1, 5), jnp.float32),
        "b1": scale * jax.random.normal(ks[1], (32,), jnp.float32),
        "w2": scale * jax.random.normal(ks[2], (128, 32, 5), jnp.float32),
        "b2": scale * jax.random.normal(ks[3], (128,), jnp.float32),
        "w3": scale * jax.random.normal(ks[4], (64, 128, 5), jnp.float32),
        "b3": scale * jax.random.normal(ks[5], (64,), jnp.float32),
        "w4": scale * jax.random.normal(ks[6], (flat, 64), jnp.float32),   # (in, out)
        "b4": scale * jax.random.normal(ks[7], (64,), jnp.float32),
        "w5": scale * jax.random.normal(ks[8], (64, type_count), jnp.float32),
        "b5": scale * jax.random.normal(ks[9], (type_count,), jnp.float32),
    }


if __name__ == "__main__":
    MTU_LENGTH = 128
    TYPE_COUNT = 4
    BATCH = 8          # exercises TB=4 (2 grid steps, megacore-parallel)

    key = jax.random.PRNGKey(0)
    k_params, k_x = jax.random.split(key)

    params = init_params(k_params, MTU_LENGTH, TYPE_COUNT)
    x = jax.random.normal(k_x, (BATCH, 1, MTU_LENGTH), jnp.float32)

    logits = jax.jit(classifier_forward)(params, x)
    jax.block_until_ready(logits)
    assert logits.shape == (BATCH, TYPE_COUNT)

    with jax.default_matmul_precision("float32"):
        ref = jax.jit(_reference_forward)(params, x)
    jax.block_until_ready(ref)
    max_err = float(jnp.max(jnp.abs(logits - ref)))
    assert jnp.allclose(logits, ref, atol=2e-3, rtol=2e-2), max_err

    print("KERNEL_OK")
</pallas_src>

<mosaic_0001>
module attributes {stable_mosaic.version = 11 : i64} {
  func.func @_classifier_kernel(%arg0: i32, %arg1: memref<512x1xf32, #tpu.memory_space<vmem>>, %arg2: memref<5x32xf32, #tpu.memory_space<vmem>>, %arg3: memref<1x32xf32, #tpu.memory_space<vmem>>, %arg4: memref<5x32x128xf32, #tpu.memory_space<vmem>>, %arg5: memref<1x128xf32, #tpu.memory_space<vmem>>, %arg6: memref<5x128x64xf32, #tpu.memory_space<vmem>>, %arg7: memref<1x64xf32, #tpu.memory_space<vmem>>, %arg8: memref<5x64x64xf32, #tpu.memory_space<vmem>>, %arg9: memref<1x64xf32, #tpu.memory_space<vmem>>, %arg10: memref<64x4xf32, #tpu.memory_space<vmem>>, %arg11: memref<1x4xf32, #tpu.memory_space<vmem>>, %arg12: memref<4x1x4xf32, #tpu.memory_space<vmem>>, %arg13: memref<124x32xf32, #tpu.memory_space<vmem>>, %arg14: memref<62x32xf32, #tpu.memory_space<vmem>>, %arg15: memref<29x128xf32, #tpu.memory_space<vmem>>, %arg16: memref<14x128xf32, #tpu.memory_space<vmem>>) attributes {dimension_semantics = [#tpu.dimension_semantics<parallel>], iteration_bounds = array<i64: 2>, scalar_prefetch = 0 : i64, scratch_operands = 4 : i64, tpu.core_type = #tpu.core_type<tc>, window_params = [{transform_indices = @transform_0, window_bounds = array<i64: 512, 1>}, {pipeline_mode = #tpu.pipeline_mode<synchronous>, transform_indices = @transform_1, window_bounds = array<i64: 5, 32>}, {pipeline_mode = #tpu.pipeline_mode<synchronous>, transform_indices = @transform_2, window_bounds = array<i64: 1, 32>}, {pipeline_mode = #tpu.pipeline_mode<synchronous>, transform_indices = @transform_3, window_bounds = array<i64: 5, 32, 128>}, {pipeline_mode = #tpu.pipeline_mode<synchronous>, transform_indices = @transform_4, window_bounds = array<i64: 1, 128>}, {pipeline_mode = #tpu.pipeline_mode<synchronous>, transform_indices = @transform_5, window_bounds = array<i64: 5, 128, 64>}, {pipeline_mode = #tpu.pipeline_mode<synchronous>, transform_indices = @transform_6, window_bounds = array<i64: 1, 64>}, {pipeline_mode = #tpu.pipeline_mode<synchronous>, transform_indices = @transform_7, window_bounds = array<i64: 5, 64, 64>}, {pipeline_mode = #tpu.pipeline_mode<synchronous>, transform_indices = @transform_8, window_bounds = array<i64: 1, 64>}, {pipeline_mode = #tpu.pipeline_mode<synchronous>, transform_indices = @transform_9, window_bounds = array<i64: 64, 4>}, {pipeline_mode = #tpu.pipeline_mode<synchronous>, transform_indices = @transform_10, window_bounds = array<i64: 1, 4>}, {transform_indices = @transform_11, window_bounds = array<i64: 4, 1, 4>}]} {
    %cst = arith.constant 0.000000e+00 : f32
    %0 = vector.broadcast %cst : f32 to vector<124x32xf32>
    %c0 = arith.constant 0 : index
    %c0_0 = arith.constant 0 : index
    %1 = vector.load %arg1[%c0, %c0_0] : memref<512x1xf32, #tpu.memory_space<vmem>>, vector<124x1xf32>
    %c0_1 = arith.constant 0 : index
    %c0_2 = arith.constant 0 : index
    %2 = vector.load %arg2[%c0_1, %c0_2] : memref<5x32xf32, #tpu.memory_space<vmem>>, vector<1x32xf32>
    %3 = vector.broadcast %1 : vector<124x1xf32> to vector<124x32xf32>
    %4 = vector.broadcast %2 : vector<1x32xf32> to vector<124x32xf32>
    %5 = arith.mulf %3, %4 : vector<124x32xf32>
    %6 = arith.addf %0, %5 : vector<124x32xf32>
    %c1 = arith.constant 1 : index
    %c0_3 = arith.constant 0 : index
    %7 = vector.load %arg1[%c1, %c0_3] : memref<512x1xf32, #tpu.memory_space<vmem>>, vector<124x1xf32>
    %c1_4 = arith.constant 1 : index
    %c0_5 = arith.constant 0 : index
    %8 = vector.load %arg2[%c1_4, %c0_5] : memref<5x32xf32, #tpu.memory_space<vmem>>, vector<1x32xf32>
    %9 = vector.broadcast %7 : vector<124x1xf32> to vector<124x32xf32>
    %10 = vector.broadcast %8 : vector<1x32xf32> to vector<124x32xf32>
    %11 = arith.mulf %9, %10 : vector<124x32xf32>
    %12 = arith.addf %6, %11 : vector<124x32xf32>
    %c2 = arith.constant 2 : index
    %c0_6 = arith.constant 0 : index
    %13 = vector.load %arg1[%c2, %c0_6] : memref<512x1xf32, #tpu.memory_space<vmem>>, vector<124x1xf32>
    %c2_7 = arith.constant 2 : index
    %c0_8 = arith.constant 0 : index
    %14 = vector.load %arg2[%c2_7, %c0_8] : memref<5x32xf32, #tpu.memory_space<vmem>>, vector<1x32xf32>
    %15 = vector.broadcast %13 : vector<124x1xf32> to vector<124x32xf32>
    %16 = vector.broadcast %14 : vector<1x32xf32> to vector<124x32xf32>
    %17 = arith.mulf %15, %16 : vector<124x32xf32>
    %18 = arith.addf %12, %17 : vector<124x32xf32>
    %c3 = arith.constant 3 : index
    %c0_9 = arith.constant 0 : index
    %19 = vector.load %arg1[%c3, %c0_9] : memref<512x1xf32, #tpu.memory_space<vmem>>, vector<124x1xf32>
    %c3_10 = arith.constant 3 : index
    %c0_11 = arith.constant 0 : index
    %20 = vector.load %arg2[%c3_10, %c0_11] : memref<5x32xf32, #tpu.memory_space<vmem>>, vector<1x32xf32>
    %21 = vector.broadcast %19 : vector<124x1xf32> to vector<124x32xf32>
    %22 = vector.broadcast %20 : vector<1x32xf32> to vector<124x32xf32>
    %23 = arith.mulf %21, %22 : vector<124x32xf32>
    %24 = arith.addf %18, %23 : vector<124x32xf32>
    %c4 = arith.constant 4 : index
    %c0_12 = arith.constant 0 : index
    %25 = vector.load %arg1[%c4, %c0_12] : memref<512x1xf32, #tpu.memory_space<vmem>>, vector<124x1xf32>
    %c4_13 = arith.constant 4 : index
    %c0_14 = arith.constant 0 : index
    %26 = vector.load %arg2[%c4_13, %c0_14] : memref<5x32xf32, #tpu.memory_space<vmem>>, vector<1x32xf32>
    %27 = vector.broadcast %25 : vector<124x1xf32> to vector<124x32xf32>
    %28 = vector.broadcast %26 : vector<1x32xf32> to vector<124x32xf32>
    %29 = arith.mulf %27, %28 : vector<124x32xf32>
    %30 = arith.addf %24, %29 : vector<124x32xf32>
    %c0_15 = arith.constant 0 : index
    %c0_16 = arith.constant 0 : index
    %31 = vector.load %arg3[%c0_15, %c0_16] : memref<1x32xf32, #tpu.memory_space<vmem>>, vector<1x32xf32>
    %32 = vector.broadcast %31 : vector<1x32xf32> to vector<124x32xf32>
    %33 = arith.addf %30, %32 : vector<124x32xf32>
    %cst_17 = arith.constant 0.000000e+00 : f32
    %34 = vector.broadcast %cst_17 : f32 to vector<124x32xf32>
    %35 = arith.cmpf oge, %33, %34 : vector<124x32xf32>
    %cst_18 = arith.constant 2.000000e-02 : f32
    %36 = vector.broadcast %cst_18 : f32 to vector<124x32xf32>
    %37 = arith.mulf %36, %33 : vector<124x32xf32>
    %38 = arith.select %35, %33, %37 : vector<124x32xi1>, vector<124x32xf32>
    %c0_19 = arith.constant 0 : index
    %c0_20 = arith.constant 0 : index
    %39 = vector.load %arg13[%c0_19, %c0_20] : memref<124x32xf32, #tpu.memory_space<vmem>>, vector<124x32xf32>
    tpu.vector_store %arg13[%c0_19, %c0_20], %38 {strides = array<i32>} : memref<124x32xf32, #tpu.memory_space<vmem>>, vector<124x32xf32>,
    %c0_21 = arith.constant 0 : index
    %c0_22 = arith.constant 0 : index
    %40 = tpu.strided_load %arg13[%c0_21, %c0_22] {strides = array<i32: 2, 1>} : memref<124x32xf32, #tpu.memory_space<vmem>>, vector<62x32xf32>
    %c1_23 = arith.constant 1 : index
    %c0_24 = arith.constant 0 : index
    %41 = tpu.strided_load %arg13[%c1_23, %c0_24] {strides = array<i32: 2, 1>} : memref<124x32xf32, #tpu.memory_space<vmem>>, vector<62x32xf32>
    %42 = arith.maximumf %40, %41 : vector<62x32xf32>
    %c0_25 = arith.constant 0 : index
    %c0_26 = arith.constant 0 : index
    %43 = vector.load %arg14[%c0_25, %c0_26] : memref<62x32xf32, #tpu.memory_space<vmem>>, vector<62x32xf32>
    tpu.vector_store %arg14[%c0_25, %c0_26], %42 {strides = array<i32>} : memref<62x32xf32, #tpu.memory_space<vmem>>, vector<62x32xf32>,
    %cst_27 = arith.constant 0.000000e+00 : f32
    %44 = vector.broadcast %cst_27 : f32 to vector<29x128xf32>
    %c0_28 = arith.constant 0 : index
    %c0_29 = arith.constant 0 : index
    %45 = tpu.strided_load %arg14[%c0_28, %c0_29] {strides = array<i32: 2, 1>} : memref<62x32xf32, #tpu.memory_space<vmem>>, vector<29x32xf32>
    %c0_30 = arith.constant 0 : index
    %c0_31 = arith.constant 0 : index
    %c0_32 = arith.constant 0 : index
    %46 = vector.load %arg4[%c0_30, %c0_31, %c0_32] : memref<5x32x128xf32, #tpu.memory_space<vmem>>, vector<1x32x128xf32>
    %47 = vector.shape_cast %46 : vector<1x32x128xf32> to vector<32x128xf32>
    %cst_33 = arith.constant dense<0.000000e+00> : vector<29x128xf32>
    %48 = tpu.matmul %45, %47, %cst_33 {dimension_numbers = #tpu.dot_dimension_numbers<[1], [0], [0], [1], [0, 0, 1, 1], [], []>} : vector<29x32xf32>, vector<32x128xf32>, vector<29x128xf32> -> vector<29x128xf32>
    %49 = arith.addf %44, %48 : vector<29x128xf32>
    %c1_34 = arith.constant 1 : index
    %c0_35 = arith.constant 0 : index
    %50 = tpu.strided_load %arg14[%c1_34, %c0_35] {strides = array<i32: 2, 1>} : memref<62x32xf32, #tpu.memory_space<vmem>>, vector<29x32xf32>
    %c1_36 = arith.constant 1 : index
    %c0_37 = arith.constant 0 : index
    %c0_38 = arith.constant 0 : index
    %51 = vector.load %arg4[%c1_36, %c0_37, %c0_38] : memref<5x32x128xf32, #tpu.memory_space<vmem>>, vector<1x32x128xf32>
    %52 = vector.shape_cast %51 : vector<1x32x128xf32> to vector<32x128xf32>
    %cst_39 = arith.constant dense<0.000000e+00> : vector<29x128xf32>
    %53 = tpu.matmul %50, %52, %cst_39 {dimension_numbers = #tpu.dot_dimension_numbers<[1], [0], [0], [1], [0, 0, 1, 1], [], []>} : vector<29x32xf32>, vector<32x128xf32>, vector<29x128xf32> -> vector<29x128xf32>
    %54 = arith.addf %49, %53 : vector<29x128xf32>
    %c2_40 = arith.constant 2 : index
    %c0_41 = arith.constant 0 : index
    %55 = tpu.strided_load %arg14[%c2_40, %c0_41] {strides = array<i32: 2, 1>} : memref<62x32xf32, #tpu.memory_space<vmem>>, vector<29x32xf32>
    %c2_42 = arith.constant 2 : index
    %c0_43 = arith.constant 0 : index
    %c0_44 = arith.constant 0 : index
    %56 = vector.load %arg4[%c2_42, %c0_43, %c0_44] : memref<5x32x128xf32, #tpu.memory_space<vmem>>, vector<1x32x128xf32>
    %57 = vector.shape_cast %56 : vector<1x32x128xf32> to vector<32x128xf32>
    %cst_45 = arith.constant dense<0.000000e+00> : vector<29x128xf32>
    %58 = tpu.matmul %55, %57, %cst_45 {dimension_numbers = #tpu.dot_dimension_numbers<[1], [0], [0], [1], [0, 0, 1, 1], [], []>} : vector<29x32xf32>, vector<32x128xf32>, vector<29x128xf32> -> vector<29x128xf32>
    %59 = arith.addf %54, %58 : vector<29x128xf32>
    %c3_46 = arith.constant 3 : index
    %c0_47 = arith.constant 0 : index
    %60 = tpu.strided_load %arg14[%c3_46, %c0_47] {strides = array<i32: 2, 1>} : memref<62x32xf32, #tpu.memory_space<vmem>>, vector<29x32xf32>
    %c3_48 = arith.constant 3 : index
    %c0_49 = arith.constant 0 : index
    %c0_50 = arith.constant 0 : index
    %61 = vector.load %arg4[%c3_48, %c0_49, %c0_50] : memref<5x32x128xf32, #tpu.memory_space<vmem>>, vector<1x32x128xf32>
    %62 = vector.shape_cast %61 : vector<1x32x128xf32> to vector<32x128xf32>
    %cst_51 = arith.constant dense<0.000000e+00> : vector<29x128xf32>
    %63 = tpu.matmul %60, %62, %cst_51 {dimension_numbers = #tpu.dot_dimension_numbers<[1], [0], [0], [1], [0, 0, 1, 1], [], []>} : vector<29x32xf32>, vector<32x128xf32>, vector<29x128xf32> -> vector<29x128xf32>
    %64 = arith.addf %59, %63 : vector<29x128xf32>
    %c4_52 = arith.constant 4 : index
    %c0_53 = arith.constant 0 : index
    %65 = tpu.strided_load %arg14[%c4_52, %c0_53] {strides = array<i32: 2, 1>} : memref<62x32xf32, #tpu.memory_space<vmem>>, vector<29x32xf32>
    %c4_54 = arith.constant 4 : index
    %c0_55 = arith.constant 0 : index
    %c0_56 = arith.constant 0 : index
    %66 = vector.load %arg4[%c4_54, %c0_55, %c0_56] : memref<5x32x128xf32, #tpu.memory_space<vmem>>, vector<1x32x128xf32>
    %67 = vector.shape_cast %66 : vector<1x32x128xf32> to vector<32x128xf32>
    %cst_57 = arith.constant dense<0.000000e+00> : vector<29x128xf32>
    %68 = tpu.matmul %65, %67, %cst_57 {dimension_numbers = #tpu.dot_dimension_numbers<[1], [0], [0], [1], [0, 0, 1, 1], [], []>} : vector<29x32xf32>, vector<32x128xf32>, vector<29x128xf32> -> vector<29x128xf32>
    %69 = arith.addf %64, %68 : vector<29x128xf32>
    %c0_58 = arith.constant 0 : index
    %c0_59 = arith.constant 0 : index
    %70 = vector.load %arg5[%c0_58, %c0_59] : memref<1x128xf32, #tpu.memory_space<vmem>>, vector<1x128xf32>
    %71 = vector.broadcast %70 : vector<1x128xf32> to vector<29x128xf32>
    %72 = arith.addf %69, %71 : vector<29x128xf32>
    %cst_60 = arith.constant 0.000000e+00 : f32
    %73 = vector.broadcast %cst_60 : f32 to vector<29x128xf32>
    %74 = arith.cmpf oge, %72, %73 : vector<29x128xf32>
    %cst_61 = arith.constant 2.000000e-02 : f32
    %75 = vector.broadcast %cst_61 : f32 to vector<29x128xf32>
    %76 = arith.mulf %75, %72 : vector<29x128xf32>
    %77 = arith.select %74, %72, %76 : vector<29x128xi1>, vector<29x128xf32>
    %c0_62 = arith.constant 0 : index
    %c0_63 = arith.constant 0 : index
    %78 = vector.load %arg15[%c0_62, %c0_63] : memref<29x128xf32, #tpu.memory_space<vmem>>, vector<29x128xf32>
    tpu.vector_store %arg15[%c0_62, %c0_63], %77 {strides = array<i32>} : memref<29x128xf32, #tpu.memory_space<vmem>>, vector<29x128xf32>,
    %c0_64 = arith.constant 0 : index
    %c0_65 = arith.constant 0 : index
    %79 = tpu.strided_load %arg15[%c0_64, %c0_65] {strides = array<i32: 2, 1>} : memref<29x128xf32, #tpu.memory_space<vmem>>, vector<14x128xf32>
    %c1_66 = arith.constant 1 : index
    %c0_67 = arith.constant 0 : index
    %80 = tpu.strided_load %arg15[%c1_66, %c0_67] {strides = array<i32: 2, 1>} : memref<29x128xf32, #tpu.memory_space<vmem>>, vector<14x128xf32>
    %81 = arith.maximumf %79, %80 : vector<14x128xf32>
    %c0_68 = arith.constant 0 : index
    %c0_69 = arith.constant 0 : index
    %82 = vector.load %arg16[%c0_68, %c0_69] : memref<14x128xf32, #tpu.memory_space<vmem>>, vector<14x128xf32>
    tpu.vector_store %arg16[%c0_68, %c0_69], %81 {strides = array<i32>} : memref<14x128xf32, #tpu.memory_space<vmem>>, vector<14x128xf32>,
    %cst_70 = arith.constant 0.000000e+00 : f32
    %83 = vector.broadcast %cst_70 : f32 to vector<5x64xf32>
    %c0_71 = arith.constant 0 : index
    %c0_72 = arith.constant 0 : index
    %84 = tpu.strided_load %arg16[%c0_71, %c0_72] {strides = array<i32: 2, 1>} : memref<14x128xf32, #tpu.memory_space<vmem>>, vector<5x128xf32>
    %c0_73 = arith.constant 0 : index
    %c0_74 = arith.constant 0 : index
    %c0_75 = arith.constant 0 : index
    %85 = vector.load %arg6[%c0_73, %c0_74, %c0_75] : memref<5x128x64xf32, #tpu.memory_space<vmem>>, vector<1x128x64xf32>
    %86 = vector.shape_cast %85 : vector<1x128x64xf32> to vector<128x64xf32>
    %cst_76 = arith.constant dense<0.000000e+00> : vector<5x64xf32>
    %87 = tpu.matmul %84, %86, %cst_76 {dimension_numbers = #tpu.dot_dimension_numbers<[1], [0], [0], [1], [0, 0, 1, 1], [], []>} : vector<5x128xf32>, vector<128x64xf32>, vector<5x64xf32> -> vector<5x64xf32>
    %88 = arith.addf %83, %87 : vector<5x64xf32>
    %c1_77 = arith.constant 1 : index
    %c0_78 = arith.constant 0 : index
    %89 = tpu.strided_load %arg16[%c1_77, %c0_78] {strides = array<i32: 2, 1>} : memref<14x128xf32, #tpu.memory_space<vmem>>, vector<5x128xf32>
    %c1_79 = arith.constant 1 : index
    %c0_80 = arith.constant 0 : index
    %c0_81 = arith.constant 0 : index
    %90 = vector.load %arg6[%c1_79, %c0_80, %c0_81] : memref<5x128x64xf32, #tpu.memory_space<vmem>>, vector<1x128x64xf32>
    %91 = vector.shape_cast %90 : vector<1x128x64xf32> to vector<128x64xf32>
    %cst_82 = arith.constant dense<0.000000e+00> : vector<5x64xf32>
    %92 = tpu.matmul %89, %91, %cst_82 {dimension_numbers = #tpu.dot_dimension_numbers<[1], [0], [0], [1], [0, 0, 1, 1], [], []>} : vector<5x128xf32>, vector<128x64xf32>, vector<5x64xf32> -> vector<5x64xf32>
    %93 = arith.addf %88, %92 : vector<5x64xf32>
    %c2_83 = arith.constant 2 : index
    %c0_84 = arith.constant 0 : index
    %94 = tpu.strided_load %arg16[%c2_83, %c0_84] {strides = array<i32: 2, 1>} : memref<14x128xf32, #tpu.memory_space<vmem>>, vector<5x128xf32>
    %c2_85 = arith.constant 2 : index
    %c0_86 = arith.constant 0 : index
    %c0_87 = arith.constant 0 : index
    %95 = vector.load %arg6[%c2_85, %c0_86, %c0_87] : memref<5x128x64xf32, #tpu.memory_space<vmem>>, vector<1x128x64xf32>
    %96 = vector.shape_cast %95 : vector<1x128x64xf32> to vector<128x64xf32>
    %cst_88 = arith.constant dense<0.000000e+00> : vector<5x64xf32>
    %97 = tpu.matmul %94, %96, %cst_88 {dimension_numbers = #tpu.dot_dimension_numbers<[1], [0], [0], [1], [0, 0, 1, 1], [], []>} : vector<5x128xf32>, vector<128x64xf32>, vector<5x64xf32> -> vector<5x64xf32>
    %98 = arith.addf %93, %97 : vector<5x64xf32>
    %c3_89 = arith.constant 3 : index
    %c0_90 = arith.constant 0 : index
    %99 = tpu.strided_load %arg16[%c3_89, %c0_90] {strides = array<i32: 2, 1>} : memref<14x128xf32, #tpu.memory_space<vmem>>, vector<5x128xf32>
    %c3_91 = arith.constant 3 : index
    %c0_92 = arith.constant 0 : index
    %c0_93 = arith.constant 0 : index
    %100 = vector.load %arg6[%c3_91, %c0_92, %c0_93] : memref<5x128x64xf32, #tpu.memory_space<vmem>>, vector<1x128x64xf32>
    %101 = vector.shape_cast %100 : vector<1x128x64xf32> to vector<128x64xf32>
    %cst_94 = arith.constant dense<0.000000e+00> : vector<5x64xf32>
    %102 = tpu.matmul %99, %101, %cst_94 {dimension_numbers = #tpu.dot_dimension_numbers<[1], [0], [0], [1], [0, 0, 1, 1], [], []>} : vector<5x128xf32>, vector<128x64xf32>, vector<5x64xf32> -> vector<5x64xf32>
    %103 = arith.addf %98, %102 : vector<5x64xf32>
    %c4_95 = arith.constant 4 : index
    %c0_96 = arith.constant 0 : index
    %104 = tpu.strided_load %arg16[%c4_95, %c0_96] {strides = array<i32: 2, 1>} : memref<14x128xf32, #tpu.memory_space<vmem>>, vector<5x128xf32>
    %c4_97 = arith.constant 4 : index
    %c0_98 = arith.constant 0 : index
    %c0_99 = arith.constant 0 : index
    %105 = vector.load %arg6[%c4_97, %c0_98, %c0_99] : memref<5x128x64xf32, #tpu.memory_space<vmem>>, vector<1x128x64xf32>
    %106 = vector.shape_cast %105 : vector<1x128x64xf32> to vector<128x64xf32>
    %cst_100 = arith.constant dense<0.000000e+00> : vector<5x64xf32>
    %107 = tpu.matmul %104, %106, %cst_100 {dimension_numbers = #tpu.dot_dimension_numbers<[1], [0], [0], [1], [0, 0, 1, 1], [], []>} : vector<5x128xf32>, vector<128x64xf32>, vector<5x64xf32> -> vector<5x64xf32>
    %108 = arith.addf %103, %107 : vector<5x64xf32>
    %c0_101 = arith.constant 0 : index
    %c0_102 = arith.constant 0 : index
    %109 = vector.load %arg7[%c0_101, %c0_102] : memref<1x64xf32, #tpu.memory_space<vmem>>, vector<1x64xf32>
    %110 = vector.broadcast %109 : vector<1x64xf32> to vector<5x64xf32>
    %111 = arith.addf %108, %110 : vector<5x64xf32>
    %cst_103 = arith.constant 0.000000e+00 : f32
    %112 = vector.broadcast %cst_103 : f32 to vector<5x64xf32>
    %113 = arith.cmpf oge, %111, %112 : vector<5x64xf32>
    %cst_104 = arith.constant 2.000000e-02 : f32
    %114 = vector.broadcast %cst_104 : f32 to vector<5x64xf32>
    %115 = arith.mulf %114, %111 : vector<5x64xf32>
    %116 = arith.select %113, %111, %115 : vector<5x64xi1>, vector<5x64xf32>
    %cst_105 = arith.constant 0.000000e+00 : f32
    %117 = vector.broadcast %cst_105 : f32 to vector<1x64xf32>
    %118 = vector.extract_strided_slice %116 {offsets = [0, 0], sizes = [1, 64], strides = [1, 1]} : vector<5x64xf32> to vector<1x64xf32>
    %c0_106 = arith.constant 0 : index
    %c0_107 = arith.constant 0 : index
    %c0_108 = arith.constant 0 : index
    %119 = vector.load %arg8[%c0_106, %c0_107, %c0_108] : memref<5x64x64xf32, #tpu.memory_space<vmem>>, vector<1x64x64xf32>
    %120 = vector.shape_cast %119 : vector<1x64x64xf32> to vector<64x64xf32>
    %cst_109 = arith.constant dense<0.000000e+00> : vector<1x64xf32>
    %121 = tpu.matmul %118, %120, %cst_109 {dimension_numbers = #tpu.dot_dimension_numbers<[1], [0], [0], [1], [0, 0, 1, 1], [], []>} : vector<1x64xf32>, vector<64x64xf32>, vector<1x64xf32> -> vector<1x64xf32>
    %122 = arith.addf %117, %121 : vector<1x64xf32>
    %123 = vector.extract_strided_slice %116 {offsets = [1, 0], sizes = [1, 64], strides = [1, 1]} : vector<5x64xf32> to vector<1x64xf32>
    %c1_110 = arith.constant 1 : index
    %c0_111 = arith.constant 0 : index
    %c0_112 = arith.constant 0 : index
    %124 = vector.load %arg8[%c1_110, %c0_111, %c0_112] : memref<5x64x64xf32, #tpu.memory_space<vmem>>, vector<1x64x64xf32>
    %125 = vector.shape_cast %124 : vector<1x64x64xf32> to vector<64x64xf32>
    %cst_113 = arith.constant dense<0.000000e+00> : vector<1x64xf32>
    %126 = tpu.matmul %123, %125, %cst_113 {dimension_numbers = #tpu.dot_dimension_numbers<[1], [0], [0], [1], [0, 0, 1, 1], [], []>} : vector<1x64xf32>, vector<64x64xf32>, vector<1x64xf32> -> vector<1x64xf32>
    %127 = arith.addf %122, %126 : vector<1x64xf32>
    %128 = vector.extract_strided_slice %116 {offsets = [2, 0], sizes = [1, 64], strides = [1, 1]} : vector<5x64xf32> to vector<1x64xf32>
    %c2_114 = arith.constant 2 : index
    %c0_115 = arith.constant 0 : index
    %c0_116 = arith.constant 0 : index
    %129 = vector.load %arg8[%c2_114, %c0_115, %c0_116] : memref<5x64x64xf32, #tpu.memory_space<vmem>>, vector<1x64x64xf32>
    %130 = vector.shape_cast %129 : vector<1x64x64xf32> to vector<64x64xf32>
    %cst_117 = arith.constant dense<0.000000e+00> : vector<1x64xf32>
    %131 = tpu.matmul %128, %130, %cst_117 {dimension_numbers = #tpu.dot_dimension_numbers<[1], [0], [0], [1], [0, 0, 1, 1], [], []>} : vector<1x64xf32>, vector<64x64xf32>, vector<1x64xf32> -> vector<1x64xf32>
    %132 = arith.addf %127, %131 : vector<1x64xf32>
    %133 = vector.extract_strided_slice %116 {offsets = [3, 0], sizes = [1, 64], strides = [1, 1]} : vector<5x64xf32> to vector<1x64xf32>
    %c3_118 = arith.constant 3 : index
    %c0_119 = arith.constant 0 : index
    %c0_120 = arith.constant 0 : index
    %134 = vector.load %arg8[%c3_118, %c0_119, %c0_120] : memref<5x64x64xf32, #tpu.memory_space<vmem>>, vector<1x64x64xf32>
    %135 = vector.shape_cast %134 : vector<1x64x64xf32> to vector<64x64xf32>
    %cst_121 = arith.constant dense<0.000000e+00> : vector<1x64xf32>
    %136 = tpu.matmul %133, %135, %cst_121 {dimension_numbers = #tpu.dot_dimension_numbers<[1], [0], [0], [1], [0, 0, 1, 1], [], []>} : vector<1x64xf32>, vector<64x64xf32>, vector<1x64xf32> -> vector<1x64xf32>
    %137 = arith.addf %132, %136 : vector<1x64xf32>
    %138 = vector.extract_strided_slice %116 {offsets = [4, 0], sizes = [1, 64], strides = [1, 1]} : vector<5x64xf32> to vector<1x64xf32>
    %c4_122 = arith.constant 4 : index
    %c0_123 = arith.constant 0 : index
    %c0_124 = arith.constant 0 : index
    %139 = vector.load %arg8[%c4_122, %c0_123, %c0_124] : memref<5x64x64xf32, #tpu.memory_space<vmem>>, vector<1x64x64xf32>
    %140 = vector.shape_cast %139 : vector<1x64x64xf32> to vector<64x64xf32>
    %cst_125 = arith.constant dense<0.000000e+00> : vector<1x64xf32>
    %141 = tpu.matmul %138, %140, %cst_125 {dimension_numbers = #tpu.dot_dimension_numbers<[1], [0], [0], [1], [0, 0, 1, 1], [], []>} : vector<1x64xf32>, vector<64x64xf32>, vector<1x64xf32> -> vector<1x64xf32>
    %142 = arith.addf %137, %141 : vector<1x64xf32>
    %c0_126 = arith.constant 0 : index
    %c0_127 = arith.constant 0 : index
    %143 = vector.load %arg9[%c0_126, %c0_127] : memref<1x64xf32, #tpu.memory_space<vmem>>, vector<1x64xf32>
    %144 = arith.addf %142, %143 : vector<1x64xf32>
    %cst_128 = arith.constant 0.000000e+00 : f32
    %145 = vector.broadcast %cst_128 : f32 to vector<1x64xf32>
    %146 = arith.cmpf oge, %144, %145 : vector<1x64xf32>
    %cst_129 = arith.constant 2.000000e-02 : f32
    %147 = vector.broadcast %cst_129 : f32 to vector<1x64xf32>
    %148 = arith.mulf %147, %144 : vector<1x64xf32>
    %149 = arith.select %146, %144, %148 : vector<1x64xi1>, vector<1x64xf32>
    %c0_130 = arith.constant 0 : index
    %c0_131 = arith.constant 0 : index
    %150 = vector.load %arg10[%c0_130, %c0_131] : memref<64x4xf32, #tpu.memory_space<vmem>>, vector<64x4xf32>
    %cst_132 = arith.constant dense<0.000000e+00> : vector<1x4xf32>
    %151 = tpu.matmul %149, %150, %cst_132 {dimension_numbers = #tpu.dot_dimension_numbers<[1], [0], [0], [1], [0, 0, 1, 1], [], []>} : vector<1x64xf32>, vector<64x4xf32>, vector<1x4xf32> -> vector<1x4xf32>
    %c0_133 = arith.constant 0 : index
    %c0_134 = arith.constant 0 : index
    %152 = vector.load %arg11[%c0_133, %c0_134] : memref<1x4xf32, #tpu.memory_space<vmem>>, vector<1x4xf32>
    %153 = arith.addf %151, %152 : vector<1x4xf32>
    %c0_135 = arith.constant 0 : index
    %c0_136 = arith.constant 0 : index
    %c0_137 = arith.constant 0 : index
    %154 = vector.load %arg12[%c0_135, %c0_136, %c0_137] : memref<4x1x4xf32, #tpu.memory_space<vmem>>, vector<1x1x4xf32>
    %155 = vector.shape_cast %154 : vector<1x1x4xf32> to vector<1x4xf32>
    %156 = vector.shape_cast %153 : vector<1x4xf32> to vector<1x1x4xf32>
    tpu.vector_store %arg12[%c0_135, %c0_136, %c0_137], %156 {strides = array<i32>} : memref<4x1x4xf32, #tpu.memory_space<vmem>>, vector<1x1x4xf32>,
    %cst_138 = arith.constant 0.000000e+00 : f32
    %157 = vector.broadcast %cst_138 : f32 to vector<124x32xf32>
    %c128 = arith.constant 128 : index
    %c0_139 = arith.constant 0 : index
    %158 = vector.load %arg1[%c128, %c0_139] : memref<512x1xf32, #tpu.memory_space<vmem>>, vector<124x1xf32>
    %c0_140 = arith.constant 0 : index
    %c0_141 = arith.constant 0 : index
    %159 = vector.load %arg2[%c0_140, %c0_141] : memref<5x32xf32, #tpu.memory_space<vmem>>, vector<1x32xf32>
    %160 = vector.broadcast %158 : vector<124x1xf32> to vector<124x32xf32>
    %161 = vector.broadcast %159 : vector<1x32xf32> to vector<124x32xf32>
    %162 = arith.mulf %160, %161 : vector<124x32xf32>
    %163 = arith.addf %157, %162 : vector<124x32xf32>
    %c129 = arith.constant 129 : index
    %c0_142 = arith.constant 0 : index
    %164 = vector.load %arg1[%c129, %c0_142] : memref<512x1xf32, #tpu.memory_space<vmem>>, vector<124x1xf32>
    %c1_143 = arith.constant 1 : index
    %c0_144 = arith.constant 0 : index
    %165 = vector.load %arg2[%c1_143, %c0_144] : memref<5x32xf32, #tpu.memory_space<vmem>>, vector<1x32xf32>
    %166 = vector.broadcast %164 : vector<124x1xf32> to vector<124x32xf32>
    %167 = vector.broadcast %165 : vector<1x32xf32> to vector<124x32xf32>
    %168 = arith.mulf %166, %167 : vector<124x32xf32>
    %169 = arith.addf %163, %168 : vector<124x32xf32>
    %c130 = arith.constant 130 : index
    %c0_145 = arith.constant 0 : index
    %170 = vector.load %arg1[%c130, %c0_145] : memref<512x1xf32, #tpu.memory_space<vmem>>, vector<124x1xf32>
    %c2_146 = arith.constant 2 : index
    %c0_147 = arith.constant 0 : index
    %171 = vector.load %arg2[%c2_146, %c0_147] : memref<5x32xf32, #tpu.memory_space<vmem>>, vector<1x32xf32>
    %172 = vector.broadcast %170 : vector<124x1xf32> to vector<124x32xf32>
    %173 = vector.broadcast %171 : vector<1x32xf32> to vector<124x32xf32>
    %174 = arith.mulf %172, %173 : vector<124x32xf32>
    %175 = arith.addf %169, %174 : vector<124x32xf32>
    %c131 = arith.constant 131 : index
    %c0_148 = arith.constant 0 : index
    %176 = vector.load %arg1[%c131, %c0_148] : memref<512x1xf32, #tpu.memory_space<vmem>>, vector<124x1xf32>
    %c3_149 = arith.constant 3 : index
    %c0_150 = arith.constant 0 : index
    %177 = vector.load %arg2[%c3_149, %c0_150] : memref<5x32xf32, #tpu.memory_space<vmem>>, vector<1x32xf32>
    %178 = vector.broadcast %176 : vector<124x1xf32> to vector<124x32xf32>
    %179 = vector.broadcast %177 : vector<1x32xf32> to vector<124x32xf32>
    %180 = arith.mulf %178, %179 : vector<124x32xf32>
    %181 = arith.addf %175, %180 : vector<124x32xf32>
    %c132 = arith.constant 132 : index
    %c0_151 = arith.constant 0 : index
    %182 = vector.load %arg1[%c132, %c0_151] : memref<512x1xf32, #tpu.memory_space<vmem>>, vector<124x1xf32>
    %c4_152 = arith.constant 4 : index
    %c0_153 = arith.constant 0 : index
    %183 = vector.load %arg2[%c4_152, %c0_153] : memref<5x32xf32, #tpu.memory_space<vmem>>, vector<1x32xf32>
    %184 = vector.broadcast %182 : vector<124x1xf32> to vector<124x32xf32>
    %185 = vector.broadcast %183 : vector<1x32xf32> to vector<124x32xf32>
    %186 = arith.mulf %184, %185 : vector<124x32xf32>
    %187 = arith.addf %181, %186 : vector<124x32xf32>
    %c0_154 = arith.constant 0 : index
    %c0_155 = arith.constant 0 : index
    %188 = vector.load %arg3[%c0_154, %c0_155] : memref<1x32xf32, #tpu.memory_space<vmem>>, vector<1x32xf32>
    %189 = vector.broadcast %188 : vector<1x32xf32> to vector<124x32xf32>
    %190 = arith.addf %187, %189 : vector<124x32xf32>
    %cst_156 = arith.constant 0.000000e+00 : f32
    %191 = vector.broadcast %cst_156 : f32 to vector<124x32xf32>
    %192 = arith.cmpf oge, %190, %191 : vector<124x32xf32>
    %cst_157 = arith.constant 2.000000e-02 : f32
    %193 = vector.broadcast %cst_157 : f32 to vector<124x32xf32>
    %194 = arith.mulf %193, %190 : vector<124x32xf32>
    %195 = arith.select %192, %190, %194 : vector<124x32xi1>, vector<124x32xf32>
    %c0_158 = arith.constant 0 : index
    %c0_159 = arith.constant 0 : index
    %196 = vector.load %arg13[%c0_158, %c0_159] : memref<124x32xf32, #tpu.memory_space<vmem>>, vector<124x32xf32>
    tpu.vector_store %arg13[%c0_158, %c0_159], %195 {strides = array<i32>} : memref<124x32xf32, #tpu.memory_space<vmem>>, vector<124x32xf32>,
    %c0_160 = arith.constant 0 : index
    %c0_161 = arith.constant 0 : index
    %197 = tpu.strided_load %arg13[%c0_160, %c0_161] {strides = array<i32: 2, 1>} : memref<124x32xf32, #tpu.memory_space<vmem>>, vector<62x32xf32>
    %c1_162 = arith.constant 1 : index
    %c0_163 = arith.constant 0 : index
    %198 = tpu.strided_load %arg13[%c1_162, %c0_163] {strides = array<i32: 2, 1>} : memref<124x32xf32, #tpu.memory_space<vmem>>, vector<62x32xf32>
    %199 = arith.maximumf %197, %198 : vector<62x32xf32>
    %c0_164 = arith.constant 0 : index
    %c0_165 = arith.constant 0 : index
    %200 = vector.load %arg14[%c0_164, %c0_165] : memref<62x32xf32, #tpu.memory_space<vmem>>, vector<62x32xf32>
    tpu.vector_store %arg14[%c0_164, %c0_165], %199 {strides = array<i32>} : memref<62x32xf32, #tpu.memory_space<vmem>>, vector<62x32xf32>,
    %cst_166 = arith.constant 0.000000e+00 : f32
    %201 = vector.broadcast %cst_166 : f32 to vector<29x128xf32>
    %c0_167 = arith.constant 0 : index
    %c0_168 = arith.constant 0 : index
    %202 = tpu.strided_load %arg14[%c0_167, %c0_168] {strides = array<i32: 2, 1>} : memref<62x32xf32, #tpu.memory_space<vmem>>, vector<29x32xf32>
    %c0_169 = arith.constant 0 : index
    %c0_170 = arith.constant 0 : index
    %c0_171 = arith.constant 0 : index
    %203 = vector.load %arg4[%c0_169, %c0_170, %c0_171] : memref<5x32x128xf32, #tpu.memory_space<vmem>>, vector<1x32x128xf32>
    %204 = vector.shape_cast %203 : vector<1x32x128xf32> to vector<32x128xf32>
    %cst_172 = arith.constant dense<0.000000e+00> : vector<29x128xf32>
    %205 = tpu.matmul %202, %204, %cst_172 {dimension_numbers = #tpu.dot_dimension_numbers<[1], [0], [0], [1], [0, 0, 1, 1], [], []>} : vector<29x32xf32>, vector<32x128xf32>, vector<29x128xf32> -> vector<29x128xf32>
    %206 = arith.addf %201, %205 : vector<29x128xf32>
    %c1_173 = arith.constant 1 : index
    %c0_174 = arith.constant 0 : index
    %207 = tpu.strided_load %arg14[%c1_173, %c0_174] {strides = array<i32: 2, 1>} : memref<62x32xf32, #tpu.memory_space<vmem>>, vector<29x32xf32>
    %c1_175 = arith.constant 1 : index
    %c0_176 = arith.constant 0 : index
    %c0_177 = arith.constant 0 : index
    %208 = vector.load %arg4[%c1_175, %c0_176, %c0_177] : memref<5x32x128xf32, #tpu.memory_space<vmem>>, vector<1x32x128xf32>
    %209 = vector.shape_cast %208 : vector<1x32x128xf32> to vector<32x128xf32>
    %cst_178 = arith.constant dense<0.000000e+00> : vector<29x128xf32>
    %210 = tpu.matmul %207, %209, %cst_178 {dimension_numbers = #tpu.dot_dimension_numbers<[1], [0], [0], [1], [0, 0, 1, 1], [], []>} : vector<29x32xf32>, vector<32x128xf32>, vector<29x128xf32> -> vector<29x128xf32>
    %211 = arith.addf %206, %210 : vector<29x128xf32>
    %c2_179 = arith.constant 2 : index
    %c0_180 = arith.constant 0 : index
    %212 = tpu.strided_load %arg14[%c2_179, %c0_180] {strides = array<i32: 2, 1>} : memref<62x32xf32, #tpu.memory_space<vmem>>, vector<29x32xf32>
    %c2_181 = arith.constant 2 : index
    %c0_182 = arith.constant 0 : index
    %c0_183 = arith.constant 0 : index
    %213 = vector.load %arg4[%c2_181, %c0_182, %c0_183] : memref<5x32x128xf32, #tpu.memory_space<vmem>>, vector<1x32x128xf32>
    %214 = vector.shape_cast %213 : vector<1x32x128xf32> to vector<32x128xf32>
    %cst_184 = arith.constant dense<0.000000e+00> : vector<29x128xf32>
    %215 = tpu.matmul %212, %214, %cst_184 {dimension_numbers = #tpu.dot_dimension_numbers<[1], [0], [0], [1], [0, 0, 1, 1], [], []>} : vector<29x32xf32>, vector<32x128xf32>, vector<29x128xf32> -> vector<29x128xf32>
    %216 = arith.addf %211, %215 : vector<29x128xf32>
    %c3_185 = arith.constant 3 : index
    %c0_186 = arith.constant 0 : index
    %217 = tpu.strided_load %arg14[%c3_185, %c0_186] {strides = array<i32: 2, 1>} : memref<62x32xf32, #tpu.memory_space<vmem>>, vector<29x32xf32>
    %c3_187 = arith.constant 3 : index
    %c0_188 = arith.constant 0 : index
    %c0_189 = arith.constant 0 : index
    %218 = vector.load %arg4[%c3_187, %c0_188, %c0_189] : memref<5x32x128xf32, #tpu.memory_space<vmem>>, vector<1x32x128xf32>
    %219 = vector.shape_cast %218 : vector<1x32x128xf32> to vector<32x128xf32>
    %cst_190 = arith.constant dense<0.000000e+00> : vector<29x128xf32>
    %220 = tpu.matmul %217, %219, %cst_190 {dimension_numbers = #tpu.dot_dimension_numbers<[1], [0], [0], [1], [0, 0, 1, 1], [], []>} : vector<29x32xf32>, vector<32x128xf32>, vector<29x128xf32> -> vector<29x128xf32>
    %221 = arith.addf %216, %220 : vector<29x128xf32>
    %c4_191 = arith.constant 4 : index
    %c0_192 = arith.constant 0 : index
    %222 = tpu.strided_load %arg14[%c4_191, %c0_192] {strides = array<i32: 2, 1>} : memref<62x32xf32, #tpu.memory_space<vmem>>, vector<29x32xf32>
    %c4_193 = arith.constant 4 : index
    %c0_194 = arith.constant 0 : index
    %c0_195 = arith.constant 0 : index
    %223 = vector.load %arg4[%c4_193, %c0_194, %c0_195] : memref<5x32x128xf32, #tpu.memory_space<vmem>>, vector<1x32x128xf32>
    %224 = vector.shape_cast %223 : vector<1x32x128xf32> to vector<32x128xf32>
    %cst_196 = arith.constant dense<0.000000e+00> : vector<29x128xf32>
    %225 = tpu.matmul %222, %224, %cst_196 {dimension_numbers = #tpu.dot_dimension_numbers<[1], [0], [0], [1], [0, 0, 1, 1], [], []>} : vector<29x32xf32>, vector<32x128xf32>, vector<29x128xf32> -> vector<29x128xf32>
    %226 = arith.addf %221, %225 : vector<29x128xf32>
    %c0_197 = arith.constant 0 : index
    %c0_198 = arith.constant 0 : index
    %227 = vector.load %arg5[%c0_197, %c0_198] : memref<1x128xf32, #tpu.memory_space<vmem>>, vector<1x128xf32>
    %228 = vector.broadcast %227 : vector<1x128xf32> to vector<29x128xf32>
    %229 = arith.addf %226, %228 : vector<29x128xf32>
    %cst_199 = arith.constant 0.000000e+00 : f32
    %230 = vector.broadcast %cst_199 : f32 to vector<29x128xf32>
    %231 = arith.cmpf oge, %229, %230 : vector<29x128xf32>
    %cst_200 = arith.constant 2.000000e-02 : f32
    %232 = vector.broadcast %cst_200 : f32 to vector<29x128xf32>
    %233 = arith.mulf %232, %229 : vector<29x128xf32>
    %234 = arith.select %231, %229, %233 : vector<29x128xi1>, vector<29x128xf32>
    %c0_201 = arith.constant 0 : index
    %c0_202 = arith.constant 0 : index
    %235 = vector.load %arg15[%c0_201, %c0_202] : memref<29x128xf32, #tpu.memory_space<vmem>>, vector<29x128xf32>
    tpu.vector_store %arg15[%c0_201, %c0_202], %234 {strides = array<i32>} : memref<29x128xf32, #tpu.memory_space<vmem>>, vector<29x128xf32>,
    %c0_203 = arith.constant 0 : index
    %c0_204 = arith.constant 0 : index
    %236 = tpu.strided_load %arg15[%c0_203, %c0_204] {strides = array<i32: 2, 1>} : memref<29x128xf32, #tpu.memory_space<vmem>>, vector<14x128xf32>
    %c1_205 = arith.constant 1 : index
    %c0_206 = arith.constant 0 : index
    %237 = tpu.strided_load %arg15[%c1_205, %c0_206] {strides = array<i32: 2, 1>} : memref<29x128xf32, #tpu.memory_space<vmem>>, vector<14x128xf32>
    %238 = arith.maximumf %236, %237 : vector<14x128xf32>
    %c0_207 = arith.constant 0 : index
    %c0_208 = arith.constant 0 : index
    %239 = vector.load %arg16[%c0_207, %c0_208] : memref<14x128xf32, #tpu.memory_space<vmem>>, vector<14x128xf32>
    tpu.vector_store %arg16[%c0_207, %c0_208], %238 {strides = array<i32>} : memref<14x128xf32, #tpu.memory_space<vmem>>, vector<14x128xf32>,
    %cst_209 = arith.constant 0.000000e+00 : f32
    %240 = vector.broadcast %cst_209 : f32 to vector<5x64xf32>
    %c0_210 = arith.constant 0 : index
    %c0_211 = arith.constant 0 : index
    %241 = tpu.strided_load %arg16[%c0_210, %c0_211] {strides = array<i32: 2, 1>} : memref<14x128xf32, #tpu.memory_space<vmem>>, vector<5x128xf32>
    %c0_212 = arith.constant 0 : index
    %c0_213 = arith.constant 0 : index
    %c0_214 = arith.constant 0 : index
    %242 = vector.load %arg6[%c0_212, %c0_213, %c0_214] : memref<5x128x64xf32, #tpu.memory_space<vmem>>, vector<1x128x64xf32>
    %243 = vector.shape_cast %242 : vector<1x128x64xf32> to vector<128x64xf32>
    %cst_215 = arith.constant dense<0.000000e+00> : vector<5x64xf32>
    %244 = tpu.matmul %241, %243, %cst_215 {dimension_numbers = #tpu.dot_dimension_numbers<[1], [0], [0], [1], [0, 0, 1, 1], [], []>} : vector<5x128xf32>, vector<128x64xf32>, vector<5x64xf32> -> vector<5x64xf32>
    %245 = arith.addf %240, %244 : vector<5x64xf32>
    %c1_216 = arith.constant 1 : index
    %c0_217 = arith.constant 0 : index
    %246 = tpu.strided_load %arg16[%c1_216, %c0_217] {strides = array<i32: 2, 1>} : memref<14x128xf32, #tpu.memory_space<vmem>>, vector<5x128xf32>
    %c1_218 = arith.constant 1 : index
    %c0_219 = arith.constant 0 : index
    %c0_220 = arith.constant 0 : index
    %247 = vector.load %arg6[%c1_218, %c0_219, %c0_220] : memref<5x128x64xf32, #tpu.memory_space<vmem>>, vector<1x128x64xf32>
    %248 = vector.shape_cast %247 : vector<1x128x64xf32> to vector<128x64xf32>
    %cst_221 = arith.constant dense<0.000000e+00> : vector<5x64xf32>
    %249 = tpu.matmul %246, %248, %cst_221 {dimension_numbers = #tpu.dot_dimension_numbers<[1], [0], [0], [1], [0, 0, 1, 1], [], []>} : vector<5x128xf32>, vector<128x64xf32>, vector<5x64xf32> -> vector<5x64xf32>
    %250 = arith.addf %245, %249 : vector<5x64xf32>
    %c2_222 = arith.constant 2 : index
    %c0_223 = arith.constant 0 : index
    %251 = tpu.strided_load %arg16[%c2_222, %c0_223] {strides = array<i32: 2, 1>} : memref<14x128xf32, #tpu.memory_space<vmem>>, vector<5x128xf32>
    %c2_224 = arith.constant 2 : index
    %c0_225 = arith.constant 0 : index
    %c0_226 = arith.constant 0 : index
    %252 = vector.load %arg6[%c2_224, %c0_225, %c0_226] : memref<5x128x64xf32, #tpu.memory_space<vmem>>, vector<1x128x64xf32>
    %253 = vector.shape_cast %252 : vector<1x128x64xf32> to vector<128x64xf32>
    %cst_227 = arith.constant dense<0.000000e+00> : vector<5x64xf32>
    %254 = tpu.matmul %251, %253, %cst_227 {dimension_numbers = #tpu.dot_dimension_numbers<[1], [0], [0], [1], [0, 0, 1, 1], [], []>} : vector<5x128xf32>, vector<128x64xf32>, vector<5x64xf32> -> vector<5x64xf32>
    %255 = arith.addf %250, %254 : vector<5x64xf32>
    %c3_228 = arith.constant 3 : index
    %c0_229 = arith.constant 0 : index
    %256 = tpu.strided_load %arg16[%c3_228, %c0_229] {strides = array<i32: 2, 1>} : memref<14x128xf32, #tpu.memory_space<vmem>>, vector<5x128xf32>
    %c3_230 = arith.constant 3 : index
    %c0_231 = arith.constant 0 : index
    %c0_232 = arith.constant 0 : index
    %257 = vector.load %arg6[%c3_230, %c0_231, %c0_232] : memref<5x128x64xf32, #tpu.memory_space<vmem>>, vector<1x128x64xf32>
    %258 = vector.shape_cast %257 : vector<1x128x64xf32> to vector<128x64xf32>
    %cst_233 = arith.constant dense<0.000000e+00> : vector<5x64xf32>
    %259 = tpu.matmul %256, %258, %cst_233 {dimension_numbers = #tpu.dot_dimension_numbers<[1], [0], [0], [1], [0, 0, 1, 1], [], []>} : vector<5x128xf32>, vector<128x64xf32>, vector<5x64xf32> -> vector<5x64xf32>
    %260 = arith.addf %255, %259 : vector<5x64xf32>
    %c4_234 = arith.constant 4 : index
    %c0_235 = arith.constant 0 : index
    %261 = tpu.strided_load %arg16[%c4_234, %c0_235] {strides = array<i32: 2, 1>} : memref<14x128xf32, #tpu.memory_space<vmem>>, vector<5x128xf32>
    %c4_236 = arith.constant 4 : index
    %c0_237 = arith.constant 0 : index
    %c0_238 = arith.constant 0 : index
    %262 = vector.load %arg6[%c4_236, %c0_237, %c0_238] : memref<5x128x64xf32, #tpu.memory_space<vmem>>, vector<1x128x64xf32>
    %263 = vector.shape_cast %262 : vector<1x128x64xf32> to vector<128x64xf32>
    %cst_239 = arith.constant dense<0.000000e+00> : vector<5x64xf32>
    %264 = tpu.matmul %261, %263, %cst_239 {dimension_numbers = #tpu.dot_dimension_numbers<[1], [0], [0], [1], [0, 0, 1, 1], [], []>} : vector<5x128xf32>, vector<128x64xf32>, vector<5x64xf32> -> vector<5x64xf32>
    %265 = arith.addf %260, %264 : vector<5x64xf32>
    %c0_240 = arith.constant 0 : index
    %c0_241 = arith.constant 0 : index
    %266 = vector.load %arg7[%c0_240, %c0_241] : memref<1x64xf32, #tpu.memory_space<vmem>>, vector<1x64xf32>
    %267 = vector.broadcast %266 : vector<1x64xf32> to vector<5x64xf32>
    %268 = arith.addf %265, %267 : vector<5x64xf32>
    %cst_242 = arith.constant 0.000000e+00 : f32
    %269 = vector.broadcast %cst_242 : f32 to vector<5x64xf32>
    %270 = arith.cmpf oge, %268, %269 : vector<5x64xf32>
    %cst_243 = arith.constant 2.000000e-02 : f32
    %271 = vector.broadcast %cst_243 : f32 to vector<5x64xf32>
    %272 = arith.mulf %271, %268 : vector<5x64xf32>
    %273 = arith.select %270, %268, %272 : vector<5x64xi1>, vector<5x64xf32>
    %cst_244 = arith.constant 0.000000e+00 : f32
    %274 = vector.broadcast %cst_244 : f32 to vector<1x64xf32>
    %275 = vector.extract_strided_slice %273 {offsets = [0, 0], sizes = [1, 64], strides = [1, 1]} : vector<5x64xf32> to vector<1x64xf32>
    %c0_245 = arith.constant 0 : index
    %c0_246 = arith.constant 0 : index
    %c0_247 = arith.constant 0 : index
    %276 = vector.load %arg8[%c0_245, %c0_246, %c0_247] : memref<5x64x64xf32, #tpu.memory_space<vmem>>, vector<1x64x64xf32>
    %277 = vector.shape_cast %276 : vector<1x64x64xf32> to vector<64x64xf32>
    %cst_248 = arith.constant dense<0.000000e+00> : vector<1x64xf32>
    %278 = tpu.matmul %275, %277, %cst_248 {dimension_numbers = #tpu.dot_dimension_numbers<[1], [0], [0], [1], [0, 0, 1, 1], [], []>} : vector<1x64xf32>, vector<64x64xf32>, vector<1x64xf32> -> vector<1x64xf32>
    %279 = arith.addf %274, %278 : vector<1x64xf32>
    %280 = vector.extract_strided_slice %273 {offsets = [1, 0], sizes = [1, 64], strides = [1, 1]} : vector<5x64xf32> to vector<1x64xf32>
    %c1_249 = arith.constant 1 : index
    %c0_250 = arith.constant 0 : index
    %c0_251 = arith.constant 0 : index
    %281 = vector.load %arg8[%c1_249, %c0_250, %c0_251] : memref<5x64x64xf32, #tpu.memory_space<vmem>>, vector<1x64x64xf32>
    %282 = vector.shape_cast %281 : vector<1x64x64xf32> to vector<64x64xf32>
    %cst_252 = arith.constant dense<0.000000e+00> : vector<1x64xf32>
    %283 = tpu.matmul %280, %282, %cst_252 {dimension_numbers = #tpu.dot_dimension_numbers<[1], [0], [0], [1], [0, 0, 1, 1], [], []>} : vector<1x64xf32>, vector<64x64xf32>, vector<1x64xf32> -> vector<1x64xf32>
    %284 = arith.addf %279, %283 : vector<1x64xf32>
    %285 = vector.extract_strided_slice %273 {offsets = [2, 0], sizes = [1, 64], strides = [1, 1]} : vector<5x64xf32> to vector<1x64xf32>
    %c2_253 = arith.constant 2 : index
    %c0_254 = arith.constant 0 : index
    %c0_255 = arith.constant 0 : index
    %286 = vector.load %arg8[%c2_253, %c0_254, %c0_255] : memref<5x64x64xf32, #tpu.memory_space<vmem>>, vector<1x64x64xf32>
    %287 = vector.shape_cast %286 : vector<1x64x64xf32> to vector<64x64xf32>
    %cst_256 = arith.constant dense<0.000000e+00> : vector<1x64xf32>
    %288 = tpu.matmul %285, %287, %cst_256 {dimension_numbers = #tpu.dot_dimension_numbers<[1], [0], [0], [1], [0, 0, 1, 1], [], []>} : vector<1x64xf32>, vector<64x64xf32>, vector<1x64xf32> -> vector<1x64xf32>
    %289 = arith.addf %284, %288 : vector<1x64xf32>
    %290 = vector.extract_strided_slice %273 {offsets = [3, 0], sizes = [1, 64], strides = [1, 1]} : vector<5x64xf32> to vector<1x64xf32>
    %c3_257 = arith.constant 3 : index
    %c0_258 = arith.constant 0 : index
    %c0_259 = arith.constant 0 : index
    %291 = vector.load %arg8[%c3_257, %c0_258, %c0_259] : memref<5x64x64xf32, #tpu.memory_space<vmem>>, vector<1x64x64xf32>
    %292 = vector.shape_cast %291 : vector<1x64x64xf32> to vector<64x64xf32>
    %cst_260 = arith.constant dense<0.000000e+00> : vector<1x64xf32>
    %293 = tpu.matmul %290, %292, %cst_260 {dimension_numbers = #tpu.dot_dimension_numbers<[1], [0], [0], [1], [0, 0, 1, 1], [], []>} : vector<1x64xf32>, vector<64x64xf32>, vector<1x64xf32> -> vector<1x64xf32>
    %294 = arith.addf %289, %293 : vector<1x64xf32>
    %295 = vector.extract_strided_slice %273 {offsets = [4, 0], sizes = [1, 64], strides = [1, 1]} : vector<5x64xf32> to vector<1x64xf32>
    %c4_261 = arith.constant 4 : index
    %c0_262 = arith.constant 0 : index
    %c0_263 = arith.constant 0 : index
    %296 = vector.load %arg8[%c4_261, %c0_262, %c0_263] : memref<5x64x64xf32, #tpu.memory_space<vmem>>, vector<1x64x64xf32>
    %297 = vector.shape_cast %296 : vector<1x64x64xf32> to vector<64x64xf32>
    %cst_264 = arith.constant dense<0.000000e+00> : vector<1x64xf32>
    %298 = tpu.matmul %295, %297, %cst_264 {dimension_numbers = #tpu.dot_dimension_numbers<[1], [0], [0], [1], [0, 0, 1, 1], [], []>} : vector<1x64xf32>, vector<64x64xf32>, vector<1x64xf32> -> vector<1x64xf32>
    %299 = arith.addf %294, %298 : vector<1x64xf32>
    %c0_265 = arith.constant 0 : index
    %c0_266 = arith.constant 0 : index
    %300 = vector.load %arg9[%c0_265, %c0_266] : memref<1x64xf32, #tpu.memory_space<vmem>>, vector<1x64xf32>
    %301 = arith.addf %299, %300 : vector<1x64xf32>
    %cst_267 = arith.constant 0.000000e+00 : f32
    %302 = vector.broadcast %cst_267 : f32 to vector<1x64xf32>
    %303 = arith.cmpf oge, %301, %302 : vector<1x64xf32>
    %cst_268 = arith.constant 2.000000e-02 : f32
    %304 = vector.broadcast %cst_268 : f32 to vector<1x64xf32>
    %305 = arith.mulf %304, %301 : vector<1x64xf32>
    %306 = arith.select %303, %301, %305 : vector<1x64xi1>, vector<1x64xf32>
    %c0_269 = arith.constant 0 : index
    %c0_270 = arith.constant 0 : index
    %307 = vector.load %arg10[%c0_269, %c0_270] : memref<64x4xf32, #tpu.memory_space<vmem>>, vector<64x4xf32>
    %cst_271 = arith.constant dense<0.000000e+00> : vector<1x4xf32>
    %308 = tpu.matmul %306, %307, %cst_271 {dimension_numbers = #tpu.dot_dimension_numbers<[1], [0], [0], [1], [0, 0, 1, 1], [], []>} : vector<1x64xf32>, vector<64x4xf32>, vector<1x4xf32> -> vector<1x4xf32>
    %c0_272 = arith.constant 0 : index
    %c0_273 = arith.constant 0 : index
    %309 = vector.load %arg11[%c0_272, %c0_273] : memref<1x4xf32, #tpu.memory_space<vmem>>, vector<1x4xf32>
    %310 = arith.addf %308, %309 : vector<1x4xf32>
    %c1_274 = arith.constant 1 : index
    %c0_275 = arith.constant 0 : index
    %c0_276 = arith.constant 0 : index
    %311 = vector.load %arg12[%c1_274, %c0_275, %c0_276] : memref<4x1x4xf32, #tpu.memory_space<vmem>>, vector<1x1x4xf32>
    %312 = vector.shape_cast %311 : vector<1x1x4xf32> to vector<1x4xf32>
    %313 = vector.shape_cast %310 : vector<1x4xf32> to vector<1x1x4xf32>
    tpu.vector_store %arg12[%c1_274, %c0_275, %c0_276], %313 {strides = array<i32>} : memref<4x1x4xf32, #tpu.memory_space<vmem>>, vector<1x1x4xf32>,
    %cst_277 = arith.constant 0.000000e+00 : f32
    %314 = vector.broadcast %cst_277 : f32 to vector<124x32xf32>
    %c256 = arith.constant 256 : index
    %c0_278 = arith.constant 0 : index
    %315 = vector.load %arg1[%c256, %c0_278] : memref<512x1xf32, #tpu.memory_space<vmem>>, vector<124x1xf32>
    %c0_279 = arith.constant 0 : index
    %c0_280 = arith.constant 0 : index
    %316 = vector.load %arg2[%c0_279, %c0_280] : memref<5x32xf32, #tpu.memory_space<vmem>>, vector<1x32xf32>
    %317 = vector.broadcast %315 : vector<124x1xf32> to vector<124x32xf32>
    %318 = vector.broadcast %316 : vector<1x32xf32> to vector<124x32xf32>
    %319 = arith.mulf %317, %318 : vector<124x32xf32>
    %320 = arith.addf %314, %319 : vector<124x32xf32>
    %c257 = arith.constant 257 : index
    %c0_281 = arith.constant 0 : index
    %321 = vector.load %arg1[%c257, %c0_281] : memref<512x1xf32, #tpu.memory_space<vmem>>, vector<124x1xf32>
    %c1_282 = arith.constant 1 : index
    %c0_283 = arith.constant 0 : index
    %322 = vector.load %arg2[%c1_282, %c0_283] : memref<5x32xf32, #tpu.memory_space<vmem>>, vector<1x32xf32>
    %323 = vector.broadcast %321 : vector<124x1xf32> to vector<124x32xf32>
    %324 = vector.broadcast %322 : vector<1x32xf32> to vector<124x32xf32>
    %325 = arith.mulf %323, %324 : vector<124x32xf32>
    %326 = arith.addf %320, %325 : vector<124x32xf32>
    %c258 = arith.constant 258 : index
    %c0_284 = arith.constant 0 : index
    %327 = vector.load %arg1[%c258, %c0_284] : memref<512x1xf32, #tpu.memory_space<vmem>>, vector<124x1xf32>
    %c2_285 = arith.constant 2 : index
    %c0_286 = arith.constant 0 : index
    %328 = vector.load %arg2[%c2_285, %c0_286] : memref<5x32xf32, #tpu.memory_space<vmem>>, vector<1x32xf32>
    %329 = vector.broadcast %327 : vector<124x1xf32> to vector<124x32xf32>
    %330 = vector.broadcast %328 : vector<1x32xf32> to vector<124x32xf32>
    %331 = arith.mulf %329, %330 : vector<124x32xf32>
    %332 = arith.addf %326, %331 : vector<124x32xf32>
    %c259 = arith.constant 259 : index
    %c0_287 = arith.constant 0 : index
    %333 = vector.load %arg1[%c259, %c0_287] : memref<512x1xf32, #tpu.memory_space<vmem>>, vector<124x1xf32>
    %c3_288 = arith.constant 3 : index
    %c0_289 = arith.constant 0 : index
    %334 = vector.load %arg2[%c3_288, %c0_289] : memref<5x32xf32, #tpu.memory_space<vmem>>, vector<1x32xf32>
    %335 = vector.broadcast %333 : vector<124x1xf32> to vector<124x32xf32>
    %336 = vector.broadcast %334 : vector<1x32xf32> to vector<124x32xf32>
    %337 = arith.mulf %335, %336 : vector<124x32xf32>
    %338 = arith.addf %332, %337 : vector<124x32xf32>
    %c260 = arith.constant 260 : index
    %c0_290 = arith.constant 0 : index
    %339 = vector.load %arg1[%c260, %c0_290] : memref<512x1xf32, #tpu.memory_space<vmem>>, vector<124x1xf32>
    %c4_291 = arith.constant 4 : index
    %c0_292 = arith.constant 0 : index
    %340 = vector.load %arg2[%c4_291, %c0_292] : memref<5x32xf32, #tpu.memory_space<vmem>>, vector<1x32xf32>
    %341 = vector.broadcast %339 : vector<124x1xf32> to vector<124x32xf32>
    %342 = vector.broadcast %340 : vector<1x32xf32> to vector<124x32xf32>
    %343 = arith.mulf %341, %342 : vector<124x32xf32>
    %344 = arith.addf %338, %343 : vector<124x32xf32>
    %c0_293 = arith.constant 0 : index
    %c0_294 = arith.constant 0 : index
    %345 = vector.load %arg3[%c0_293, %c0_294] : memref<1x32xf32, #tpu.memory_space<vmem>>, vector<1x32xf32>
    %346 = vector.broadcast %345 : vector<1x32xf32> to vector<124x32xf32>
    %347 = arith.addf %344, %346 : vector<124x32xf32>
    %cst_295 = arith.constant 0.000000e+00 : f32
    %348 = vector.broadcast %cst_295 : f32 to vector<124x32xf32>
    %349 = arith.cmpf oge, %347, %348 : vector<124x32xf32>
    %cst_296 = arith.constant 2.000000e-02 : f32
    %350 = vector.broadcast %cst_296 : f32 to vector<124x32xf32>
    %351 = arith.mulf %350, %347 : vector<124x32xf32>
    %352 = arith.select %349, %347, %351 : vector<124x32xi1>, vector<124x32xf32>
    %c0_297 = arith.constant 0 : index
    %c0_298 = arith.constant 0 : index
    %353 = vector.load %arg13[%c0_297, %c0_298] : memref<124x32xf32, #tpu.memory_space<vmem>>, vector<124x32xf32>
    tpu.vector_store %arg13[%c0_297, %c0_298], %352 {strides = array<i32>} : memref<124x32xf32, #tpu.memory_space<vmem>>, vector<124x32xf32>,
    %c0_299 = arith.constant 0 : index
    %c0_300 = arith.constant 0 : index
    %354 = tpu.strided_load %arg13[%c0_299, %c0_300] {strides = array<i32: 2, 1>} : memref<124x32xf32, #tpu.memory_space<vmem>>, vector<62x32xf32>
    %c1_301 = arith.constant 1 : index
    %c0_302 = arith.constant 0 : index
    %355 = tpu.strided_load %arg13[%c1_301, %c0_302] {strides = array<i32: 2, 1>} : memref<124x32xf32, #tpu.memory_space<vmem>>, vector<62x32xf32>
    %356 = arith.maximumf %354, %355 : vector<62x32xf32>
    %c0_303 = arith.constant 0 : index
    %c0_304 = arith.constant 0 : index
    %357 = vector.load %arg14[%c0_303, %c0_304] : memref<62x32xf32, #tpu.memory_space<vmem>>, vector<62x32xf32>
    tpu.vector_store %arg14[%c0_303, %c0_304], %356 {strides = array<i32>} : memref<62x32xf32, #tpu.memory_space<vmem>>, vector<62x32xf32>,
    %cst_305 = arith.constant 0.000000e+00 : f32
    %358 = vector.broadcast %cst_305 : f32 to vector<29x128xf32>
    %c0_306 = arith.constant 0 : index
    %c0_307 = arith.constant 0 : index
    %359 = tpu.strided_load %arg14[%c0_306, %c0_307] {strides = array<i32: 2, 1>} : memref<62x32xf32, #tpu.memory_space<vmem>>, vector<29x32xf32>
    %c0_308 = arith.constant 0 : index
    %c0_309 = arith.constant 0 : index
    %c0_310 = arith.constant 0 : index
    %360 = vector.load %arg4[%c0_308, %c0_309, %c0_310] : memref<5x32x128xf32, #tpu.memory_space<vmem>>, vector<1x32x128xf32>
    %361 = vector.shape_cast %360 : vector<1x32x128xf32> to vector<32x128xf32>
    %cst_311 = arith.constant dense<0.000000e+00> : vector<29x128xf32>
    %362 = tpu.matmul %359, %361, %cst_311 {dimension_numbers = #tpu.dot_dimension_numbers<[1], [0], [0], [1], [0, 0, 1, 1], [], []>} : vector<29x32xf32>, vector<32x128xf32>, vector<29x128xf32> -> vector<29x128xf32>
    %363 = arith.addf %358, %362 : vector<29x128xf32>
    %c1_312 = arith.constant 1 : index
    %c0_313 = arith.constant 0 : index
    %364 = tpu.strided_load %arg14[%c1_312, %c0_313] {strides = array<i32: 2, 1>} : memref<62x32xf32, #tpu.memory_space<vmem>>, vector<29x32xf32>
    %c1_314 = arith.constant 1 : index
    %c0_315 = arith.constant 0 : index
    %c0_316 = arith.constant 0 : index
    %365 = vector.load %arg4[%c1_314, %c0_315, %c0_316] : memref<5x32x128xf32, #tpu.memory_space<vmem>>, vector<1x32x128xf32>
    %366 = vector.shape_cast %365 : vector<1x32x128xf32> to vector<32x128xf32>
    %cst_317 = arith.constant dense<0.000000e+00> : vector<29x128xf32>
    %367 = tpu.matmul %364, %366, %cst_317 {dimension_numbers = #tpu.dot_dimension_numbers<[1], [0], [0], [1], [0, 0, 1, 1], [], []>} : vector<29x32xf32>, vector<32x128xf32>, vector<29x128xf32> -> vector<29x128xf32>
    %368 = arith.addf %363, %367 : vector<29x128xf32>
    %c2_318 = arith.constant 2 : index
    %c0_319 = arith.constant 0 : index
    %369 = tpu.strided_load %arg14[%c2_318, %c0_319] {strides = array<i32: 2, 1>} : memref<62x32xf32, #tpu.memory_space<vmem>>, vector<29x32xf32>
    %c2_320 = arith.constant 2 : index
    %c0_321 = arith.constant 0 : index
    %c0_322 = arith.constant 0 : index
    %370 = vector.load %arg4[%c2_320, %c0_321, %c0_322] : memref<5x32x128xf32, #tpu.memory_space<vmem>>, vector<1x32x128xf32>
    %371 = vector.shape_cast %370 : vector<1x32x128xf32> to vector<32x128xf32>
    %cst_323 = arith.constant dense<0.000000e+00> : vector<29x128xf32>
    %372 = tpu.matmul %369, %371, %cst_323 {dimension_numbers = #tpu.dot_dimension_numbers<[1], [0], [0], [1], [0, 0, 1, 1], [], []>} : vector<29x32xf32>, vector<32x128xf32>, vector<29x128xf32> -> vector<29x128xf32>
    %373 = arith.addf %368, %372 : vector<29x128xf32>
    %c3_324 = arith.constant 3 : index
    %c0_325 = arith.constant 0 : index
    %374 = tpu.strided_load %arg14[%c3_324, %c0_325] {strides = array<i32: 2, 1>} : memref<62x32xf32, #tpu.memory_space<vmem>>, vector<29x32xf32>
    %c3_326 = arith.constant 3 : index
    %c0_327 = arith.constant 0 : index
    %c0_328 = arith.constant 0 : index
    %375 = vector.load %arg4[%c3_326, %c0_327, %c0_328] : memref<5x32x128xf32, #tpu.memory_space<vmem>>, vector<1x32x128xf32>
    %376 = vector.shape_cast %375 : vector<1x32x128xf32> to vector<32x128xf32>
    %cst_329 = arith.constant dense<0.000000e+00> : vector<29x128xf32>
    %377 = tpu.matmul %374, %376, %cst_329 {dimension_numbers = #tpu.dot_dimension_numbers<[1], [0], [0], [1], [0, 0, 1, 1], [], []>} : vector<29x32xf32>, vector<32x128xf32>, vector<29x128xf32> -> vector<29x128xf32>
    %378 = arith.addf %373, %377 : vector<29x128xf32>
    %c4_330 = arith.constant 4 : index
    %c0_331 = arith.constant 0 : index
    %379 = tpu.strided_load %arg14[%c4_330, %c0_331] {strides = array<i32: 2, 1>} : memref<62x32xf32, #tpu.memory_space<vmem>>, vector<29x32xf32>
    %c4_332 = arith.constant 4 : index
    %c0_333 = arith.constant 0 : index
    %c0_334 = arith.constant 0 : index
    %380 = vector.load %arg4[%c4_332, %c0_333, %c0_334] : memref<5x32x128xf32, #tpu.memory_space<vmem>>, vector<1x32x128xf32>
    %381 = vector.shape_cast %380 : vector<1x32x128xf32> to vector<32x128xf32>
    %cst_335 = arith.constant dense<0.000000e+00> : vector<29x128xf32>
    %382 = tpu.matmul %379, %381, %cst_335 {dimension_numbers = #tpu.dot_dimension_numbers<[1], [0], [0], [1], [0, 0, 1, 1], [], []>} : vector<29x32xf32>, vector<32x128xf32>, vector<29x128xf32> -> vector<29x128xf32>
    %383 = arith.addf %378, %382 : vector<29x128xf32>
    %c0_336 = arith.constant 0 : index
    %c0_337 = arith.constant 0 : index
    %384 = vector.load %arg5[%c0_336, %c0_337] : memref<1x128xf32, #tpu.memory_space<vmem>>, vector<1x128xf32>
    %385 = vector.broadcast %384 : vector<1x128xf32> to vector<29x128xf32>
    %386 = arith.addf %383, %385 : vector<29x128xf32>
    %cst_338 = arith.constant 0.000000e+00 : f32
    %387 = vector.broadcast %cst_338 : f32 to vector<29x128xf32>
    %388 = arith.cmpf oge, %386, %387 : vector<29x128xf32>
    %cst_339 = arith.constant 2.000000e-02 : f32
    %389 = vector.broadcast %cst_339 : f32 to vector<29x128xf32>
    %390 = arith.mulf %389, %386 : vector<29x128xf32>
    %391 = arith.select %388, %386, %390 : vector<29x128xi1>, vector<29x128xf32>
    %c0_340 = arith.constant 0 : index
    %c0_341 = arith.constant 0 : index
    %392 = vector.load %arg15[%c0_340, %c0_341] : memref<29x128xf32, #tpu.memory_space<vmem>>, vector<29x128xf32>
    tpu.vector_store %arg15[%c0_340, %c0_341], %391 {strides = array<i32>} : memref<29x128xf32, #tpu.memory_space<vmem>>, vector<29x128xf32>,
    %c0_342 = arith.constant 0 : index
    %c0_343 = arith.constant 0 : index
    %393 = tpu.strided_load %arg15[%c0_342, %c0_343] {strides = array<i32: 2, 1>} : memref<29x128xf32, #tpu.memory_space<vmem>>, vector<14x128xf32>
    %c1_344 = arith.constant 1 : index
    %c0_345 = arith.constant 0 : index
    %394 = tpu.strided_load %arg15[%c1_344, %c0_345] {strides = array<i32: 2, 1>} : memref<29x128xf32, #tpu.memory_space<vmem>>, vector<14x128xf32>
    %395 = arith.maximumf %393, %394 : vector<14x128xf32>
    %c0_346 = arith.constant 0 : index
    %c0_347 = arith.constant 0 : index
    %396 = vector.load %arg16[%c0_346, %c0_347] : memref<14x128xf32, #tpu.memory_space<vmem>>, vector<14x128xf32>
    tpu.vector_store %arg16[%c0_346, %c0_347], %395 {strides = array<i32>} : memref<14x128xf32, #tpu.memory_space<vmem>>, vector<14x128xf32>,
    %cst_348 = arith.constant 0.000000e+00 : f32
    %397 = vector.broadcast %cst_348 : f32 to vector<5x64xf32>
    %c0_349 = arith.constant 0 : index
    %c0_350 = arith.constant 0 : index
    %398 = tpu.strided_load %arg16[%c0_349, %c0_350] {strides = array<i32: 2, 1>} : memref<14x128xf32, #tpu.memory_space<vmem>>, vector<5x128xf32>
    %c0_351 = arith.constant 0 : index
    %c0_352 = arith.constant 0 : index
    %c0_353 = arith.constant 0 : index
    %399 = vector.load %arg6[%c0_351, %c0_352, %c0_353] : memref<5x128x64xf32, #tpu.memory_space<vmem>>, vector<1x128x64xf32>
    %400 = vector.shape_cast %399 : vector<1x128x64xf32> to vector<128x64xf32>
    %cst_354 = arith.constant dense<0.000000e+00> : vector<5x64xf32>
    %401 = tpu.matmul %398, %400, %cst_354 {dimension_numbers = #tpu.dot_dimension_numbers<[1], [0], [0], [1], [0, 0, 1, 1], [], []>} : vector<5x128xf32>, vector<128x64xf32>, vector<5x64xf32> -> vector<5x64xf32>
    %402 = arith.addf %397, %401 : vector<5x64xf32>
    %c1_355 = arith.constant 1 : index
    %c0_356 = arith.constant 0 : index
    %403 = tpu.strided_load %arg16[%c1_355, %c0_356] {strides = array<i32: 2, 1>} : memref<14x128xf32, #tpu.memory_space<vmem>>, vector<5x128xf32>
    %c1_357 = arith.constant 1 : index
    %c0_358 = arith.constant 0 : index
    %c0_359 = arith.constant 0 : index
    %404 = vector.load %arg6[%c1_357, %c0_358, %c0_359] : memref<5x128x64xf32, #tpu.memory_space<vmem>>, vector<1x128x64xf32>
    %405 = vector.shape_cast %404 : vector<1x128x64xf32> to vector<128x64xf32>
    %cst_360 = arith.constant dense<0.000000e+00> : vector<5x64xf32>
    %406 = tpu.matmul %403, %405, %cst_360 {dimension_numbers = #tpu.dot_dimension_numbers<[1], [0], [0], [1], [0, 0, 1, 1], [], []>} : vector<5x128xf32>, vector<128x64xf32>, vector<5x64xf32> -> vector<5x64xf32>
    %407 = arith.addf %402, %406 : vector<5x64xf32>
    %c2_361 = arith.constant 2 : index
    %c0_362 = arith.constant 0 : index
    %408 = tpu.strided_load %arg16[%c2_361, %c0_362] {strides = array<i32: 2, 1>} : memref<14x128xf32, #tpu.memory_space<vmem>>, vector<5x128xf32>
    %c2_363 = arith.constant 2 : index
    %c0_364 = arith.constant 0 : index
    %c0_365 = arith.constant 0 : index
    %409 = vector.load %arg6[%c2_363, %c0_364, %c0_365] : memref<5x128x64xf32, #tpu.memory_space<vmem>>, vector<1x128x64xf32>
    %410 = vector.shape_cast %409 : vector<1x128x64xf32> to vector<128x64xf32>
    %cst_366 = arith.constant dense<0.000000e+00> : vector<5x64xf32>
    %411 = tpu.matmul %408, %410, %cst_366 {dimension_numbers = #tpu.dot_dimension_numbers<[1], [0], [0], [1], [0, 0, 1, 1], [], []>} : vector<5x128xf32>, vector<128x64xf32>, vector<5x64xf32> -> vector<5x64xf32>
    %412 = arith.addf %407, %411 : vector<5x64xf32>
    %c3_367 = arith.constant 3 : index
    %c0_368 = arith.constant 0 : index
    %413 = tpu.strided_load %arg16[%c3_367, %c0_368] {strides = array<i32: 2, 1>} : memref<14x128xf32, #tpu.memory_space<vmem>>, vector<5x128xf32>
    %c3_369 = arith.constant 3 : index
    %c0_370 = arith.constant 0 : index
    %c0_371 = arith.constant 0 : index
    %414 = vector.load %arg6[%c3_369, %c0_370, %c0_371] : memref<5x128x64xf32, #tpu.memory_space<vmem>>, vector<1x128x64xf32>
    %415 = vector.shape_cast %414 : vector<1x128x64xf32> to vector<128x64xf32>
    %cst_372 = arith.constant dense<0.000000e+00> : vector<5x64xf32>
    %416 = tpu.matmul %413, %415, %cst_372 {dimension_numbers = #tpu.dot_dimension_numbers<[1], [0], [0], [1], [0, 0, 1, 1], [], []>} : vector<5x128xf32>, vector<128x64xf32>, vector<5x64xf32> -> vector<5x64xf32>
    %417 = arith.addf %412, %416 : vector<5x64xf32>
    %c4_373 = arith.constant 4 : index
    %c0_374 = arith.constant 0 : index
    %418 = tpu.strided_load %arg16[%c4_373, %c0_374] {strides = array<i32: 2, 1>} : memref<14x128xf32, #tpu.memory_space<vmem>>, vector<5x128xf32>
    %c4_375 = arith.constant 4 : index
    %c0_376 = arith.constant 0 : index
    %c0_377 = arith.constant 0 : index
    %419 = vector.load %arg6[%c4_375, %c0_376, %c0_377] : memref<5x128x64xf32, #tpu.memory_space<vmem>>, vector<1x128x64xf32>
    %420 = vector.shape_cast %419 : vector<1x128x64xf32> to vector<128x64xf32>
    %cst_378 = arith.constant dense<0.000000e+00> : vector<5x64xf32>
    %421 = tpu.matmul %418, %420, %cst_378 {dimension_numbers = #tpu.dot_dimension_numbers<[1], [0], [0], [1], [0, 0, 1, 1], [], []>} : vector<5x128xf32>, vector<128x64xf32>, vector<5x64xf32> -> vector<5x64xf32>
    %422 = arith.addf %417, %421 : vector<5x64xf32>
    %c0_379 = arith.constant 0 : index
    %c0_380 = arith.constant 0 : index
    %423 = vector.load %arg7[%c0_379, %c0_380] : memref<1x64xf32, #tpu.memory_space<vmem>>, vector<1x64xf32>
    %424 = vector.broadcast %423 : vector<1x64xf32> to vector<5x64xf32>
    %425 = arith.addf %422, %424 : vector<5x64xf32>
    %cst_381 = arith.constant 0.000000e+00 : f32
    %426 = vector.broadcast %cst_381 : f32 to vector<5x64xf32>
    %427 = arith.cmpf oge, %425, %426 : vector<5x64xf32>
    %cst_382 = arith.constant 2.000000e-02 : f32
    %428 = vector.broadcast %cst_382 : f32 to vector<5x64xf32>
    %429 = arith.mulf %428, %425 : vector<5x64xf32>
    %430 = arith.select %427, %425, %429 : vector<5x64xi1>, vector<5x64xf32>
    %cst_383 = arith.constant 0.000000e+00 : f32
    %431 = vector.broadcast %cst_383 : f32 to vector<1x64xf32>
    %432 = vector.extract_strided_slice %430 {offsets = [0, 0], sizes = [1, 64], strides = [1, 1]} : vector<5x64xf32> to vector<1x64xf32>
    %c0_384 = arith.constant 0 : index
    %c0_385 = arith.constant 0 : index
    %c0_386 = arith.constant 0 : index
    %433 = vector.load %arg8[%c0_384, %c0_385, %c0_386] : memref<5x64x64xf32, #tpu.memory_space<vmem>>, vector<1x64x64xf32>
    %434 = vector.shape_cast %433 : vector<1x64x64xf32> to vector<64x64xf32>
    %cst_387 = arith.constant dense<0.000000e+00> : vector<1x64xf32>
    %435 = tpu.matmul %432, %434, %cst_387 {dimension_numbers = #tpu.dot_dimension_numbers<[1], [0], [0], [1], [0, 0, 1, 1], [], []>} : vector<1x64xf32>, vector<64x64xf32>, vector<1x64xf32> -> vector<1x64xf32>
    %436 = arith.addf %431, %435 : vector<1x64xf32>
    %437 = vector.extract_strided_slice %430 {offsets = [1, 0], sizes = [1, 64], strides = [1, 1]} : vector<5x64xf32> to vector<1x64xf32>
    %c1_388 = arith.constant 1 : index
    %c0_389 = arith.constant 0 : index
    %c0_390 = arith.constant 0 : index
    %438 = vector.load %arg8[%c1_388, %c0_389, %c0_390] : memref<5x64x64xf32, #tpu.memory_space<vmem>>, vector<1x64x64xf32>
    %439 = vector.shape_cast %438 : vector<1x64x64xf32> to vector<64x64xf32>
    %cst_391 = arith.constant dense<0.000000e+00> : vector<1x64xf32>
    %440 = tpu.matmul %437, %439, %cst_391 {dimension_numbers = #tpu.dot_dimension_numbers<[1], [0], [0], [1], [0, 0, 1, 1], [], []>} : vector<1x64xf32>, vector<64x64xf32>, vector<1x64xf32> -> vector<1x64xf32>
    %441 = arith.addf %436, %440 : vector<1x64xf32>
    %442 = vector.extract_strided_slice %430 {offsets = [2, 0], sizes = [1, 64], strides = [1, 1]} : vector<5x64xf32> to vector<1x64xf32>
    %c2_392 = arith.constant 2 : index
    %c0_393 = arith.constant 0 : index
    %c0_394 = arith.constant 0 : index
    %443 = vector.load %arg8[%c2_392, %c0_393, %c0_394] : memref<5x64x64xf32, #tpu.memory_space<vmem>>, vector<1x64x64xf32>
    %444 = vector.shape_cast %443 : vector<1x64x64xf32> to vector<64x64xf32>
    %cst_395 = arith.constant dense<0.000000e+00> : vector<1x64xf32>
    %445 = tpu.matmul %442, %444, %cst_395 {dimension_numbers = #tpu.dot_dimension_numbers<[1], [0], [0], [1], [0, 0, 1, 1], [], []>} : vector<1x64xf32>, vector<64x64xf32>, vector<1x64xf32> -> vector<1x64xf32>
    %446 = arith.addf %441, %445 : vector<1x64xf32>
    %447 = vector.extract_strided_slice %430 {offsets = [3, 0], sizes = [1, 64], strides = [1, 1]} : vector<5x64xf32> to vector<1x64xf32>
    %c3_396 = arith.constant 3 : index
    %c0_397 = arith.constant 0 : index
    %c0_398 = arith.constant 0 : index
    %448 = vector.load %arg8[%c3_396, %c0_397, %c0_398] : memref<5x64x64xf32, #tpu.memory_space<vmem>>, vector<1x64x64xf32>
    %449 = vector.shape_cast %448 : vector<1x64x64xf32> to vector<64x64xf32>
    %cst_399 = arith.constant dense<0.000000e+00> : vector<1x64xf32>
    %450 = tpu.matmul %447, %449, %cst_399 {dimension_numbers = #tpu.dot_dimension_numbers<[1], [0], [0], [1], [0, 0, 1, 1], [], []>} : vector<1x64xf32>, vector<64x64xf32>, vector<1x64xf32> -> vector<1x64xf32>
    %451 = arith.addf %446, %450 : vector<1x64xf32>
    %452 = vector.extract_strided_slice %430 {offsets = [4, 0], sizes = [1, 64], strides = [1, 1]} : vector<5x64xf32> to vector<1x64xf32>
    %c4_400 = arith.constant 4 : index
    %c0_401 = arith.constant 0 : index
    %c0_402 = arith.constant 0 : index
    %453 = vector.load %arg8[%c4_400, %c0_401, %c0_402] : memref<5x64x64xf32, #tpu.memory_space<vmem>>, vector<1x64x64xf32>
    %454 = vector.shape_cast %453 : vector<1x64x64xf32> to vector<64x64xf32>
    %cst_403 = arith.constant dense<0.000000e+00> : vector<1x64xf32>
    %455 = tpu.matmul %452, %454, %cst_403 {dimension_numbers = #tpu.dot_dimension_numbers<[1], [0], [0], [1], [0, 0, 1, 1], [], []>} : vector<1x64xf32>, vector<64x64xf32>, vector<1x64xf32> -> vector<1x64xf32>
    %456 = arith.addf %451, %455 : vector<1x64xf32>
    %c0_404 = arith.constant 0 : index
    %c0_405 = arith.constant 0 : index
    %457 = vector.load %arg9[%c0_404, %c0_405] : memref<1x64xf32, #tpu.memory_space<vmem>>, vector<1x64xf32>
    %458 = arith.addf %456, %457 : vector<1x64xf32>
    %cst_406 = arith.constant 0.000000e+00 : f32
    %459 = vector.broadcast %cst_406 : f32 to vector<1x64xf32>
    %460 = arith.cmpf oge, %458, %459 : vector<1x64xf32>
    %cst_407 = arith.constant 2.000000e-02 : f32
    %461 = vector.broadcast %cst_407 : f32 to vector<1x64xf32>
    %462 = arith.mulf %461, %458 : vector<1x64xf32>
    %463 = arith.select %460, %458, %462 : vector<1x64xi1>, vector<1x64xf32>
    %c0_408 = arith.constant 0 : index
    %c0_409 = arith.constant 0 : index
    %464 = vector.load %arg10[%c0_408, %c0_409] : memref<64x4xf32, #tpu.memory_space<vmem>>, vector<64x4xf32>
    %cst_410 = arith.constant dense<0.000000e+00> : vector<1x4xf32>
    %465 = tpu.matmul %463, %464, %cst_410 {dimension_numbers = #tpu.dot_dimension_numbers<[1], [0], [0], [1], [0, 0, 1, 1], [], []>} : vector<1x64xf32>, vector<64x4xf32>, vector<1x4xf32> -> vector<1x4xf32>
    %c0_411 = arith.constant 0 : index
    %c0_412 = arith.constant 0 : index
    %466 = vector.load %arg11[%c0_411, %c0_412] : memref<1x4xf32, #tpu.memory_space<vmem>>, vector<1x4xf32>
    %467 = arith.addf %465, %466 : vector<1x4xf32>
    %c2_413 = arith.constant 2 : index
    %c0_414 = arith.constant 0 : index
    %c0_415 = arith.constant 0 : index
    %468 = vector.load %arg12[%c2_413, %c0_414, %c0_415] : memref<4x1x4xf32, #tpu.memory_space<vmem>>, vector<1x1x4xf32>
    %469 = vector.shape_cast %468 : vector<1x1x4xf32> to vector<1x4xf32>
    %470 = vector.shape_cast %467 : vector<1x4xf32> to vector<1x1x4xf32>
    tpu.vector_store %arg12[%c2_413, %c0_414, %c0_415], %470 {strides = array<i32>} : memref<4x1x4xf32, #tpu.memory_space<vmem>>, vector<1x1x4xf32>,
    %cst_416 = arith.constant 0.000000e+00 : f32
    %471 = vector.broadcast %cst_416 : f32 to vector<124x32xf32>
    %c384 = arith.constant 384 : index
    %c0_417 = arith.constant 0 : index
    %472 = vector.load %arg1[%c384, %c0_417] : memref<512x1xf32, #tpu.memory_space<vmem>>, vector<124x1xf32>
    %c0_418 = arith.constant 0 : index
    %c0_419 = arith.constant 0 : index
    %473 = vector.load %arg2[%c0_418, %c0_419] : memref<5x32xf32, #tpu.memory_space<vmem>>, vector<1x32xf32>
    %474 = vector.broadcast %472 : vector<124x1xf32> to vector<124x32xf32>
    %475 = vector.broadcast %473 : vector<1x32xf32> to vector<124x32xf32>
    %476 = arith.mulf %474, %475 : vector<124x32xf32>
    %477 = arith.addf %471, %476 : vector<124x32xf32>
    %c385 = arith.constant 385 : index
    %c0_420 = arith.constant 0 : index
    %478 = vector.load %arg1[%c385, %c0_420] : memref<512x1xf32, #tpu.memory_space<vmem>>, vector<124x1xf32>
    %c1_421 = arith.constant 1 : index
    %c0_422 = arith.constant 0 : index
    %479 = vector.load %arg2[%c1_421, %c0_422] : memref<5x32xf32, #tpu.memory_space<vmem>>, vector<1x32xf32>
    %480 = vector.broadcast %478 : vector<124x1xf32> to vector<124x32xf32>
    %481 = vector.broadcast %479 : vector<1x32xf32> to vector<124x32xf32>
    %482 = arith.mulf %480, %481 : vector<124x32xf32>
    %483 = arith.addf %477, %482 : vector<124x32xf32>
    %c386 = arith.constant 386 : index
    %c0_423 = arith.constant 0 : index
    %484 = vector.load %arg1[%c386, %c0_423] : memref<512x1xf32, #tpu.memory_space<vmem>>, vector<124x1xf32>
    %c2_424 = arith.constant 2 : index
    %c0_425 = arith.constant 0 : index
    %485 = vector.load %arg2[%c2_424, %c0_425] : memref<5x32xf32, #tpu.memory_space<vmem>>, vector<1x32xf32>
    %486 = vector.broadcast %484 : vector<124x1xf32> to vector<124x32xf32>
    %487 = vector.broadcast %485 : vector<1x32xf32> to vector<124x32xf32>
    %488 = arith.mulf %486, %487 : vector<124x32xf32>
    %489 = arith.addf %483, %488 : vector<124x32xf32>
    %c387 = arith.constant 387 : index
    %c0_426 = arith.constant 0 : index
    %490 = vector.load %arg1[%c387, %c0_426] : memref<512x1xf32, #tpu.memory_space<vmem>>, vector<124x1xf32>
    %c3_427 = arith.constant 3 : index
    %c0_428 = arith.constant 0 : index
    %491 = vector.load %arg2[%c3_427, %c0_428] : memref<5x32xf32, #tpu.memory_space<vmem>>, vector<1x32xf32>
    %492 = vector.broadcast %490 : vector<124x1xf32> to vector<124x32xf32>
    %493 = vector.broadcast %491 : vector<1x32xf32> to vector<124x32xf32>
    %494 = arith.mulf %492, %493 : vector<124x32xf32>
    %495 = arith.addf %489, %494 : vector<124x32xf32>
    %c388 = arith.constant 388 : index
    %c0_429 = arith.constant 0 : index
    %496 = vector.load %arg1[%c388, %c0_429] : memref<512x1xf32, #tpu.memory_space<vmem>>, vector<124x1xf32>
    %c4_430 = arith.constant 4 : index
    %c0_431 = arith.constant 0 : index
    %497 = vector.load %arg2[%c4_430, %c0_431] : memref<5x32xf32, #tpu.memory_space<vmem>>, vector<1x32xf32>
    %498 = vector.broadcast %496 : vector<124x1xf32> to vector<124x32xf32>
    %499 = vector.broadcast %497 : vector<1x32xf32> to vector<124x32xf32>
    %500 = arith.mulf %498, %499 : vector<124x32xf32>
    %501 = arith.addf %495, %500 : vector<124x32xf32>
    %c0_432 = arith.constant 0 : index
    %c0_433 = arith.constant 0 : index
    %502 = vector.load %arg3[%c0_432, %c0_433] : memref<1x32xf32, #tpu.memory_space<vmem>>, vector<1x32xf32>
    %503 = vector.broadcast %502 : vector<1x32xf32> to vector<124x32xf32>
    %504 = arith.addf %501, %503 : vector<124x32xf32>
    %cst_434 = arith.constant 0.000000e+00 : f32
    %505 = vector.broadcast %cst_434 : f32 to vector<124x32xf32>
    %506 = arith.cmpf oge, %504, %505 : vector<124x32xf32>
    %cst_435 = arith.constant 2.000000e-02 : f32
    %507 = vector.broadcast %cst_435 : f32 to vector<124x32xf32>
    %508 = arith.mulf %507, %504 : vector<124x32xf32>
    %509 = arith.select %506, %504, %508 : vector<124x32xi1>, vector<124x32xf32>
    %c0_436 = arith.constant 0 : index
    %c0_437 = arith.constant 0 : index
    %510 = vector.load %arg13[%c0_436, %c0_437] : memref<124x32xf32, #tpu.memory_space<vmem>>, vector<124x32xf32>
    tpu.vector_store %arg13[%c0_436, %c0_437], %509 {strides = array<i32>} : memref<124x32xf32, #tpu.memory_space<vmem>>, vector<124x32xf32>,
    %c0_438 = arith.constant 0 : index
    %c0_439 = arith.constant 0 : index
    %511 = tpu.strided_load %arg13[%c0_438, %c0_439] {strides = array<i32: 2, 1>} : memref<124x32xf32, #tpu.memory_space<vmem>>, vector<62x32xf32>
    %c1_440 = arith.constant 1 : index
    %c0_441 = arith.constant 0 : index
    %512 = tpu.strided_load %arg13[%c1_440, %c0_441] {strides = array<i32: 2, 1>} : memref<124x32xf32, #tpu.memory_space<vmem>>, vector<62x32xf32>
    %513 = arith.maximumf %511, %512 : vector<62x32xf32>
    %c0_442 = arith.constant 0 : index
    %c0_443 = arith.constant 0 : index
    %514 = vector.load %arg14[%c0_442, %c0_443] : memref<62x32xf32, #tpu.memory_space<vmem>>, vector<62x32xf32>
    tpu.vector_store %arg14[%c0_442, %c0_443], %513 {strides = array<i32>} : memref<62x32xf32, #tpu.memory_space<vmem>>, vector<62x32xf32>,
    %cst_444 = arith.constant 0.000000e+00 : f32
    %515 = vector.broadcast %cst_444 : f32 to vector<29x128xf32>
    %c0_445 = arith.constant 0 : index
    %c0_446 = arith.constant 0 : index
    %516 = tpu.strided_load %arg14[%c0_445, %c0_446] {strides = array<i32: 2, 1>} : memref<62x32xf32, #tpu.memory_space<vmem>>, vector<29x32xf32>
    %c0_447 = arith.constant 0 : index
    %c0_448 = arith.constant 0 : index
    %c0_449 = arith.constant 0 : index
    %517 = vector.load %arg4[%c0_447, %c0_448, %c0_449] : memref<5x32x128xf32, #tpu.memory_space<vmem>>, vector<1x32x128xf32>
    %518 = vector.shape_cast %517 : vector<1x32x128xf32> to vector<32x128xf32>
    %cst_450 = arith.constant dense<0.000000e+00> : vector<29x128xf32>
    %519 = tpu.matmul %516, %518, %cst_450 {dimension_numbers = #tpu.dot_dimension_numbers<[1], [0], [0], [1], [0, 0, 1, 1], [], []>} : vector<29x32xf32>, vector<32x128xf32>, vector<29x128xf32> -> vector<29x128xf32>
    %520 = arith.addf %515, %519 : vector<29x128xf32>
    %c1_451 = arith.constant 1 : index
    %c0_452 = arith.constant 0 : index
    %521 = tpu.strided_load %arg14[%c1_451, %c0_452] {strides = array<i32: 2, 1>} : memref<62x32xf32, #tpu.memory_space<vmem>>, vector<29x32xf32>
    %c1_453 = arith.constant 1 : index
    %c0_454 = arith.constant 0 : index
    %c0_455 = arith.constant 0 : index
    %522 = vector.load %arg4[%c1_453, %c0_454, %c0_455] : memref<5x32x128xf32, #tpu.memory_space<vmem>>, vector<1x32x128xf32>
    %523 = vector.shape_cast %522 : vector<1x32x128xf32> to vector<32x128xf32>
    %cst_456 = arith.constant dense<0.000000e+00> : vector<29x128xf32>
    %524 = tpu.matmul %521, %523, %cst_456 {dimension_numbers = #tpu.dot_dimension_numbers<[1], [0], [0], [1], [0, 0, 1, 1], [], []>} : vector<29x32xf32>, vector<32x128xf32>, vector<29x128xf32> -> vector<29x128xf32>
    %525 = arith.addf %520, %524 : vector<29x128xf32>
    %c2_457 = arith.constant 2 : index
    %c0_458 = arith.constant 0 : index
    %526 = tpu.strided_load %arg14[%c2_457, %c0_458] {strides = array<i32: 2, 1>} : memref<62x32xf32, #tpu.memory_space<vmem>>, vector<29x32xf32>
    %c2_459 = arith.constant 2 : index
    %c0_460 = arith.constant 0 : index
    %c0_461 = arith.constant 0 : index
    %527 = vector.load %arg4[%c2_459, %c0_460, %c0_461] : memref<5x32x128xf32, #tpu.memory_space<vmem>>, vector<1x32x128xf32>
    %528 = vector.shape_cast %527 : vector<1x32x128xf32> to vector<32x128xf32>
    %cst_462 = arith.constant dense<0.000000e+00> : vector<29x128xf32>
    %529 = tpu.matmul %526, %528, %cst_462 {dimension_numbers = #tpu.dot_dimension_numbers<[1], [0], [0], [1], [0, 0, 1, 1], [], []>} : vector<29x32xf32>, vector<32x128xf32>, vector<29x128xf32> -> vector<29x128xf32>
    %530 = arith.addf %525, %529 : vector<29x128xf32>
    %c3_463 = arith.constant 3 : index
    %c0_464 = arith.constant 0 : index
    %531 = tpu.strided_load %arg14[%c3_463, %c0_464] {strides = array<i32: 2, 1>} : memref<62x32xf32, #tpu.memory_space<vmem>>, vector<29x32xf32>
    %c3_465 = arith.constant 3 : index
    %c0_466 = arith.constant 0 : index
    %c0_467 = arith.constant 0 : index
    %532 = vector.load %arg4[%c3_465, %c0_466, %c0_467] : memref<5x32x128xf32, #tpu.memory_space<vmem>>, vector<1x32x128xf32>
    %533 = vector.shape_cast %532 : vector<1x32x128xf32> to vector<32x128xf32>
    %cst_468 = arith.constant dense<0.000000e+00> : vector<29x128xf32>
    %534 = tpu.matmul %531, %533, %cst_468 {dimension_numbers = #tpu.dot_dimension_numbers<[1], [0], [0], [1], [0, 0, 1, 1], [], []>} : vector<29x32xf32>, vector<32x128xf32>, vector<29x128xf32> -> vector<29x128xf32>
    %535 = arith.addf %530, %534 : vector<29x128xf32>
    %c4_469 = arith.constant 4 : index
    %c0_470 = arith.constant 0 : index
    %536 = tpu.strided_load %arg14[%c4_469, %c0_470] {strides = array<i32: 2, 1>} : memref<62x32xf32, #tpu.memory_space<vmem>>, vector<29x32xf32>
    %c4_471 = arith.constant 4 : index
    %c0_472 = arith.constant 0 : index
    %c0_473 = arith.constant 0 : index
    %537 = vector.load %arg4[%c4_471, %c0_472, %c0_473] : memref<5x32x128xf32, #tpu.memory_space<vmem>>, vector<1x32x128xf32>
    %538 = vector.shape_cast %537 : vector<1x32x128xf32> to vector<32x128xf32>
    %cst_474 = arith.constant dense<0.000000e+00> : vector<29x128xf32>
    %539 = tpu.matmul %536, %538, %cst_474 {dimension_numbers = #tpu.dot_dimension_numbers<[1], [0], [0], [1], [0, 0, 1, 1], [], []>} : vector<29x32xf32>, vector<32x128xf32>, vector<29x128xf32> -> vector<29x128xf32>
    %540 = arith.addf %535, %539 : vector<29x128xf32>
    %c0_475 = arith.constant 0 : index
    %c0_476 = arith.constant 0 : index
    %541 = vector.load %arg5[%c0_475, %c0_476] : memref<1x128xf32, #tpu.memory_space<vmem>>, vector<1x128xf32>
    %542 = vector.broadcast %541 : vector<1x128xf32> to vector<29x128xf32>
    %543 = arith.addf %540, %542 : vector<29x128xf32>
    %cst_477 = arith.constant 0.000000e+00 : f32
    %544 = vector.broadcast %cst_477 : f32 to vector<29x128xf32>
    %545 = arith.cmpf oge, %543, %544 : vector<29x128xf32>
    %cst_478 = arith.constant 2.000000e-02 : f32
    %546 = vector.broadcast %cst_478 : f32 to vector<29x128xf32>
    %547 = arith.mulf %546, %543 : vector<29x128xf32>
    %548 = arith.select %545, %543, %547 : vector<29x128xi1>, vector<29x128xf32>
    %c0_479 = arith.constant 0 : index
    %c0_480 = arith.constant 0 : index
    %549 = vector.load %arg15[%c0_479, %c0_480] : memref<29x128xf32, #tpu.memory_space<vmem>>, vector<29x128xf32>
    tpu.vector_store %arg15[%c0_479, %c0_480], %548 {strides = array<i32>} : memref<29x128xf32, #tpu.memory_space<vmem>>, vector<29x128xf32>,
    %c0_481 = arith.constant 0 : index
    %c0_482 = arith.constant 0 : index
    %550 = tpu.strided_load %arg15[%c0_481, %c0_482] {strides = array<i32: 2, 1>} : memref<29x128xf32, #tpu.memory_space<vmem>>, vector<14x128xf32>
    %c1_483 = arith.constant 1 : index
    %c0_484 = arith.constant 0 : index
    %551 = tpu.strided_load %arg15[%c1_483, %c0_484] {strides = array<i32: 2, 1>} : memref<29x128xf32, #tpu.memory_space<vmem>>, vector<14x128xf32>
    %552 = arith.maximumf %550, %551 : vector<14x128xf32>
    %c0_485 = arith.constant 0 : index
    %c0_486 = arith.constant 0 : index
    %553 = vector.load %arg16[%c0_485, %c0_486] : memref<14x128xf32, #tpu.memory_space<vmem>>, vector<14x128xf32>
    tpu.vector_store %arg16[%c0_485, %c0_486], %552 {strides = array<i32>} : memref<14x128xf32, #tpu.memory_space<vmem>>, vector<14x128xf32>,
    %cst_487 = arith.constant 0.000000e+00 : f32
    %554 = vector.broadcast %cst_487 : f32 to vector<5x64xf32>
    %c0_488 = arith.constant 0 : index
    %c0_489 = arith.constant 0 : index
    %555 = tpu.strided_load %arg16[%c0_488, %c0_489] {strides = array<i32: 2, 1>} : memref<14x128xf32, #tpu.memory_space<vmem>>, vector<5x128xf32>
    %c0_490 = arith.constant 0 : index
    %c0_491 = arith.constant 0 : index
    %c0_492 = arith.constant 0 : index
    %556 = vector.load %arg6[%c0_490, %c0_491, %c0_492] : memref<5x128x64xf32, #tpu.memory_space<vmem>>, vector<1x128x64xf32>
    %557 = vector.shape_cast %556 : vector<1x128x64xf32> to vector<128x64xf32>
    %cst_493 = arith.constant dense<0.000000e+00> : vector<5x64xf32>
    %558 = tpu.matmul %555, %557, %cst_493 {dimension_numbers = #tpu.dot_dimension_numbers<[1], [0], [0], [1], [0, 0, 1, 1], [], []>} : vector<5x128xf32>, vector<128x64xf32>, vector<5x64xf32> -> vector<5x64xf32>
    %559 = arith.addf %554, %558 : vector<5x64xf32>
    %c1_494 = arith.constant 1 : index
    %c0_495 = arith.constant 0 : index
    %560 = tpu.strided_load %arg16[%c1_494, %c0_495] {strides = array<i32: 2, 1>} : memref<14x128xf32, #tpu.memory_space<vmem>>, vector<5x128xf32>
    %c1_496 = arith.constant 1 : index
    %c0_497 = arith.constant 0 : index
    %c0_498 = arith.constant 0 : index
    %561 = vector.load %arg6[%c1_496, %c0_497, %c0_498] : memref<5x128x64xf32, #tpu.memory_space<vmem>>, vector<1x128x64xf32>
    %562 = vector.shape_cast %561 : vector<1x128x64xf32> to vector<128x64xf32>
    %cst_499 = arith.constant dense<0.000000e+00> : vector<5x64xf32>
    %563 = tpu.matmul %560, %562, %cst_499 {dimension_numbers = #tpu.dot_dimension_numbers<[1], [0], [0], [1], [0, 0, 1, 1], [], []>} : vector<5x128xf32>, vector<128x64xf32>, vector<5x64xf32> -> vector<5x64xf32>
    %564 = arith.addf %559, %563 : vector<5x64xf32>
    %c2_500 = arith.constant 2 : index
    %c0_501 = arith.constant 0 : index
    %565 = tpu.strided_load %arg16[%c2_500, %c0_501] {strides = array<i32: 2, 1>} : memref<14x128xf32, #tpu.memory_space<vmem>>, vector<5x128xf32>
    %c2_502 = arith.constant 2 : index
    %c0_503 = arith.constant 0 : index
    %c0_504 = arith.constant 0 : index
    %566 = vector.load %arg6[%c2_502, %c0_503, %c0_504] : memref<5x128x64xf32, #tpu.memory_space<vmem>>, vector<1x128x64xf32>
    %567 = vector.shape_cast %566 : vector<1x128x64xf32> to vector<128x64xf32>
    %cst_505 = arith.constant dense<0.000000e+00> : vector<5x64xf32>
    %568 = tpu.matmul %565, %567, %cst_505 {dimension_numbers = #tpu.dot_dimension_numbers<[1], [0], [0], [1], [0, 0, 1, 1], [], []>} : vector<5x128xf32>, vector<128x64xf32>, vector<5x64xf32> -> vector<5x64xf32>
    %569 = arith.addf %564, %568 : vector<5x64xf32>
    %c3_506 = arith.constant 3 : index
    %c0_507 = arith.constant 0 : index
    %570 = tpu.strided_load %arg16[%c3_506, %c0_507] {strides = array<i32: 2, 1>} : memref<14x128xf32, #tpu.memory_space<vmem>>, vector<5x128xf32>
    %c3_508 = arith.constant 3 : index
    %c0_509 = arith.constant 0 : index
    %c0_510 = arith.constant 0 : index
    %571 = vector.load %arg6[%c3_508, %c0_509, %c0_510] : memref<5x128x64xf32, #tpu.memory_space<vmem>>, vector<1x128x64xf32>
    %572 = vector.shape_cast %571 : vector<1x128x64xf32> to vector<128x64xf32>
    %cst_511 = arith.constant dense<0.000000e+00> : vector<5x64xf32>
    %573 = tpu.matmul %570, %572, %cst_511 {dimension_numbers = #tpu.dot_dimension_numbers<[1], [0], [0], [1], [0, 0, 1, 1], [], []>} : vector<5x128xf32>, vector<128x64xf32>, vector<5x64xf32> -> vector<5x64xf32>
    %574 = arith.addf %569, %573 : vector<5x64xf32>
    %c4_512 = arith.constant 4 : index
    %c0_513 = arith.constant 0 : index
    %575 = tpu.strided_load %arg16[%c4_512, %c0_513] {strides = array<i32: 2, 1>} : memref<14x128xf32, #tpu.memory_space<vmem>>, vector<5x128xf32>
    %c4_514 = arith.constant 4 : index
    %c0_515 = arith.constant 0 : index
    %c0_516 = arith.constant 0 : index
    %576 = vector.load %arg6[%c4_514, %c0_515, %c0_516] : memref<5x128x64xf32, #tpu.memory_space<vmem>>, vector<1x128x64xf32>
    %577 = vector.shape_cast %576 : vector<1x128x64xf32> to vector<128x64xf32>
    %cst_517 = arith.constant dense<0.000000e+00> : vector<5x64xf32>
    %578 = tpu.matmul %575, %577, %cst_517 {dimension_numbers = #tpu.dot_dimension_numbers<[1], [0], [0], [1], [0, 0, 1, 1], [], []>} : vector<5x128xf32>, vector<128x64xf32>, vector<5x64xf32> -> vector<5x64xf32>
    %579 = arith.addf %574, %578 : vector<5x64xf32>
    %c0_518 = arith.constant 0 : index
    %c0_519 = arith.constant 0 : index
    %580 = vector.load %arg7[%c0_518, %c0_519] : memref<1x64xf32, #tpu.memory_space<vmem>>, vector<1x64xf32>
    %581 = vector.broadcast %580 : vector<1x64xf32> to vector<5x64xf32>
    %582 = arith.addf %579, %581 : vector<5x64xf32>
    %cst_520 = arith.constant 0.000000e+00 : f32
    %583 = vector.broadcast %cst_520 : f32 to vector<5x64xf32>
    %584 = arith.cmpf oge, %582, %583 : vector<5x64xf32>
    %cst_521 = arith.constant 2.000000e-02 : f32
    %585 = vector.broadcast %cst_521 : f32 to vector<5x64xf32>
    %586 = arith.mulf %585, %582 : vector<5x64xf32>
    %587 = arith.select %584, %582, %586 : vector<5x64xi1>, vector<5x64xf32>
    %cst_522 = arith.constant 0.000000e+00 : f32
    %588 = vector.broadcast %cst_522 : f32 to vector<1x64xf32>
    %589 = vector.extract_strided_slice %587 {offsets = [0, 0], sizes = [1, 64], strides = [1, 1]} : vector<5x64xf32> to vector<1x64xf32>
    %c0_523 = arith.constant 0 : index
    %c0_524 = arith.constant 0 : index
    %c0_525 = arith.constant 0 : index
    %590 = vector.load %arg8[%c0_523, %c0_524, %c0_525] : memref<5x64x64xf32, #tpu.memory_space<vmem>>, vector<1x64x64xf32>
    %591 = vector.shape_cast %590 : vector<1x64x64xf32> to vector<64x64xf32>
    %cst_526 = arith.constant dense<0.000000e+00> : vector<1x64xf32>
    %592 = tpu.matmul %589, %591, %cst_526 {dimension_numbers = #tpu.dot_dimension_numbers<[1], [0], [0], [1], [0, 0, 1, 1], [], []>} : vector<1x64xf32>, vector<64x64xf32>, vector<1x64xf32> -> vector<1x64xf32>
    %593 = arith.addf %588, %592 : vector<1x64xf32>
    %594 = vector.extract_strided_slice %587 {offsets = [1, 0], sizes = [1, 64], strides = [1, 1]} : vector<5x64xf32> to vector<1x64xf32>
    %c1_527 = arith.constant 1 : index
    %c0_528 = arith.constant 0 : index
    %c0_529 = arith.constant 0 : index
    %595 = vector.load %arg8[%c1_527, %c0_528, %c0_529] : memref<5x64x64xf32, #tpu.memory_space<vmem>>, vector<1x64x64xf32>
    %596 = vector.shape_cast %595 : vector<1x64x64xf32> to vector<64x64xf32>
    %cst_530 = arith.constant dense<0.000000e+00> : vector<1x64xf32>
    %597 = tpu.matmul %594, %596, %cst_530 {dimension_numbers = #tpu.dot_dimension_numbers<[1], [0], [0], [1], [0, 0, 1, 1], [], []>} : vector<1x64xf32>, vector<64x64xf32>, vector<1x64xf32> -> vector<1x64xf32>
    %598 = arith.addf %593, %597 : vector<1x64xf32>
    %599 = vector.extract_strided_slice %587 {offsets = [2, 0], sizes = [1, 64], strides = [1, 1]} : vector<5x64xf32> to vector<1x64xf32>
    %c2_531 = arith.constant 2 : index
    %c0_532 = arith.constant 0 : index
    %c0_533 = arith.constant 0 : index
    %600 = vector.load %arg8[%c2_531, %c0_532, %c0_533] : memref<5x64x64xf32, #tpu.memory_space<vmem>>, vector<1x64x64xf32>
    %601 = vector.shape_cast %600 : vector<1x64x64xf32> to vector<64x64xf32>
    %cst_534 = arith.constant dense<0.000000e+00> : vector<1x64xf32>
    %602 = tpu.matmul %599, %601, %cst_534 {dimension_numbers = #tpu.dot_dimension_numbers<[1], [0], [0], [1], [0, 0, 1, 1], [], []>} : vector<1x64xf32>, vector<64x64xf32>, vector<1x64xf32> -> vector<1x64xf32>
    %603 = arith.addf %598, %602 : vector<1x64xf32>
    %604 = vector.extract_strided_slice %587 {offsets = [3, 0], sizes = [1, 64], strides = [1, 1]} : vector<5x64xf32> to vector<1x64xf32>
    %c3_535 = arith.constant 3 : index
    %c0_536 = arith.constant 0 : index
    %c0_537 = arith.constant 0 : index
    %605 = vector.load %arg8[%c3_535, %c0_536, %c0_537] : memref<5x64x64xf32, #tpu.memory_space<vmem>>, vector<1x64x64xf32>
    %606 = vector.shape_cast %605 : vector<1x64x64xf32> to vector<64x64xf32>
    %cst_538 = arith.constant dense<0.000000e+00> : vector<1x64xf32>
    %607 = tpu.matmul %604, %606, %cst_538 {dimension_numbers = #tpu.dot_dimension_numbers<[1], [0], [0], [1], [0, 0, 1, 1], [], []>} : vector<1x64xf32>, vector<64x64xf32>, vector<1x64xf32> -> vector<1x64xf32>
    %608 = arith.addf %603, %607 : vector<1x64xf32>
    %609 = vector.extract_strided_slice %587 {offsets = [4, 0], sizes = [1, 64], strides = [1, 1]} : vector<5x64xf32> to vector<1x64xf32>
    %c4_539 = arith.constant 4 : index
    %c0_540 = arith.constant 0 : index
    %c0_541 = arith.constant 0 : index
    %610 = vector.load %arg8[%c4_539, %c0_540, %c0_541] : memref<5x64x64xf32, #tpu.memory_space<vmem>>, vector<1x64x64xf32>
    %611 = vector.shape_cast %610 : vector<1x64x64xf32> to vector<64x64xf32>
    %cst_542 = arith.constant dense<0.000000e+00> : vector<1x64xf32>
    %612 = tpu.matmul %609, %611, %cst_542 {dimension_numbers = #tpu.dot_dimension_numbers<[1], [0], [0], [1], [0, 0, 1, 1], [], []>} : vector<1x64xf32>, vector<64x64xf32>, vector<1x64xf32> -> vector<1x64xf32>
    %613 = arith.addf %608, %612 : vector<1x64xf32>
    %c0_543 = arith.constant 0 : index
    %c0_544 = arith.constant 0 : index
    %614 = vector.load %arg9[%c0_543, %c0_544] : memref<1x64xf32, #tpu.memory_space<vmem>>, vector<1x64xf32>
    %615 = arith.addf %613, %614 : vector<1x64xf32>
    %cst_545 = arith.constant 0.000000e+00 : f32
    %616 = vector.broadcast %cst_545 : f32 to vector<1x64xf32>
    %617 = arith.cmpf oge, %615, %616 : vector<1x64xf32>
    %cst_546 = arith.constant 2.000000e-02 : f32
    %618 = vector.broadcast %cst_546 : f32 to vector<1x64xf32>
    %619 = arith.mulf %618, %615 : vector<1x64xf32>
    %620 = arith.select %617, %615, %619 : vector<1x64xi1>, vector<1x64xf32>
    %c0_547 = arith.constant 0 : index
    %c0_548 = arith.constant 0 : index
    %621 = vector.load %arg10[%c0_547, %c0_548] : memref<64x4xf32, #tpu.memory_space<vmem>>, vector<64x4xf32>
    %cst_549 = arith.constant dense<0.000000e+00> : vector<1x4xf32>
    %622 = tpu.matmul %620, %621, %cst_549 {dimension_numbers = #tpu.dot_dimension_numbers<[1], [0], [0], [1], [0, 0, 1, 1], [], []>} : vector<1x64xf32>, vector<64x4xf32>, vector<1x4xf32> -> vector<1x4xf32>
    %c0_550 = arith.constant 0 : index
    %c0_551 = arith.constant 0 : index
    %623 = vector.load %arg11[%c0_550, %c0_551] : memref<1x4xf32, #tpu.memory_space<vmem>>, vector<1x4xf32>
    %624 = arith.addf %622, %623 : vector<1x4xf32>
    %c3_552 = arith.constant 3 : index
    %c0_553 = arith.constant 0 : index
    %c0_554 = arith.constant 0 : index
    %625 = vector.load %arg12[%c3_552, %c0_553, %c0_554] : memref<4x1x4xf32, #tpu.memory_space<vmem>>, vector<1x1x4xf32>
    %626 = vector.shape_cast %625 : vector<1x1x4xf32> to vector<1x4xf32>
    %627 = vector.shape_cast %624 : vector<1x4xf32> to vector<1x1x4xf32>
    tpu.vector_store %arg12[%c3_552, %c0_553, %c0_554], %627 {strides = array<i32>} : memref<4x1x4xf32, #tpu.memory_space<vmem>>, vector<1x1x4xf32>,
    return
  }
  func.func @transform_0(%arg0: i32) -> (i32, i32) {
    %c0_i32 = arith.constant 0 : i32
    %c0_i32_0 = arith.constant 0 : i32
    return %arg0, %c0_i32 : i32, i32
  }
  func.func @transform_1(%arg0: i32) -> (i32, i32) {
    %c0_i32 = arith.constant 0 : i32
    %c0_i32_0 = arith.constant 0 : i32
    %c0_i32_1 = arith.constant 0 : i32
    return %c0_i32, %c0_i32_0 : i32, i32
  }
  func.func @transform_2(%arg0: i32) -> (i32, i32) {
    %c0_i32 = arith.constant 0 : i32
    %c0_i32_0 = arith.constant 0 : i32
    %c0_i32_1 = arith.constant 0 : i32
    return %c0_i32, %c0_i32_0 : i32, i32
  }
  func.func @transform_3(%arg0: i32) -> (i32, i32, i32) {
    %c0_i32 = arith.constant 0 : i32
    %c0_i32_0 = arith.constant 0 : i32
    %c0_i32_1 = arith.constant 0 : i32
    %c0_i32_2 = arith.constant 0 : i32
    return %c0_i32, %c0_i32_0, %c0_i32_1 : i32, i32, i32
  }
  func.func @transform_4(%arg0: i32) -> (i32, i32) {
    %c0_i32 = arith.constant 0 : i32
    %c0_i32_0 = arith.constant 0 : i32
    %c0_i32_1 = arith.constant 0 : i32
    return %c0_i32, %c0_i32_0 : i32, i32
  }
  func.func @transform_5(%arg0: i32) -> (i32, i32, i32) {
    %c0_i32 = arith.constant 0 : i32
    %c0_i32_0 = arith.constant 0 : i32
    %c0_i32_1 = arith.constant 0 : i32
    %c0_i32_2 = arith.constant 0 : i32
    return %c0_i32, %c0_i32_0, %c0_i32_1 : i32, i32, i32
  }
  func.func @transform_6(%arg0: i32) -> (i32, i32) {
    %c0_i32 = arith.constant 0 : i32
    %c0_i32_0 = arith.constant 0 : i32
    %c0_i32_1 = arith.constant 0 : i32
    return %c0_i32, %c0_i32_0 : i32, i32
  }
  func.func @transform_7(%arg0: i32) -> (i32, i32, i32) {
    %c0_i32 = arith.constant 0 : i32
    %c0_i32_0 = arith.constant 0 : i32
    %c0_i32_1 = arith.constant 0 : i32
    %c0_i32_2 = arith.constant 0 : i32
    return %c0_i32, %c0_i32_0, %c0_i32_1 : i32, i32, i32
  }
  func.func @transform_8(%arg0: i32) -> (i32, i32) {
    %c0_i32 = arith.constant 0 : i32
    %c0_i32_0 = arith.constant 0 : i32
    %c0_i32_1 = arith.constant 0 : i32
    return %c0_i32, %c0_i32_0 : i32, i32
  }
  func.func @transform_9(%arg0: i32) -> (i32, i32) {
    %c0_i32 = arith.constant 0 : i32
    %c0_i32_0 = arith.constant 0 : i32
    %c0_i32_1 = arith.constant 0 : i32
    return %c0_i32, %c0_i32_0 : i32, i32
  }
  func.func @transform_10(%arg0: i32) -> (i32, i32) {
    %c0_i32 = arith.constant 0 : i32
    %c0_i32_0 = arith.constant 0 : i32
    %c0_i32_1 = arith.constant 0 : i32
    return %c0_i32, %c0_i32_0 : i32, i32
  }
  func.func @transform_11(%arg0: i32) -> (i32, i32, i32) {
    %c0_i32 = arith.constant 0 : i32
    %c0_i32_0 = arith.constant 0 : i32
    %c0_i32_1 = arith.constant 0 : i32
    return %arg0, %c0_i32, %c0_i32_0 : i32, i32, i32
  }
}

</mosaic_0001>

<bundles_post_ra>
// kernel: classifier_forward.1
= control target key start
LH: loop header
LB: loop body
LE: loop exit
PB: predicated region body
PF: predicated region fallthrough
CT: control target
= control target key end

     0   :  { %s12538_s17 = smov 0   ;;  %s16898_s0 = inlined_call_operand.vmem [shape: f32[1024,1], index: 0, kind: input, shape index: {}]   ;;  %s16899_s1 = inlined_call_operand.vmem [shape: f32[5,32], index: 1, kind: input, shape index: {}]   ;;  %s16900_s2 = inlined_call_operand.vmem [shape: f32[1,32], index: 2, kind: input, shape index: {}]   ;;  %s16901_s3 = inlined_call_operand.vmem [shape: f32[5,32,128], index: 3, kind: input, shape index: {}]   ;;  %s16902_s4 = inlined_call_operand.vmem [shape: f32[1,128], index: 4, kind: input, shape index: {}]   ;;  %s16903_s5 = inlined_call_operand.vmem [shape: f32[5,128,64], index: 5, kind: input, shape index: {}]   ;;  %s16904_s6 = inlined_call_operand.vmem [shape: f32[1,64], index: 6, kind: input, shape index: {}]   ;;  %s16905_s7 = inlined_call_operand.vmem [shape: f32[5,64,64], index: 7, kind: input, shape index: {}]   ;;  %s16906_s8 = inlined_call_operand.vmem [shape: f32[1,64], index: 8, kind: input, shape index: {}]   ;;  %s16907_s9 = inlined_call_operand.vmem [shape: f32[64,4], index: 9, kind: input, shape index: {}]   ;;  %s16908_s10 = inlined_call_operand.vmem [shape: f32[1,4], index: 10, kind: input, shape index: {}]   ;;  %s16909_s11 = inlined_call_operand.vmem [shape: f32[8,1,4], index: 11, kind: output, shape index: {}]  }
   0x1 LB: > { %s9703_s18 = sadd.s32 4294967295, %s12473_s17   ;;  %p9707_p0 = scmp.ge.s32.totalorder %s12473_s17, 1  ;;  %s12473_s17 = sphi %s12538_s17, %s21_s17  }
   0x2   : > { %p338_p1 = scmp.lt.s32.totalorder %s12473_s17, 3 }
   0x4   : > { %p339_p2 = pnand %p9707_p0, %p338_p1 }
   0x6   : > { %342 = sbr.rel (%p339_p2) target bundleno = 3523 (0xdc3), region = 64 }
   0xb   : > { %s9708_s19 = sshll.u32 %s9703_s18, 6  ;;  %v12475_v0 = vmov 0   ;;  %vm1124_vm0 = vcmask 261120   ;;  %vm1140_vm15 = vcmask 257024   ;;  %s9710_s14 = sshll.u32 %s9703_s18, 2 }
   0xc   : > { %12464 = vset.pattern.permute.xlu1 %v12475_v0  ;;  %12463 = vset.pattern.permute.xlu0 %v12475_v0  ;;  %p378_p3 = scmp.lt.s32.totalorder %s9708_s19, 127  ;;  %p384_p4 = scmp.lt.s32.totalorder %s9710_s14, 7 }
   0xe   : > { %s16952_s19 = smov (!%p378_p3, %s9708_s19), 127  ;;  %s16954_s14 = smov (!%p384_p4, %s9710_s14), 7 }
   0xf   : > { %s9709_s20 = sshll.u32 %s16952_s19, 3  ;;  %s15162_s21 = scalar_lea.vmem %s16909_s11, %s16954_s14 }
  0x10   : > { %s12551_s23 = scalar_lea.vmem %s16898_s0, %s9709_s20 }
  0x11   : > { %v390_v1 = vld [vmem:[%s12551_s23 + $0x10] sm:$0xff]  ;;  %v388_v2 = vld [vmem:[%s12551_s23] sm:$0xff]  ;;  %v391_v3 = vld [vmem:[%s12551_s23 + $0x18] sm:$0xff] }
  0x12   : > { %417 = vperm.xlu1 %12464, %v390_v1   ;;  %407 = vperm.xlu0 %12463, %v388_v2   ;;  %v389_v4 = vld [vmem:[%s12551_s23 + $0x8] sm:$0xff]  ;;  %v524_v7 = vld [vmem:[%s12551_s23 + $0x19] sm:$0xff]  ;;  %v523_v8 = vld [vmem:[%s12551_s23 + $0x11] sm:$0xff] }
  0x13   : > { %v522_v5 = vld [vmem:[%s12551_s23 + $0x9] sm:$0xff]  ;;  %v521_v6 = vld [vmem:[%s12551_s23 + $0x1] sm:$0xff]  ;;  %v395_v11 = vld [vmem:[%s12551_s23 + $0x38] sm:$0xff] }
  0x14   : > { %v393_v9 = vld [vmem:[%s12551_s23 + $0x28] sm:$0xff]  ;;  %v392_v10 = vld [vmem:[%s12551_s23 + $0x20] sm:$0xff]  ;;  %v394_v12 = vld [vmem:[%s12551_s23 + $0x30] sm:$0xff] }
  0x15   : > { %v526_v13 = vld [vmem:[%s12551_s23 + $0x29] sm:$0xff]  ;;  %v525_v14 = vld [vmem:[%s12551_s23 + $0x21] sm:$0xff]  ;;  %v528_v15 = vld [vmem:[%s12551_s23 + $0x39] sm:$0xff] }
  0x16   : > { %422 = vperm.xlu1 %12464, %v391_v3   ;;  %412 = vperm.xlu0 %12463, %v389_v4   ;;  %v527_v16 = vld [vmem:[%s12551_s23 + $0x31] sm:$0xff]  ;;  %v654_v18 = vld [vmem:[%s12551_s23 + $0x2] sm:$0xff]  ;;  %v657_v19 = vld [vmem:[%s12551_s23 + $0x1a] sm:$0xff] }
  0x17   : > { %v655_v17 = vld [vmem:[%s12551_s23 + $0xa] sm:$0xff]  ;;  %v656_v20 = vld [vmem:[%s12551_s23 + $0x12] sm:$0xff]  ;;  %v658_v22 = vld [vmem:[%s12551_s23 + $0x22] sm:$0xff] }
  0x18   : > { %v659_v21 = vld [vmem:[%s12551_s23 + $0x2a] sm:$0xff]  ;;  %v661_v23 = vld [vmem:[%s12551_s23 + $0x3a] sm:$0xff]  ;;  %v660_v24 = vld [vmem:[%s12551_s23 + $0x32] sm:$0xff] }
  0x19   : > { %v397_v25 = vld [vmem:[%s12551_s23 + $0x48] sm:$0xff]  ;;  %v396_v26 = vld [vmem:[%s12551_s23 + $0x40] sm:$0xff]  ;;  %v399_v27 = vld [vmem:[%s12551_s23 + $0x58] sm:$0xff] }
  0x1a   : > { %545 = vperm.xlu1 %12464, %v522_v5   ;;  %540 = vperm.xlu0 %12463, %v521_v6   ;;  %v398_v28 = vld [vmem:[%s12551_s23 + $0x50] sm:$0xff]  ;;  %v529_v30 = vld [vmem:[%s12551_s23 + $0x41] sm:$0xff]  ;;  %v532_v31 = vld [vmem:[%s12551_s23 + $0x59] sm:$0xff] }
  0x1b   : > { %v530_v29 = vld [vmem:[%s12551_s23 + $0x49] sm:$0xff]  ;;  %v531_v32 = vld [vmem:[%s12551_s23 + $0x51] sm:$0xff]  ;;  %v790_v35 = vld [vmem:[%s12551_s23 + $0x1b] sm:$0xff] }
  0x1c   : > { %v788_v33 = vld [vmem:[%s12551_s23 + $0xb] sm:$0xff]  ;;  %v787_v34 = vld [vmem:[%s12551_s23 + $0x3] sm:$0xff]  ;;  %v789_v36 = vld [vmem:[%s12551_s23 + $0x13] sm:$0xff] }
  0x1d   : > { %v401_v37 = vld [vmem:[%s12551_s23 + $0x68] sm:$0xff]  ;;  %v400_v38 = vld [vmem:[%s12551_s23 + $0x60] sm:$0xff]  ;;  %v403_v39 = vld [vmem:[%s12551_s23 + $0x78] sm:$0xf] }
  0x1e   : > { %555 = vperm.xlu1 %12464, %v524_v7   ;;  %550 = vperm.xlu0 %12463, %v523_v8   ;;  %v402_v40 = vld [vmem:[%s12551_s23 + $0x70] sm:$0xff]  ;;  %v533_v42 = vld [vmem:[%s12551_s23 + $0x61] sm:$0xff]  ;;  %v536_v43 = vld [vmem:[%s12551_s23 + $0x79] sm:$0xf] }
  0x1f   : > { %v534_v41 = vld [vmem:[%s12551_s23 + $0x69] sm:$0xff]  ;;  %v535_v44 = vld [vmem:[%s12551_s23 + $0x71] sm:$0xff]  ;;  %v794_v47 = vld [vmem:[%s12551_s23 + $0x3b] sm:$0xff] }
  0x20   : > { %v792_v45 = vld [vmem:[%s12551_s23 + $0x2b] sm:$0xff]  ;;  %v791_v46 = vld [vmem:[%s12551_s23 + $0x23] sm:$0xff]  ;;  %v793_v48 = vld [vmem:[%s12551_s23 + $0x33] sm:$0xff] }
  0x21   : > { %v663_v49 = vld [vmem:[%s12551_s23 + $0x4a] sm:$0xff]  ;;  %v662_v50 = vld [vmem:[%s12551_s23 + $0x42] sm:$0xff]  ;;  %v665_v51 = vld [vmem:[%s12551_s23 + $0x5a] sm:$0xff] }
  0x22   : > { %432 = vperm.xlu1 %12464, %v393_v9   ;;  %427 = vperm.xlu0 %12463, %v392_v10   ;;  %v664_v52 = vld [vmem:[%s12551_s23 + $0x52] sm:$0xff]  ;;  %v920_v54 = vld [vmem:[%s12551_s23 + $0x4] sm:$0xff]  ;;  %v923_v55 = vld [vmem:[%s12551_s23 + $0x1c] sm:$0xff] }
  0x23   : > { %v921_v53 = vld [vmem:[%s12551_s23 + $0xc] sm:$0xff]  ;;  %v922_v56 = vld [vmem:[%s12551_s23 + $0x14] sm:$0xff]  ;;  %v666_v58 = vld [vmem:[%s12551_s23 + $0x62] sm:$0xff] }
  0x24   : > { %v667_v57 = vld [vmem:[%s12551_s23 + $0x6a] sm:$0xff]  ;;  %v669_v59 = vld [vmem:[%s12551_s23 + $0x7a] sm:$0xf]  ;;  %v668_v60 = vld [vmem:[%s12551_s23 + $0x72] sm:$0xff] }
  0x25   : > { %v925_v61 = vld [vmem:[%s12551_s23 + $0x2c] sm:$0xff]  ;;  %v924_v62 = vld [vmem:[%s12551_s23 + $0x24] sm:$0xff]  ;;  %v927_v63 = vld [vmem:[%s12551_s23 + $0x3c] sm:$0xff] }
  0x26   : > { %442 = vperm.xlu1 %12464, %v395_v11   ;;  %437 = vperm.xlu0 %12463, %v394_v12   ;;  %v926_v0 = vld [vmem:[%s12551_s23 + $0x34] sm:$0xff]  ;;  %v796_v3 = vld [vmem:[%s12551_s23 + $0x4b] sm:$0xff]  ;;  %v795_v4 = vld [vmem:[%s12551_s23 + $0x43] sm:$0xff] }
  0x27   : > { %v798_v7 = vld [vmem:[%s12551_s23 + $0x5b] sm:$0xff]  ;;  %v797_v8 = vld [vmem:[%s12551_s23 + $0x53] sm:$0xff]  ;;  %v800_v11 = vld [vmem:[%s12551_s23 + $0x6b] sm:$0xff] }
  0x28   : > { %v799_v12 = vld [vmem:[%s12551_s23 + $0x63] sm:$0xff] }
  0x2a   : > { %565 = vperm.xlu1 %12464, %v526_v13   ;;  %560 = vperm.xlu0 %12463, %v525_v14  }
  0x2e   : > { %575 = vperm.xlu1 %12464, %v528_v15   ;;  %570 = vperm.xlu0 %12463, %v527_v16   ;;  %v802_v15 = vld [vmem:[%s12551_s23 + $0x7b] sm:$0xf]  ;;  %v801_v16 = vld [vmem:[%s12551_s23 + $0x73] sm:$0xff] }
  0x32   : > { %678 = vperm.xlu1 %12464, %v655_v17   ;;  %673 = vperm.xlu0 %12463, %v654_v18   ;;  %v9720_v17 = vld [vmem:[%s16901_s3 + $0x38] sm:$0xff] }
  0x33   : > { %11016 = vmatprep.subr.mxu0 %v9720_v17 }
  0x34   : > { %11017 = vmatpush3.msra.mxu0 %v9720_v17  ;;  %v2887_v17 = vld [vmem:[%s12551_s23 + $0xb9] sm:$0xff] }
  0x36   : > { %688 = vperm.xlu1 %12464, %v657_v19   ;;  %683 = vperm.xlu0 %12463, %v656_v20   ;;  %v1200_v20 = vld [vmem:[%s16901_s3 + $0x18] sm:$0xff] }
  0x37   : > { %11030 = vmatprep.subr.mxu1 %v1200_v20 }
  0x38   : > { %11031 = vmatpush3.msra.mxu1 %v1200_v20  ;;  %v2886_v20 = vld [vmem:[%s12551_s23 + $0xb1] sm:$0xff] }
  0x3a   : > { %698 = vperm.xlu1 %12464, %v659_v21   ;;  %693 = vperm.xlu0 %12463, %v658_v22   ;;  %v929_v21 = vld [vmem:[%s12551_s23 + $0x4c] sm:$0xff]  ;;  %v928_v22 = vld [vmem:[%s12551_s23 + $0x44] sm:$0xff] }
  0x3e   : > { %708 = vperm.xlu1 %12464, %v661_v23   ;;  %703 = vperm.xlu0 %12463, %v660_v24  }
  0x42   : > { %452 = vperm.xlu1 %12464, %v397_v25   ;;  %447 = vperm.xlu0 %12463, %v396_v26   ;;  %v9719_v25 = vld [vmem:[%s16901_s3 + $0x30] sm:$0xff] }
  0x43   : > { %v1199_v26 = vld [vmem:[%s16901_s3 + $0x10] sm:$0xff]  ;;  %11018 = vmatprep.subr.mxu0 %v9719_v25 }
  0x44   : > { %11032 = vmatprep.subr.mxu1 %v1199_v26  ;;  %11019 = vmatpush3.msra.mxu0 %v9719_v25  ;;  %v3014_v25 = vld [vmem:[%s12551_s23 + $0x8a] sm:$0xff] }
  0x45   : > { %11033 = vmatpush3.msra.mxu1 %v1199_v26  ;;  %v3013_v26 = vld [vmem:[%s12551_s23 + $0x82] sm:$0xff] }
  0x46   : > { %462 = vperm.xlu1 %12464, %v399_v27   ;;  %457 = vperm.xlu0 %12463, %v398_v28   ;;  %v931_v27 = vld [vmem:[%s12551_s23 + $0x5c] sm:$0xff]  ;;  %v930_v28 = vld [vmem:[%s12551_s23 + $0x54] sm:$0xff] }
  0x4a   : > { %585 = vperm.xlu1 %12464, %v530_v29   ;;  %580 = vperm.xlu0 %12463, %v529_v30   ;;  %v9718_v29 = vld [vmem:[%s16901_s3 + $0x28] sm:$0xff] }
  0x4b   : > { %v1198_v30 = vld [vmem:[%s16901_s3 + $0x8] sm:$0xff]  ;;  %11020 = vmatprep.subr.mxu0 %v9718_v29 }
  0x4c   : > { %11034 = vmatprep.subr.mxu1 %v1198_v30  ;;  %11021 = vmatpush3.msra.mxu0 %v9718_v29  ;;  %v3016_v29 = vld [vmem:[%s12551_s23 + $0x9a] sm:$0xff] }
  0x4d   : > { %11035 = vmatpush3.msra.mxu1 %v1198_v30  ;;  %v3015_v30 = vld [vmem:[%s12551_s23 + $0x92] sm:$0xff] }
  0x4e   : > { %595 = vperm.xlu1 %12464, %v532_v31   ;;  %590 = vperm.xlu0 %12463, %v531_v32  }
  0x52   : > { %811 = vperm.xlu1 %12464, %v788_v33   ;;  %806 = vperm.xlu0 %12463, %v787_v34   ;;  %v9717_v33 = vld [vmem:[%s16901_s3 + $0x20] sm:$0xff] }
  0x53   : > { %v1197_v34 = vld [vmem:[%s16901_s3] sm:$0xff]  ;;  %11022 = vmatprep.subr.mxu0 %v9717_v33 }
  0x54   : > { %11036 = vmatprep.subr.mxu1 %v1197_v34  ;;  %11023 = vmatpush3.msra.mxu0 %v9717_v33 }
  0x55   : > { %11037 = vmatpush3.msra.mxu1 %v1197_v34 }
  0x56   : > { %821 = vperm.xlu1 %12464, %v790_v35   ;;  %816 = vperm.xlu0 %12463, %v789_v36   ;;  %v933_v35 = vld [vmem:[%s12551_s23 + $0x6c] sm:$0xff]  ;;  %v932_v36 = vld [vmem:[%s12551_s23 + $0x64] sm:$0xff] }
  0x5a   : > { %472 = vperm.xlu1 %12464, %v401_v37   ;;  %467 = vperm.xlu0 %12463, %v400_v38  }
  0x5e   : > { %482 = vperm.xlu1 %12464, %v403_v39   ;;  %477 = vperm.xlu0 %12463, %v402_v40   ;;  %v935_v39 = vld [vmem:[%s12551_s23 + $0x7c] sm:$0xf]  ;;  %v934_v40 = vld [vmem:[%s12551_s23 + $0x74] sm:$0xff] }
  0x62   : > { %605 = vperm.xlu1 %12464, %v534_v41   ;;  %600 = vperm.xlu0 %12463, %v533_v42  }
  0x66   : > { %615 = vperm.xlu1 %12464, %v536_v43   ;;  %610 = vperm.xlu0 %12463, %v535_v44   ;;  %v2748_v43 = vld [vmem:[%s12551_s23 + $0x88] sm:$0xff]  ;;  %v2747_v44 = vld [vmem:[%s12551_s23 + $0x80] sm:$0xff] }
  0x6a   : > { %831 = vperm.xlu1 %12464, %v792_v45   ;;  %826 = vperm.xlu0 %12463, %v791_v46  }
  0x6e   : > { %841 = vperm.xlu1 %12464, %v794_v47   ;;  %836 = vperm.xlu0 %12463, %v793_v48   ;;  %v2750_v47 = vld [vmem:[%s12551_s23 + $0x98] sm:$0xff]  ;;  %v2749_v48 = vld [vmem:[%s12551_s23 + $0x90] sm:$0xff] }
  0x72   : > { %718 = vperm.xlu1 %12464, %v663_v49   ;;  %713 = vperm.xlu0 %12463, %v662_v50  }
  0x76   : > { %728 = vperm.xlu1 %12464, %v665_v51   ;;  %723 = vperm.xlu0 %12463, %v664_v52   ;;  %v2881_v51 = vld [vmem:[%s12551_s23 + $0x89] sm:$0xff]  ;;  %v2880_v52 = vld [vmem:[%s12551_s23 + $0x81] sm:$0xff] }
  0x7a   : > { %944 = vperm.xlu1 %12464, %v921_v53   ;;  %939 = vperm.xlu0 %12463, %v920_v54  }
  0x7e   : > { %954 = vperm.xlu1 %12464, %v923_v55   ;;  %949 = vperm.xlu0 %12463, %v922_v56   ;;  %v2883_v55 = vld [vmem:[%s12551_s23 + $0x99] sm:$0xff]  ;;  %v2882_v56 = vld [vmem:[%s12551_s23 + $0x91] sm:$0xff] }
  0x82   : > { %738 = vperm.xlu1 %12464, %v667_v57   ;;  %733 = vperm.xlu0 %12463, %v666_v58  }
  0x86   : > { %748 = vperm.xlu1 %12464, %v669_v59   ;;  %743 = vperm.xlu0 %12463, %v668_v60   ;;  %v2752_v59 = vld [vmem:[%s12551_s23 + $0xa8] sm:$0xff]  ;;  %v2751_v60 = vld [vmem:[%s12551_s23 + $0xa0] sm:$0xff] }
  0x8a   : > { %964 = vperm.xlu1 %12464, %v925_v61   ;;  %959 = vperm.xlu0 %12463, %v924_v62   ;;  %v12722_v61 = vld [vmem:[%s16901_s3 + $0x58] sm:$0xff] }
  0x8b   : > { %16914 = vst [vmem:[#allocation6_spill] sm:$0xff] %v12722_v61  ;;  %v12727_v62 = vld [vmem:[%s16901_s3 + $0x78] sm:$0xff]  ;;  %11044 = vmatprep.subr.mxu0 %v12722_v61 }
  0x8c   : > { %16915 = vst [vmem:[#allocation7_spill] sm:$0xff] %v12727_v62  ;;  %11058 = vmatprep.subr.mxu1 %v12727_v62 }
  0x8d   : > { %v12617_v1 = vpop.permute.xlu1 %417  ;;  %v12619_v2 = vpop.permute.xlu0 %407 }
  0x8e   : > { %974 = vperm.xlu1 %12464, %v927_v63   ;;  %969 = vperm.xlu0 %12463, %v926_v0  }
  0x91   : > { %v12623_v5 = vpop.permute.xlu1 %422  ;;  %v12625_v6 = vpop.permute.xlu0 %412 }
  0x92   : > { %851 = vperm.xlu1 %12464, %v796_v3   ;;  %846 = vperm.xlu0 %12463, %v795_v4   ;;  %v2754_v3 = vld [vmem:[%s12551_s23 + $0xb8] sm:$0xff]  ;;  %v2753_v4 = vld [vmem:[%s12551_s23 + $0xb0] sm:$0xff] }
  0x95   : > { %v12629_v9 = vpop.permute.xlu1 %545  ;;  %v12631_v10 = vpop.permute.xlu0 %540 }
  0x96   : > { %861 = vperm.xlu1 %12464, %v798_v7   ;;  %856 = vperm.xlu0 %12463, %v797_v8  }
  0x99   : > { %v12635_v13 = vpop.permute.xlu1 %555  ;;  %v12637_v14 = vpop.permute.xlu0 %550 }
  0x9a   : > { %871 = vperm.xlu1 %12464, %v800_v11   ;;  %866 = vperm.xlu0 %12463, %v799_v12   ;;  %v2885_v11 = vld [vmem:[%s12551_s23 + $0xa9] sm:$0xff]  ;;  %v2884_v12 = vld [vmem:[%s12551_s23 + $0xa1] sm:$0xff] }
  0x9d   : > { %v12644_v18 = vpop.permute.xlu1 %432  ;;  %v12646_v19 = vpop.permute.xlu0 %427 }
  0x9e   : > { %881 = vperm.xlu1 %12464, %v802_v15   ;;  %876 = vperm.xlu0 %12463, %v801_v16  }
  0xa1   : > { %v12653_v23 = vpop.permute.xlu1 %442  ;;  %v12655_v24 = vpop.permute.xlu0 %437 }
  0xa2   : > { %984 = vperm.xlu1 %12464, %v929_v21   ;;  %979 = vperm.xlu0 %12463, %v928_v22  }
  0xa5   : > { %v12671_v31 = vpop.permute.xlu1 %565  ;;  %v12673_v32 = vpop.permute.xlu0 %560 }
  0xa6   : > { %994 = vperm.xlu1 %12464, %v931_v27   ;;  %989 = vperm.xlu0 %12463, %v930_v28  }
  0xa9   : > { %v12683_v37 = vpop.permute.xlu1 %575  ;;  %v12685_v38 = vpop.permute.xlu0 %570 }
  0xaa   : > { %1004 = vperm.xlu1 %12464, %v933_v35   ;;  %999 = vperm.xlu0 %12463, %v932_v36   ;;  %v3018_v35 = vld [vmem:[%s12551_s23 + $0xaa] sm:$0xff]  ;;  %v3017_v36 = vld [vmem:[%s12551_s23 + $0xa2] sm:$0xff] }
  0xad   : > { %v12689_v41 = vpop.permute.xlu1 %678  ;;  %v12691_v42 = vpop.permute.xlu0 %673 }
  0xae   : > { %1014 = vperm.xlu1 %12464, %v935_v39   ;;  %1009 = vperm.xlu0 %12463, %v934_v40  }
  0xb1   : > { %v12695_v45 = vpop.permute.xlu1 %688  ;;  %v12697_v46 = vpop.permute.xlu0 %683 }
  0xb2   : > { %2771 = vperm.xlu1 %12464, %v2748_v43   ;;  %2766 = vperm.xlu0 %12463, %v2747_v44   ;;  %v3020_v43 = vld [vmem:[%s12551_s23 + $0xba] sm:$0xff]  ;;  %v3019_v44 = vld [vmem:[%s12551_s23 + $0xb2] sm:$0xff] }
  0xb5   : > { %v12701_v49 = vpop.permute.xlu1 %698  ;;  %v12703_v50 = vpop.permute.xlu0 %693 }
  0xb6   : > { %2781 = vperm.xlu1 %12464, %v2750_v47   ;;  %2776 = vperm.xlu0 %12463, %v2749_v48  }
  0xb9   : > { %v12707_v53 = vpop.permute.xlu1 %708  ;;  %v12709_v54 = vpop.permute.xlu0 %703 }
  0xba   : > { %2904 = vperm.xlu1 %12464, %v2881_v51   ;;  %2899 = vperm.xlu0 %12463, %v2880_v52   ;;  %v2756_v51 = vld [vmem:[%s12551_s23 + $0xc8] sm:$0xff]  ;;  %v2755_v52 = vld [vmem:[%s12551_s23 + $0xc0] sm:$0xff] }
  0xbd   : > { %v12713_v57 = vpop.permute.xlu1 %452  ;;  %v12715_v58 = vpop.permute.xlu0 %447 }
  0xbe   : > { %2914 = vperm.xlu1 %12464, %v2883_v55   ;;  %2909 = vperm.xlu0 %12463, %v2882_v56  }
  0xc1   : > { %v12731_v63 = vpop.permute.xlu1 %462  ;;  %v12733_v0 = vpop.permute.xlu0 %457 }
  0xc2   : > { %2791 = vperm.xlu1 %12464, %v2752_v59   ;;  %2786 = vperm.xlu0 %12463, %v2751_v60   ;;  %v2758_v59 = vld [vmem:[%s12551_s23 + $0xd8] sm:$0xff]  ;;  %v2757_v60 = vld [vmem:[%s12551_s23 + $0xd0] sm:$0xff] }
  0xc5   : > { %v12737_v7 = vpop.permute.xlu1 %585  ;;  %v12739_v8 = vpop.permute.xlu0 %580 }
  0xc6   : > { %2801 = vperm.xlu1 %12464, %v2754_v3   ;;  %2796 = vperm.xlu0 %12463, %v2753_v4  }
  0xc9   : > { %v12743_v15 = vpop.permute.xlu1 %595  ;;  %v12745_v16 = vpop.permute.xlu0 %590 }
  0xca   : > { %2924 = vperm.xlu1 %12464, %v2885_v11   ;;  %2919 = vperm.xlu0 %12463, %v2884_v12   ;;  %v2889_v11 = vld [vmem:[%s12551_s23 + $0xc9] sm:$0xff]  ;;  %v2888_v12 = vld [vmem:[%s12551_s23 + $0xc1] sm:$0xff] }
  0xcd   : > { %v12749_v21 = vpop.permute.xlu1 %811  ;;  %v12751_v22 = vpop.permute.xlu0 %806 }
  0xce   : > { %2934 = vperm.xlu1 %12464, %v2887_v17   ;;  %2929 = vperm.xlu0 %12463, %v2886_v20  }
  0xd1   : > { %v12755_v27 = vpop.permute.xlu1 %821  ;;  %v12757_v28 = vpop.permute.xlu0 %816 }
  0xd2   : > { %3037 = vperm.xlu1 %12464, %v3014_v25   ;;  %3032 = vperm.xlu0 %12463, %v3013_v26   ;;  %v12798_v25 = vld [vmem:[%s16899_s1 + $0x1] ss:$0 sm:$0xff]  ;;  %v2891_v26 = vld [vmem:[%s12551_s23 + $0xd9] sm:$0xff] }
  0xd5   : > { %v12761_v33 = vpop.permute.xlu1 %472  ;;  %v12763_v34 = vpop.permute.xlu0 %467 }
  0xd6   : > { %3047 = vperm.xlu1 %12464, %v3016_v29   ;;  %3042 = vperm.xlu0 %12463, %v3015_v30   ;;  %v2890_v29 = vld [vmem:[%s12551_s23 + $0xd1] sm:$0xff]  ;;  %v12805_v30 = vld [vmem:[%s16899_s1 + $0x2] ss:$0 sm:$0xff] }
  0xd9   : > { %v12767_v39 = vpop.permute.xlu1 %482  ;;  %v12769_v40 = vpop.permute.xlu0 %477 }
  0xda   : > { %3057 = vperm.xlu1 %12464, %v3018_v35   ;;  %3052 = vperm.xlu0 %12463, %v3017_v36   ;;  %v12810_v35 = vld [vmem:[%s16899_s1] ss:$0 sm:$0xff]  ;;  %v623_v36 = vmul.f32 %v12798_v25, %v12629_v9  ;;  %v756_v9 = vmul.f32 %v12805_v30, %v12689_v41 }
  0xdd   : > { %v12773_v47 = vpop.permute.xlu1 %605  ;;  %v12775_v48 = vpop.permute.xlu0 %600 }
  0xde   : > { %3067 = vperm.xlu1 %12464, %v3020_v43   ;;  %3062 = vperm.xlu0 %12463, %v3019_v44  }
  0xe1   : > { %v12779_v55 = vpop.permute.xlu1 %615  ;;  %v12781_v56 = vpop.permute.xlu0 %610 }
  0xe2   : > { %2811 = vperm.xlu1 %12464, %v2756_v51   ;;  %2806 = vperm.xlu0 %12463, %v2755_v52   ;;  %v622_v51 = vmul.f32 %v12798_v25, %v12631_v10  ;;  %v12823_v52 = vld [vmem:[%s16899_s1 + $0x3] ss:$0 sm:$0xff]  ;;  %v489_v10 = vmul.f32 %v12810_v35, %v12619_v2  ;;  %v625_v2 = vmul.f32 %v12798_v25, %v12635_v13 }
  0xe3   : > { %v888_v41 = vmul.f32 %v12823_v52, %v12751_v22  ;;  %v758_v13 = vmul.f32 %v12805_v30, %v12695_v45  ;;  %v890_v45 = vmul.f32 %v12823_v52, %v12757_v28 }
  0xe4   : > { %v638_v61 = vadd.f32 %v622_v51, %v489_v10  ;;  %v491_v51 = vmul.f32 %v12810_v35, %v12617_v1 }
  0xe5   : > { %v12785_v3 = vpop.permute.xlu1 %831  ;;  %v12787_v4 = vpop.permute.xlu0 %826 }
  0xe6   : > { %2821 = vperm.xlu1 %12464, %v2758_v59   ;;  %2816 = vperm.xlu0 %12463, %v2757_v60   ;;  %v490_v59 = vmul.f32 %v12810_v35, %v12625_v6  ;;  %v3147_v60 = vld [vmem:[%s12551_s23 + $0x8b] sm:$0xff] }
  0xe8   : > { %v639_v62 = vadd.f32 %v623_v36, %v490_v59  ;;  %v3149_v59 = vld [vmem:[%s12551_s23 + $0x9b] sm:$0xff] }
  0xe9   : > { %v12791_v17 = vpop.permute.xlu1 %841  ;;  %v12793_v20 = vpop.permute.xlu0 %836 }
  0xea   : > { %2944 = vperm.xlu1 %12464, %v2889_v11   ;;  %2939 = vperm.xlu0 %12463, %v2888_v12   ;;  %v3146_v11 = vld [vmem:[%s12551_s23 + $0x83] sm:$0xff]  ;;  %v755_v12 = vmul.f32 %v12805_v30, %v12691_v42  ;;  %v624_v42 = vmul.f32 %v12798_v25, %v12637_v14  ;;  %v772_v36 = vadd.f32 %v756_v9, %v639_v62 }
  0xeb   : > { %v757_v14 = vmul.f32 %v12805_v30, %v12697_v46  ;;  %v12871_v46 = vld [vmem:[%s16900_s2] ss:$0 sm:$0xff] }
  0xec   : > { %v771_v22 = vadd.f32 %v755_v12, %v638_v61  ;;  %v891_v12 = vmul.f32 %v12823_v52, %v12755_v27 }
  0xed   : > { %v12814_v43 = vpop.permute.xlu1 %718  ;;  %v12816_v44 = vpop.permute.xlu0 %713 }
  0xee   : > { %2954 = vperm.xlu1 %12464, %v2891_v26   ;;  %2949 = vperm.xlu0 %12463, %v2890_v29   ;;  %v889_v26 = vmul.f32 %v12823_v52, %v12749_v21  ;;  %v12850_v21 = vld [vmem:[%s16899_s1 + $0x4] ss:$0 sm:$0xff]  ;;  %v904_v10 = vadd.f32 %v888_v41, %v771_v22 }
  0xf0   : > { %v905_v62 = vadd.f32 %v889_v26, %v772_v36  ;;  %v2760_v26 = vld [vmem:[%s12551_s23 + $0xe8] sm:$0xff] }
  0xf1   : > { %v12837_v29 = vpop.permute.xlu1 %728  ;;  %v12839_v6 = vpop.permute.xlu0 %723 }
  0xf2   : > { %16916 = vst [vmem:[#allocation8_spill] sm:$0xff] %v12837_v29  ;;  %16917 = vst [vmem:[#allocation9_spill] sm:$0xff] %v12839_v6  ;;  %3170 = vperm.xlu1 %12464, %v3147_v60   ;;  %3165 = vperm.xlu0 %12463, %v3146_v11   ;;  %v3148_v6 = vld [vmem:[%s12551_s23 + $0x93] sm:$0xff]  ;;  %v492_v60 = vmul.f32 %v12810_v35, %v12623_v5  ;;  %v640_v5 = vadd.f32 %v624_v42, %v491_v51 }
  0xf4   : > { %v641_v61 = vadd.f32 %v625_v2, %v492_v60  ;;  %v773_v2 = vadd.f32 %v757_v14, %v640_v5 }
  0xf5   : > { %v945_v9 = vpop.permute.xlu1 %944  ;;  %v940_v11 = vpop.permute.xlu0 %939 }
  0xf6   : > { %v1022_v29 = vmul.f32 %v12850_v21, %v945_v9  ;;  %v1021_v1 = vmul.f32 %v12850_v21, %v940_v11  ;;  %3180 = vperm.xlu1 %12464, %v3149_v59   ;;  %3175 = vperm.xlu0 %12463, %v3148_v6   ;;  %v2759_v59 = vld [vmem:[%s12551_s23 + $0xe0] sm:$0xff]  ;;  %v774_v6 = vadd.f32 %v758_v13, %v641_v61 }
  0xf7   : > { %v906_v11 = vadd.f32 %v890_v45, %v773_v2  ;;  %v493_v2 = vmul.f32 %v12810_v35, %v12646_v19 }
  0xf8   : > { %v1038_v41 = vadd.f32 %v1022_v29, %v905_v62  ;;  %v1037_v36 = vadd.f32 %v1021_v1, %v904_v10  ;;  %v907_v9 = vadd.f32 %v891_v12, %v774_v6  ;;  %v2762_v29 = vld [vmem:[%s12551_s23 + $0xf8] sm:$0xf]  ;;  %v2761_v62 = vld [vmem:[%s12551_s23 + $0xf0] sm:$0xff]  ;;  %v626_v12 = vmul.f32 %v12798_v25, %v12673_v32 }
  0xf9   : > { %v955_v42 = vpop.permute.xlu1 %954  ;;  %v950_v51 = vpop.permute.xlu0 %949  ;;  %v629_v32 = vmul.f32 %v12798_v25, %v12683_v37  ;;  %v893_v37 = vmul.f32 %v12823_v52, %v12785_v3  ;;  %v2894_v3 = vld [vmem:[%s12551_s23 + $0xf1] sm:$0xff] }
  0xfa   : > { %v1061_v27 = vadd.f32 %v12871_v46, %v1038_v41  ;;  %v1060_v22 = vadd.f32 %v12871_v46, %v1037_v36  ;;  %v1024_v28 = vmul.f32 %v12850_v21, %v955_v42  ;;  %v1023_v60 = vmul.f32 %v12850_v21, %v950_v51  ;;  %2831 = vperm.xlu1 %12464, %v2760_v26   ;;  %v2892_v51 = vld [vmem:[%s12551_s23 + $0xe1] sm:$0xff] }
  0xfb   : > { %2826 = vperm.xlu0 %12463, %v2759_v59   ;;  %v627_v26 = vmul.f32 %v12798_v25, %v12671_v31  ;;  %v494_v36 = vmul.f32 %v12810_v35, %v12644_v18  ;;  %v2893_v31 = vld [vmem:[%s12551_s23 + $0xe9] sm:$0xff]  ;;  %v760_v42 = vmul.f32 %v12805_v30, %v12701_v49  ;;  %v759_v18 = vmul.f32 %v12805_v30, %v12703_v50 }
  0xfc   : > { %vm1077_vm1 = vcmp.ge.f32.partialorder %v1061_v27, 0.0  ;;  %v1093_v13 = vmul.f32 0.02, %v1061_v27  ;;  %vm1076_vm2 = vcmp.ge.f32.partialorder %v1060_v22, 0.0  ;;  %v1092_v14 = vmul.f32 0.02, %v1060_v22 }
  0xfd   : > { %v1040_v10 = vadd.f32 %v1024_v28, %v907_v9  ;;  %v1039_v1 = vadd.f32 %v1023_v60, %v906_v11  ;;  %v12881_v61 = vpop.permute.xlu1 %738  ;;  %v12883_v5 = vpop.permute.xlu0 %733  ;;  %v643_v19 = vadd.f32 %v627_v26, %v494_v36  ;;  %v642_v9 = vadd.f32 %v626_v12, %v493_v2 }
  0xfe   : > { %v1109_v45 = vsel %vm1077_vm1, %v1061_v27, %v1093_v13  ;;  %v1108_v41 = vsel %vm1076_vm2, %v1060_v22, %v1092_v14  ;;  %2841 = vperm.xlu1 %12464, %v2762_v29   ;;  %v892_v49 = vmul.f32 %v12823_v52, %v12787_v4  ;;  %v496_v50 = vmul.f32 %v12810_v35, %v12653_v23  ;;  %v2895_v13 = vld [vmem:[%s12551_s23 + $0xf9] sm:$0xf] }
  0xff   : > { %1126 = vst.msk [vmem:[#allocation2 + $0x8] sm:$0xff] %vm1124_vm0, %v1109_v45  ;;  %1125 = vst.msk [vmem:[#allocation2] sm:$0xff] %vm1124_vm0, %v1108_v41  ;;  %v1063_v59 = vadd.f32 %v12871_v46, %v1040_v10  ;;  %v1062_v6 = vadd.f32 %v12871_v46, %v1039_v1  ;;  %2836 = vperm.xlu0 %12463, %v2761_v62   ;;  %v628_v11 = vmul.f32 %v12798_v25, %v12685_v38 }
 0x100   : > { %v776_v14 = vadd.f32 %v760_v42, %v643_v19  ;;  %v775_v10 = vadd.f32 %v759_v18, %v642_v9  ;;  %v495_v4 = vmul.f32 %v12810_v35, %v12655_v24  ;;  %v645_v1 = vadd.f32 %v629_v32, %v496_v50  ;;  %v3153_v50 = vld [vmem:[%s12551_s23 + $0xbb] sm:$0xff] }
 0x101   : > { %vm1079_vm3 = vcmp.ge.f32.partialorder %v1063_v59, 0.0  ;;  %v1095_v27 = vmul.f32 0.02, %v1063_v59  ;;  %vm1078_vm4 = vcmp.ge.f32.partialorder %v1062_v6, 0.0  ;;  %v1094_v22 = vmul.f32 0.02, %v1062_v6  ;;  %v12905_v28 = vpop.permute.xlu1 %748  ;;  %v12907_v60 = vpop.permute.xlu0 %743 }
 0x102   : > { %2964 = vperm.xlu1 %12464, %v2893_v31   ;;  %v762_v23 = vmul.f32 %v12805_v30, %v12707_v53  ;;  %v761_v38 = vmul.f32 %v12805_v30, %v12709_v54  ;;  %v909_v45 = vadd.f32 %v893_v37, %v776_v14  ;;  %v908_v41 = vadd.f32 %v892_v49, %v775_v10  ;;  %v3151_v54 = vld [vmem:[%s12551_s23 + $0xab] sm:$0xff]  ;;  %v3152_v14 = vld [vmem:[%s12551_s23 + $0xb3] sm:$0xff] }
 0x103   : > { %v1111_v29 = vsel %vm1079_vm3, %v1063_v59, %v1095_v27  ;;  %v1110_v62 = vsel %vm1078_vm4, %v1062_v6, %v1094_v22  ;;  %2959 = vperm.xlu0 %12463, %v2892_v51   ;;  %v644_v24 = vadd.f32 %v628_v11, %v495_v4  ;;  %v895_v2 = vmul.f32 %v12823_v52, %v12791_v17  ;;  %v3150_v51 = vld [vmem:[%s12551_s23 + $0xa3] sm:$0xff] }
 0x104   : > { %1128 = vst.msk [vmem:[#allocation2 + $0x18] sm:$0xff] %vm1124_vm0, %v1111_v29  ;;  %1127 = vst.msk [vmem:[#allocation2 + $0x10] sm:$0xff] %vm1124_vm0, %v1110_v62  ;;  %v894_v53 = vmul.f32 %v12823_v52, %v12793_v20  ;;  %v778_v27 = vadd.f32 %v762_v23, %v645_v1  ;;  %vm1188_vm3 = vcmask 259072  }
 0x105   : > { %v965_v26 = vpop.permute.xlu1 %964  ;;  %v960_v12 = vpop.permute.xlu0 %959  ;;  %v777_v22 = vadd.f32 %v761_v38, %v644_v24 }
 0x106   : > { %v1142_v36 = vld [vmem:[#allocation2] ss:$2 sm:$0xff]  ;;  %v1158_v59 = vld [vmem:[#allocation2 + $0x1] ss:$2 sm:$0xff]  ;;  %v1026_v6 = vmul.f32 %v12850_v21, %v965_v26  ;;  %v1025_v31 = vmul.f32 %v12850_v21, %v960_v12  ;;  %2974 = vperm.xlu1 %12464, %v2895_v13   ;;  %v911_v11 = vadd.f32 %v895_v2, %v778_v27  ;;  %v630_v27 = vmul.f32 %v12798_v25, %v12739_v8 }
 0x107   : > { %2969 = vperm.xlu0 %12463, %v2894_v3   ;;  %v1173_v32 = vmax.f32 %v1142_v36, %v1158_v59  ;;  %v910_v29 = vadd.f32 %v894_v53, %v777_v22  ;;  %v3022_v59 = vld [vmem:[%s12551_s23 + $0xca] sm:$0xff]  ;;  %v633_v22 = vmul.f32 %v12798_v25, %v12743_v15  ;;  %v500_v8 = vmul.f32 %v12810_v35, %v12731_v63 }
 0x108   : > { %v1042_v42 = vadd.f32 %v1026_v6, %v909_v45  ;;  %v1041_v18 = vadd.f32 %v1025_v31, %v908_v41  ;;  %v3021_v6 = vld [vmem:[%s12551_s23 + $0xc2] sm:$0xff]  ;;  %v499_v15 = vmul.f32 %v12810_v35, %v12733_v0  ;;  %v3280_v0 = vld [vmem:[%s12551_s23 + $0x8c] sm:$0xff] }
 0x109   : > { %v975_v19 = vpop.permute.xlu1 %974  ;;  %v970_v9 = vpop.permute.xlu0 %969  ;;  %1181 = vst.msk [vmem:[#allocation3] sm:$0xff] %vm1124_vm0, %v1173_v32 }
 0x10a   : > { %v1065_v37 = vadd.f32 %v12871_v46, %v1042_v42  ;;  %v1064_v17 = vadd.f32 %v12871_v46, %v1041_v18  ;;  %v1028_v20 = vmul.f32 %v12850_v21, %v975_v19  ;;  %v1027_v49 = vmul.f32 %v12850_v21, %v970_v9  ;;  %3190 = vperm.xlu1 %12464, %v3151_v54   ;;  %v3024_v18 = vld [vmem:[%s12551_s23 + $0xda] sm:$0xff]  ;;  %v3023_v19 = vld [vmem:[%s12551_s23 + $0xd2] sm:$0xff] }
 0x10b   : > { %v1144_v62 = vld [vmem:[#allocation2 + $0x10] ss:$2 sm:$0xff]  ;;  %v1160_v13 = vld [vmem:[#allocation2 + $0x11] ss:$2 sm:$0xff]  ;;  %3185 = vperm.xlu0 %12463, %v3150_v51   ;;  %v631_v54 = vmul.f32 %v12798_v25, %v12737_v7  ;;  %v498_v51 = vmul.f32 %v12810_v35, %v12713_v57  ;;  %v497_v7 = vmul.f32 %v12810_v35, %v12715_v58  ;;  %v632_v9 = vmul.f32 %v12798_v25, %v12745_v16 }
 0x10c   : > { %vm1081_vm5 = vcmp.ge.f32.partialorder %v1065_v37, 0.0  ;;  %v1097_v10 = vmul.f32 0.02, %v1065_v37  ;;  %vm1080_vm6 = vcmp.ge.f32.partialorder %v1064_v17, 0.0  ;;  %v1096_v3 = vmul.f32 0.02, %v1064_v17 }
 0x10d   : > { %v1044_v4 = vadd.f32 %v1028_v20, %v911_v11  ;;  %v1043_v1 = vadd.f32 %v1027_v49, %v910_v29  ;;  %v12942_v23 = vpop.permute.xlu1 %851  ;;  %v12944_v38 = vpop.permute.xlu0 %846  ;;  %v1174_v26 = vmax.f32 %v1144_v62, %v1160_v13  ;;  %v635_v20 = vmul.f32 %v12798_v25, %v12773_v47 }
 0x10e   : > { %v1113_v12 = vsel %vm1081_vm5, %v1065_v37, %v1097_v10  ;;  %v1112_v45 = vsel %vm1080_vm6, %v1064_v17, %v1096_v3  ;;  %3200 = vperm.xlu1 %12464, %v3153_v50   ;;  %v647_v17 = vadd.f32 %v631_v54, %v498_v51  ;;  %v634_v16 = vmul.f32 %v12798_v25, %v12775_v48  ;;  %v3279_v48 = vld [vmem:[%s12551_s23 + $0x84] sm:$0xff] }
 0x10f   : > { %1130 = vst.msk [vmem:[#allocation2 + $0x28] sm:$0xff] %vm1124_vm0, %v1113_v12  ;;  %1129 = vst.msk [vmem:[#allocation2 + $0x20] sm:$0xff] %vm1124_vm0, %v1112_v45  ;;  %v1067_v41 = vadd.f32 %v12871_v46, %v1044_v4  ;;  %v1066_v36 = vadd.f32 %v12871_v46, %v1043_v1  ;;  %3195 = vperm.xlu0 %12463, %v3152_v14   ;;  %v764_v11 = vmul.f32 %v12805_v30, %v12814_v43 }
 0x110   : > { %1182 = vst.msk [vmem:[#allocation3 + $0x8] sm:$0xff] %vm1124_vm0, %v1174_v26  ;;  %v646_v62 = vadd.f32 %v630_v27, %v497_v7  ;;  %v649_v13 = vadd.f32 %v633_v22, %v500_v8  ;;  %v502_v47 = vmul.f32 %v12810_v35, %v12761_v33  ;;  %v763_v14 = vmul.f32 %v12805_v30, %v12816_v44 }
 0x111   : > { %vm1083_vm7 = vcmp.ge.f32.partialorder %v1067_v41, 0.0  ;;  %v1099_v31 = vmul.f32 0.02, %v1067_v41  ;;  %vm1082_vm8 = vcmp.ge.f32.partialorder %v1066_v36, 0.0  ;;  %v1098_v24 = vmul.f32 0.02, %v1066_v36  ;;  %v12953_v2 = vpop.permute.xlu1 %861  ;;  %v12955_v53 = vpop.permute.xlu0 %856 }
 0x112   : > { %3077 = vperm.xlu1 %12464, %v3022_v59   ;;  %v648_v10 = vadd.f32 %v632_v9, %v499_v15  ;;  %v501_v43 = vmul.f32 %v12810_v35, %v12763_v34  ;;  %v504_v3 = vmul.f32 %v12810_v35, %v12767_v39  ;;  %v637_v4 = vmul.f32 %v12798_v25, %v12779_v55 }
 0x113   : > { %v1115_v32 = vsel %vm1083_vm7, %v1067_v41, %v1099_v31  ;;  %v1114_v42 = vsel %vm1082_vm8, %v1066_v36, %v1098_v24  ;;  %3072 = vperm.xlu0 %12463, %v3021_v6   ;;  %v503_v33 = vmul.f32 %v12810_v35, %v12769_v40  ;;  %v651_v44 = vadd.f32 %v635_v20, %v502_v47  ;;  %v16918_v41 = vld [vmem:[#allocation8_spill] sm:$0xff]  ;;  %v16919_v31 = vld [vmem:[#allocation9_spill] sm:$0xff]  ;;  %v3281_v24 = vld [vmem:[%s12551_s23 + $0x94] sm:$0xff] }
 0x114   : > { %1132 = vst.msk [vmem:[#allocation2 + $0x38] sm:$0xff] %vm1124_vm0, %v1115_v32  ;;  %1131 = vst.msk [vmem:[#allocation2 + $0x30] sm:$0xff] %vm1124_vm0, %v1114_v42  ;;  %v897_v34 = vmul.f32 %v12823_v52, %v12942_v23  ;;  %v896_v39 = vmul.f32 %v12823_v52, %v12944_v38  ;;  %v650_v12 = vadd.f32 %v634_v16, %v501_v43  ;;  %v3282_v40 = vld [vmem:[%s12551_s23 + $0x9c] sm:$0xff] }
 0x115   : > { %v12973_v37 = vpop.permute.xlu1 %871  ;;  %v12975_v57 = vpop.permute.xlu0 %866  ;;  %v636_v55 = vmul.f32 %v12798_v25, %v12781_v56  ;;  %v780_v45 = vadd.f32 %v764_v11, %v647_v17  ;;  %v766_v36 = vmul.f32 %v12805_v30, %v16918_v41  ;;  %v779_v35 = vadd.f32 %v763_v14, %v646_v62  ;;  %v3025_v20 = vld [vmem:[%s12551_s23 + $0xe2] sm:$0xff] }
 0x116   : > { %v1146_v49 = vld [vmem:[#allocation2 + $0x20] ss:$2 sm:$0xff]  ;;  %v1162_v58 = vld [vmem:[#allocation2 + $0x21] ss:$2 sm:$0xff]  ;;  %3087 = vperm.xlu1 %12464, %v3024_v18   ;;  %v765_v23 = vmul.f32 %v12805_v30, %v16919_v31  ;;  %v768_v38 = vmul.f32 %v12805_v30, %v12881_v61  ;;  %v653_v32 = vadd.f32 %v637_v4, %v504_v3  ;;  %v767_v56 = vmul.f32 %v12805_v30, %v12883_v5 }
 0x117   : > { %v1202_v50 = vld [vmem:[#allocation3 + $0x1] ss:$2 sm:$0xff]  ;;  %v1190_v63 = vld [vmem:[#allocation3] ss:$2 sm:$0xff]  ;;  %3082 = vperm.xlu0 %12463, %v3023_v19   ;;  %v1175_v29 = vmax.f32 %v1146_v49, %v1162_v58  ;;  %v770_v25 = vmul.f32 %v12805_v30, %v12905_v28  ;;  %v769_v42 = vmul.f32 %v12805_v30, %v12907_v60  ;;  %v913_v27 = vadd.f32 %v897_v34, %v780_v45 }
 0x118   : > { %11024 = vmatprep.mubr.msk.f32.mxu0 %vm1124_vm0, %v1202_v50  ;;  %11038 = vmatprep.mubr.msk.f32.mxu1 %vm1124_vm0, %v1190_v63  ;;  %v912_v22 = vadd.f32 %v896_v39, %v779_v35  ;;  %v652_v5 = vadd.f32 %v636_v55, %v503_v33  ;;  %v782_v7 = vadd.f32 %v766_v36, %v649_v13  ;;  %v3026_v60 = vld [vmem:[%s12551_s23 + $0xea] sm:$0xff] }
 0x119   : > { %v882_v1 = vpop.permute.xlu1 %881  ;;  %v13001_v26 = vpop.permute.xlu0 %876  ;;  %1183 = vst.msk [vmem:[#allocation3 + $0x10] sm:$0xff] %vm1124_vm0, %v1175_v29  ;;  %v899_v28 = vmul.f32 %v12823_v52, %v12953_v2  ;;  %v898_v30 = vmul.f32 %v12823_v52, %v12955_v53  ;;  %v781_v9 = vadd.f32 %v765_v23, %v648_v10  ;;  %v784_v8 = vadd.f32 %v768_v38, %v651_v44  ;;  %v3284_v31 = vld [vmem:[%s12551_s23 + $0xac] sm:$0xff]  ;;  %v3283_v23 = vld [vmem:[%s12551_s23 + $0xa4] sm:$0xff] }
 0x11a   : > { %3303 = vperm.xlu1 %12464, %v3280_v0   ;;  %v783_v49 = vadd.f32 %v767_v56, %v650_v12  ;;  %v786_v58 = vadd.f32 %v770_v25, %v653_v32  ;;  %v13035_v50 = vadd.f32 %v769_v42, %v652_v5  ;;  %v901_v16 = vmul.f32 %v12823_v52, %v12973_v37  ;;  %v3028_v37 = vld [vmem:[%s12551_s23 + $0xfa] sm:$0xf]  ;;  %v16920_v38 = vld [vmem:[#allocation6_spill] sm:$0xff] }
 0x11b   : > { %v1148_v59 = vld [vmem:[#allocation2 + $0x30] ss:$2 sm:$0xff]  ;;  %v1164_v6 = vld [vmem:[#allocation2 + $0x31] ss:$2 sm:$0xff]  ;;  %3298 = vperm.xlu0 %12463, %v3279_v48   ;;  %v915_v62 = vadd.f32 %v899_v28, %v782_v7  ;;  %v914_v13 = vadd.f32 %v898_v30, %v781_v9  ;;  %v900_v47 = vmul.f32 %v12823_v52, %v12975_v57  ;;  %v903_v14 = vmul.f32 %v12823_v52, %v882_v1  ;;  %v9729_v28 = vld [vmem:[%s16901_s3 + $0x40] sm:$0xff] }
 0x11c   : > { %v1176_v54 = vmax.f32 %v1148_v59, %v1164_v6  ;;  %v3027_v48 = vld [vmem:[%s12551_s23 + $0xf2] sm:$0xff]  ;;  %v917_v3 = vadd.f32 %v901_v16, %v784_v8  ;;  %v902_v4 = vmul.f32 %v12823_v52, %v13001_v26  ;;  %v3286_v9 = vld [vmem:[%s12551_s23 + $0xbc] sm:$0xff] }
 0x11d   : > { %v985_v18 = vpop.permute.xlu1 %984  ;;  %v980_v51 = vpop.permute.xlu0 %979  ;;  %v9731_v52 = vld [vmem:[%s16901_s3 + $0x50] sm:$0xff]  ;;  %v916_v6 = vadd.f32 %v900_v47, %v783_v49  ;;  %v9737_v49 = vld [vmem:[%s16901_s3 + $0x60] sm:$0xff] }
 0x11e   : > { %v1030_v61 = vmul.f32 %v12850_v21, %v985_v18  ;;  %v1029_v19 = vmul.f32 %v12850_v21, %v980_v51  ;;  %3313 = vperm.xlu1 %12464, %v3282_v40   ;;  %1184 = vst.msk [vmem:[#allocation3 + $0x18] sm:$0xff] %vm1124_vm0, %v1176_v54  ;;  %v9739_v26 = vld [vmem:[%s16901_s3 + $0x70] sm:$0xff]  ;;  %v919_v40 = vadd.f32 %v903_v14, %v786_v58  ;;  %v9730_v54 = vld [vmem:[%s16901_s3 + $0x48] sm:$0xff] }
 0x11f   : > { %3308 = vperm.xlu0 %12463, %v3281_v24   ;;  %v16921_v24 = vld [vmem:[#allocation7_spill] sm:$0xff] }
 0x120   : > { %v1046_v15 = vadd.f32 %v1030_v61, %v913_v27  ;;  %v1045_v17 = vadd.f32 %v1029_v19, %v912_v22  ;;  %v9738_v61 = vld [vmem:[%s16901_s3 + $0x68] sm:$0xff]  ;;  %v918_v19 = vadd.f32 %v902_v4, %v13035_v50  ;;  %v3285_v8 = vld [vmem:[%s12551_s23 + $0xb4] sm:$0xff] }
 0x121   : > { %v995_v2 = vpop.permute.xlu1 %994  ;;  %v990_v11 = vpop.permute.xlu0 %989  ;;  %v3157_v4 = vld [vmem:[%s12551_s23 + $0xdb] sm:$0xff] }
 0x122   : > { %v1069_v53 = vadd.f32 %v12871_v46, %v1046_v15  ;;  %v1068_v63 = vadd.f32 %v12871_v46, %v1045_v17  ;;  %v1032_v0 = vmul.f32 %v12850_v21, %v995_v2  ;;  %v1031_v29 = vmul.f32 %v12850_v21, %v990_v11  ;;  %3097 = vperm.xlu1 %12464, %v3026_v60   ;;  %v13098_v11 = vld [vmem:[%s16901_s3 + $0x98] sm:$0xff] }
 0x123   : > { %3092 = vperm.xlu0 %12463, %v3025_v20  }
 0x124   : > { %vm1085_vm9 = vcmp.ge.f32.partialorder %v1069_v53, 0.0  ;;  %v1101_v10 = vmul.f32 0.02, %v1069_v53  ;;  %vm1084_vm10 = vcmp.ge.f32.partialorder %v1068_v63, 0.0  ;;  %v1100_v43 = vmul.f32 0.02, %v1068_v63 }
 0x125   : > { %v1048_v33 = vadd.f32 %v1032_v0, %v915_v62  ;;  %v1047_v44 = vadd.f32 %v1031_v29, %v914_v13  ;;  %v1005_v34 = vpop.permute.xlu1 %1004  ;;  %v1204_v39 = vld [vmem:[#allocation3 + $0x11] ss:$2 sm:$0xff]  ;;  %v1192_v12 = vld [vmem:[#allocation3 + $0x10] ss:$2 sm:$0xff]  ;;  %v1000_v55 = vpop.permute.xlu0 %999  ;;  %v3154_v13 = vld [vmem:[%s12551_s23 + $0xc3] sm:$0xff] }
 0x126   : > { %v1117_v57 = vsel %vm1085_vm9, %v1069_v53, %v1101_v10  ;;  %v1116_v45 = vsel %vm1084_vm10, %v1068_v63, %v1100_v43  ;;  %v1034_v1 = vmul.f32 %v12850_v21, %v1005_v34  ;;  %11025 = vmatmul.mubr.msk.f32.vlgmr.msra.gmra.mxu0 %vm1124_vm0, %v1204_v39  ;;  %11039 = vmatmul.mubr.msk.f32.vlgmr.msra.gmra.mxu1 %vm1124_vm0, %v1192_v12  ;;  %v3155_v62 = vld [vmem:[%s12551_s23 + $0xcb] sm:$0xff] }
 0x127   : > { %1134 = vst.msk [vmem:[#allocation2 + $0x48] sm:$0xff] %vm1124_vm0, %v1117_v57  ;;  %1133 = vst.msk [vmem:[#allocation2 + $0x40] sm:$0xff] %vm1124_vm0, %v1116_v45  ;;  %v1071_v41 = vadd.f32 %v12871_v46, %v1048_v33  ;;  %v1070_v36 = vadd.f32 %v12871_v46, %v1047_v44  ;;  %v1033_v59 = vmul.f32 %v12850_v21, %v1000_v55  ;;  %3107 = vperm.xlu1 %12464, %v3028_v37   ;;  %v3156_v33 = vld [vmem:[%s12551_s23 + $0xd3] sm:$0xff]  ;;  %v3159_v12 = vld [vmem:[%s12551_s23 + $0xeb] sm:$0xff] }
 0x128   : > { %3102 = vperm.xlu0 %12463, %v3027_v48   ;;  %v1050_v35 = vadd.f32 %v1034_v1, %v917_v3  ;;  %11045 = vmatpush3.msra.mxu0 %v16920_v38  ;;  %v3158_v55 = vld [vmem:[%s12551_s23 + $0xe3] sm:$0xff] }
 0x129   : > { %11059 = vmatpush3.msra.mxu1 %v16921_v24  ;;  %vm1087_vm11 = vcmp.ge.f32.partialorder %v1071_v41, 0.0  ;;  %v1103_v32 = vmul.f32 0.02, %v1071_v41  ;;  %vm1086_vm12 = vcmp.ge.f32.partialorder %v1070_v36, 0.0  ;;  %v1102_v56 = vmul.f32 0.02, %v1070_v36  ;;  %v1015_v25 = vpop.permute.xlu1 %1014  ;;  %v1010_v42 = vpop.permute.xlu0 %1009  ;;  %11046 = vmatprep.subr.mxu0 %v9731_v52 }
 0x12a   : > { %11060 = vmatprep.subr.mxu1 %v9739_v26  ;;  %v1073_v18 = vadd.f32 %v12871_v46, %v1050_v35  ;;  %v1049_v51 = vadd.f32 %v1033_v59, %v916_v6  ;;  %v1036_v27 = vmul.f32 %v12850_v21, %v1015_v25  ;;  %v1035_v22 = vmul.f32 %v12850_v21, %v1010_v42  ;;  %v3161_v59 = vld [vmem:[%s12551_s23 + $0xfb] sm:$0xf]  ;;  %v3160_v6 = vld [vmem:[%s12551_s23 + $0xf3] sm:$0xff] }
 0x12b   : > { %11047 = vmatpush3.msra.mxu0 %v9731_v52  ;;  %v1119_v5 = vsel %vm1087_vm11, %v1071_v41, %v1103_v32  ;;  %v1118_v7 = vsel %vm1086_vm12, %v1070_v36, %v1102_v56  ;;  %3323 = vperm.xlu1 %12464, %v3284_v31   ;;  %v3288_v24 = vld [vmem:[%s12551_s23 + $0xcc] sm:$0xff]  ;;  %v3290_v25 = vld [vmem:[%s12551_s23 + $0xdc] sm:$0xff]  ;;  %v3289_v42 = vld [vmem:[%s12551_s23 + $0xd4] sm:$0xff]  ;;  %vm12477_vm12 = vmmov 0  }
 0x12c   : > { %3318 = vperm.xlu0 %12463, %v3283_v23   ;;  %1136 = vst.msk [vmem:[#allocation2 + $0x58] sm:$0xff] %vm1124_vm0, %v1119_v5  ;;  %1135 = vst.msk [vmem:[#allocation2 + $0x50] sm:$0xff] %vm1124_vm0, %v1118_v7  ;;  %vm1089_vm13 = vcmp.ge.f32.partialorder %v1073_v18, 0.0  ;;  %v1105_v21 = vmul.f32 0.02, %v1073_v18  ;;  %v1072_v30 = vadd.f32 %v12871_v46, %v1049_v51  ;;  %v1052_v60 = vadd.f32 %v1036_v27, %v919_v40  ;;  %v3292_v5 = vld [vmem:[%s12551_s23 + $0xec] sm:$0xff] }
 0x12d   : > { %11061 = vmatpush3.msra.mxu1 %v9739_v26  ;;  %11048 = vmatprep.subr.mxu0 %v9730_v54  ;;  %v1051_v15 = vadd.f32 %v1035_v22, %v918_v19  ;;  %v13086_v17 = vpop.permute.xlu1 %2771  ;;  %v13088_v20 = vpop.permute.xlu0 %2766  ;;  %v1523_v19 = vld [vmem:[#allocation3 + $0x3] ss:$2 sm:$0xff] }
 0x12e   : > { %11062 = vmatprep.subr.mxu1 %v9738_v61  ;;  %11049 = vmatpush3.msra.mxu0 %v9730_v54  ;;  %v1150_v58 = vld [vmem:[#allocation2 + $0x40] ss:$2 sm:$0xff]  ;;  %v1166_v50 = vld [vmem:[#allocation2 + $0x41] ss:$2 sm:$0xff]  ;;  %v1121_v16 = vsel %vm1089_vm13, %v1073_v18, %v1105_v21  ;;  %vm1088_vm14 = vcmp.ge.f32.partialorder %v1072_v30, 0.0  ;;  %v1075_v2 = vadd.f32 %v12871_v46, %v1052_v60 }
 0x12f   : > { %11063 = vmatpush3.msra.mxu1 %v9738_v61  ;;  %11050 = vmatprep.subr.mxu0 %v9729_v28  ;;  %1138 = vst.msk [vmem:[#allocation2 + $0x68] sm:$0xff] %vm1124_vm0, %v1121_v16  ;;  %v1104_v53 = vmul.f32 0.02, %v1072_v30  ;;  %v1074_v63 = vadd.f32 %v12871_v46, %v1051_v15  ;;  %v1177_v0 = vmax.f32 %v1150_v58, %v1166_v50  ;;  %v3287_v54 = vld [vmem:[%s12551_s23 + $0xc4] sm:$0xff]  ;;  %v9747_v15 = vld [vmem:[%s16901_s3 + $0x90] sm:$0xff] }
 0x130   : > { %3333 = vperm.xlu1 %12464, %v3286_v9   ;;  %3328 = vperm.xlu0 %12463, %v3285_v8   ;;  %vm1091_vm1 = vcmp.ge.f32.partialorder %v1075_v2, 0.0  ;;  %v1107_v29 = vmul.f32 0.02, %v1075_v2  ;;  %v1409_v61 = vld [vmem:[#allocation3 + $0x2] ss:$2 sm:$0xff] }
 0x131   : > { %11064 = vmatprep.subr.mxu1 %v9737_v49  ;;  %11051 = vmatpush3.msra.mxu0 %v9729_v28  ;;  %v1120_v47 = vsel %vm1088_vm14, %v1072_v30, %v1104_v53  ;;  %vm1090_vm2 = vcmp.ge.f32.partialorder %v1074_v63, 0.0  ;;  %v1106_v14 = vmul.f32 0.02, %v1074_v63  ;;  %v13105_v37 = vpop.permute.xlu1 %2781  ;;  %v13107_v48 = vpop.permute.xlu0 %2776  ;;  %1185 = vst.msk [vmem:[#allocation3 + $0x20] sm:$0xff] %vm1124_vm0, %v1177_v0  ;;  %v3291_v7 = vld [vmem:[%s12551_s23 + $0xe4] sm:$0xff] }
 0x132   : > { %11065 = vmatpush3.msra.mxu1 %v9737_v49  ;;  %11072 = vmatprep.subr.mxu0 %v13098_v11  ;;  %1137 = vst.msk [vmem:[#allocation2 + $0x60] sm:$0xff] %vm1124_vm0, %v1120_v47  ;;  %v1123_v46 = vsel %vm1091_vm1, %v1075_v2, %v1107_v29  ;;  %v9746_v50 = vld [vmem:[%s16901_s3 + $0x88] sm:$0xff]  ;;  %v3294_v2 = vld [vmem:[%s12551_s23 + $0xfc] sm:$0xf]  ;;  %v5049_v47 = vld [vmem:[%s12551_s23 + $0x100] sm:$0xff] }
 0x133   : > { %v1152_v10 = vld [vmem:[#allocation2 + $0x50] ss:$2 sm:$0xff]  ;;  %v1168_v43 = vld [vmem:[#allocation2 + $0x51] ss:$2 sm:$0xff]  ;;  %1141 = vst.msk [vmem:[#allocation2 + $0x78] sm:$0xf] %vm1140_vm15, %v1123_v46  ;;  %v1122_v3 = vsel %vm1090_vm2, %v1074_v63, %v1106_v14 }
 0x134   : > { %3210 = vperm.xlu1 %12464, %v3155_v62   ;;  %3205 = vperm.xlu0 %12463, %v3154_v13   ;;  %1139 = vst.msk [vmem:[#allocation2 + $0x70] sm:$0xff] %vm1124_vm0, %v1122_v3  ;;  %v1178_v44 = vmax.f32 %v1152_v10, %v1168_v43  ;;  %v3293_v63 = vld [vmem:[%s12551_s23 + $0xf4] sm:$0xff]  ;;  %v1637_v0 = vld [vmem:[#allocation3 + $0x4] ss:$2 sm:$0xff] }
 0x135   : > { %v13116_v34 = vpop.permute.xlu1 %2904  ;;  %v13118_v39 = vpop.permute.xlu0 %2899  ;;  %v5050_v13 = vld [vmem:[%s12551_s23 + $0x108] sm:$0xff]  ;;  %v5052_v3 = vld [vmem:[%s12551_s23 + $0x118] sm:$0xff] }
 0x136   : > { %1186 = vst.msk [vmem:[#allocation3 + $0x28] sm:$0xff] %vm1124_vm0, %v1178_v44 }
 0x138   : > { %3220 = vperm.xlu1 %12464, %v3157_v4   ;;  %3215 = vperm.xlu0 %12463, %v3156_v33   ;;  %v1411_v21 = vld [vmem:[#allocation3 + $0x12] ss:$2 sm:$0xff]  ;;  %v1525_v30 = vld [vmem:[#allocation3 + $0x13] ss:$2 sm:$0xff] }
 0x139   : > { %v1154_v57 = vld [vmem:[#allocation2 + $0x60] ss:$2 sm:$0xff]  ;;  %v1170_v45 = vld [vmem:[#allocation2 + $0x61] ss:$2 sm:$0xff]  ;;  %v13123_v1 = vpop.permute.xlu1 %2914  ;;  %v13125_v52 = vpop.permute.xlu0 %2909  ;;  %v5051_v4 = vld [vmem:[%s12551_s23 + $0x110] sm:$0xff] }
 0x13a   : > { %v1179_v26 = vmax.f32 %v1154_v57, %v1170_v45  ;;  %v1639_v14 = vld [vmem:[#allocation3 + $0x14] ss:$2 sm:$0xff] }
 0x13b   : > { %v1156_v41 = vld [vmem:[#allocation2 + $0x70] ss:$2 sm:$0x3f]  ;;  %v1172_v36 = vld [vmem:[#allocation2 + $0x71] ss:$2 sm:$0x3f] }
 0x13c   : > { %3230 = vperm.xlu1 %12464, %v3159_v12   ;;  %3225 = vperm.xlu0 %12463, %v3158_v55   ;;  %v1180_v40 = vmax.f32 %v1156_v41, %v1172_v36  ;;  %1187 = vst.msk [vmem:[#allocation3 + $0x30] sm:$0xff] %vm1124_vm0, %v1179_v26  ;;  %v5183_v55 = vld [vmem:[%s12551_s23 + $0x109] sm:$0xff]  ;;  %v5182_v57 = vld [vmem:[%s12551_s23 + $0x101] sm:$0xff]  ;;  %v5185_v41 = vld [vmem:[%s12551_s23 + $0x119] sm:$0xff] }
 0x13d   : > { %v13130_v35 = vpop.permute.xlu1 %2791  ;;  %v1206_v31 = vld [vmem:[#allocation3 + $0x21] ss:$2 sm:$0xff]  ;;  %v1194_v23 = vld [vmem:[#allocation3 + $0x20] ss:$2 sm:$0xff]  ;;  %v13132_v38 = vpop.permute.xlu0 %2786  ;;  %v5184_v36 = vld [vmem:[%s12551_s23 + $0x111] sm:$0xff] }
 0x13e   : > { %11027 = vmatprep.mubr.msk.f32.mxu0 %vm1124_vm0, %v1206_v31  ;;  %11041 = vmatprep.mubr.msk.f32.mxu1 %vm1124_vm0, %v1194_v23  ;;  %1189 = vst.msk [vmem:[#allocation3 + $0x38] sm:$0x3f] %vm1188_vm3, %v1180_v40  ;;  %v5054_v40 = vld [vmem:[%s12551_s23 + $0x128] sm:$0xff]  ;;  %v5053_v31 = vld [vmem:[%s12551_s23 + $0x120] sm:$0xff] }
 0x140   : > { %3240 = vperm.xlu1 %12464, %v3161_v59   ;;  %3235 = vperm.xlu0 %12463, %v3160_v6  }
 0x141   : > { %v13139_v32 = vpop.permute.xlu1 %2801  ;;  %v13141_v56 = vpop.permute.xlu0 %2796 }
 0x143   : > { %v1413_v9 = vld [vmem:[#allocation3 + $0x22] ss:$2 sm:$0xff]  ;;  %v1527_v8 = vld [vmem:[#allocation3 + $0x23] ss:$2 sm:$0xff] }
 0x144   : > { %3343 = vperm.xlu1 %12464, %v3288_v24   ;;  %3338 = vperm.xlu0 %12463, %v3287_v54   ;;  %v1641_v46 = vld [vmem:[#allocation3 + $0x24] ss:$2 sm:$0xff]  ;;  %v5056_v54 = vld [vmem:[%s12551_s23 + $0x138] sm:$0xff] }
 0x145   : > { %v13145_v18 = vpop.permute.xlu1 %2924  ;;  %v1208_v51 = vld [vmem:[#allocation3 + $0x31] ss:$2 sm:$0x1f]  ;;  %v1196_v27 = vld [vmem:[#allocation3 + $0x30] ss:$2 sm:$0x1f]  ;;  %v13147_v22 = vpop.permute.xlu0 %2919 }
 0x146   : > { %11028 = vmatmul.mubr.msk.f32.gmra.mxu0 %vm1124_vm0, %v1208_v51  ;;  %11042 = vmatmul.mubr.msk.f32.gmra.mxu1 %vm1124_vm0, %v1196_v27  ;;  %v1415_v58 = vld [vmem:[#allocation3 + $0x32] ss:$2 sm:$0x1f]  ;;  %v1529_v53 = vld [vmem:[#allocation3 + $0x33] ss:$2 sm:$0x1f] }
 0x147   : > { %11052 = vmatprep.mubr.msk.f32.mxu0 %vm1124_vm0, %v1409_v61  ;;  %11066 = vmatprep.mubr.msk.f32.mxu1 %vm1124_vm0, %v1523_v19  ;;  %v1643_v33 = vld [vmem:[#allocation3 + $0x34] ss:$2 sm:$0x1f]  ;;  %v5187_v27 = vld [vmem:[%s12551_s23 + $0x129] sm:$0xff]  ;;  %v5186_v61 = vld [vmem:[%s12551_s23 + $0x121] sm:$0xff] }
 0x148   : > { %3353 = vperm.xlu1 %12464, %v3290_v25   ;;  %3348 = vperm.xlu0 %12463, %v3289_v42   ;;  %v5055_v25 = vld [vmem:[%s12551_s23 + $0x130] sm:$0xff] }
 0x149   : > { %v13155_v28 = vpop.permute.xlu1 %2934  ;;  %v13157_v60 = vpop.permute.xlu0 %2929 }
 0x14a   : > { %11053 = vmatmul.mubr.msk.f32.vlgmr.msra.gmra.mxu0 %vm1124_vm0, %v1411_v21  ;;  %11067 = vmatmul.mubr.msk.f32.vlgmr.msra.gmra.mxu1 %vm1124_vm0, %v1525_v30  ;;  %v5188_v21 = vld [vmem:[%s12551_s23 + $0x131] sm:$0xff] }
 0x14b   : > { %11055 = vmatprep.mubr.msk.f32.mxu0 %vm1124_vm0, %v1413_v9  ;;  %11069 = vmatprep.mubr.msk.f32.mxu1 %vm1124_vm0, %v1527_v8  ;;  %v5316_v8 = vld [vmem:[%s12551_s23 + $0x10a] sm:$0xff] }
 0x14c   : > { %3363 = vperm.xlu1 %12464, %v3292_v5   ;;  %3358 = vperm.xlu0 %12463, %v3291_v7   ;;  %v5189_v7 = vld [vmem:[%s12551_s23 + $0x139] sm:$0xff] }
 0x14d   : > { %11073 = vmatpush3.msra.mxu0 %v13098_v11  ;;  %v13167_v49 = vpop.permute.xlu1 %3037  ;;  %v13172_v16 = vpop.permute.xlu0 %3032  ;;  %v9745_v11 = vld [vmem:[%s16901_s3 + $0x80] sm:$0xff] }
 0x14e   : > { %11074 = vmatprep.subr.mxu0 %v9747_v15  ;;  %11056 = vmatmul.mubr.msk.f32.gmra.mxu0 %vm1124_vm0, %v1415_v58 }
 0x14f   : > { %11075 = vmatpush3.msra.mxu0 %v9747_v15  ;;  %11070 = vmatmul.mubr.msk.f32.gmra.mxu1 %vm1124_vm0, %v1529_v53  ;;  %v5315_v15 = vld [vmem:[%s12551_s23 + $0x102] sm:$0xff]  ;;  %v5317_v53 = vld [vmem:[%s12551_s23 + $0x112] sm:$0xff] }
 0x150   : > { %11076 = vmatprep.subr.mxu0 %v9746_v50  ;;  %3373 = vperm.xlu1 %12464, %v3294_v2  }
 0x151   : > { %3368 = vperm.xlu0 %12463, %v3293_v63   ;;  %11077 = vmatpush3.msra.mxu0 %v9746_v50  ;;  %v13181_v29 = vpop.permute.xlu1 %3047  ;;  %v13183_v62 = vpop.permute.xlu0 %3042  ;;  %v5318_v50 = vld [vmem:[%s12551_s23 + $0x11a] sm:$0xff] }
 0x152   : > { %11080 = vmatprep.mubr.msk.f32.mxu0 %vm1124_vm0, %v1637_v0  ;;  %11078 = vmatprep.subr.mxu0 %v9745_v11 }
 0x153   : > { %11079 = vmatpush3.msra.mxu0 %v9745_v11  ;;  %v5320_v11 = vld [vmem:[%s12551_s23 + $0x12a] sm:$0xff] }
 0x154   : > { %11081 = vmatmul.mubr.msk.f32.vlgmr.msra.gmra.mxu0 %vm1124_vm0, %v1639_v14  ;;  %5073 = vperm.xlu1 %12464, %v5050_v13   ;;  %v5319_v13 = vld [vmem:[%s12551_s23 + $0x122] sm:$0xff]  ;;  %v5322_v14 = vld [vmem:[%s12551_s23 + $0x13a] sm:$0xff] }
 0x155   : > { %5068 = vperm.xlu0 %12463, %v5049_v47   ;;  %11083 = vmatprep.mubr.msk.f32.mxu0 %vm1124_vm0, %v1641_v46  ;;  %v13190_v10 = vpop.permute.xlu1 %3057  ;;  %v13192_v43 = vpop.permute.xlu0 %3052 }
 0x158   : > { %11084 = vmatmul.mubr.msk.f32.gmra.mxu0 %vm1124_vm0, %v1643_v33  ;;  %5083 = vperm.xlu1 %12464, %v5052_v3   ;;  %v5321_v3 = vld [vmem:[%s12551_s23 + $0x132] sm:$0xff]  ;;  %v5058_v33 = vld [vmem:[%s12551_s23 + $0x148] sm:$0xff] }
 0x159   : > { %5078 = vperm.xlu0 %12463, %v5051_v4   ;;  %v13197_v44 = vpop.permute.xlu1 %3067  ;;  %v13199_v12 = vpop.permute.xlu0 %3062 }
 0x15c   : > { %5206 = vperm.xlu1 %12464, %v5183_v55  }
 0x15d   : > { %5201 = vperm.xlu0 %12463, %v5182_v57   ;;  %v13203_v45 = vpop.permute.xlu1 %2811  ;;  %v13205_v26 = vpop.permute.xlu0 %2806  ;;  %v5057_v57 = vld [vmem:[%s12551_s23 + $0x140] sm:$0xff] }
 0x160   : > { %5216 = vperm.xlu1 %12464, %v5185_v41  }
 0x161   : > { %5211 = vperm.xlu0 %12463, %v5184_v36   ;;  %v13209_v59 = vpop.permute.xlu1 %2821  ;;  %v13211_v6 = vpop.permute.xlu0 %2816  ;;  %v5060_v36 = vld [vmem:[%s12551_s23 + $0x158] sm:$0xff] }
 0x164   : > { %5093 = vperm.xlu1 %12464, %v5054_v40  }
 0x165   : > { %5088 = vperm.xlu0 %12463, %v5053_v31   ;;  %v13215_v23 = vpop.permute.xlu1 %2944  ;;  %v13217_v24 = vpop.permute.xlu0 %2939  ;;  %v5059_v31 = vld [vmem:[%s12551_s23 + $0x150] sm:$0xff] }
 0x168   : > { %5103 = vperm.xlu1 %12464, %v5056_v54  }
 0x169   : > { %5098 = vperm.xlu0 %12463, %v5055_v25   ;;  %v13221_v42 = vpop.permute.xlu1 %2954  ;;  %v13223_v51 = vpop.permute.xlu0 %2949  ;;  %v5191_v25 = vld [vmem:[%s12551_s23 + $0x149] sm:$0xff] }
 0x16c   : > { %5226 = vperm.xlu1 %12464, %v5187_v27  }
 0x16d   : > { %5221 = vperm.xlu0 %12463, %v5186_v61   ;;  %v13227_v19 = vpop.permute.xlu1 %3170  ;;  %v13229_v5 = vpop.permute.xlu0 %3165  ;;  %v5190_v61 = vld [vmem:[%s12551_s23 + $0x141] sm:$0xff] }
 0x170   : > { %5236 = vperm.xlu1 %12464, %v5189_v7   ;;  %v13278_v7 = vld [vmem:[%s16899_s1 + $0x1] ss:$0 sm:$0xff] }
 0x171   : > { %5231 = vperm.xlu0 %12463, %v5188_v21   ;;  %v13233_v30 = vpop.permute.xlu1 %3180  ;;  %v13235_v9 = vpop.permute.xlu0 %3175  ;;  %v13283_v21 = vld [vmem:[%s16899_s1] ss:$0 sm:$0xff] }
 0x174   : > { %5339 = vperm.xlu1 %12464, %v5316_v8   ;;  %v13288_v8 = vld [vmem:[%s16899_s1 + $0x2] ss:$0 sm:$0xff] }
 0x175   : > { %5334 = vperm.xlu0 %12463, %v5315_v15   ;;  %v13239_v58 = vpop.permute.xlu1 %2831 }
 0x176   : > { %v13242_v2 = vpop.permute.xlu0 %2826 }
 0x178   : > { %5349 = vperm.xlu1 %12464, %v5318_v50   ;;  %v5193_v50 = vld [vmem:[%s12551_s23 + $0x159] sm:$0xff] }
 0x179   : > { %5344 = vperm.xlu0 %12463, %v5317_v53   ;;  %v13245_v63 = vpop.permute.xlu1 %2841  ;;  %v2982_v53 = vmul.f32 %v13278_v7, %v13116_v34  ;;  %v3115_v34 = vmul.f32 %v13288_v8, %v13167_v49 }
 0x17a   : > { %v13248_v0 = vpop.permute.xlu0 %2836 }
 0x17c   : > { %5359 = vperm.xlu1 %12464, %v5320_v11  }
 0x17d   : > { %5354 = vperm.xlu0 %12463, %v5319_v13   ;;  %v13251_v47 = vpop.permute.xlu1 %2964  ;;  %v5192_v13 = vld [vmem:[%s12551_s23 + $0x151] sm:$0xff] }
 0x17e   : > { %v13254_v46 = vpop.permute.xlu0 %2959 }
 0x180   : > { %5369 = vperm.xlu1 %12464, %v5322_v14   ;;  %v2981_v14 = vmul.f32 %v13278_v7, %v13118_v39  ;;  %v2983_v39 = vmul.f32 %v13278_v7, %v13125_v52  ;;  %v2850_v52 = vmul.f32 %v13283_v21, %v13107_v48  ;;  %v9769_v48 = vld [vmem:[%s16903_s5 + $0xf8] sm:$0xff] }
 0x181   : > { %5364 = vperm.xlu0 %12463, %v5321_v3   ;;  %v13257_v4 = vpop.permute.xlu1 %2974  ;;  %v13303_v3 = vld [vmem:[%s16899_s1 + $0x3] ss:$0 sm:$0xff] }
 0x182   : > { %v13260_v55 = vpop.permute.xlu0 %2969  ;;  %v3248_v49 = vmul.f32 %v13303_v3, %v13227_v19  ;;  %v3117_v19 = vmul.f32 %v13288_v8, %v13181_v29 }
 0x183   : > { %16922 = vst [vmem:[#allocation8_spill] sm:$0xff] %v13260_v55 }
 0x184   : > { %5113 = vperm.xlu1 %12464, %v5058_v33   ;;  %v2849_v33 = vmul.f32 %v13283_v21, %v13086_v17  ;;  %v5449_v17 = vld [vmem:[%s12551_s23 + $0x10b] sm:$0xff] }
 0x185   : > { %5108 = vperm.xlu0 %12463, %v5057_v57   ;;  %v13263_v41 = vpop.permute.xlu1 %3190  ;;  %v2984_v57 = vmul.f32 %v13278_v7, %v13123_v1  ;;  %v2851_v1 = vmul.f32 %v13283_v21, %v13105_v37 }
 0x186   : > { %v13266_v40 = vpop.permute.xlu0 %3185 }
 0x187   : > { %v3000_v37 = vadd.f32 %v2984_v57, %v2851_v1  ;;  %v3116_v57 = vmul.f32 %v13288_v8, %v13183_v62  ;;  %v3250_v1 = vmul.f32 %v13303_v3, %v13233_v30  ;;  %v1803_v62 = vld [vmem:[%s16903_s5 + $0x70] sm:$0xff]  ;;  %v13364_v30 = vld [vmem:[%s16900_s2] ss:$0 sm:$0xff] }
 0x188   : > { %5123 = vperm.xlu1 %12464, %v5060_v36   ;;  %v2848_v36 = vmul.f32 %v13283_v21, %v13088_v20  ;;  %v5448_v20 = vld [vmem:[%s12551_s23 + $0x103] sm:$0xff] }
 0x189   : > { %5118 = vperm.xlu0 %12463, %v5059_v31   ;;  %v13269_v54 = vpop.permute.xlu1 %3200  ;;  %v3114_v31 = vmul.f32 %v13288_v8, %v13172_v16  ;;  %v3247_v16 = vmul.f32 %v13303_v3, %v13229_v5  ;;  %v1804_v5 = vld [vmem:[%s16903_s5 + $0x78] sm:$0xff] }
 0x18a   : > { %v13272_v27 = vpop.permute.xlu0 %3195  ;;  %v2997_v55 = vadd.f32 %v2981_v14, %v2848_v36  ;;  %v2999_v14 = vadd.f32 %v2983_v39, %v2850_v52  ;;  %v3133_v52 = vadd.f32 %v3117_v19, %v3000_v37  ;;  %v5062_v19 = vld [vmem:[%s12551_s23 + $0x168] sm:$0xff] }
 0x18c   : > { %5246 = vperm.xlu1 %12464, %v5191_v25   ;;  %v3130_v36 = vadd.f32 %v3114_v31, %v2997_v55  ;;  %v9768_v55 = vld [vmem:[%s16903_s5 + $0xf0] sm:$0xff]  ;;  %v3249_v31 = vmul.f32 %v13303_v3, %v13235_v9  ;;  %v9767_v9 = vld [vmem:[%s16903_s5 + $0xe8] sm:$0xff] }
 0x18d   : > { %5241 = vperm.xlu0 %12463, %v5190_v61   ;;  %v13290_v15 = vpop.permute.xlu1 %3077  ;;  %v2998_v61 = vadd.f32 %v2982_v53, %v2849_v33  ;;  %v16912_v33 = vmov 0.0  }
 0x18e   : > { %v13295_v11 = vpop.permute.xlu0 %3072  ;;  %11086 = vmatprep.subr.mxu1 %v16912_v33  ;;  %11121 = vmatprep.subr.mxu0 %v16912_v33  ;;  %v3263_v39 = vadd.f32 %v3247_v16, %v3130_v36 }
 0x18f   : > { %v3131_v53 = vadd.f32 %v3115_v34, %v2998_v61  ;;  %v5451_v34 = vld [vmem:[%s12551_s23 + $0x11b] sm:$0xff]  ;;  %11087 = vmatpush3.msra.mxu1 %v9769_v48  ;;  %11122 = vmatpush3.msra.mxu0 %v1804_v5  ;;  %v3132_v48 = vadd.f32 %v3116_v57, %v2999_v14  ;;  %v3266_v5 = vadd.f32 %v3250_v1, %v3133_v52 }
 0x190   : > { %5256 = vperm.xlu1 %12464, %v5193_v50   ;;  %11088 = vmatprep.subr.mxu1 %v16912_v33  ;;  %v1801_v57 = vld [vmem:[%s16903_s5 + $0x60] sm:$0xff]  ;;  %v13399_v1 = vmul.f32 %v13283_v21, %v13139_v32  ;;  %v9765_v32 = vld [vmem:[%s16903_s5 + $0xd8] sm:$0xff] }
 0x191   : > { %5251 = vperm.xlu0 %12463, %v5192_v13   ;;  %v13317_v25 = vpop.permute.xlu1 %3087  ;;  %v13334_v13 = vld [vmem:[%s16899_s1 + $0x4] ss:$0 sm:$0xff]  ;;  %11123 = vmatprep.subr.mxu0 %v16912_v33 }
 0x192   : > { %16923 = vst [vmem:[#allocation9_spill] sm:$0xff] %v13317_v25  ;;  %v13324_v50 = vpop.permute.xlu0 %3082  ;;  %v5450_v25 = vld [vmem:[%s12551_s23 + $0x113] sm:$0xff]  ;;  %11089 = vmatpush3.msra.mxu1 %v9768_v55  ;;  %11124 = vmatpush3.msra.mxu0 %v1803_v62 }
 0x193   : > { %16924 = vst [vmem:[#allocation6_spill] sm:$0xff] %v13324_v50  ;;  %11090 = vmatprep.subr.mxu1 %v16912_v33  ;;  %11125 = vmatprep.subr.mxu0 %v16912_v33 }
 0x194   : > { %5472 = vperm.xlu1 %12464, %v5449_v17   ;;  %v3264_v17 = vadd.f32 %v3248_v49, %v3131_v53  ;;  %v13381_v53 = vmul.f32 %v13283_v21, %v13132_v38  ;;  %11091 = vmatpush3.msra.mxu1 %v9767_v9  ;;  %v2986_v9 = vmul.f32 %v13278_v7, %v13145_v18 }
 0x195   : > { %5467 = vperm.xlu0 %12463, %v5448_v20   ;;  %v3304_v29 = vpop.permute.xlu1 %3303  ;;  %v13371_v20 = vmul.f32 %v13283_v21, %v13130_v35  ;;  %11092 = vmatprep.subr.mxu1 %v16912_v33 }
 0x196   : > { %v3381_v61 = vmul.f32 %v13334_v13, %v3304_v29  ;;  %v3299_v50 = vpop.permute.xlu0 %3298  ;;  %11118 = vmatprep.mubr.msk.f32.mxu1 %vm12477_vm12, %v16912_v33  ;;  %11153 = vmatprep.mubr.msk.f32.mxu0 %vm12477_vm12, %v16912_v33 }
 0x197   : > { %v3380_v49 = vmul.f32 %v13334_v13, %v3299_v50  ;;  %v1802_v50 = vld [vmem:[%s16903_s5 + $0x68] sm:$0xff] }
 0x198   : > { %v3397_v16 = vadd.f32 %v3381_v61, %v3264_v17  ;;  %5482 = vperm.xlu1 %12464, %v5451_v34   ;;  %v5061_v17 = vld [vmem:[%s12551_s23 + $0x160] sm:$0xff]  ;;  %v3265_v61 = vadd.f32 %v3249_v31, %v3132_v48  ;;  %11126 = vmatpush3.msra.mxu0 %v1802_v50 }
 0x199   : > { %v3396_v35 = vadd.f32 %v3380_v49, %v3263_v39  ;;  %5477 = vperm.xlu0 %12463, %v5450_v25   ;;  %v3314_v37 = vpop.permute.xlu1 %3313  ;;  %v9766_v25 = vld [vmem:[%s16903_s5 + $0xe0] sm:$0xff]  ;;  %v2854_v39 = vmul.f32 %v13283_v21, %v13141_v56  ;;  %11127 = vmatprep.subr.mxu0 %v16912_v33 }
 0x19a   : > { %v3420_v36 = vadd.f32 %v13364_v30, %v3397_v16  ;;  %v3383_v29 = vmul.f32 %v13334_v13, %v3314_v37  ;;  %v3309_v34 = vpop.permute.xlu0 %3308  ;;  %v5064_v16 = vld [vmem:[%s12551_s23 + $0x178] sm:$0xf]  ;;  %11093 = vmatpush3.msra.mxu1 %v9766_v25  ;;  %11128 = vmatpush3.msra.mxu0 %v1801_v57  ;;  %v3252_v25 = vmul.f32 %v13303_v3, %v13263_v41 }
 0x19b   : > { %v3419_v38 = vadd.f32 %v13364_v30, %v3396_v35  ;;  %v3382_v14 = vmul.f32 %v13334_v13, %v3309_v34  ;;  %v5063_v35 = vld [vmem:[%s12551_s23 + $0x170] sm:$0xff]  ;;  %v1800_v37 = vld [vmem:[%s16903_s5 + $0x58] sm:$0xff]  ;;  %11094 = vmatprep.subr.mxu1 %v16912_v33  ;;  %11129 = vmatprep.subr.mxu0 %v16912_v33 }
 0x19c   : > { %vm3436_vm4 = vcmp.ge.f32.partialorder %v3420_v36, 0.0  ;;  %v3452_v55 = vmul.f32 0.02, %v3420_v36  ;;  %v3399_v62 = vadd.f32 %v3383_v29, %v3266_v5  ;;  %5133 = vperm.xlu1 %12464, %v5062_v19   ;;  %v2985_v19 = vmul.f32 %v13278_v7, %v13147_v22  ;;  %11095 = vmatpush3.msra.mxu1 %v9765_v32  ;;  %v9764_v34 = vld [vmem:[%s16903_s5 + $0xd0] sm:$0xff] }
 0x19d   : > { %vm3435_vm5 = vcmp.ge.f32.partialorder %v3419_v38, 0.0  ;;  %v3451_v31 = vmul.f32 0.02, %v3419_v38  ;;  %v3398_v49 = vadd.f32 %v3382_v14, %v3265_v61  ;;  %5128 = vperm.xlu0 %12463, %v5061_v17   ;;  %v13404_v52 = vpop.permute.xlu1 %3097  ;;  %v3119_v29 = vmul.f32 %v13288_v8, %v13190_v10  ;;  %v1799_v17 = vld [vmem:[%s16903_s5 + $0x50] sm:$0xff]  ;;  %11130 = vmatpush3.msra.mxu0 %v1800_v37 }
 0x19e   : > { %v3468_v50 = vsel %vm3436_vm4, %v3420_v36, %v3452_v55  ;;  %v3422_v48 = vadd.f32 %v13364_v30, %v3399_v62  ;;  %v13414_v56 = vpop.permute.xlu0 %3092  ;;  %v2988_v36 = vmul.f32 %v13278_v7, %v13155_v28  ;;  %v2987_v28 = vmul.f32 %v13278_v7, %v13157_v60  ;;  %11096 = vmatprep.subr.mxu1 %v16912_v33 }
 0x19f   : > { %3484 = vst.msk [vmem:[#allocation2 + $0x8] sm:$0xff] %vm1124_vm0, %v3468_v50  ;;  %v3467_v5 = vsel %vm3435_vm5, %v3419_v38, %v3451_v31  ;;  %v3421_v18 = vadd.f32 %v13364_v30, %v3398_v49  ;;  %v3118_v10 = vmul.f32 %v13288_v8, %v13192_v43  ;;  %v5195_v38 = vld [vmem:[%s12551_s23 + $0x169] sm:$0xff]  ;;  %v3002_v14 = vadd.f32 %v2986_v9, %v13371_v20  ;;  %v5194_v31 = vld [vmem:[%s12551_s23 + $0x161] sm:$0xff]  ;;  %v5197_v9 = vld [vmem:[%s12551_s23 + $0x179] sm:$0xf] }
 0x1a0   : > { %3483 = vst.msk [vmem:[#allocation2] sm:$0xff] %vm1124_vm0, %v3467_v5  ;;  %vm3438_vm6 = vcmp.ge.f32.partialorder %v3422_v48, 0.0  ;;  %v3454_v22 = vmul.f32 0.02, %v3422_v48  ;;  %5143 = vperm.xlu1 %12464, %v5064_v16   ;;  %11131 = vmatprep.subr.mxu0 %v16912_v33  ;;  %v3001_v60 = vadd.f32 %v2985_v19, %v13381_v53  ;;  %v3251_v43 = vmul.f32 %v13303_v3, %v13266_v40  ;;  %v9763_v20 = vld [vmem:[%s16903_s5 + $0xc8] sm:$0xff]  ;;  %v9762_v50 = vld [vmem:[%s16903_s5 + $0xc0] sm:$0xff] }
 0x1a1   : > { %vm3437_vm7 = vcmp.ge.f32.partialorder %v3421_v18, 0.0  ;;  %v3453_v61 = vmul.f32 0.02, %v3421_v18  ;;  %5138 = vperm.xlu0 %12463, %v5063_v35   ;;  %11097 = vmatpush3.msra.mxu1 %v9764_v34  ;;  %v1798_v49 = vld [vmem:[%s16903_s5 + $0x48] sm:$0xff]  ;;  %v3135_v16 = vadd.f32 %v3119_v29, %v3002_v14  ;;  %v3004_v40 = vadd.f32 %v2988_v36, %v13399_v1  ;;  %v5196_v1 = vld [vmem:[%s12551_s23 + $0x171] sm:$0xff] }
 0x1a2   : > { %v3470_v57 = vsel %vm3438_vm6, %v3422_v48, %v3454_v22  ;;  %v13446_v55 = vpop.permute.xlu1 %3107  ;;  %11132 = vmatpush3.msra.mxu0 %v1799_v17  ;;  %11098 = vmatprep.subr.mxu1 %v16912_v33  ;;  %v3003_v53 = vadd.f32 %v2987_v28, %v2854_v39  ;;  %v3134_v32 = vadd.f32 %v3118_v10, %v3001_v60  ;;  %v1797_v39 = vld [vmem:[%s16903_s5 + $0x40] sm:$0xff]  ;;  %v9761_v17 = vld [vmem:[%s16903_s5 + $0xb8] sm:$0xff] }
 0x1a3   : > { %v13448_v62 = vpop.permute.xlu0 %3102  ;;  %3486 = vst.msk [vmem:[#allocation2 + $0x18] sm:$0xff] %vm1124_vm0, %v3470_v57  ;;  %v3469_v41 = vsel %vm3437_vm7, %v3421_v18, %v3453_v61  ;;  %11133 = vmatprep.subr.mxu0 %v16912_v33  ;;  %v3121_v48 = vmul.f32 %v13288_v8, %v13197_v44  ;;  %v3120_v35 = vmul.f32 %v13288_v8, %v13199_v12 }
 0x1a4   : > { %3485 = vst.msk [vmem:[#allocation2 + $0x10] sm:$0xff] %vm1124_vm0, %v3469_v41  ;;  %5266 = vperm.xlu1 %12464, %v5195_v38   ;;  %v3268_v37 = vadd.f32 %v3252_v25, %v3135_v16  ;;  %11099 = vmatpush3.msra.mxu1 %v9763_v20  ;;  %v3267_v18 = vadd.f32 %v3251_v43, %v3134_v32  ;;  %v5453_v38 = vld [vmem:[%s12551_s23 + $0x12b] sm:$0xff] }
 0x1a5   : > { %5261 = vperm.xlu0 %12463, %v5194_v31   ;;  %11134 = vmatpush3.msra.mxu0 %v1798_v49  ;;  %v3254_v22 = vmul.f32 %v13303_v3, %v13269_v54  ;;  %v3253_v34 = vmul.f32 %v13303_v3, %v13272_v27  ;;  %v1796_v54 = vld [vmem:[%s16903_s5 + $0x38] sm:$0xff]  ;;  %v3137_v14 = vadd.f32 %v3121_v48, %v3004_v40  ;;  %v5452_v31 = vld [vmem:[%s12551_s23 + $0x123] sm:$0xff]  ;;  %v9760_v49 = vld [vmem:[%s16903_s5 + $0xb0] sm:$0xff] }
 0x1a6   : > { %v3324_v19 = vpop.permute.xlu1 %3323  ;;  %11100 = vmatprep.subr.mxu1 %v16912_v33  ;;  %11135 = vmatprep.subr.mxu0 %v16912_v33  ;;  %v3136_v25 = vadd.f32 %v3120_v35, %v3003_v53 }
 0x1a7   : > { %v3319_v5 = vpop.permute.xlu0 %3318  ;;  %v3385_v36 = vmul.f32 %v13334_v13, %v3324_v19  ;;  %v3499_v44 = vld [vmem:[#allocation2] ss:$2 sm:$0xff]  ;;  %v3507_v12 = vld [vmem:[#allocation2 + $0x1] ss:$2 sm:$0xff]  ;;  %11101 = vmatpush3.msra.mxu1 %v9762_v50  ;;  %11136 = vmatpush3.msra.mxu0 %v1797_v39  ;;  %v3270_v53 = vadd.f32 %v3254_v22, %v3137_v14  ;;  %v1795_v50 = vld [vmem:[%s16903_s5 + $0x30] sm:$0xff]  ;;  %v2990_v22 = vmul.f32 %v13278_v7, %v13215_v23 }
 0x1a8   : > { %v3384_v29 = vmul.f32 %v13334_v13, %v3319_v5  ;;  %5276 = vperm.xlu1 %12464, %v5197_v9   ;;  %v3515_v28 = vmax.f32 %v3499_v44, %v3507_v12  ;;  %11102 = vmatprep.subr.mxu1 %v16912_v33  ;;  %v3269_v32 = vadd.f32 %v3253_v34, %v3136_v25  ;;  %v5455_v9 = vld [vmem:[%s12551_s23 + $0x13b] sm:$0xff]  ;;  %v9759_v44 = vld [vmem:[%s16903_s5 + $0xa8] sm:$0xff] }
 0x1a9   : > { %v3401_v10 = vadd.f32 %v3385_v36, %v3268_v37  ;;  %5271 = vperm.xlu0 %12463, %v5196_v1   ;;  %11137 = vmatprep.subr.mxu0 %v16912_v33  ;;  %v1794_v12 = vld [vmem:[%s16903_s5 + $0x28] sm:$0xff]  ;;  %v2991_v23 = vmul.f32 %v13278_v7, %v13223_v51  ;;  %v1793_v14 = vld [vmem:[%s16903_s5 + $0x20] sm:$0xff]  ;;  %v2857_v51 = vmul.f32 %v13283_v21, %v13203_v45  ;;  %v9757_v45 = vld [vmem:[%s16903_s5 + $0x98] sm:$0xff] }
 0x1aa   : > { %v3400_v61 = vadd.f32 %v3384_v29, %v3267_v18  ;;  %3523 = vst.msk [vmem:[#allocation3] sm:$0xff] %vm1124_vm0, %v3515_v28  ;;  %11103 = vmatpush3.msra.mxu1 %v9761_v17  ;;  %11138 = vmatpush3.msra.mxu0 %v1796_v54  ;;  %v5454_v18 = vld [vmem:[%s12551_s23 + $0x133] sm:$0xff]  ;;  %v5324_v28 = vld [vmem:[%s12551_s23 + $0x14a] sm:$0xff]  ;;  %v9758_v54 = vld [vmem:[%s16903_s5 + $0xa0] sm:$0xff] }
 0x1ab   : > { %v3334_v57 = vpop.permute.xlu1 %3333  ;;  %v3329_v27 = vpop.permute.xlu0 %3328  ;;  %v3424_v60 = vadd.f32 %v13364_v30, %v3401_v10  ;;  %v3500_v16 = vld [vmem:[#allocation2 + $0x10] ss:$2 sm:$0xff]  ;;  %v3508_v40 = vld [vmem:[#allocation2 + $0x11] ss:$2 sm:$0xff]  ;;  %11104 = vmatprep.subr.mxu1 %v16912_v33  ;;  %11139 = vmatprep.subr.mxu0 %v16912_v33  ;;  %v2989_v10 = vmul.f32 %v13278_v7, %v13217_v24 }
 0x1ac   : > { %v3423_v43 = vadd.f32 %v13364_v30, %v3400_v61  ;;  %v3387_v41 = vmul.f32 %v13334_v13, %v3334_v57  ;;  %v3386_v20 = vmul.f32 %v13334_v13, %v3329_v27  ;;  %5492 = vperm.xlu1 %12464, %v5453_v38   ;;  %v3516_v48 = vmax.f32 %v3500_v16, %v3508_v40  ;;  %v5323_v38 = vld [vmem:[%s12551_s23 + $0x142] sm:$0xff] }
 0x1ad   : > { %vm3440_vm8 = vcmp.ge.f32.partialorder %v3424_v60, 0.0  ;;  %v3456_v35 = vmul.f32 0.02, %v3424_v60  ;;  %5487 = vperm.xlu0 %12463, %v5452_v31   ;;  %11105 = vmatpush3.msra.mxu1 %v9760_v49  ;;  %v2992_v61 = vmul.f32 %v13278_v7, %v13221_v42  ;;  %v2856_v27 = vmul.f32 %v13283_v21, %v13205_v26  ;;  %v1792_v26 = vld [vmem:[%s16903_s5 + $0x18] sm:$0xff] }
 0x1ae   : > { %vm3439_vm9 = vcmp.ge.f32.partialorder %v3423_v43, 0.0  ;;  %v3455_v37 = vmul.f32 0.02, %v3423_v43  ;;  %v3403_v19 = vadd.f32 %v3387_v41, %v3270_v53  ;;  %v3402_v5 = vadd.f32 %v3386_v20, %v3269_v32  ;;  %3524 = vst.msk [vmem:[#allocation3 + $0x8] sm:$0xff] %vm1124_vm0, %v3516_v48  ;;  %11140 = vmatpush3.msra.mxu0 %v1795_v50  ;;  %11106 = vmatprep.subr.mxu1 %v16912_v33  ;;  %v9756_v50 = vld [vmem:[%s16903_s5 + $0x90] sm:$0xff] }
 0x1af   : > { %v13511_v1 = vpop.permute.xlu1 %3210  ;;  %v13513_v39 = vpop.permute.xlu0 %3205  ;;  %v3472_v36 = vsel %vm3440_vm8, %v3424_v60, %v3456_v35  ;;  %11141 = vmatprep.subr.mxu0 %v16912_v33  ;;  %11107 = vmatpush3.msra.mxu1 %v9759_v44  ;;  %v2859_v31 = vmul.f32 %v13283_v21, %v13209_v59  ;;  %v2858_v60 = vmul.f32 %v13283_v21, %v13211_v6  ;;  %v5326_v6 = vld [vmem:[%s12551_s23 + $0x15a] sm:$0xff] }
 0x1b0   : > { %v3471_v29 = vsel %vm3439_vm9, %v3423_v43, %v3455_v37  ;;  %3488 = vst.msk [vmem:[#allocation2 + $0x28] sm:$0xff] %vm1124_vm0, %v3472_v36  ;;  %v3426_v34 = vadd.f32 %v13364_v30, %v3403_v19  ;;  %v3425_v17 = vadd.f32 %v13364_v30, %v3402_v5  ;;  %5502 = vperm.xlu1 %12464, %v5455_v9   ;;  %v5325_v9 = vld [vmem:[%s12551_s23 + $0x152] sm:$0xff] }
 0x1b1   : > { %3487 = vst.msk [vmem:[#allocation2 + $0x20] sm:$0xff] %vm1124_vm0, %v3471_v29  ;;  %5497 = vperm.xlu0 %12463, %v5454_v18   ;;  %11142 = vmatpush3.msra.mxu0 %v1794_v12  ;;  %v3006_v59 = vadd.f32 %v2990_v22, %v2857_v51  ;;  %v3005_v20 = vadd.f32 %v2989_v10, %v2856_v27  ;;  %v1791_v37 = vld [vmem:[%s16903_s5 + $0x10] sm:$0xff]  ;;  %v16925_v12 = vld [vmem:[#allocation9_spill] sm:$0xff]  ;;  %v5584_v27 = vld [vmem:[%s12551_s23 + $0x11c] sm:$0xff] }
 0x1b2   : > { %vm3442_vm10 = vcmp.ge.f32.partialorder %v3426_v34, 0.0  ;;  %v3458_v24 = vmul.f32 0.02, %v3426_v34  ;;  %vm3441_vm11 = vcmp.ge.f32.partialorder %v3425_v17, 0.0  ;;  %v3457_v25 = vmul.f32 0.02, %v3425_v17  ;;  %11108 = vmatprep.subr.mxu1 %v16912_v33  ;;  %11143 = vmatprep.subr.mxu0 %v16912_v33 }
 0x1b3   : > { %v13546_v42 = vpop.permute.xlu1 %3220  ;;  %v13548_v57 = vpop.permute.xlu0 %3215  ;;  %11109 = vmatpush3.msra.mxu1 %v9758_v54  ;;  %11144 = vmatpush3.msra.mxu0 %v1793_v14  ;;  %v3008_v49 = vadd.f32 %v2992_v61, %v2859_v31  ;;  %v13569_v16 = vadd.f32 %v2991_v23, %v2858_v60  ;;  %v2994_v40 = vmul.f32 %v13278_v7, %v13251_v47  ;;  %v9754_v61 = vld [vmem:[%s16903_s5 + $0x80] sm:$0xff]  ;;  %v16927_v54 = vld [vmem:[#allocation6_spill] sm:$0xff] }
 0x1b4   : > { %v3474_v43 = vsel %vm3442_vm10, %v3426_v34, %v3458_v24  ;;  %v3473_v41 = vsel %vm3441_vm11, %v3425_v17, %v3457_v25  ;;  %5379 = vperm.xlu1 %12464, %v5324_v28   ;;  %11110 = vmatprep.subr.mxu1 %v16912_v33  ;;  %v2861_v48 = vmul.f32 %v13283_v21, %v13239_v58  ;;  %v1790_v34 = vld [vmem:[%s16903_s5 + $0x8] sm:$0xff]  ;;  %v16926_v28 = vld [vmem:[#allocation8_spill] sm:$0xff] }
 0x1b5   : > { %3490 = vst.msk [vmem:[#allocation2 + $0x38] sm:$0xff] %vm1124_vm0, %v3474_v43  ;;  %3489 = vst.msk [vmem:[#allocation2 + $0x30] sm:$0xff] %vm1124_vm0, %v3473_v41  ;;  %5374 = vperm.xlu0 %12463, %v5323_v38   ;;  %11145 = vmatprep.subr.mxu0 %v16912_v33  ;;  %v2860_v35 = vmul.f32 %v13283_v21, %v13242_v2  ;;  %v2993_v47 = vmul.f32 %v13278_v7, %v13254_v46 }
 0x1b6   : > { %11111 = vmatpush3.msra.mxu1 %v9757_v45  ;;  %11146 = vmatpush3.msra.mxu0 %v1792_v26  ;;  %v2996_v18 = vmul.f32 %v13278_v7, %v13257_v4  ;;  %v3123_v58 = vmul.f32 %v13288_v8, %v13290_v15  ;;  %v2863_v46 = vmul.f32 %v13283_v21, %v13245_v63  ;;  %v5582_v4 = vld [vmem:[%s12551_s23 + $0x10c] sm:$0xff] }
 0x1b7   : > { %v13573_v53 = vpop.permute.xlu1 %3230  ;;  %v13575_v32 = vpop.permute.xlu0 %3225  ;;  %11112 = vmatprep.subr.mxu1 %v16912_v33  ;;  %v13601_v36 = vmul.f32 %v13283_v21, %v13248_v0  ;;  %v3122_v29 = vmul.f32 %v13288_v8, %v13295_v11  ;;  %11147 = vmatprep.subr.mxu0 %v16912_v33  ;;  %v9755_v15 = vld [vmem:[%s16903_s5 + $0x88] sm:$0xff]  ;;  %v3010_v44 = vadd.f32 %v2994_v40, %v2861_v48 }
 0x1b8   : > { %v3501_v19 = vld [vmem:[#allocation2 + $0x20] ss:$2 sm:$0xff]  ;;  %v3509_v5 = vld [vmem:[#allocation2 + $0x21] ss:$2 sm:$0xff]  ;;  %5389 = vperm.xlu1 %12464, %v5326_v6   ;;  %v3125_v22 = vmul.f32 %v13288_v8, %v16925_v12  ;;  %v3256_v63 = vmul.f32 %v13303_v3, %v13511_v1  ;;  %11113 = vmatpush3.msra.mxu1 %v9756_v50  ;;  %v3009_v17 = vadd.f32 %v2993_v47, %v2860_v35 }
 0x1b9   : > { %v3517_v2 = vmax.f32 %v3501_v19, %v3509_v5  ;;  %5384 = vperm.xlu0 %12463, %v5325_v9   ;;  %v5581_v11 = vld [vmem:[%s12551_s23 + $0x104] sm:$0xff]  ;;  %11148 = vmatpush3.msra.mxu0 %v1791_v37  ;;  %v13625_v10 = vmul.f32 %v13278_v7, %v16926_v28  ;;  %v3255_v1 = vmul.f32 %v13303_v3, %v13513_v39 }
 0x1ba   : > { %11114 = vmatprep.subr.mxu1 %v16912_v33  ;;  %11149 = vmatprep.subr.mxu0 %v16912_v33  ;;  %v13634_v23 = vadd.f32 %v2996_v18, %v2863_v46  ;;  %v3139_v38 = vadd.f32 %v3123_v58, %v3006_v59  ;;  %v3124_v14 = vmul.f32 %v13288_v8, %v16927_v54  ;;  %v1789_v7 = vld [vmem:[%s16903_s5] sm:$0xff]  ;;  %v5583_v59 = vld [vmem:[%s12551_s23 + $0x114] sm:$0xff]  ;;  %v5328_v35 = vld [vmem:[%s12551_s23 + $0x16a] sm:$0xff] }
 0x1bb   : > { %v13614_v0 = vpop.permute.xlu1 %3240  ;;  %v13616_v21 = vpop.permute.xlu0 %3235  ;;  %3525 = vst.msk [vmem:[#allocation3 + $0x10] sm:$0xff] %vm1124_vm0, %v3517_v2  ;;  %11115 = vmatpush3.msra.mxu1 %v9755_v15  ;;  %v3138_v25 = vadd.f32 %v3122_v29, %v3005_v20  ;;  %v3127_v51 = vmul.f32 %v13288_v8, %v13404_v52  ;;  %11150 = vmatpush3.msra.mxu0 %v1790_v34  ;;  %v5327_v19 = vld [vmem:[%s12551_s23 + $0x162] sm:$0xff] }
 0x1bc   : > { %5605 = vperm.xlu1 %12464, %v5582_v4   ;;  %v3502_v39 = vld [vmem:[#allocation2 + $0x30] ss:$2 sm:$0xff]  ;;  %v3510_v24 = vld [vmem:[#allocation2 + $0x31] ss:$2 sm:$0xff]  ;;  %v3141_v60 = vadd.f32 %v3125_v22, %v3008_v49  ;;  %v3126_v43 = vmul.f32 %v13288_v8, %v13414_v56  ;;  %v3272_v41 = vadd.f32 %v3256_v63, %v3139_v38  ;;  %11116 = vmatprep.subr.mxu1 %v16912_v33 }
 0x1bd   : > { %5600 = vperm.xlu0 %12463, %v5581_v11   ;;  %v3518_v31 = vmax.f32 %v3502_v39, %v3510_v24  ;;  %11151 = vmatprep.subr.mxu0 %v16912_v33  ;;  %v3271_v20 = vadd.f32 %v3255_v1, %v3138_v25  ;;  %v3140_v56 = vadd.f32 %v3124_v14, %v13569_v16  ;;  %v5330_v4 = vld [vmem:[%s12551_s23 + $0x17a] sm:$0xf] }
 0x1be   : > { %11117 = vmatpush3.msra.mxu1 %v9754_v61  ;;  %11152 = vmatpush3.msra.mxu0 %v1789_v7  ;;  %v3258_v49 = vmul.f32 %v13303_v3, %v13546_v42  ;;  %v3257_v40 = vmul.f32 %v13303_v3, %v13548_v57  ;;  %v3143_v9 = vadd.f32 %v3127_v51, %v3010_v44 }
 0x1bf   : > { %v3344_v45 = vpop.permute.xlu1 %3343  ;;  %v3339_v26 = vpop.permute.xlu0 %3338  ;;  %3526 = vst.msk [vmem:[#allocation3 + $0x18] sm:$0xff] %vm1124_vm0, %v3518_v31  ;;  %v3142_v16 = vadd.f32 %v3126_v43, %v3009_v17  ;;  %v3260_v42 = vmul.f32 %v13303_v3, %v13573_v53  ;;  %v3259_v57 = vmul.f32 %v13303_v3, %v13575_v32  ;;  %11156 = vmatprep.subr.mxu1 %v16912_v33 }
 0x1c0   : > { %v3389_v52 = vmul.f32 %v13334_v13, %v3344_v45  ;;  %v3388_v6 = vmul.f32 %v13334_v13, %v3339_v26  ;;  %5615 = vperm.xlu1 %12464, %v5584_v27   ;;  %11191 = vmatprep.subr.mxu0 %v16912_v33  ;;  %v3129_v53 = vmul.f32 %v13288_v8, %v13446_v55  ;;  %v5329_v55 = vld [vmem:[%s12551_s23 + $0x172] sm:$0xff]  ;;  %v5588_v26 = vld [vmem:[%s12551_s23 + $0x13c] sm:$0xff] }
 0x1c1   : > { %5610 = vperm.xlu0 %12463, %v5583_v59   ;;  %v3128_v32 = vmul.f32 %v13288_v8, %v13448_v62  ;;  %v3274_v46 = vadd.f32 %v3258_v49, %v3141_v60  ;;  %v3273_v29 = vadd.f32 %v3257_v40, %v3140_v56  ;;  %v3276_v12 = vadd.f32 %v3260_v42, %v3143_v9  ;;  %v5587_v49 = vld [vmem:[%s12551_s23 + $0x134] sm:$0xff] }
 0x1c2   : > { %v3405_v50 = vadd.f32 %v3389_v52, %v3272_v41  ;;  %v3404_v48 = vadd.f32 %v3388_v6, %v3271_v20  ;;  %v3275_v22 = vadd.f32 %v3259_v57, %v3142_v16  ;;  %v3011_v61 = vadd.f32 %v13625_v10, %v13601_v36  ;;  %v5586_v36 = vld [vmem:[%s12551_s23 + $0x12c] sm:$0xff] }
 0x1c3   : > { %v3354_v47 = vpop.permute.xlu1 %3353  ;;  %v3349_v37 = vpop.permute.xlu0 %3348  ;;  %v3262_v38 = vmul.f32 %v13303_v3, %v13614_v0  ;;  %v3145_v7 = vadd.f32 %v3129_v53, %v13634_v23  ;;  %v3261_v39 = vmul.f32 %v13303_v3, %v13616_v21  ;;  %v5585_v0 = vld [vmem:[%s12551_s23 + $0x124] sm:$0xff] }
 0x1c4   : > { %v3428_v5 = vadd.f32 %v13364_v30, %v3405_v50  ;;  %v3427_v18 = vadd.f32 %v13364_v30, %v3404_v48  ;;  %v3391_v58 = vmul.f32 %v13334_v13, %v3354_v47  ;;  %v3390_v2 = vmul.f32 %v13334_v13, %v3349_v37  ;;  %5399 = vperm.xlu1 %12464, %v5328_v35  }
 0x1c5   : > { %5394 = vperm.xlu0 %12463, %v5327_v19   ;;  %v3144_v27 = vadd.f32 %v3128_v32, %v3011_v61  ;;  %v3278_v23 = vadd.f32 %v3262_v38, %v3145_v7  ;;  %v5459_v32 = vld [vmem:[%s12551_s23 + $0x15b] sm:$0xff]  ;;  %v5590_v7 = vld [vmem:[%s12551_s23 + $0x14c] sm:$0xff] }
 0x1c6   : > { %vm3444_vm13 = vcmp.ge.f32.partialorder %v3428_v5, 0.0  ;;  %v3460_v15 = vmul.f32 0.02, %v3428_v5  ;;  %vm3443_vm14 = vcmp.ge.f32.partialorder %v3427_v18, 0.0  ;;  %v3459_v44 = vmul.f32 0.02, %v3427_v18 }
 0x1c7   : > { %v3407_v63 = vadd.f32 %v3391_v58, %v3274_v46  ;;  %v3406_v11 = vadd.f32 %v3390_v2, %v3273_v29  ;;  %v3364_v34 = vpop.permute.xlu1 %3363  ;;  %v3359_v17 = vpop.permute.xlu0 %3358  ;;  %v3277_v52 = vadd.f32 %v3261_v39, %v3144_v27  ;;  %v5589_v39 = vld [vmem:[%s12551_s23 + $0x144] sm:$0xff]  ;;  %v5594_v27 = vld [vmem:[%s12551_s23 + $0x16c] sm:$0xff] }
 0x1c8   : > { %v3476_v28 = vsel %vm3444_vm13, %v3428_v5, %v3460_v15  ;;  %v3475_v8 = vsel %vm3443_vm14, %v3427_v18, %v3459_v44  ;;  %v3393_v62 = vmul.f32 %v13334_v13, %v3364_v34  ;;  %v3392_v1 = vmul.f32 %v13334_v13, %v3359_v17  ;;  %5409 = vperm.xlu1 %12464, %v5330_v4   ;;  %v5456_v5 = vld [vmem:[%s12551_s23 + $0x143] sm:$0xff]  ;;  %v5458_v4 = vld [vmem:[%s12551_s23 + $0x153] sm:$0xff]  ;;  %v5461_v34 = vld [vmem:[%s12551_s23 + $0x16b] sm:$0xff] }
 0x1c9   : > { %3492 = vst.msk [vmem:[#allocation2 + $0x48] sm:$0xff] %vm1124_vm0, %v3476_v28  ;;  %3491 = vst.msk [vmem:[#allocation2 + $0x40] sm:$0xff] %vm1124_vm0, %v3475_v8  ;;  %v3430_v54 = vadd.f32 %v13364_v30, %v3407_v63  ;;  %v3429_v14 = vadd.f32 %v13364_v30, %v3406_v11  ;;  %5404 = vperm.xlu0 %12463, %v5329_v55   ;;  %v5460_v17 = vld [vmem:[%s12551_s23 + $0x163] sm:$0xff]  ;;  %v5463_v8 = vld [vmem:[%s12551_s23 + $0x17b] sm:$0xf] }
 0x1ca   : > { %v3409_v24 = vadd.f32 %v3393_v62, %v3276_v12  ;;  %v3408_v25 = vadd.f32 %v3392_v1, %v3275_v22  ;;  %v5462_v62 = vld [vmem:[%s12551_s23 + $0x173] sm:$0xff] }
 0x1cb   : > { %vm3446_vm1 = vcmp.ge.f32.partialorder %v3430_v54, 0.0  ;;  %v3462_v10 = vmul.f32 0.02, %v3430_v54  ;;  %vm3445_vm2 = vcmp.ge.f32.partialorder %v3429_v14, 0.0  ;;  %v3461_v51 = vmul.f32 0.02, %v3429_v14  ;;  %v3374_v43 = vpop.permute.xlu1 %3373 }
 0x1cc   : > { %v3432_v31 = vadd.f32 %v13364_v30, %v3409_v24  ;;  %v3431_v60 = vadd.f32 %v13364_v30, %v3408_v25  ;;  %v3395_v21 = vmul.f32 %v13334_v13, %v3374_v43  ;;  %v3369_v45 = vpop.permute.xlu0 %3368  ;;  %5625 = vperm.xlu1 %12464, %v5586_v36   ;;  %v5592_v36 = vld [vmem:[%s12551_s23 + $0x15c] sm:$0xff] }
 0x1cd   : > { %v3478_v41 = vsel %vm3446_vm1, %v3430_v54, %v3462_v10  ;;  %v3477_v3 = vsel %vm3445_vm2, %v3429_v14, %v3461_v51  ;;  %5620 = vperm.xlu0 %12463, %v5585_v0   ;;  %v3394_v56 = vmul.f32 %v13334_v13, %v3369_v45  ;;  %v5457_v13 = vld [vmem:[%s12551_s23 + $0x14b] sm:$0xff]  ;;  %v5591_v0 = vld [vmem:[%s12551_s23 + $0x154] sm:$0xff] }
 0x1ce   : > { %3494 = vst.msk [vmem:[#allocation2 + $0x58] sm:$0xff] %vm1124_vm0, %v3478_v41  ;;  %3493 = vst.msk [vmem:[#allocation2 + $0x50] sm:$0xff] %vm1124_vm0, %v3477_v3  ;;  %vm3448_vm4 = vcmp.ge.f32.partialorder %v3432_v31, 0.0  ;;  %v3464_v59 = vmul.f32 0.02, %v3432_v31  ;;  %vm3447_vm5 = vcmp.ge.f32.partialorder %v3431_v60, 0.0  ;;  %v3411_v6 = vadd.f32 %v3395_v21, %v3278_v23 }
 0x1cf   : > { %v3463_v20 = vmul.f32 0.02, %v3431_v60  ;;  %v13702_v50 = vpop.permute.xlu1 %5073  ;;  %v3410_v16 = vadd.f32 %v3394_v56, %v3277_v52  ;;  %v5596_v23 = vld [vmem:[%s12551_s23 + $0x17c] sm:$0xf]  ;;  %v5595_v41 = vld [vmem:[%s12551_s23 + $0x174] sm:$0xff]  ;;  %v7352_v45 = vld [vmem:[%s12551_s23 + $0x188] sm:$0xff] }
 0x1d0   : > { %v3480_v40 = vsel %vm3448_vm4, %v3432_v31, %v3464_v59  ;;  %v3503_v48 = vld [vmem:[#allocation2 + $0x40] ss:$2 sm:$0xff]  ;;  %v3434_v35 = vadd.f32 %v13364_v30, %v3411_v6  ;;  %v13707_v42 = vpop.permute.xlu0 %5068  ;;  %5635 = vperm.xlu1 %12464, %v5588_v26   ;;  %v3511_v57 = vld [vmem:[#allocation2 + $0x41] ss:$2 sm:$0xff]  ;;  %v7354_v52 = vld [vmem:[%s12551_s23 + $0x198] sm:$0xff] }
 0x1d1   : > { %v3479_v9 = vsel %vm3447_vm5, %v3431_v60, %v3463_v20  ;;  %3496 = vst.msk [vmem:[#allocation2 + $0x68] sm:$0xff] %vm1124_vm0, %v3480_v40  ;;  %5630 = vperm.xlu0 %12463, %v5587_v49   ;;  %v3519_v47 = vmax.f32 %v3503_v48, %v3511_v57  ;;  %v3433_v19 = vadd.f32 %v13364_v30, %v3410_v16  ;;  %v5593_v31 = vld [vmem:[%s12551_s23 + $0x164] sm:$0xff]  ;;  %v7353_v6 = vld [vmem:[%s12551_s23 + $0x190] sm:$0xff]  ;;  %v7487_v16 = vld [vmem:[%s12551_s23 + $0x199] sm:$0xff] }
 0x1d2   : > { %3495 = vst.msk [vmem:[#allocation2 + $0x60] sm:$0xff] %vm1124_vm0, %v3479_v9  ;;  %vm3450_vm6 = vcmp.ge.f32.partialorder %v3434_v35, 0.0  ;;  %v3466_v37 = vmul.f32 0.02, %v3434_v35  ;;  %v7351_v26 = vld [vmem:[%s12551_s23 + $0x180] sm:$0xff]  ;;  %v7485_v40 = vld [vmem:[%s12551_s23 + $0x189] sm:$0xff] }
 0x1d3   : > { %v13712_v18 = vpop.permute.xlu1 %5083  ;;  %3527 = vst.msk [vmem:[#allocation3 + $0x20] sm:$0xff] %vm1124_vm0, %v3519_v47  ;;  %vm3449_vm7 = vcmp.ge.f32.partialorder %v3433_v19, 0.0  ;;  %v3465_v2 = vmul.f32 0.02, %v3433_v19  ;;  %v7484_v9 = vld [vmem:[%s12551_s23 + $0x181] sm:$0xff]  ;;  %v7486_v57 = vld [vmem:[%s12551_s23 + $0x191] sm:$0xff] }
 0x1d4   : > { %v3482_v58 = vsel %vm3450_vm6, %v3434_v35, %v3466_v37  ;;  %v13715_v53 = vpop.permute.xlu0 %5078  ;;  %5512 = vperm.xlu1 %12464, %v5457_v13  }
 0x1d5   : > { %3498 = vst.msk [vmem:[#allocation2 + $0x78] sm:$0xf] %vm1140_vm15, %v3482_v58  ;;  %5507 = vperm.xlu0 %12463, %v5456_v5   ;;  %v3504_v46 = vld [vmem:[#allocation2 + $0x50] ss:$2 sm:$0xff]  ;;  %v3512_v29 = vld [vmem:[#allocation2 + $0x51] ss:$2 sm:$0xff]  ;;  %v3481_v30 = vsel %vm3449_vm7, %v3433_v19, %v3465_v2 }
 0x1d6   : > { %v3520_v15 = vmax.f32 %v3504_v46, %v3512_v29  ;;  %3497 = vst.msk [vmem:[#allocation2 + $0x70] sm:$0xff] %vm1124_vm0, %v3481_v30  ;;  %v7356_v5 = vld [vmem:[%s12551_s23 + $0x1a8] sm:$0xff]  ;;  %v7355_v58 = vld [vmem:[%s12551_s23 + $0x1a0] sm:$0xff]  ;;  %v7358_v30 = vld [vmem:[%s12551_s23 + $0x1b8] sm:$0xff] }
 0x1d7   : > { %v13721_v44 = vpop.permute.xlu1 %5206 }
 0x1d8   : > { %v13723_v63 = vpop.permute.xlu0 %5201  ;;  %5522 = vperm.xlu1 %12464, %v5459_v32   ;;  %3528 = vst.msk [vmem:[#allocation3 + $0x28] sm:$0xff] %vm1124_vm0, %v3520_v15 }
 0x1d9   : > { %v3505_v12 = vld [vmem:[#allocation2 + $0x60] ss:$2 sm:$0xff]  ;;  %v3513_v22 = vld [vmem:[#allocation2 + $0x61] ss:$2 sm:$0xff]  ;;  %5517 = vperm.xlu0 %12463, %v5458_v4  }
 0x1da   : > { %v3521_v11 = vmax.f32 %v3505_v12, %v3513_v22  ;;  %v7357_v12 = vld [vmem:[%s12551_s23 + $0x1b0] sm:$0xff] }
 0x1db   : > { %v13729_v55 = vpop.permute.xlu1 %5216 }
 0x1dc   : > { %3529 = vst.msk [vmem:[#allocation3 + $0x30] sm:$0xff] %vm1124_vm0, %v3521_v11  ;;  %v13731_v28 = vpop.permute.xlu0 %5211  ;;  %5532 = vperm.xlu1 %12464, %v5461_v34  }
 0x1dd   : > { %5527 = vperm.xlu0 %12463, %v5460_v17   ;;  %v3506_v1 = vld [vmem:[#allocation2 + $0x70] ss:$2 sm:$0x3f]  ;;  %v3514_v38 = vld [vmem:[#allocation2 + $0x71] ss:$2 sm:$0x3f] }
 0x1de   : > { %v3522_v14 = vmax.f32 %v3506_v1, %v3514_v38  ;;  %v7488_v1 = vld [vmem:[%s12551_s23 + $0x1a1] sm:$0xff] }
 0x1df   : > { %v13735_v61 = vpop.permute.xlu1 %5093 }
 0x1e0   : > { %v13737_v54 = vpop.permute.xlu0 %5088  ;;  %5542 = vperm.xlu1 %12464, %v5463_v8   ;;  %3530 = vst.msk [vmem:[#allocation3 + $0x38] sm:$0x3f] %vm1188_vm3, %v3522_v14  ;;  %v7489_v8 = vld [vmem:[%s12551_s23 + $0x1a9] sm:$0xff] }
 0x1e1   : > { %5537 = vperm.xlu0 %12463, %v5462_v62  }
 0x1e3   : > { %v13742_v24 = vpop.permute.xlu1 %5103 }
 0x1e4   : > { %v13744_v25 = vpop.permute.xlu0 %5098  ;;  %5645 = vperm.xlu1 %12464, %v5590_v7  }
 0x1e5   : > { %5640 = vperm.xlu0 %12463, %v5589_v39  }
 0x1e6   : > { %v11026_v13 = vpop.f32.mrf.mxu0  ;;  %v11040_v37 = vpop.f32.mrf.mxu1 }
 0x1e7   : > { %v13748_v10 = vpop.permute.xlu1 %5226  ;;  %v1395_v39 = vadd.f32 %v11040_v37, %v11026_v13 }
 0x1e8   : > { %v13750_v51 = vpop.permute.xlu0 %5221  ;;  %5655 = vperm.xlu1 %12464, %v5592_v36   ;;  %v1292_v2 = vpop.f32.mrf.mxu0 }
 0x1e9   : > { %5650 = vperm.xlu0 %12463, %v5591_v0   ;;  %v1389_v46 = vpop.f32.mrf.mxu1  ;;  %v7491_v0 = vld [vmem:[%s12551_s23 + $0x1b9] sm:$0xff] }
 0x1eb   : > { %v13754_v60 = vpop.permute.xlu1 %5236 }
 0x1ec   : > { %v13756_v43 = vpop.permute.xlu0 %5231  ;;  %5665 = vperm.xlu1 %12464, %v5594_v27  }
 0x1ed   : > { %5660 = vperm.xlu0 %12463, %v5593_v31   ;;  %v7490_v31 = vld [vmem:[%s12551_s23 + $0x1b1] sm:$0xff] }
 0x1ef   : > { %v13760_v3 = vpop.permute.xlu1 %5339 }
 0x1f0   : > { %v13762_v21 = vpop.permute.xlu0 %5334  ;;  %5675 = vperm.xlu1 %12464, %v5596_v23   ;;  %v1390_v23 = vadd.f32 %v1389_v46, %v1292_v2  ;;  %v9753_v46 = vld [vmem:[%s16902_s4] ss:$0 sm:$0xff] }
 0x1f1   : > { %5670 = vperm.xlu0 %12463, %v5595_v41  }
 0x1f3   : > { %v13766_v59 = vpop.permute.xlu1 %5349 }
 0x1f4   : > { %v13768_v20 = vpop.permute.xlu0 %5344  ;;  %7375 = vperm.xlu1 %12464, %v7352_v45  }
 0x1f5   : > { %7370 = vperm.xlu0 %12463, %v7351_v26  }
 0x1f7   : > { %v13772_v56 = vpop.permute.xlu1 %5359 }
 0x1f8   : > { %v13774_v49 = vpop.permute.xlu0 %5354  ;;  %7385 = vperm.xlu1 %12464, %v7354_v52  }
 0x1f9   : > { %7380 = vperm.xlu0 %12463, %v7353_v6  }
 0x1fb   : > { %v13778_v48 = vpop.permute.xlu1 %5369 }
 0x1fc   : > { %v13780_v35 = vpop.permute.xlu0 %5364  ;;  %7508 = vperm.xlu1 %12464, %v7485_v40  }
 0x1fd   : > { %7503 = vperm.xlu0 %12463, %v7484_v9  }
 0x1ff   : > { %v13784_v47 = vpop.permute.xlu1 %5113 }
 0x200   : > { %v13786_v19 = vpop.permute.xlu0 %5108  ;;  %7518 = vperm.xlu1 %12464, %v7487_v16   ;;  %v7618_v16 = vld [vmem:[%s12551_s23 + $0x18a] sm:$0xff] }
 0x201   : > { %7513 = vperm.xlu0 %12463, %v7486_v57   ;;  %v7617_v57 = vld [vmem:[%s12551_s23 + $0x182] sm:$0xff] }
 0x203   : > { %v13790_v32 = vpop.permute.xlu1 %5123 }
 0x204   : > { %v13792_v29 = vpop.permute.xlu0 %5118  ;;  %7395 = vperm.xlu1 %12464, %v7356_v5  }
 0x205   : > { %7390 = vperm.xlu0 %12463, %v7355_v58  }
 0x206   : > { %v11029_v4 = vpop.f32.mrf.mxu0  ;;  %v11043_v15 = vpop.f32.mrf.mxu1 }
 0x207   : > { %v13796_v22 = vpop.permute.xlu1 %5246  ;;  %v1405_v6 = vadd.f32 %v11043_v15, %v11029_v4 }
 0x208   : > { %v13798_v11 = vpop.permute.xlu0 %5241  ;;  %7405 = vperm.xlu1 %12464, %v7358_v30   ;;  %v1302_v34 = vpop.f32.mrf.mxu0 }
 0x209   : > { %7400 = vperm.xlu0 %12463, %v7357_v12   ;;  %v1399_v17 = vpop.f32.mrf.mxu1 }
 0x20a   : > { %v11054_v62 = vpop.f32.mrf.mxu0  ;;  %v1400_v58 = vadd.f32 %v1399_v17, %v1302_v34 }
 0x20b   : > { %v13802_v38 = vpop.permute.xlu1 %5256  ;;  %v11068_v36 = vpop.f32.mrf.mxu1  ;;  %v1519_v41 = vadd.f32 %v11054_v62, %v1395_v39 }
 0x20c   : > { %v13804_v14 = vpop.permute.xlu0 %5251  ;;  %7528 = vperm.xlu1 %12464, %v7489_v8   ;;  %v1499_v7 = vpop.f32.mrf.mxu0  ;;  %v7620_v8 = vld [vmem:[%s12551_s23 + $0x19a] sm:$0xff] }
 0x20d   : > { %7523 = vperm.xlu0 %12463, %v7488_v1   ;;  %v1518_v40 = vadd.f32 %v1499_v7, %v1390_v23  ;;  %v1613_v9 = vpop.f32.mrf.mxu1  ;;  %v1633_v13 = vadd.f32 %v11068_v36, %v1519_v41  ;;  %v7619_v7 = vld [vmem:[%s12551_s23 + $0x192] sm:$0xff] }
 0x20e   : > { %v11057_v27 = vpop.f32.mrf.mxu0 }
 0x20f   : > { %v13808_v45 = vpop.permute.xlu1 %5472  ;;  %v1521_v37 = vadd.f32 %v11057_v27, %v1405_v6  ;;  %v1632_v4 = vadd.f32 %v1613_v9, %v1518_v40  ;;  %v11071_v15 = vpop.f32.mrf.mxu1 }
 0x210   : > { %v13810_v26 = vpop.permute.xlu0 %5467  ;;  %7538 = vperm.xlu1 %12464, %v7491_v0   ;;  %v1509_v52 = vpop.f32.mrf.mxu0 }
 0x211   : > { %7533 = vperm.xlu0 %12463, %v7490_v31   ;;  %v1520_v62 = vadd.f32 %v1509_v52, %v1400_v58  ;;  %v1635_v39 = vadd.f32 %v11071_v15, %v1521_v37  ;;  %v1623_v31 = vpop.f32.mrf.mxu1  ;;  %v7622_v52 = vld [vmem:[%s12551_s23 + $0x1aa] sm:$0xff] }
 0x213   : > { %v13814_v5 = vpop.permute.xlu1 %5482  ;;  %v1634_v40 = vadd.f32 %v1623_v31, %v1520_v62 }
 0x214   : > { %v11082_v2 = vpop.f32.mrf.mxu0  ;;  %v13819_v30 = vpop.permute.xlu0 %5477  ;;  %7641 = vperm.xlu1 %12464, %v7618_v16   ;;  %v7621_v16 = vld [vmem:[%s12551_s23 + $0x1a2] sm:$0xff] }
 0x215   : > { %v1747_v12 = vadd.f32 %v11082_v2, %v1633_v13  ;;  %7636 = vperm.xlu0 %12463, %v7617_v57  }
 0x216   : > { %v1727_v1 = vpop.f32.mrf.mxu0 }
 0x217   : > { %v1758_v34 = vadd.f32 %v9753_v46, %v1747_v12  ;;  %v1746_v17 = vadd.f32 %v1727_v1, %v1632_v4  ;;  %v13823_v36 = vpop.permute.xlu1 %5133  ;;  %v7623_v1 = vld [vmem:[%s12551_s23 + $0x1b2] sm:$0xff] }
 0x218   : > { %v11085_v0 = vpop.f32.mrf.mxu0  ;;  %v13825_v27 = vpop.permute.xlu0 %5128  ;;  %7651 = vperm.xlu1 %12464, %v7620_v8   ;;  %v7624_v8 = vld [vmem:[%s12551_s23 + $0x1ba] sm:$0xff] }
 0x219   : > { %vm1762_vm8 = vcmp.ge.f32.partialorder %v1758_v34, 0.0  ;;  %v1766_v23 = vmul.f32 0.02, %v1758_v34  ;;  %v1757_v41 = vadd.f32 %v9753_v46, %v1746_v17  ;;  %v1749_v6 = vadd.f32 %v11085_v0, %v1635_v39  ;;  %7646 = vperm.xlu0 %12463, %v7619_v7   ;;  %v7360_v0 = vld [vmem:[%s12551_s23 + $0x1c8] sm:$0xff] }
 0x21a   : > { %v1737_v9 = vpop.f32.mrf.mxu0 }
 0x21b   : > { %v1770_v57 = vsel %vm1762_vm8, %v1758_v34, %v1766_v23  ;;  %vm1761_vm9 = vcmp.ge.f32.partialorder %v1757_v41, 0.0  ;;  %v1765_v13 = vmul.f32 0.02, %v1757_v41  ;;  %v1760_v37 = vadd.f32 %v9753_v46, %v1749_v6  ;;  %v13829_v58 = vpop.permute.xlu1 %5143  ;;  %v7359_v23 = vld [vmem:[%s12551_s23 + $0x1c0] sm:$0xff] }
 0x21c   : > { %1774 = vst [vmem:[#allocation4 + $0x8] sm:$0xff] %v1770_v57  ;;  %v1748_v2 = vadd.f32 %v1737_v9, %v1634_v40  ;;  %v13831_v4 = vpop.permute.xlu0 %5138  ;;  %7661 = vperm.xlu1 %12464, %v7622_v52   ;;  %v7362_v40 = vld [vmem:[%s12551_s23 + $0x1d8] sm:$0xff]  ;;  %v7361_v9 = vld [vmem:[%s12551_s23 + $0x1d0] sm:$0xff] }
 0x21d   : > { %v1769_v15 = vsel %vm1761_vm9, %v1757_v41, %v1765_v13  ;;  %vm1764_vm10 = vcmp.ge.f32.partialorder %v1760_v37, 0.0  ;;  %v1768_v12 = vmul.f32 0.02, %v1760_v37  ;;  %7656 = vperm.xlu0 %12463, %v7621_v16  }
 0x21e   : > { %1773 = vst [vmem:[#allocation4] sm:$0xff] %v1769_v15  ;;  %v1759_v62 = vadd.f32 %v9753_v46, %v1748_v2  ;;  %v7492_v2 = vld [vmem:[%s12551_s23 + $0x1c1] sm:$0xff] }
 0x21f   : > { %v1772_v7 = vsel %vm1764_vm10, %v1760_v37, %v1768_v12  ;;  %v13835_v39 = vpop.permute.xlu1 %5266  ;;  %v7493_v37 = vld [vmem:[%s12551_s23 + $0x1c9] sm:$0xff] }
 0x220   : > { %1776 = vst [vmem:[#allocation4 + $0x18] sm:$0x1f] %v1772_v7  ;;  %vm1763_vm11 = vcmp.ge.f32.partialorder %v1759_v62, 0.0  ;;  %v1767_v34 = vmul.f32 0.02, %v1759_v62  ;;  %v13837_v17 = vpop.permute.xlu0 %5261  ;;  %7671 = vperm.xlu1 %12464, %v7624_v8  }
 0x221   : > { %7666 = vperm.xlu0 %12463, %v7623_v1   ;;  %v13860_v7 = vld [vmem:[%s16899_s1 + $0x1] ss:$0 sm:$0xff] }
 0x222   : > { %v1771_v31 = vsel %vm1763_vm11, %v1759_v62, %v1767_v34  ;;  %v7495_v34 = vld [vmem:[%s12551_s23 + $0x1d9] sm:$0xff] }
 0x223   : > { %1775 = vst [vmem:[#allocation4 + $0x10] sm:$0xff] %v1771_v31  ;;  %v13841_v46 = vpop.permute.xlu1 %5276  ;;  %v13867_v31 = vld [vmem:[%s16899_s1] ss:$0 sm:$0xff] }
 0x224   : > { %v13843_v41 = vpop.permute.xlu0 %5271  ;;  %7415 = vperm.xlu1 %12464, %v7360_v0   ;;  %v7494_v0 = vld [vmem:[%s12551_s23 + $0x1d1] sm:$0xff] }
 0x225   : > { %v1777_v6 = vld [vmem:[#allocation4] ss:$2 sm:$0xff]  ;;  %v1781_v52 = vld [vmem:[#allocation4 + $0x1] ss:$2 sm:$0xff]  ;;  %7410 = vperm.xlu0 %12463, %v7359_v23  }
 0x226   : > { %v1784_v16 = vmax.f32 %v1777_v6, %v1781_v52  ;;  %v5284_v6 = vmul.f32 %v13860_v7, %v13721_v44 }
 0x227   : > { %v13847_v57 = vpop.permute.xlu1 %5492 }
 0x228   : > { %v13849_v13 = vpop.permute.xlu0 %5487  ;;  %7425 = vperm.xlu1 %12464, %v7362_v40   ;;  %1786 = vst [vmem:[#allocation5] sm:$0xff] %v1784_v16  ;;  %v5283_v40 = vmul.f32 %v13860_v7, %v13723_v63  ;;  %v5151_v16 = vmul.f32 %v13867_v31, %v13702_v50  ;;  %v5285_v63 = vmul.f32 %v13860_v7, %v13731_v28  ;;  %v13908_v28 = vld [vmem:[%s16899_s1 + $0x3] ss:$0 sm:$0xff] }
 0x229   : > { %7420 = vperm.xlu0 %12463, %v7361_v9   ;;  %v7751_v9 = vld [vmem:[%s12551_s23 + $0x18b] sm:$0xff] }
 0x22a   : > { %v1779_v15 = vld [vmem:[#allocation4 + $0x10] ss:$2 sm:$0x3f]  ;;  %v1783_v12 = vld [vmem:[#allocation4 + $0x11] ss:$2 sm:$0x3f] }
 0x22b   : > { %v13853_v8 = vpop.permute.xlu1 %5502  ;;  %v1785_v62 = vmax.f32 %v1779_v15, %v1783_v12  ;;  %v5150_v15 = vmul.f32 %v13867_v31, %v13707_v42  ;;  %v5153_v42 = vmul.f32 %v13867_v31, %v13712_v18  ;;  %v5549_v18 = vmul.f32 %v13908_v28, %v13810_v26  ;;  %v9800_v26 = vld [vmem:[%s16903_s5 + $0x1f0] sm:$0xff] }
 0x22c   : > { %v13855_v1 = vpop.permute.xlu0 %5497  ;;  %7548 = vperm.xlu1 %12464, %v7493_v37   ;;  %v5286_v37 = vmul.f32 %v13860_v7, %v13729_v55  ;;  %v9785_v55 = vld [vmem:[%s16903_s5 + $0x178] sm:$0xff] }
 0x22d   : > { %7543 = vperm.xlu0 %12463, %v7492_v2   ;;  %1787 = vst [vmem:[#allocation5 + $0x8] sm:$0x3f] %v1785_v62  ;;  %v13885_v2 = vld [vmem:[%s16899_s1 + $0x2] ss:$0 sm:$0xff]  ;;  %v5300_v62 = vadd.f32 %v5284_v6, %v5151_v16  ;;  %v7750_v6 = vld [vmem:[%s12551_s23 + $0x183] sm:$0xff]  ;;  %v9784_v16 = vld [vmem:[%s16903_s5 + $0x170] sm:$0xff] }
 0x22e   : > { %v5417_v44 = vmul.f32 %v13885_v2, %v13760_v3  ;;  %v5416_v50 = vmul.f32 %v13885_v2, %v13762_v21  ;;  %v9801_v3 = vld [vmem:[%s16903_s5 + $0x1f8] sm:$0xff]  ;;  %v5550_v21 = vmul.f32 %v13908_v28, %v13808_v45  ;;  %v13925_v45 = vld [vmem:[%s16899_s1 + $0x4] ss:$0 sm:$0xff] }
 0x22f   : > { %v13869_v23 = vpop.permute.xlu1 %5379 }
 0x230   : > { %v13873_v52 = vpop.permute.xlu0 %5374  ;;  %7558 = vperm.xlu1 %12464, %v7495_v34  }
 0x231   : > { %16928 = vst [vmem:[#allocation7_spill] sm:$0xff] %v13873_v52  ;;  %7553 = vperm.xlu0 %12463, %v7494_v0   ;;  %v5299_v52 = vadd.f32 %v5283_v40, %v5150_v15 }
 0x233   : > { %v13895_v12 = vpop.permute.xlu1 %5389  ;;  %v5432_v15 = vadd.f32 %v5416_v50, %v5299_v52  ;;  %v7753_v50 = vld [vmem:[%s12551_s23 + $0x19b] sm:$0xff] }
 0x234   : > { %16929 = vst [vmem:[#allocation9_spill] sm:$0xff] %v13895_v12  ;;  %v1806_v34 = vld [vmem:[#allocation5 + $0x1] ss:$2 sm:$0x1f]  ;;  %v13912_v33 = vpop.permute.xlu0 %5384  ;;  %7774 = vperm.xlu1 %12464, %v7751_v9   ;;  %v5152_v12 = vmul.f32 %v13867_v31, %v13715_v53  ;;  %v5302_v9 = vadd.f32 %v5286_v37, %v5153_v42  ;;  %v5419_v53 = vmul.f32 %v13885_v2, %v13766_v59 }
 0x235   : > { %v1788_v0 = vld [vmem:[#allocation5] ss:$2 sm:$0x1f]  ;;  %16930 = vst [vmem:[#allocation8_spill] sm:$0xff] %v13912_v33  ;;  %11119 = vmatmul.mubr.f32.vlgmr.msra.gmra.mxu1 %v1806_v34  ;;  %v5433_v33 = vadd.f32 %v5417_v44, %v5300_v62  ;;  %v5418_v34 = vmul.f32 %v13885_v2, %v13768_v20  ;;  %7769 = vperm.xlu0 %12463, %v7750_v6  }
 0x236   : > { %11154 = vmatmul.mubr.f32.vlgmr.msra.gmra.mxu0 %v1788_v0  ;;  %11157 = vmatpush3.msra.mxu1 %v9785_v55  ;;  %v5301_v40 = vadd.f32 %v5285_v63, %v5152_v12  ;;  %v16931_v0 = vmov 0.0   ;;  %v9783_v59 = vld [vmem:[%s16903_s5 + $0x168] sm:$0xff]  ;;  %v5552_v55 = vmul.f32 %v13908_v28, %v13814_v5  ;;  %v5565_v12 = vadd.f32 %v5549_v18, %v5432_v15  ;;  %v9782_v18 = vld [vmem:[%s16903_s5 + $0x160] sm:$0xff] }
 0x237   : > { %11192 = vmatpush3.msra.mxu0 %v9801_v3  ;;  %11158 = vmatprep.subr.mxu1 %v16931_v0  ;;  %v5606_v37 = vpop.permute.xlu1 %5605  ;;  %v5566_v44 = vadd.f32 %v5550_v21, %v5433_v33  ;;  %v9799_v20 = vld [vmem:[%s16903_s5 + $0x1e8] sm:$0xff]  ;;  %v5551_v3 = vmul.f32 %v13908_v28, %v13819_v30  ;;  %v13952_v33 = vld [vmem:[%s16900_s2] ss:$0 sm:$0xff]  ;;  %v13957_v42 = vmul.f32 %v13867_v31, %v13735_v61  ;;  %v7752_v30 = vld [vmem:[%s12551_s23 + $0x193] sm:$0xff] }
 0x238   : > { %11193 = vmatprep.subr.mxu0 %v16931_v0  ;;  %11159 = vmatpush3.msra.mxu1 %v9784_v16  ;;  %v5683_v52 = vmul.f32 %v13925_v45, %v5606_v37  ;;  %v5601_v63 = vpop.permute.xlu0 %5600  ;;  %v5435_v62 = vadd.f32 %v5419_v53, %v5302_v9  ;;  %v13966_v6 = vmul.f32 %v13867_v31, %v13737_v54  ;;  %v9798_v61 = vld [vmem:[%s16903_s5 + $0x1e0] sm:$0xff] }
 0x239   : > { %11194 = vmatpush3.msra.mxu0 %v9800_v26  ;;  %11160 = vmatprep.subr.mxu1 %v16931_v0  ;;  %v5682_v5 = vmul.f32 %v13925_v45, %v5601_v63  ;;  %v5434_v16 = vadd.f32 %v5418_v34, %v5301_v40  ;;  %v9781_v40 = vld [vmem:[%s16903_s5 + $0x158] sm:$0xff] }
 0x23a   : > { %11195 = vmatprep.subr.mxu0 %v16931_v0  ;;  %v5699_v21 = vadd.f32 %v5683_v52, %v5566_v44  ;;  %11161 = vmatpush3.msra.mxu1 %v9783_v59  ;;  %v5568_v53 = vadd.f32 %v5552_v55, %v5435_v62  ;;  %v9797_v44 = vld [vmem:[%s16903_s5 + $0x1d8] sm:$0xff]  ;;  %v7364_v52 = vld [vmem:[%s12551_s23 + $0x1e8] sm:$0xff]  ;;  %v7363_v62 = vld [vmem:[%s12551_s23 + $0x1e0] sm:$0xff] }
 0x23b   : > { %11196 = vmatpush3.msra.mxu0 %v9799_v20  ;;  %v5698_v26 = vadd.f32 %v5682_v5, %v5565_v12  ;;  %7784 = vperm.xlu1 %12464, %v7753_v50   ;;  %v5616_v9 = vpop.permute.xlu1 %5615  ;;  %v5567_v37 = vadd.f32 %v5551_v3, %v5434_v16  ;;  %v5157_v20 = vmul.f32 %v13867_v31, %v13742_v24  ;;  %v9780_v24 = vld [vmem:[%s16903_s5 + $0x150] sm:$0xff] }
 0x23c   : > { %v5722_v15 = vadd.f32 %v13952_v33, %v5699_v21  ;;  %11162 = vmatprep.subr.mxu1 %v16931_v0  ;;  %11197 = vmatprep.subr.mxu0 %v16931_v0  ;;  %v5685_v54 = vmul.f32 %v13925_v45, %v5616_v9  ;;  %v5611_v34 = vpop.permute.xlu0 %5610  ;;  %v5156_v12 = vmul.f32 %v13867_v31, %v13744_v25  ;;  %v9796_v25 = vld [vmem:[%s16903_s5 + $0x1d0] sm:$0xff] }
 0x23d   : > { %v5721_v59 = vadd.f32 %v13952_v33, %v5698_v26  ;;  %7779 = vperm.xlu0 %12463, %v7752_v30   ;;  %11163 = vmatpush3.msra.mxu1 %v9782_v18  ;;  %v5684_v55 = vmul.f32 %v13925_v45, %v5611_v34  ;;  %v5288_v30 = vmul.f32 %v13860_v7, %v13748_v10  ;;  %v7366_v34 = vld [vmem:[%s12551_s23 + $0x1f8] sm:$0xf] }
 0x23e   : > { %vm5738_vm13 = vcmp.ge.f32.partialorder %v5722_v15, 0.0  ;;  %v5754_v63 = vmul.f32 0.02, %v5722_v15  ;;  %11198 = vmatpush3.msra.mxu0 %v9798_v61  ;;  %11164 = vmatprep.subr.mxu1 %v16931_v0  ;;  %v5701_v50 = vadd.f32 %v5685_v54, %v5568_v53  ;;  %v5287_v61 = vmul.f32 %v13860_v7, %v13750_v51  ;;  %v9779_v53 = vld [vmem:[%s16903_s5 + $0x148] sm:$0xff] }
 0x23f   : > { %vm5737_vm14 = vcmp.ge.f32.partialorder %v5721_v59, 0.0  ;;  %v5753_v3 = vmul.f32 0.02, %v5721_v59  ;;  %11199 = vmatprep.subr.mxu0 %v16931_v0  ;;  %11165 = vmatpush3.msra.mxu1 %v9781_v40  ;;  %v5700_v5 = vadd.f32 %v5684_v55, %v5567_v37  ;;  %v13994_v21 = vpop.permute.xlu1 %5399  ;;  %v5421_v51 = vmul.f32 %v13885_v2, %v13772_v56  ;;  %v9795_v40 = vld [vmem:[%s16903_s5 + $0x1c8] sm:$0xff] }
 0x240   : > { %v5770_v18 = vsel %vm5738_vm13, %v5722_v15, %v5754_v63  ;;  %v5724_v16 = vadd.f32 %v13952_v33, %v5701_v50  ;;  %11200 = vmatpush3.msra.mxu0 %v9797_v44  ;;  %7435 = vperm.xlu1 %12464, %v7364_v52   ;;  %v14002_v26 = vpop.permute.xlu0 %5394  ;;  %v5290_v15 = vmul.f32 %v13860_v7, %v13754_v60 }
 0x241   : > { %5786 = vst.msk [vmem:[#allocation2 + $0x8] sm:$0xff] %vm1124_vm0, %v5770_v18  ;;  %v5769_v9 = vsel %vm5737_vm14, %v5721_v59, %v5753_v3  ;;  %v5723_v10 = vadd.f32 %v13952_v33, %v5700_v5  ;;  %11166 = vmatprep.subr.mxu1 %v16931_v0  ;;  %11201 = vmatprep.subr.mxu0 %v16931_v0  ;;  %v7497_v18 = vld [vmem:[%s12551_s23 + $0x1e9] sm:$0xff] }
 0x242   : > { %5785 = vst.msk [vmem:[#allocation2] sm:$0xff] %vm1124_vm0, %v5769_v9  ;;  %vm5740_vm1 = vcmp.ge.f32.partialorder %v5724_v16, 0.0  ;;  %v5756_v54 = vmul.f32 0.02, %v5724_v16  ;;  %7430 = vperm.xlu0 %12463, %v7363_v62   ;;  %11167 = vmatpush3.msra.mxu1 %v9780_v24  ;;  %v5289_v37 = vmul.f32 %v13860_v7, %v13756_v43  ;;  %v5420_v60 = vmul.f32 %v13885_v2, %v13774_v49  ;;  %v7365_v43 = vld [vmem:[%s12551_s23 + $0x1f0] sm:$0xff]  ;;  %v9778_v49 = vld [vmem:[%s16903_s5 + $0x140] sm:$0xff] }
 0x243   : > { %vm5739_vm2 = vcmp.ge.f32.partialorder %v5723_v10, 0.0  ;;  %v5755_v56 = vmul.f32 0.02, %v5723_v10  ;;  %11202 = vmatpush3.msra.mxu0 %v9796_v25  ;;  %11168 = vmatprep.subr.mxu1 %v16931_v0  ;;  %v14028_v59 = vpop.permute.xlu1 %5409  ;;  %v5304_v44 = vadd.f32 %v5288_v30, %v13957_v42  ;;  %v5554_v55 = vmul.f32 %v13908_v28, %v13847_v57  ;;  %v9794_v42 = vld [vmem:[%s16903_s5 + $0x1c0] sm:$0xff] }
 0x244   : > { %v5772_v52 = vsel %vm5740_vm1, %v5724_v16, %v5756_v54  ;;  %11203 = vmatprep.subr.mxu0 %v16931_v0  ;;  %11169 = vmatpush3.msra.mxu1 %v9779_v53  ;;  %v14038_v63 = vpop.permute.xlu0 %5404  ;;  %v5303_v50 = vadd.f32 %v5287_v61, %v13966_v6  ;;  %v5553_v3 = vmul.f32 %v13908_v28, %v13849_v13  ;;  %v9777_v13 = vld [vmem:[%s16903_s5 + $0x138] sm:$0xff] }
 0x245   : > { %5788 = vst.msk [vmem:[#allocation2 + $0x18] sm:$0xff] %vm1124_vm0, %v5772_v52  ;;  %v5771_v57 = vsel %vm5739_vm2, %v5723_v10, %v5755_v56  ;;  %11204 = vmatpush3.msra.mxu0 %v9795_v40  ;;  %7445 = vperm.xlu1 %12464, %v7366_v34   ;;  %v5306_v5 = vadd.f32 %v5290_v15, %v5157_v20  ;;  %v9776_v15 = vld [vmem:[%s16903_s5 + $0x130] sm:$0xff]  ;;  %v14074_v40 = vld [vmem:[#allocation3 + $0x1] ss:$2 sm:$0xff] }
 0x246   : > { %v5437_v62 = vadd.f32 %v5421_v51, %v5304_v44  ;;  %v5423_v24 = vmul.f32 %v13885_v2, %v13778_v48  ;;  %5787 = vst.msk [vmem:[#allocation2 + $0x10] sm:$0xff] %vm1124_vm0, %v5771_v57  ;;  %11170 = vmatprep.subr.mxu1 %v16931_v0  ;;  %11205 = vmatprep.subr.mxu0 %v16931_v0  ;;  %v9793_v48 = vld [vmem:[%s16903_s5 + $0x1b8] sm:$0xff]  ;;  %v14079_v56 = vld [vmem:[#allocation3 + $0x2] ss:$2 sm:$0xff]  ;;  %v14094_v57 = vld [vmem:[#allocation3 + $0x3] ss:$2 sm:$0xff] }
 0x247   : > { %v5305_v6 = vadd.f32 %v5289_v37, %v5156_v12  ;;  %v5436_v30 = vadd.f32 %v5420_v60, %v5303_v50  ;;  %v5422_v20 = vmul.f32 %v13885_v2, %v13780_v35  ;;  %7440 = vperm.xlu0 %12463, %v7365_v43   ;;  %11171 = vmatpush3.msra.mxu1 %v9778_v49  ;;  %v5626_v16 = vpop.permute.xlu1 %5625  ;;  %v7496_v12 = vld [vmem:[%s12551_s23 + $0x1e1] sm:$0xff] }
 0x248   : > { %v5570_v25 = vadd.f32 %v5554_v55, %v5437_v62  ;;  %v5556_v61 = vmul.f32 %v13908_v28, %v13853_v8  ;;  %11206 = vmatpush3.msra.mxu0 %v9794_v42  ;;  %11172 = vmatprep.subr.mxu1 %v16931_v0  ;;  %v5687_v9 = vmul.f32 %v13925_v45, %v5626_v16  ;;  %v5621_v10 = vpop.permute.xlu0 %5620  ;;  %v14081_v44 = vld [vmem:[#allocation3] ss:$2 sm:$0xff]  ;;  %v7499_v62 = vld [vmem:[%s12551_s23 + $0x1f9] sm:$0xf] }
 0x249   : > { %v5569_v35 = vadd.f32 %v5553_v3, %v5436_v30  ;;  %v5555_v53 = vmul.f32 %v13908_v28, %v13855_v1  ;;  %11207 = vmatprep.subr.mxu0 %v16931_v0  ;;  %11173 = vmatpush3.msra.mxu1 %v9777_v13  ;;  %v5686_v8 = vmul.f32 %v13925_v45, %v5621_v10  ;;  %v5801_v51 = vld [vmem:[#allocation2] ss:$2 sm:$0xff]  ;;  %v5809_v54 = vld [vmem:[#allocation2 + $0x1] ss:$2 sm:$0xff]  ;;  %v9792_v1 = vld [vmem:[%s16903_s5 + $0x1b0] sm:$0xff] }
 0x24a   : > { %v5439_v34 = vadd.f32 %v5423_v24, %v5306_v5  ;;  %11208 = vmatpush3.msra.mxu0 %v9793_v48  ;;  %7568 = vperm.xlu1 %12464, %v7497_v18   ;;  %v5703_v37 = vadd.f32 %v5687_v9, %v5570_v25  ;;  %v5817_v60 = vmax.f32 %v5801_v51, %v5809_v54  ;;  %v9775_v43 = vld [vmem:[%s16903_s5 + $0x128] sm:$0xff]  ;;  %v7498_v25 = vld [vmem:[%s12551_s23 + $0x1f1] sm:$0xff] }
 0x24b   : > { %v5438_v55 = vadd.f32 %v5422_v20, %v5305_v6  ;;  %v14085_v52 = vmul.f32 %v13867_v31, %v13784_v47  ;;  %11174 = vmatprep.subr.mxu1 %v16931_v0  ;;  %11209 = vmatprep.subr.mxu0 %v16931_v0  ;;  %v5702_v49 = vadd.f32 %v5686_v8, %v5569_v35  ;;  %v5636_v50 = vpop.permute.xlu1 %5635  ;;  %v14092_v3 = vld [vmem:[#allocation3 + $0x4] ss:$2 sm:$0xff] }
 0x24c   : > { %v5572_v42 = vadd.f32 %v5556_v61, %v5439_v34  ;;  %7563 = vperm.xlu0 %12463, %v7496_v12   ;;  %11175 = vmatpush3.msra.mxu1 %v9776_v15  ;;  %v5726_v47 = vadd.f32 %v13952_v33, %v5703_v37  ;;  %v9791_v5 = vld [vmem:[%s16903_s5 + $0x1a8] sm:$0xff]  ;;  %v5689_v24 = vmul.f32 %v13925_v45, %v5636_v50  ;;  %v5631_v13 = vpop.permute.xlu0 %5630  ;;  %v9774_v61 = vld [vmem:[%s16903_s5 + $0x120] sm:$0xff]  ;;  %v9773_v34 = vld [vmem:[%s16903_s5 + $0x118] sm:$0xff] }
 0x24d   : > { %5825 = vst.msk [vmem:[#allocation3] sm:$0xff] %vm1124_vm0, %v5817_v60  ;;  %v5571_v6 = vadd.f32 %v5555_v53, %v5438_v55  ;;  %11210 = vmatpush3.msra.mxu0 %v9792_v1  ;;  %11176 = vmatprep.subr.mxu1 %v16931_v0  ;;  %v5725_v30 = vadd.f32 %v13952_v33, %v5702_v49  ;;  %v5802_v48 = vld [vmem:[#allocation2 + $0x10] ss:$2 sm:$0xff]  ;;  %v5810_v18 = vld [vmem:[#allocation2 + $0x11] ss:$2 sm:$0xff]  ;;  %v9790_v53 = vld [vmem:[%s16903_s5 + $0x1a0] sm:$0xff] }
 0x24e   : > { %v5688_v20 = vmul.f32 %v13925_v45, %v5631_v13  ;;  %11211 = vmatprep.subr.mxu0 %v16931_v0  ;;  %vm5742_vm4 = vcmp.ge.f32.partialorder %v5726_v47, 0.0  ;;  %v5758_v16 = vmul.f32 0.02, %v5726_v47  ;;  %11177 = vmatpush3.msra.mxu1 %v9775_v43  ;;  %v5705_v12 = vadd.f32 %v5689_v24, %v5572_v42  ;;  %v9789_v60 = vld [vmem:[%s16903_s5 + $0x198] sm:$0xff]  ;;  %v7755_v43 = vld [vmem:[%s12551_s23 + $0x1ab] sm:$0xff] }
 0x24f   : > { %v5818_v9 = vmax.f32 %v5802_v48, %v5810_v18  ;;  %v5292_v10 = vmul.f32 %v13860_v7, %v13796_v22  ;;  %11212 = vmatpush3.msra.mxu0 %v9791_v5  ;;  %vm5741_vm5 = vcmp.ge.f32.partialorder %v5725_v30, 0.0  ;;  %v5757_v35 = vmul.f32 0.02, %v5725_v30  ;;  %7578 = vperm.xlu1 %12464, %v7499_v62   ;;  %v14116_v8 = vpop.permute.xlu1 %5512  ;;  %v7754_v5 = vld [vmem:[%s12551_s23 + $0x1a3] sm:$0xff] }
 0x250   : > { %v5704_v15 = vadd.f32 %v5688_v20, %v5571_v6  ;;  %v5291_v51 = vmul.f32 %v13860_v7, %v13798_v11  ;;  %v5774_v54 = vsel %vm5742_vm4, %v5726_v47, %v5758_v16  ;;  %11178 = vmatprep.subr.mxu1 %v16931_v0  ;;  %11213 = vmatprep.subr.mxu0 %v16931_v0  ;;  %v14127_v1 = vpop.permute.xlu0 %5507  ;;  %v9771_v48 = vld [vmem:[%s16903_s5 + $0x108] sm:$0xff] }
 0x251   : > { %v5728_v22 = vadd.f32 %v13952_v33, %v5705_v12  ;;  %5826 = vst.msk [vmem:[#allocation3 + $0x8] sm:$0xff] %vm1124_vm0, %v5818_v9  ;;  %v5294_v37 = vmul.f32 %v13860_v7, %v13802_v38  ;;  %5790 = vst.msk [vmem:[#allocation2 + $0x28] sm:$0xff] %vm1124_vm0, %v5774_v54  ;;  %v5773_v11 = vsel %vm5741_vm5, %v5725_v30, %v5757_v35  ;;  %7573 = vperm.xlu0 %12463, %v7498_v25  }
 0x252   : > { %11179 = vmatpush3.msra.mxu1 %v9774_v61  ;;  %v5727_v55 = vadd.f32 %v13952_v33, %v5704_v15  ;;  %v5158_v49 = vmul.f32 %v13867_v31, %v13786_v19  ;;  %v5293_v38 = vmul.f32 %v13860_v7, %v13804_v14  ;;  %5789 = vst.msk [vmem:[#allocation2 + $0x20] sm:$0xff] %vm1124_vm0, %v5773_v11  ;;  %v9772_v14 = vld [vmem:[%s16903_s5 + $0x110] sm:$0xff]  ;;  %v7757_v61 = vld [vmem:[%s12551_s23 + $0x1bb] sm:$0xff] }
 0x253   : > { %11214 = vmatpush3.msra.mxu0 %v9790_v53  ;;  %11180 = vmatprep.subr.mxu1 %v16931_v0  ;;  %vm5744_vm6 = vcmp.ge.f32.partialorder %v5728_v22, 0.0  ;;  %v5760_v50 = vmul.f32 0.02, %v5728_v22  ;;  %v5161_v42 = vmul.f32 %v13867_v31, %v13790_v32  ;;  %v5160_v47 = vmul.f32 %v13867_v31, %v13792_v29  ;;  %v14154_v62 = vpop.permute.xlu1 %5522  ;;  %v9788_v29 = vld [vmem:[%s16903_s5 + $0x190] sm:$0xff] }
 0x254   : > { %11215 = vmatprep.subr.mxu0 %v16931_v0  ;;  %11181 = vmatpush3.msra.mxu1 %v9773_v34  ;;  %vm5743_vm7 = vcmp.ge.f32.partialorder %v5727_v55, 0.0  ;;  %v5759_v19 = vmul.f32 0.02, %v5727_v55  ;;  %v14157_v24 = vadd.f32 %v5292_v10, %v14085_v52  ;;  %v14159_v13 = vadd.f32 %v5291_v51, %v5158_v49  ;;  %v14164_v6 = vpop.permute.xlu0 %5517  ;;  %v16932_v51 = vld [vmem:[#allocation7_spill] sm:$0xff]  ;;  %v16934_v34 = vld [vmem:[#allocation8_spill] sm:$0xff] }
 0x255   : > { %v5776_v32 = vsel %vm5744_vm6, %v5728_v22, %v5760_v50  ;;  %11216 = vmatpush3.msra.mxu0 %v9789_v60  ;;  %7794 = vperm.xlu1 %12464, %v7755_v43   ;;  %v14166_v30 = vadd.f32 %v5294_v37, %v5161_v42  ;;  %v5296_v20 = vmul.f32 %v13860_v7, %v13835_v39  ;;  %v9787_v39 = vld [vmem:[%s16903_s5 + $0x188] sm:$0xff]  ;;  %v14216_v22 = vld [vmem:[#allocation3 + $0x11] ss:$2 sm:$0xff]  ;;  %v14226_v43 = vld [vmem:[#allocation3 + $0x14] ss:$2 sm:$0xff] }
 0x256   : > { %5792 = vst.msk [vmem:[#allocation2 + $0x38] sm:$0xff] %vm1124_vm0, %v5776_v32  ;;  %v5775_v52 = vsel %vm5743_vm7, %v5727_v55, %v5759_v19  ;;  %11182 = vmatprep.subr.mxu1 %v16931_v0  ;;  %11217 = vmatprep.subr.mxu0 %v16931_v0  ;;  %v14176_v18 = vadd.f32 %v5293_v38, %v5160_v47  ;;  %v14224_v55 = vld [vmem:[#allocation3 + $0x12] ss:$2 sm:$0xff]  ;;  %v7626_v47 = vld [vmem:[%s12551_s23 + $0x1ca] sm:$0xff] }
 0x257   : > { %v5163_v16 = vmul.f32 %v13867_v31, %v13823_v36  ;;  %v5162_v25 = vmul.f32 %v13867_v31, %v13825_v27  ;;  %5791 = vst.msk [vmem:[#allocation2 + $0x30] sm:$0xff] %vm1124_vm0, %v5775_v52  ;;  %7789 = vperm.xlu0 %12463, %v7754_v5   ;;  %11183 = vmatpush3.msra.mxu1 %v9772_v14  ;;  %v14194_v27 = vpop.permute.xlu1 %5532  ;;  %v14228_v49 = vld [vmem:[#allocation3 + $0x10] ss:$2 sm:$0xff]  ;;  %v14238_v5 = vld [vmem:[#allocation3 + $0x13] ss:$2 sm:$0xff] }
 0x258   : > { %v5165_v12 = vmul.f32 %v13867_v31, %v13829_v58  ;;  %v5295_v9 = vmul.f32 %v13860_v7, %v13837_v17  ;;  %v5298_v36 = vmul.f32 %v13860_v7, %v13841_v46  ;;  %11218 = vmatpush3.msra.mxu0 %v9788_v29  ;;  %11184 = vmatprep.subr.mxu1 %v16931_v0  ;;  %v7756_v17 = vld [vmem:[%s12551_s23 + $0x1b3] sm:$0xff]  ;;  %v9770_v46 = vld [vmem:[%s16903_s5 + $0x100] sm:$0xff]  ;;  %v14207_v53 = vpop.permute.xlu0 %5527 }
 0x259   : > { %v5164_v10 = vmul.f32 %v13867_v31, %v13831_v4  ;;  %v5297_v35 = vmul.f32 %v13860_v7, %v13843_v41  ;;  %v5425_v58 = vmul.f32 %v13885_v2, %v13869_v23  ;;  %11219 = vmatprep.subr.mxu0 %v16931_v0  ;;  %11185 = vmatpush3.msra.mxu1 %v9771_v48  ;;  %v16933_v31 = vld [vmem:[#allocation9_spill] sm:$0xff]  ;;  %v9786_v7 = vld [vmem:[%s16903_s5 + $0x180] sm:$0xff] }
 0x25a   : > { %v5312_v15 = vadd.f32 %v5296_v20, %v5163_v16  ;;  %v5424_v4 = vmul.f32 %v13885_v2, %v16932_v51  ;;  %v5427_v41 = vmul.f32 %v13885_v2, %v16933_v31  ;;  %11220 = vmatpush3.msra.mxu0 %v9787_v39  ;;  %7804 = vperm.xlu1 %12464, %v7757_v61   ;;  %v5803_v23 = vld [vmem:[#allocation2 + $0x20] ss:$2 sm:$0xff]  ;;  %v5811_v54 = vld [vmem:[#allocation2 + $0x21] ss:$2 sm:$0xff]  ;;  %v7627_v51 = vld [vmem:[%s12551_s23 + $0x1d2] sm:$0xff] }
 0x25b   : > { %v5426_v37 = vmul.f32 %v13885_v2, %v16934_v34  ;;  %v5429_v11 = vmul.f32 %v13885_v2, %v13994_v21  ;;  %11186 = vmatprep.subr.mxu1 %v16931_v0  ;;  %11221 = vmatprep.subr.mxu0 %v16931_v0  ;;  %v5819_v60 = vmax.f32 %v5803_v23, %v5811_v54  ;;  %v9817_v21 = vld [vmem:[%s16903_s5 + $0x278] sm:$0xff]  ;;  %v14236_v19 = vpop.permute.xlu1 %5542  ;;  %v2055_v20 = vld [vmem:[#allocation5 + $0x3] ss:$2 sm:$0x1f]  ;;  %v7884_v34 = vld [vmem:[%s12551_s23 + $0x18c] sm:$0xff] }
 0x25c   : > { %v5311_v38 = vadd.f32 %v5295_v9, %v5162_v25  ;;  %v5314_v50 = vadd.f32 %v5298_v36, %v5165_v12  ;;  %v5428_v42 = vmul.f32 %v13885_v2, %v14002_v26  ;;  %7799 = vperm.xlu0 %12463, %v7756_v17   ;;  %11187 = vmatpush3.msra.mxu1 %v9770_v46  ;;  %v1965_v26 = vld [vmem:[#allocation5 + $0x2] ss:$2 sm:$0x1f]  ;;  %v14247_v52 = vpop.permute.xlu0 %5537  ;;  %v7628_v17 = vld [vmem:[%s12551_s23 + $0x1da] sm:$0xff] }
 0x25d   : > { %v14240_v14 = vadd.f32 %v5297_v35, %v5164_v10  ;;  %v5441_v32 = vadd.f32 %v5425_v58, %v14157_v24  ;;  %v5558_v29 = vmul.f32 %v13908_v28, %v14116_v8  ;;  %11188 = vmatprep.mubr.msk.f32.mxu1 %vm12477_vm12, %v16931_v0  ;;  %11222 = vmatpush3.msra.mxu0 %v9786_v7  ;;  %v7625_v8 = vld [vmem:[%s12551_s23 + $0x1c2] sm:$0xff] }
 0x25e   : > { %5827 = vst.msk [vmem:[#allocation3 + $0x10] sm:$0xff] %vm1124_vm0, %v5819_v60  ;;  %v5440_v48 = vadd.f32 %v5424_v4, %v14159_v13  ;;  %v5443_v16 = vadd.f32 %v5427_v41, %v14166_v30  ;;  %v5557_v24 = vmul.f32 %v13908_v28, %v14127_v1  ;;  %11223 = vmatprep.mubr.msk.f32.mxu0 %vm12477_vm12, %v16931_v0  ;;  %v5804_v25 = vld [vmem:[#allocation2 + $0x30] ss:$2 sm:$0xff]  ;;  %v5812_v39 = vld [vmem:[#allocation2 + $0x31] ss:$2 sm:$0xff]  ;;  %v9815_v58 = vld [vmem:[%s16903_s5 + $0x268] sm:$0xff] }
 0x25f   : > { %11189 = vmatmul.mubr.f32.vlgmr.msra.gmra.mxu1 %v1965_v26  ;;  %v5442_v61 = vadd.f32 %v5426_v37, %v14176_v18  ;;  %v5445_v12 = vadd.f32 %v5429_v11, %v5312_v15  ;;  %11224 = vmatmul.mubr.f32.vlgmr.msra.gmra.mxu0 %v2055_v20  ;;  %v9816_v13 = vld [vmem:[%s16903_s5 + $0x270] sm:$0xff]  ;;  %v5820_v30 = vmax.f32 %v5804_v25, %v5812_v39  ;;  %v5646_v18 = vpop.permute.xlu1 %5645  ;;  %v9814_v41 = vld [vmem:[%s16903_s5 + $0x260] sm:$0xff]  ;;  %v9811_v25 = vld [vmem:[%s16903_s5 + $0x248] sm:$0xff] }
 0x260   : > { %11226 = vmatprep.subr.mxu1 %v16931_v0  ;;  %v5444_v1 = vadd.f32 %v5428_v42, %v5311_v38  ;;  %v5431_v9 = vmul.f32 %v13885_v2, %v14028_v59  ;;  %v5560_v36 = vmul.f32 %v13908_v28, %v14154_v62  ;;  %7681 = vperm.xlu1 %12464, %v7626_v47   ;;  %v5641_v46 = vpop.permute.xlu0 %5640  ;;  %v7886_v39 = vld [vmem:[%s12551_s23 + $0x19c] sm:$0xff] }
 0x261   : > { %11227 = vmatpush3.msra.mxu1 %v9817_v21  ;;  %v5574_v10 = vadd.f32 %v5558_v29, %v5441_v32  ;;  %v5559_v35 = vmul.f32 %v13908_v28, %v14164_v6  ;;  %7676 = vperm.xlu0 %12463, %v7625_v8   ;;  %v5691_v59 = vmul.f32 %v13925_v45, %v5646_v18  ;;  %v9812_v32 = vld [vmem:[%s16903_s5 + $0x250] sm:$0xff] }
 0x262   : > { %11228 = vmatprep.subr.mxu1 %v16931_v0  ;;  %5828 = vst.msk [vmem:[#allocation3 + $0x18] sm:$0xff] %vm1124_vm0, %v5820_v30  ;;  %v5573_v62 = vadd.f32 %v5557_v24, %v5440_v48  ;;  %v5562_v15 = vmul.f32 %v13908_v28, %v14194_v27  ;;  %v5690_v6 = vmul.f32 %v13925_v45, %v5641_v46  ;;  %v9809_v46 = vld [vmem:[%s16903_s5 + $0x238] sm:$0xff] }
 0x263   : > { %11229 = vmatpush3.msra.mxu1 %v9816_v13  ;;  %11258 = vmatprep.mubr.msk.f32.mxu1 %vm12477_vm12, %v16931_v0  ;;  %v5430_v4 = vmul.f32 %v13885_v2, %v14038_v63  ;;  %v5561_v31 = vmul.f32 %v13908_v28, %v14207_v53  ;;  %v5707_v27 = vadd.f32 %v5691_v59, %v5574_v10  ;;  %v5656_v2 = vpop.permute.xlu1 %5655  ;;  %v9813_v53 = vld [vmem:[%s16903_s5 + $0x258] sm:$0xff] }
 0x264   : > { %11230 = vmatprep.subr.mxu1 %v16931_v0  ;;  %11261 = vmatprep.subr.mxu0 %v16931_v0  ;;  %v5447_v7 = vadd.f32 %v5431_v9, %v5314_v50  ;;  %v5576_v23 = vadd.f32 %v5560_v36, %v5443_v16  ;;  %v5706_v54 = vadd.f32 %v5690_v6, %v5573_v62  ;;  %v5651_v60 = vpop.permute.xlu0 %5650  ;;  %v7883_v50 = vld [vmem:[%s12551_s23 + $0x184] sm:$0xff] }
 0x265   : > { %11231 = vmatpush3.msra.mxu1 %v9815_v58  ;;  %7691 = vperm.xlu1 %12464, %v7628_v17   ;;  %v5575_v63 = vadd.f32 %v5559_v35, %v5442_v61  ;;  %v5730_v37 = vadd.f32 %v13952_v33, %v5707_v27  ;;  %v5693_v11 = vmul.f32 %v13925_v45, %v5656_v2  ;;  %v7630_v62 = vld [vmem:[%s12551_s23 + $0x1ea] sm:$0xff] }
 0x266   : > { %11232 = vmatprep.subr.mxu1 %v16931_v0  ;;  %7686 = vperm.xlu0 %12463, %v7627_v51   ;;  %v5578_v38 = vadd.f32 %v5562_v15, %v5445_v12  ;;  %v5729_v42 = vadd.f32 %v13952_v33, %v5706_v54  ;;  %v5692_v21 = vmul.f32 %v13925_v45, %v5651_v60 }
 0x267   : > { %11233 = vmatpush3.msra.mxu1 %v9814_v41  ;;  %11277 = vmatprep.mubr.msk.f32.mxu0 %vm12477_vm12, %v16931_v0  ;;  %v5577_v47 = vadd.f32 %v5561_v31, %v5444_v1  ;;  %vm5746_vm8 = vcmp.ge.f32.partialorder %v5730_v37, 0.0  ;;  %v5762_v29 = vmul.f32 0.02, %v5730_v37  ;;  %v5709_v26 = vadd.f32 %v5693_v11, %v5576_v23  ;;  %v5666_v24 = vpop.permute.xlu1 %5665  ;;  %v7885_v1 = vld [vmem:[%s12551_s23 + $0x194] sm:$0xff]  ;;  %v7629_v41 = vld [vmem:[%s12551_s23 + $0x1e2] sm:$0xff] }
 0x268   : > { %11234 = vmatprep.subr.mxu1 %v16931_v0  ;;  %v5564_v20 = vmul.f32 %v13908_v28, %v14236_v19  ;;  %vm5745_vm9 = vcmp.ge.f32.partialorder %v5729_v42, 0.0  ;;  %v5761_v48 = vmul.f32 0.02, %v5729_v42  ;;  %v5708_v16 = vadd.f32 %v5692_v21, %v5575_v63  ;;  %v5661_v12 = vpop.permute.xlu0 %5660  ;;  %v9808_v23 = vld [vmem:[%s16903_s5 + $0x230] sm:$0xff]  ;;  %v7632_v11 = vld [vmem:[%s12551_s23 + $0x1fa] sm:$0xf] }
 0x269   : > { %11235 = vmatpush3.msra.mxu1 %v9813_v53  ;;  %7907 = vperm.xlu1 %12464, %v7884_v34   ;;  %v5778_v8 = vsel %vm5746_vm8, %v5730_v37, %v5762_v29  ;;  %v5732_v61 = vadd.f32 %v13952_v33, %v5709_v26  ;;  %v5695_v19 = vmul.f32 %v13925_v45, %v5666_v24  ;;  %v9807_v37 = vld [vmem:[%s16903_s5 + $0x228] sm:$0xff] }
 0x26a   : > { %11236 = vmatprep.subr.mxu1 %v16931_v0  ;;  %7902 = vperm.xlu0 %12463, %v7883_v50   ;;  %v5563_v13 = vmul.f32 %v13908_v28, %v14247_v52  ;;  %5794 = vst.msk [vmem:[#allocation2 + $0x48] sm:$0xff] %vm1124_vm0, %v5778_v8  ;;  %v5777_v30 = vsel %vm5745_vm9, %v5729_v42, %v5761_v48  ;;  %v9810_v28 = vld [vmem:[%s16903_s5 + $0x240] sm:$0xff]  ;;  %v7631_v42 = vld [vmem:[%s12551_s23 + $0x1f2] sm:$0xff] }
 0x26b   : > { %11237 = vmatpush3.msra.mxu1 %v9812_v32  ;;  %v5731_v9 = vadd.f32 %v13952_v33, %v5708_v16  ;;  %v5694_v36 = vmul.f32 %v13925_v45, %v5661_v12  ;;  %v5446_v18 = vadd.f32 %v5430_v4, %v14240_v14  ;;  %5793 = vst.msk [vmem:[#allocation2 + $0x40] sm:$0xff] %vm1124_vm0, %v5777_v30  ;;  %vm5748_vm10 = vcmp.ge.f32.partialorder %v5732_v61, 0.0  ;;  %v5676_v14 = vpop.permute.xlu1 %5675  ;;  %v14352_v29 = vld [vmem:[#allocation3 + $0x21] ss:$2 sm:$0xff]  ;;  %v14354_v26 = vld [vmem:[#allocation3 + $0x22] ss:$2 sm:$0xff] }
 0x26c   : > { %11238 = vmatprep.subr.mxu1 %v16931_v0  ;;  %v5764_v52 = vmul.f32 0.02, %v5732_v61  ;;  %v5711_v10 = vadd.f32 %v5695_v19, %v5578_v38  ;;  %v5580_v35 = vadd.f32 %v5564_v20, %v5447_v7  ;;  %v5697_v51 = vmul.f32 %v13925_v45, %v5676_v14  ;;  %v5671_v6 = vpop.permute.xlu0 %5670  ;;  %v14356_v20 = vld [vmem:[#allocation3 + $0x20] ss:$2 sm:$0xff]  ;;  %v9805_v8 = vld [vmem:[%s16903_s5 + $0x218] sm:$0xff] }
 0x26d   : > { %11239 = vmatpush3.msra.mxu1 %v9811_v25  ;;  %7917 = vperm.xlu1 %12464, %v7886_v39   ;;  %vm5747_vm11 = vcmp.ge.f32.partialorder %v5731_v9, 0.0  ;;  %v5763_v58 = vmul.f32 0.02, %v5731_v9  ;;  %v5710_v17 = vadd.f32 %v5694_v36, %v5577_v47  ;;  %v5579_v4 = vadd.f32 %v5563_v13, %v5446_v18  ;;  %v9806_v48 = vld [vmem:[%s16903_s5 + $0x220] sm:$0xff]  ;;  %v7888_v12 = vld [vmem:[%s12551_s23 + $0x1ac] sm:$0xff] }
 0x26e   : > { %11240 = vmatprep.subr.mxu1 %v16931_v0  ;;  %7912 = vperm.xlu0 %12463, %v7885_v1   ;;  %v5780_v59 = vsel %vm5748_vm10, %v5732_v61, %v5764_v52  ;;  %v5734_v15 = vadd.f32 %v13952_v33, %v5711_v10  ;;  %v5696_v7 = vmul.f32 %v13925_v45, %v5671_v6  ;;  %v14363_v24 = vld [vmem:[#allocation3 + $0x24] ss:$2 sm:$0xff]  ;;  %v14368_v61 = vld [vmem:[#allocation3 + $0x23] ss:$2 sm:$0xff]  ;;  %v14376_v30 = vld [vmem:[%s16899_s1] ss:$0 sm:$0xff] }
 0x26f   : > { %11241 = vmatpush3.msra.mxu1 %v9810_v28  ;;  %5796 = vst.msk [vmem:[#allocation2 + $0x58] sm:$0xff] %vm1124_vm0, %v5780_v59  ;;  %v5779_v31 = vsel %vm5747_vm11, %v5731_v9, %v5763_v58  ;;  %v5733_v27 = vadd.f32 %v13952_v33, %v5710_v17  ;;  %v5713_v2 = vadd.f32 %v5697_v51, %v5580_v35  ;;  %v7376_v34 = vpop.permute.xlu1 %7375  ;;  %16935 = vst [vmem:[#allocation6_spill] sm:$0xff] %v14368_v61  ;;  %v7887_v13 = vld [vmem:[%s12551_s23 + $0x1a4] sm:$0xff]  ;;  %v14383_v36 = vld [vmem:[%s16899_s1 + $0x1] ss:$0 sm:$0xff] }
 0x270   : > { %11242 = vmatprep.subr.mxu1 %v16931_v0  ;;  %5795 = vst.msk [vmem:[#allocation2 + $0x50] sm:$0xff] %vm1124_vm0, %v5779_v31  ;;  %vm5750_vm13 = vcmp.ge.f32.partialorder %v5734_v15, 0.0  ;;  %v5766_v54 = vmul.f32 0.02, %v5734_v15  ;;  %v5712_v53 = vadd.f32 %v5696_v7, %v5579_v4  ;;  %v7371_v38 = vpop.permute.xlu0 %7370  ;;  %v9804_v52 = vld [vmem:[%s16903_s5 + $0x210] sm:$0xff]  ;;  %v7453_v58 = vmul.f32 %v14376_v30, %v7376_v34  ;;  %v9803_v17 = vld [vmem:[%s16903_s5 + $0x208] sm:$0xff] }
 0x271   : > { %11243 = vmatpush3.msra.mxu1 %v9809_v46  ;;  %7701 = vperm.xlu1 %12464, %v7630_v62   ;;  %vm5749_vm14 = vcmp.ge.f32.partialorder %v5733_v27, 0.0  ;;  %v5765_v63 = vmul.f32 0.02, %v5733_v27  ;;  %v5736_v60 = vadd.f32 %v13952_v33, %v5713_v2  ;;  %v7890_v14 = vld [vmem:[%s12551_s23 + $0x1bc] sm:$0xff]  ;;  %v7452_v62 = vmul.f32 %v14376_v30, %v7371_v38 }
 0x272   : > { %11244 = vmatprep.subr.mxu1 %v16931_v0  ;;  %7696 = vperm.xlu0 %12463, %v7629_v41   ;;  %v5782_v45 = vsel %vm5750_vm13, %v5734_v15, %v5766_v54  ;;  %v5735_v21 = vadd.f32 %v13952_v33, %v5712_v53  ;;  %v5805_v47 = vld [vmem:[#allocation2 + $0x40] ss:$2 sm:$0xff]  ;;  %v5813_v32 = vld [vmem:[#allocation2 + $0x41] ss:$2 sm:$0xff]  ;;  %v7889_v15 = vld [vmem:[%s12551_s23 + $0x1b4] sm:$0xff] }
 0x273   : > { %11245 = vmatpush3.msra.mxu1 %v9808_v23  ;;  %5798 = vst.msk [vmem:[#allocation2 + $0x68] sm:$0xff] %vm1124_vm0, %v5782_v45  ;;  %v5781_v50 = vsel %vm5749_vm14, %v5733_v27, %v5765_v63  ;;  %vm5752_vm1 = vcmp.ge.f32.partialorder %v5736_v60, 0.0  ;;  %v5768_v33 = vmul.f32 0.02, %v5736_v60  ;;  %v5821_v16 = vmax.f32 %v5805_v47, %v5813_v32  ;;  %v7386_v39 = vpop.permute.xlu1 %7385  ;;  %v9802_v27 = vld [vmem:[%s16903_s5 + $0x200] sm:$0xff] }
 0x274   : > { %11246 = vmatprep.subr.mxu1 %v16931_v0  ;;  %5797 = vst.msk [vmem:[#allocation2 + $0x60] sm:$0xff] %vm1124_vm0, %v5781_v50  ;;  %vm5751_vm2 = vcmp.ge.f32.partialorder %v5735_v21, 0.0  ;;  %v5767_v25 = vmul.f32 0.02, %v5735_v21  ;;  %v7381_v1 = vpop.permute.xlu0 %7380 }
 0x275   : > { %11247 = vmatpush3.msra.mxu1 %v9807_v37  ;;  %7711 = vperm.xlu1 %12464, %v7632_v11   ;;  %v5784_v19 = vsel %vm5752_vm1, %v5736_v60, %v5768_v33  ;;  %5829 = vst.msk [vmem:[#allocation3 + $0x20] sm:$0xff] %vm1124_vm0, %v5821_v16  ;;  %v14401_v31 = vld [vmem:[#allocation3 + $0x31] ss:$2 sm:$0x1f]  ;;  %v7455_v37 = vmul.f32 %v14376_v30, %v7386_v39  ;;  %v7758_v60 = vld [vmem:[%s12551_s23 + $0x1c3] sm:$0xff] }
 0x276   : > { %11248 = vmatprep.subr.mxu1 %v16931_v0  ;;  %7706 = vperm.xlu0 %12463, %v7631_v42   ;;  %5800 = vst.msk [vmem:[#allocation2 + $0x78] sm:$0xf] %vm1140_vm15, %v5784_v19  ;;  %v5783_v9 = vsel %vm5751_vm2, %v5735_v21, %v5767_v25  ;;  %v14403_v41 = vld [vmem:[#allocation3 + $0x32] ss:$2 sm:$0x1f]  ;;  %v7454_v42 = vmul.f32 %v14376_v30, %v7381_v1  ;;  %v7761_v25 = vld [vmem:[%s12551_s23 + $0x1db] sm:$0xff] }
 0x277   : > { %11249 = vmatpush3.msra.mxu1 %v9806_v48  ;;  %v5806_v18 = vld [vmem:[#allocation2 + $0x50] ss:$2 sm:$0xff]  ;;  %v5814_v28 = vld [vmem:[#allocation2 + $0x51] ss:$2 sm:$0xff]  ;;  %5799 = vst.msk [vmem:[#allocation2 + $0x70] sm:$0xff] %vm1124_vm0, %v5783_v9  ;;  %v7509_v35 = vpop.permute.xlu1 %7508  ;;  %v7762_v9 = vld [vmem:[%s12551_s23 + $0x1e3] sm:$0xff] }
 0x278   : > { %11250 = vmatprep.subr.mxu1 %v16931_v0  ;;  %v5822_v10 = vmax.f32 %v5806_v18, %v5814_v28  ;;  %v7586_v59 = vmul.f32 %v14383_v36, %v7509_v35  ;;  %v7504_v46 = vpop.permute.xlu0 %7503  ;;  %v14411_v54 = vld [vmem:[#allocation3 + $0x34] ss:$2 sm:$0x1f]  ;;  %v14417_v34 = vld [vmem:[#allocation3 + $0x33] ss:$2 sm:$0x1f] }
 0x279   : > { %11251 = vmatpush3.msra.mxu1 %v9805_v8  ;;  %7927 = vperm.xlu1 %12464, %v7888_v12   ;;  %v7585_v51 = vmul.f32 %v14383_v36, %v7504_v46  ;;  %v14415_v53 = vld [vmem:[#allocation3 + $0x30] ss:$2 sm:$0x1f]  ;;  %16936 = vst [vmem:[#allocation7_spill] sm:$0xff] %v14417_v34 }
 0x27a   : > { %11252 = vmatprep.subr.mxu1 %v16931_v0  ;;  %7922 = vperm.xlu0 %12463, %v7887_v13   ;;  %5830 = vst.msk [vmem:[#allocation3 + $0x28] sm:$0xff] %vm1124_vm0, %v5822_v10  ;;  %v14409_v7 = vadd.f32 %v7586_v59, %v7453_v58  ;;  %v2145_v45 = vld [vmem:[#allocation5 + $0x4] ss:$2 sm:$0x1f]  ;;  %v7760_v19 = vld [vmem:[%s12551_s23 + $0x1d3] sm:$0xff] }
 0x27b   : > { %11253 = vmatpush3.msra.mxu1 %v9804_v52  ;;  %v5807_v6 = vld [vmem:[#allocation2 + $0x60] ss:$2 sm:$0xff]  ;;  %v5815_v4 = vld [vmem:[#allocation2 + $0x61] ss:$2 sm:$0xff]  ;;  %v14413_v2 = vadd.f32 %v7585_v51, %v7452_v62  ;;  %v7519_v63 = vpop.permute.xlu1 %7518  ;;  %v7765_v52 = vld [vmem:[%s12551_s23 + $0x1fb] sm:$0xf] }
 0x27c   : > { %11254 = vmatprep.subr.mxu1 %v16931_v0  ;;  %v5823_v23 = vmax.f32 %v5807_v6, %v5815_v4  ;;  %v7759_v11 = vld [vmem:[%s12551_s23 + $0x1cb] sm:$0xff]  ;;  %v7588_v38 = vmul.f32 %v14383_v36, %v7519_v63  ;;  %v7514_v50 = vpop.permute.xlu0 %7513 }
 0x27d   : > { %11255 = vmatpush3.msra.mxu1 %v9803_v17  ;;  %7937 = vperm.xlu1 %12464, %v7890_v14   ;;  %v7587_v21 = vmul.f32 %v14383_v36, %v7514_v50  ;;  %v7763_v13 = vld [vmem:[%s12551_s23 + $0x1eb] sm:$0xff]  ;;  %v7764_v17 = vld [vmem:[%s12551_s23 + $0x1f3] sm:$0xff] }
 0x27e   : > { %11256 = vmatprep.subr.mxu1 %v16931_v0  ;;  %7932 = vperm.xlu0 %12463, %v7889_v15   ;;  %5831 = vst.msk [vmem:[#allocation3 + $0x30] sm:$0xff] %vm1124_vm0, %v5823_v23  ;;  %v5808_v47 = vld [vmem:[#allocation2 + $0x70] ss:$2 sm:$0x3f]  ;;  %v7604_v48 = vadd.f32 %v7588_v38, %v7455_v37  ;;  %v7891_v23 = vld [vmem:[%s12551_s23 + $0x1c4] sm:$0xff]  ;;  %v7894_v38 = vld [vmem:[%s12551_s23 + $0x1dc] sm:$0xff] }
 0x27f   : > { %11257 = vmatpush3.msra.mxu1 %v9802_v27  ;;  %v5816_v32 = vld [vmem:[#allocation2 + $0x71] ss:$2 sm:$0x3f]  ;;  %v7603_v16 = vadd.f32 %v7587_v21, %v7454_v42  ;;  %v7396_v8 = vpop.permute.xlu1 %7395 }
 0x280   : > { %11259 = vmatmul.mubr.f32.vlgmr.msra.gmra.mxu1 %v2145_v45  ;;  %v5824_v33 = vmax.f32 %v5808_v47, %v5816_v32  ;;  %11299 = vmatprep.subr.mxu1 %v16931_v0  ;;  %v7391_v39 = vpop.permute.xlu0 %7390  ;;  %v7457_v28 = vmul.f32 %v14376_v30, %v7396_v8  ;;  %v7892_v51 = vld [vmem:[%s12551_s23 + $0x1cc] sm:$0xff]  ;;  %v14450_v45 = vld [vmem:[%s16899_s1 + $0x2] ss:$0 sm:$0xff]  ;;  %v7893_v21 = vld [vmem:[%s12551_s23 + $0x1d4] sm:$0xff] }
 0x281   : > { %7814 = vperm.xlu1 %12464, %v7759_v11   ;;  %11315 = vmatprep.mubr.msk.f32.mxu1 %vm12477_vm12, %v16931_v0  ;;  %v7456_v58 = vmul.f32 %v14376_v30, %v7391_v39 }
 0x282   : > { %7809 = vperm.xlu0 %12463, %v7758_v60   ;;  %5832 = vst.msk [vmem:[#allocation3 + $0x38] sm:$0x3f] %vm1188_vm3, %v5824_v33 }
 0x283   : > { %v7406_v12 = vpop.permute.xlu1 %7405 }
 0x284   : > { %v7401_v1 = vpop.permute.xlu0 %7400  ;;  %v7459_v15 = vmul.f32 %v14376_v30, %v7406_v12  ;;  %v7895_v12 = vld [vmem:[%s12551_s23 + $0x1e4] sm:$0xff] }
 0x285   : > { %7824 = vperm.xlu1 %12464, %v7761_v25   ;;  %v7458_v27 = vmul.f32 %v14376_v30, %v7401_v1  ;;  %v7896_v25 = vld [vmem:[%s12551_s23 + $0x1ec] sm:$0xff] }
 0x286   : > { %7819 = vperm.xlu0 %12463, %v7760_v19  }
 0x287   : > { %v7529_v18 = vpop.permute.xlu1 %7528 }
 0x288   : > { %v7590_v10 = vmul.f32 %v14383_v36, %v7529_v18  ;;  %v7524_v35 = vpop.permute.xlu0 %7523  ;;  %v7898_v18 = vld [vmem:[%s12551_s23 + $0x1fc] sm:$0xf] }
 0x289   : > { %7834 = vperm.xlu1 %12464, %v7763_v13   ;;  %v7589_v14 = vmul.f32 %v14383_v36, %v7524_v35 }
 0x28a   : > { %7829 = vperm.xlu0 %12463, %v7762_v9   ;;  %v7606_v59 = vadd.f32 %v7590_v10, %v7457_v28 }
 0x28b   : > { %v7605_v46 = vadd.f32 %v7589_v14, %v7456_v58  ;;  %v7539_v62 = vpop.permute.xlu1 %7538 }
 0x28c   : > { %v7592_v6 = vmul.f32 %v14383_v36, %v7539_v62  ;;  %v7534_v4 = vpop.permute.xlu0 %7533 }
 0x28d   : > { %7844 = vperm.xlu1 %12464, %v7765_v52   ;;  %v7591_v63 = vmul.f32 %v14383_v36, %v7534_v4  ;;  %v7897_v52 = vld [vmem:[%s12551_s23 + $0x1f4] sm:$0xff] }
 0x28e   : > { %7839 = vperm.xlu0 %12463, %v7764_v17   ;;  %v7608_v37 = vadd.f32 %v7592_v6, %v7459_v15 }
 0x28f   : > { %v7607_v11 = vadd.f32 %v7591_v63, %v7458_v27  ;;  %v7642_v60 = vpop.permute.xlu1 %7641 }
 0x290   : > { %v7719_v50 = vmul.f32 %v14450_v45, %v7642_v60  ;;  %v7637_v42 = vpop.permute.xlu0 %7636 }
 0x291   : > { %7947 = vperm.xlu1 %12464, %v7892_v51   ;;  %v7718_v47 = vmul.f32 %v14450_v45, %v7637_v42 }
 0x292   : > { %7942 = vperm.xlu0 %12463, %v7891_v23   ;;  %v14457_v32 = vadd.f32 %v7719_v50, %v14409_v7  ;;  %v9825_v50 = vld [vmem:[%s16905_s7 + $0x70] sm:$0xff] }
 0x293   : > { %v14460_v33 = vadd.f32 %v7718_v47, %v14413_v2  ;;  %v7652_v8 = vpop.permute.xlu1 %7651 }
 0x294   : > { %v7721_v39 = vmul.f32 %v14450_v45, %v7652_v8  ;;  %v7647_v19 = vpop.permute.xlu0 %7646 }
 0x295   : > { %7957 = vperm.xlu1 %12464, %v7894_v38   ;;  %v7720_v13 = vmul.f32 %v14450_v45, %v7647_v19 }
 0x296   : > { %7952 = vperm.xlu0 %12463, %v7893_v21   ;;  %v14466_v1 = vadd.f32 %v7721_v39, %v7604_v48  ;;  %v9835_v21 = vld [vmem:[%s16905_s7 + $0xb0] sm:$0xff]  ;;  %v9834_v39 = vld [vmem:[%s16905_s7 + $0xa8] sm:$0xff] }
 0x297   : > { %v14468_v9 = vadd.f32 %v7720_v13, %v7603_v16  ;;  %v7662_v7 = vpop.permute.xlu1 %7661 }
 0x298   : > { %v7723_v2 = vmul.f32 %v14450_v45, %v7662_v7  ;;  %v7657_v28 = vpop.permute.xlu0 %7656 }
 0x299   : > { %7967 = vperm.xlu1 %12464, %v7896_v25   ;;  %v7722_v10 = vmul.f32 %v14450_v45, %v7657_v28  ;;  %v9824_v25 = vld [vmem:[%s16905_s7 + $0x68] sm:$0xff] }
 0x29a   : > { %7962 = vperm.xlu0 %12463, %v7895_v12   ;;  %v14474_v35 = vadd.f32 %v7723_v2, %v7606_v59 }
 0x29b   : > { %v14476_v58 = vadd.f32 %v7722_v10, %v7605_v46  ;;  %v7672_v17 = vpop.permute.xlu1 %7671 }
 0x29c   : > { %v7725_v48 = vmul.f32 %v14450_v45, %v7672_v17  ;;  %v7667_v16 = vpop.permute.xlu0 %7666 }
 0x29d   : > { %7977 = vperm.xlu1 %12464, %v7898_v18   ;;  %v7724_v14 = vmul.f32 %v14450_v45, %v7667_v16 }
 0x29e   : > { %7972 = vperm.xlu0 %12463, %v7897_v52   ;;  %v14480_v62 = vadd.f32 %v7725_v48, %v7608_v37  ;;  %v9826_v37 = vld [vmem:[%s16905_s7 + $0x78] sm:$0xff] }
 0x29f   : > { %v14482_v15 = vadd.f32 %v7724_v14, %v7607_v11  ;;  %v7416_v51 = vpop.permute.xlu1 %7415  ;;  %v9836_v11 = vld [vmem:[%s16905_s7 + $0xb8] sm:$0xff]  ;;  %11262 = vmatpush3.msra.mxu0 %v9826_v37 }
 0x2a0   : > { %v7411_v6 = vpop.permute.xlu0 %7410  ;;  %v7461_v23 = vmul.f32 %v14376_v30, %v7416_v51  ;;  %11300 = vmatpush3.msra.mxu1 %v9836_v11  ;;  %11263 = vmatprep.subr.mxu0 %v16931_v0  ;;  %v9823_v51 = vld [vmem:[%s16905_s7 + $0x60] sm:$0xff] }
 0x2a1   : > { %v7460_v60 = vmul.f32 %v14376_v30, %v7411_v6  ;;  %11301 = vmatprep.subr.mxu1 %v16931_v0  ;;  %11264 = vmatpush3.msra.mxu0 %v9825_v50  ;;  %v9833_v6 = vld [vmem:[%s16905_s7 + $0xa0] sm:$0xff] }
 0x2a2   : > { %11302 = vmatpush3.msra.mxu1 %v9835_v21  ;;  %11265 = vmatprep.subr.mxu0 %v16931_v0  ;;  %v9819_v11 = vld [vmem:[%s16905_s7 + $0x40] sm:$0xff] }
 0x2a3   : > { %v7426_v4 = vpop.permute.xlu1 %7425  ;;  %11303 = vmatprep.subr.mxu1 %v16931_v0  ;;  %11266 = vmatpush3.msra.mxu0 %v9824_v25  ;;  %v9829_v50 = vld [vmem:[%s16905_s7 + $0x80] sm:$0xff] }
 0x2a4   : > { %v7421_v27 = vpop.permute.xlu0 %7420  ;;  %v7463_v19 = vmul.f32 %v14376_v30, %v7426_v4  ;;  %11304 = vmatpush3.msra.mxu1 %v9834_v39  ;;  %11267 = vmatprep.subr.mxu0 %v16931_v0  ;;  %v9822_v4 = vld [vmem:[%s16905_s7 + $0x58] sm:$0xff] }
 0x2a5   : > { %v7462_v7 = vmul.f32 %v14376_v30, %v7421_v27  ;;  %11305 = vmatprep.subr.mxu1 %v16931_v0  ;;  %11268 = vmatpush3.msra.mxu0 %v9823_v51  ;;  %v9832_v27 = vld [vmem:[%s16905_s7 + $0x98] sm:$0xff] }
 0x2a6   : > { %11306 = vmatpush3.msra.mxu1 %v9833_v6  ;;  %11269 = vmatprep.subr.mxu0 %v16931_v0 }
 0x2a7   : > { %v7549_v59 = vpop.permute.xlu1 %7548  ;;  %11307 = vmatprep.subr.mxu1 %v16931_v0  ;;  %11270 = vmatpush3.msra.mxu0 %v9822_v4 }
 0x2a8   : > { %v7594_v46 = vmul.f32 %v14383_v36, %v7549_v59  ;;  %v7544_v63 = vpop.permute.xlu0 %7543  ;;  %11308 = vmatpush3.msra.mxu1 %v9832_v27  ;;  %11271 = vmatprep.subr.mxu0 %v16931_v0 }
 0x2a9   : > { %v7593_v38 = vmul.f32 %v14383_v36, %v7544_v63  ;;  %11309 = vmatprep.subr.mxu1 %v16931_v0 }
 0x2aa   : > { %v14497_v42 = vadd.f32 %v7594_v46, %v7461_v23  ;;  %v9821_v23 = vld [vmem:[%s16905_s7 + $0x50] sm:$0xff] }
 0x2ab   : > { %v14502_v47 = vadd.f32 %v7593_v38, %v7460_v60  ;;  %v7559_v8 = vpop.permute.xlu1 %7558  ;;  %v9831_v46 = vld [vmem:[%s16905_s7 + $0x90] sm:$0xff]  ;;  %11272 = vmatpush3.msra.mxu0 %v9821_v23  ;;  %v9820_v60 = vld [vmem:[%s16905_s7 + $0x48] sm:$0xff] }
 0x2ac   : > { %v7596_v12 = vmul.f32 %v14383_v36, %v7559_v8  ;;  %v7554_v13 = vpop.permute.xlu0 %7553  ;;  %11310 = vmatpush3.msra.mxu1 %v9831_v46  ;;  %11273 = vmatprep.subr.mxu0 %v16931_v0  ;;  %v9830_v38 = vld [vmem:[%s16905_s7 + $0x88] sm:$0xff] }
 0x2ad   : > { %v7595_v18 = vmul.f32 %v14383_v36, %v7554_v13  ;;  %11311 = vmatprep.subr.mxu1 %v16931_v0  ;;  %11274 = vmatpush3.msra.mxu0 %v9820_v60 }
 0x2ae   : > { %v14518_v2 = vadd.f32 %v7596_v12, %v7463_v19  ;;  %11312 = vmatpush3.msra.mxu1 %v9830_v38  ;;  %11275 = vmatprep.subr.mxu0 %v16931_v0 }
 0x2af   : > { %v14520_v28 = vadd.f32 %v7595_v18, %v7462_v7  ;;  %v7775_v52 = vpop.permute.xlu1 %7774  ;;  %11313 = vmatprep.subr.mxu1 %v16931_v0  ;;  %11276 = vmatpush3.msra.mxu0 %v9819_v11 }
 0x2b0   : > { %v14524_v10 = vpop.permute.xlu0 %7769  ;;  %11314 = vmatpush3.msra.mxu1 %v9829_v50  ;;  %11280 = vmatprep.subr.mxu0 %v16931_v0 }
 0x2b1   : > { %11337 = vmatprep.subr.mxu1 %v16931_v0 }
 0x2b6   : > { %v14526_v17 = vpop.permute.xlu1 %7784 }
 0x2b8   : > { %v14528_v48 = vpop.permute.xlu0 %7779 }
 0x2bb   : > { %v7436_v16 = vpop.permute.xlu1 %7435 }
 0x2bc   : > { %v7465_v21 = vmul.f32 %v14376_v30, %v7436_v16 }
 0x2bd   : > { %v7431_v14 = vpop.permute.xlu0 %7430 }
 0x2be   : > { %v7464_v39 = vmul.f32 %v14376_v30, %v7431_v14 }
 0x2c0   : > { %v7446_v59 = vpop.permute.xlu1 %7445 }
 0x2c1   : > { %v7467_v18 = vmul.f32 %v14376_v30, %v7446_v59  ;;  %v14593_v59 = vld [vmem:[%s16899_s1 + $0x3] ss:$0 sm:$0xff] }
 0x2c2   : > { %v7441_v63 = vpop.permute.xlu0 %7440  ;;  %v7851_v50 = vmul.f32 %v14593_v59, %v14524_v10  ;;  %v14617_v10 = vld [vmem:[%s16900_s2] ss:$0 sm:$0xff] }
 0x2c3   : > { %v7466_v6 = vmul.f32 %v14376_v30, %v7441_v63  ;;  %v7852_v63 = vmul.f32 %v14593_v59, %v7775_v52 }
 0x2c4   : > { %v7867_v52 = vadd.f32 %v7851_v50, %v14460_v33 }
 0x2c5   : > { %v7569_v37 = vpop.permute.xlu1 %7568 }
 0x2c6   : > { %v7598_v8 = vmul.f32 %v14383_v36, %v7569_v37 }
 0x2c7   : > { %v7564_v25 = vpop.permute.xlu0 %7563 }
 0x2c8   : > { %v14573_v19 = vadd.f32 %v7598_v8, %v7465_v21  ;;  %v7597_v12 = vmul.f32 %v14383_v36, %v7564_v25  ;;  %v14605_v21 = vld [vmem:[%s16899_s1 + $0x4] ss:$0 sm:$0xff]  ;;  %v7868_v25 = vadd.f32 %v7852_v63, %v14457_v32 }
 0x2ca   : > { %v14576_v13 = vadd.f32 %v7597_v12, %v7464_v39  ;;  %v7579_v7 = vpop.permute.xlu1 %7578  ;;  %v7854_v39 = vmul.f32 %v14593_v59, %v14526_v17 }
 0x2cb   : > { %v7600_v16 = vmul.f32 %v14383_v36, %v7579_v7 }
 0x2cc   : > { %v7574_v51 = vpop.permute.xlu0 %7573  ;;  %v7870_v17 = vadd.f32 %v7854_v39, %v14466_v1 }
 0x2cd   : > { %v14581_v4 = vadd.f32 %v7600_v16, %v7467_v18  ;;  %v7599_v27 = vmul.f32 %v14383_v36, %v7574_v51  ;;  %v7853_v18 = vmul.f32 %v14593_v59, %v14528_v48 }
 0x2cf   : > { %v14584_v23 = vadd.f32 %v7599_v27, %v7466_v6  ;;  %v7869_v50 = vadd.f32 %v7853_v18, %v14468_v9 }
 0x2d0   : > { %v7795_v14 = vpop.permute.xlu1 %7794 }
 0x2d2   : > { %v7790_v46 = vpop.permute.xlu0 %7789 }
 0x2d5   : > { %v7805_v60 = vpop.permute.xlu1 %7804 }
 0x2d7   : > { %v7800_v38 = vpop.permute.xlu0 %7799 }
 0x2db   : > { %v14586_v37 = vpop.permute.xlu1 %7681 }
 0x2dc   : > { %v14588_v11 = vpop.permute.xlu0 %7676 }
 0x2e0   : > { %v14595_v30 = vpop.permute.xlu1 %7691 }
 0x2e1   : > { %v14598_v36 = vpop.permute.xlu0 %7686 }
 0x2e4   : > { %v7908_v8 = vpop.permute.xlu1 %7907 }
 0x2e5   : > { %v7985_v12 = vmul.f32 %v14605_v21, %v7908_v8  ;;  %v7903_v7 = vpop.permute.xlu0 %7902 }
 0x2e6   : > { %v7984_v16 = vmul.f32 %v14605_v21, %v7903_v7 }
 0x2e7   : > { %v8001_v51 = vadd.f32 %v7985_v12, %v7868_v25 }
 0x2e8   : > { %v8000_v32 = vadd.f32 %v7984_v16, %v7867_v52  ;;  %v7918_v6 = vpop.permute.xlu1 %7917 }
 0x2e9   : > { %v8024_v27 = vadd.f32 %v14617_v10, %v8001_v51  ;;  %v7987_v63 = vmul.f32 %v14605_v21, %v7918_v6  ;;  %v7913_v33 = vpop.permute.xlu0 %7912  ;;  %v7856_v6 = vmul.f32 %v14593_v59, %v7795_v14 }
 0x2ea   : > { %v8023_v48 = vadd.f32 %v14617_v10, %v8000_v32  ;;  %v7986_v8 = vmul.f32 %v14605_v21, %v7913_v33 }
 0x2eb   : > { %vm8040_vm4 = vcmp.ge.f32.partialorder %v8024_v27, 0.0  ;;  %v8056_v34 = vmul.f32 0.02, %v8024_v27  ;;  %v8003_v61 = vadd.f32 %v7987_v63, %v7870_v17  ;;  %v7872_v33 = vadd.f32 %v7856_v6, %v14474_v35  ;;  %v14650_v35 = vld [vmem:[#allocation3] ss:$2 sm:$0xff] }
 0x2ec   : > { %vm8039_vm5 = vcmp.ge.f32.partialorder %v8023_v48, 0.0  ;;  %v8055_v25 = vmul.f32 0.02, %v8023_v48  ;;  %v8002_v12 = vadd.f32 %v7986_v8, %v7869_v50  ;;  %v14626_v7 = vpop.permute.xlu1 %7701  ;;  %v7858_v50 = vmul.f32 %v14593_v59, %v7805_v60  ;;  %16937 = vst [vmem:[#allocation9_spill] sm:$0xff] %v14650_v35 }
 0x2ed   : > { %v8072_v1 = vsel %vm8040_vm4, %v8024_v27, %v8056_v34  ;;  %v8026_v39 = vadd.f32 %v14617_v10, %v8003_v61  ;;  %v14629_v52 = vpop.permute.xlu0 %7696  ;;  %v7855_v61 = vmul.f32 %v14593_v59, %v7790_v46 }
 0x2ee   : > { %8088 = vst.msk [vmem:[#allocation2 + $0x8] sm:$0xff] %vm1124_vm0, %v8072_v1  ;;  %v8071_v9 = vsel %vm8039_vm5, %v8023_v48, %v8055_v25  ;;  %v8025_v18 = vadd.f32 %v14617_v10, %v8002_v12  ;;  %v7857_v25 = vmul.f32 %v14593_v59, %v7800_v38  ;;  %v14658_v38 = vld [vmem:[#allocation3 + $0x3] ss:$2 sm:$0xff] }
 0x2ef   : > { %8087 = vst.msk [vmem:[#allocation2] sm:$0xff] %vm1124_vm0, %v8071_v9  ;;  %vm8042_vm6 = vcmp.ge.f32.partialorder %v8026_v39, 0.0  ;;  %v8058_v16 = vmul.f32 0.02, %v8026_v39  ;;  %v7871_v14 = vadd.f32 %v7855_v61, %v14476_v58  ;;  %v14656_v58 = vld [vmem:[#allocation3 + $0x4] ss:$2 sm:$0xff]  ;;  %v7874_v61 = vadd.f32 %v7858_v50, %v14480_v62 }
 0x2f0   : > { %vm8041_vm7 = vcmp.ge.f32.partialorder %v8025_v18, 0.0  ;;  %v8057_v51 = vmul.f32 0.02, %v8025_v18  ;;  %v14634_v32 = vpop.permute.xlu1 %7711  ;;  %16938 = vst [vmem:[#allocation8_spill] sm:$0xff] %v14656_v58  ;;  %16939 = vst [vmem:[#allocation10_spill] sm:$0xff] %v14658_v38 }
 0x2f1   : > { %v8074_v34 = vsel %vm8042_vm6, %v8026_v39, %v8058_v16  ;;  %v14637_v17 = vpop.permute.xlu0 %7706 }
 0x2f2   : > { %8090 = vst.msk [vmem:[#allocation2 + $0x18] sm:$0xff] %vm1124_vm0, %v8074_v34  ;;  %v8073_v27 = vsel %vm8041_vm7, %v8025_v18, %v8057_v51  ;;  %v14648_v51 = vld [vmem:[#allocation3 + $0x1] ss:$2 sm:$0xff] }
 0x2f3   : > { %8089 = vst.msk [vmem:[#allocation2 + $0x10] sm:$0xff] %vm1124_vm0, %v8073_v27  ;;  %v14654_v27 = vld [vmem:[#allocation3 + $0x2] ss:$2 sm:$0xff] }
 0x2f4   : > { %v7928_v63 = vpop.permute.xlu1 %7927 }
 0x2f5   : > { %v7989_v48 = vmul.f32 %v14605_v21, %v7928_v63  ;;  %v7923_v8 = vpop.permute.xlu0 %7922  ;;  %v1890_v18 = vpop.f32.mrf.mxu1 }
 0x2f6   : > { %v8103_v12 = vld [vmem:[#allocation2] ss:$2 sm:$0xff]  ;;  %v8111_v1 = vld [vmem:[#allocation2 + $0x1] ss:$2 sm:$0xff]  ;;  %v7988_v46 = vmul.f32 %v14605_v21, %v7923_v8  ;;  %v1960_v16 = vpop.f32.mrf.mxu0 }
 0x2f7   : > { %v8119_v39 = vmax.f32 %v8103_v12, %v8111_v1  ;;  %v8005_v9 = vadd.f32 %v7989_v48, %v7872_v33  ;;  %v14652_v34 = vadd.f32 %v1960_v16, %v1890_v18  ;;  %v11120_v8 = vpop.f32.mrf.mxu1 }
 0x2f8   : > { %v8004_v60 = vadd.f32 %v7988_v46, %v7871_v14  ;;  %v7938_v6 = vpop.permute.xlu1 %7937  ;;  %v7873_v14 = vadd.f32 %v7857_v25, %v14482_v15  ;;  %v11155_v16 = vpop.f32.mrf.mxu0 }
 0x2f9   : > { %v8028_v63 = vadd.f32 %v14617_v10, %v8005_v9  ;;  %v7991_v33 = vmul.f32 %v14605_v21, %v7938_v6  ;;  %v7933_v48 = vpop.permute.xlu0 %7932  ;;  %8127 = vst.msk [vmem:[#allocation3] sm:$0xff] %vm1124_vm0, %v8119_v39 }
 0x2fa   : > { %v8104_v12 = vld [vmem:[#allocation2 + $0x10] ss:$2 sm:$0xff]  ;;  %v8112_v1 = vld [vmem:[#allocation2 + $0x11] ss:$2 sm:$0xff]  ;;  %v8027_v46 = vadd.f32 %v14617_v10, %v8004_v60  ;;  %v7990_v18 = vmul.f32 %v14605_v21, %v7933_v48 }
 0x2fb   : > { %v8120_v38 = vmax.f32 %v8104_v12, %v8112_v1  ;;  %vm8044_vm8 = vcmp.ge.f32.partialorder %v8028_v63, 0.0  ;;  %v8060_v62 = vmul.f32 0.02, %v8028_v63  ;;  %v8007_v50 = vadd.f32 %v7991_v33, %v7874_v61 }
 0x2fc   : > { %vm8043_vm9 = vcmp.ge.f32.partialorder %v8027_v46, 0.0  ;;  %v8059_v9 = vmul.f32 0.02, %v8027_v46  ;;  %v8006_v6 = vadd.f32 %v7990_v18, %v7873_v14  ;;  %v7815_v35 = vpop.permute.xlu1 %7814  ;;  %v7727_v18 = vmul.f32 %v14450_v45, %v14586_v37 }
 0x2fd   : > { %v8076_v8 = vsel %vm8044_vm8, %v8028_v63, %v8060_v62  ;;  %v8030_v39 = vadd.f32 %v14617_v10, %v8007_v50  ;;  %v7810_v58 = vpop.permute.xlu0 %7809  ;;  %8128 = vst.msk [vmem:[#allocation3 + $0x8] sm:$0xff] %vm1124_vm0, %v8120_v38  ;;  %v14676_v62 = vld [vmem:[#allocation3 + $0x11] ss:$2 sm:$0xff]  ;;  %v14678_v50 = vld [vmem:[#allocation3 + $0x10] ss:$2 sm:$0xff]  ;;  %vm2264_vm8 = vcmask 523264  }
 0x2fe   : > { %8092 = vst.msk [vmem:[#allocation2 + $0x28] sm:$0xff] %vm1124_vm0, %v8076_v8  ;;  %v8075_v15 = vsel %vm8043_vm9, %v8027_v46, %v8059_v9  ;;  %v8029_v25 = vadd.f32 %v14617_v10, %v8006_v6  ;;  %16940 = vst [vmem:[#allocation11_spill] sm:$0xff] %v14678_v50  ;;  %v7726_v9 = vmul.f32 %v14450_v45, %v14588_v11  ;;  %v14682_v8 = vld [vmem:[#allocation3 + $0x12] ss:$2 sm:$0xff]  ;;  %vm2745_vm9 = vcmask 24576  }
 0x2ff   : > { %8091 = vst.msk [vmem:[#allocation2 + $0x20] sm:$0xff] %vm1124_vm0, %v8075_v15  ;;  %vm8046_vm10 = vcmp.ge.f32.partialorder %v8030_v39, 0.0  ;;  %v8062_v60 = vmul.f32 0.02, %v8030_v39  ;;  %v14686_v15 = vld [vmem:[#allocation3 + $0x13] ss:$2 sm:$0xff]  ;;  %v7729_v11 = vmul.f32 %v14450_v45, %v14595_v30 }
 0x300   : > { %vm8045_vm11 = vcmp.ge.f32.partialorder %v8029_v25, 0.0  ;;  %v8061_v61 = vmul.f32 0.02, %v8029_v25  ;;  %v7825_v33 = vpop.permute.xlu1 %7824  ;;  %16942 = vst [vmem:[#allocation13_spill] sm:$0xff] %v14686_v15  ;;  %v7742_v15 = vadd.f32 %v7726_v9, %v14502_v47 }
 0x301   : > { %v8078_v48 = vsel %vm8046_vm10, %v8030_v39, %v8062_v60  ;;  %v7820_v14 = vpop.permute.xlu0 %7819  ;;  %v14684_v39 = vld [vmem:[#allocation3 + $0x14] ss:$2 sm:$0xff]  ;;  %v7745_v9 = vadd.f32 %v7729_v11, %v14518_v2 }
 0x302   : > { %8094 = vst.msk [vmem:[#allocation2 + $0x38] sm:$0xff] %vm1124_vm0, %v8078_v48  ;;  %v8077_v63 = vsel %vm8045_vm11, %v8029_v25, %v8061_v61  ;;  %16941 = vst [vmem:[#allocation12_spill] sm:$0xff] %v14684_v39  ;;  %v7860_v25 = vmul.f32 %v14593_v59, %v7815_v35  ;;  %v7859_v48 = vmul.f32 %v14593_v59, %v7810_v58 }
 0x303   : > { %8093 = vst.msk [vmem:[#allocation2 + $0x30] sm:$0xff] %vm1124_vm0, %v8077_v63  ;;  %v7743_v63 = vadd.f32 %v7727_v18, %v14497_v42  ;;  %v7731_v35 = vmul.f32 %v14450_v45, %v14626_v7  ;;  %v7862_v58 = vmul.f32 %v14593_v59, %v7825_v33 }
 0x304   : > { %v7835_v38 = vpop.permute.xlu1 %7834  ;;  %v7875_v30 = vadd.f32 %v7859_v48, %v7742_v15 }
 0x305   : > { %v7830_v12 = vpop.permute.xlu0 %7829  ;;  %v7876_v39 = vadd.f32 %v7860_v25, %v7743_v63  ;;  %v7747_v25 = vadd.f32 %v7731_v35, %v14573_v19  ;;  %v7878_v15 = vadd.f32 %v7862_v58, %v7745_v9 }
 0x306   : > { %v8105_v1 = vld [vmem:[#allocation2 + $0x20] ss:$2 sm:$0xff]  ;;  %v8113_v46 = vld [vmem:[#allocation2 + $0x21] ss:$2 sm:$0xff] }
 0x307   : > { %v8121_v16 = vmax.f32 %v8105_v1, %v8113_v46  ;;  %v7728_v1 = vmul.f32 %v14450_v45, %v14598_v36  ;;  %v7861_v36 = vmul.f32 %v14593_v59, %v7820_v14  ;;  %v7733_v14 = vmul.f32 %v14450_v45, %v14634_v32 }
 0x308   : > { %v7845_v6 = vpop.permute.xlu1 %7844 }
 0x309   : > { %v7840_v60 = vpop.permute.xlu0 %7839  ;;  %8129 = vst.msk [vmem:[#allocation3 + $0x10] sm:$0xff] %vm1124_vm0, %v8121_v16  ;;  %v7730_v16 = vmul.f32 %v14450_v45, %v14629_v52  ;;  %v7744_v7 = vadd.f32 %v7728_v1, %v14520_v28  ;;  %v7864_v52 = vmul.f32 %v14593_v59, %v7835_v38  ;;  %v7732_v38 = vmul.f32 %v14450_v45, %v14637_v17 }
 0x30a   : > { %v8106_v37 = vld [vmem:[#allocation2 + $0x30] ss:$2 sm:$0xff]  ;;  %v8114_v61 = vld [vmem:[#allocation2 + $0x31] ss:$2 sm:$0xff]  ;;  %v7866_v58 = vmul.f32 %v14593_v59, %v7845_v6 }
 0x30b   : > { %v8122_v46 = vmax.f32 %v8106_v37, %v8114_v61  ;;  %v7746_v33 = vadd.f32 %v7730_v16, %v14576_v13 }
 0x30c   : > { %v7948_v50 = vpop.permute.xlu1 %7947 }
 0x30d   : > { %v7993_v42 = vmul.f32 %v14605_v21, %v7948_v50  ;;  %v7943_v18 = vpop.permute.xlu0 %7942  ;;  %8130 = vst.msk [vmem:[#allocation3 + $0x18] sm:$0xff] %vm1124_vm0, %v8122_v46  ;;  %v7863_v50 = vmul.f32 %v14593_v59, %v7830_v12  ;;  %v7880_v12 = vadd.f32 %v7864_v52, %v7747_v25 }
 0x30e   : > { %v7992_v47 = vmul.f32 %v14605_v21, %v7943_v18 }
 0x30f   : > { %v8009_v37 = vadd.f32 %v7993_v42, %v7876_v39  ;;  %v7877_v39 = vadd.f32 %v7861_v36, %v7744_v7  ;;  %v7879_v46 = vadd.f32 %v7863_v50, %v7746_v33  ;;  %v7749_v7 = vadd.f32 %v7733_v14, %v14581_v4 }
 0x310   : > { %v8008_v61 = vadd.f32 %v7992_v47, %v7875_v30  ;;  %v7958_v63 = vpop.permute.xlu1 %7957  ;;  %v7865_v30 = vmul.f32 %v14593_v59, %v7840_v60 }
 0x311   : > { %v8032_v48 = vadd.f32 %v14617_v10, %v8009_v37  ;;  %v7995_v2 = vmul.f32 %v14605_v21, %v7958_v63  ;;  %v7953_v28 = vpop.permute.xlu0 %7952  ;;  %v7748_v37 = vadd.f32 %v7732_v38, %v14584_v23  ;;  %v7882_v60 = vadd.f32 %v7866_v58, %v7749_v7 }
 0x312   : > { %v8031_v19 = vadd.f32 %v14617_v10, %v8008_v61  ;;  %v7994_v13 = vmul.f32 %v14605_v21, %v7953_v28 }
 0x313   : > { %vm8048_vm13 = vcmp.ge.f32.partialorder %v8032_v48, 0.0  ;;  %v8064_v11 = vmul.f32 0.02, %v8032_v48  ;;  %v8011_v1 = vadd.f32 %v7995_v2, %v7878_v15 }
 0x314   : > { %vm8047_vm14 = vcmp.ge.f32.partialorder %v8031_v19, 0.0  ;;  %v8063_v32 = vmul.f32 0.02, %v8031_v19  ;;  %v8010_v35 = vadd.f32 %v7994_v13, %v7877_v39  ;;  %v7968_v16 = vpop.permute.xlu1 %7967 }
 0x315   : > { %v8080_v42 = vsel %vm8048_vm13, %v8032_v48, %v8064_v11  ;;  %v8034_v18 = vadd.f32 %v14617_v10, %v8011_v1  ;;  %v7997_v45 = vmul.f32 %v14605_v21, %v7968_v16  ;;  %v7963_v17 = vpop.permute.xlu0 %7962  ;;  %v7881_v48 = vadd.f32 %v7865_v30, %v7748_v37  ;;  %v14748_v30 = vld [vmem:[#allocation3 + $0x23] ss:$2 sm:$0xff] }
 0x316   : > { %8096 = vst.msk [vmem:[#allocation2 + $0x48] sm:$0xff] %vm1124_vm0, %v8080_v42  ;;  %v8079_v36 = vsel %vm8047_vm14, %v8031_v19, %v8063_v32  ;;  %v8033_v47 = vadd.f32 %v14617_v10, %v8010_v35  ;;  %v7996_v9 = vmul.f32 %v14605_v21, %v7963_v17  ;;  %v14739_v32 = vld [vmem:[#allocation3 + $0x21] ss:$2 sm:$0xff]  ;;  %v14743_v35 = vld [vmem:[#allocation3 + $0x20] ss:$2 sm:$0xff] }
 0x317   : > { %8095 = vst.msk [vmem:[#allocation2 + $0x40] sm:$0xff] %vm1124_vm0, %v8079_v36  ;;  %vm8050_vm1 = vcmp.ge.f32.partialorder %v8034_v18, 0.0  ;;  %v8066_v6 = vmul.f32 0.02, %v8034_v18  ;;  %v8013_v52 = vadd.f32 %v7997_v45, %v7880_v12 }
 0x318   : > { %vm8049_vm2 = vcmp.ge.f32.partialorder %v8033_v47, 0.0  ;;  %v8065_v25 = vmul.f32 0.02, %v8033_v47  ;;  %v8012_v33 = vadd.f32 %v7996_v9, %v7879_v46  ;;  %v7978_v59 = vpop.permute.xlu1 %7977 }
 0x319   : > { %v8082_v50 = vsel %vm8050_vm1, %v8034_v18, %v8066_v6  ;;  %v8036_v61 = vadd.f32 %v14617_v10, %v8013_v52  ;;  %v7999_v63 = vmul.f32 %v14605_v21, %v7978_v59  ;;  %v7973_v15 = vpop.permute.xlu0 %7972  ;;  %v14746_v18 = vld [vmem:[#allocation3 + $0x24] ss:$2 sm:$0xff] }
 0x31a   : > { %8098 = vst.msk [vmem:[#allocation2 + $0x58] sm:$0xff] %vm1124_vm0, %v8082_v50  ;;  %v8081_v4 = vsel %vm8049_vm2, %v8033_v47, %v8065_v25  ;;  %v8035_v14 = vadd.f32 %v14617_v10, %v8012_v33  ;;  %v7998_v2 = vmul.f32 %v14605_v21, %v7973_v15  ;;  %v14741_v21 = vld [vmem:[#allocation3 + $0x22] ss:$2 sm:$0xff]  ;;  %v14754_v33 = vld [vmem:[#allocation3 + $0x31] ss:$2 sm:$0x1f] }
 0x31b   : > { %8097 = vst.msk [vmem:[#allocation2 + $0x50] sm:$0xff] %vm1124_vm0, %v8081_v4  ;;  %vm8052_vm4 = vcmp.ge.f32.partialorder %v8036_v61, 0.0  ;;  %v8068_v23 = vmul.f32 0.02, %v8036_v61  ;;  %v8015_v28 = vadd.f32 %v7999_v63, %v7882_v60 }
 0x31c   : > { %vm8051_vm5 = vcmp.ge.f32.partialorder %v8035_v14, 0.0  ;;  %v8067_v38 = vmul.f32 0.02, %v8035_v14  ;;  %v8014_v39 = vadd.f32 %v7998_v2, %v7881_v48  ;;  %v14756_v60 = vld [vmem:[#allocation3 + $0x32] ss:$2 sm:$0x1f] }
 0x31d   : > { %v8084_v19 = vsel %vm8052_vm4, %v8036_v61, %v8068_v23  ;;  %v8038_v13 = vadd.f32 %v14617_v10, %v8015_v28  ;;  %v14758_v50 = vld [vmem:[#allocation3 + $0x34] ss:$2 sm:$0x1f]  ;;  %v14762_v63 = vld [vmem:[#allocation3 + $0x33] ss:$2 sm:$0x1f] }
 0x31e   : > { %v8107_v12 = vld [vmem:[#allocation2 + $0x40] ss:$2 sm:$0xff]  ;;  %v8115_v11 = vld [vmem:[#allocation2 + $0x41] ss:$2 sm:$0xff]  ;;  %8100 = vst.msk [vmem:[#allocation2 + $0x68] sm:$0xff] %vm1124_vm0, %v8084_v19  ;;  %v8083_v1 = vsel %vm8051_vm5, %v8035_v14, %v8067_v38  ;;  %v8037_v46 = vadd.f32 %v14617_v10, %v8014_v39 }
 0x31f   : > { %v8123_v16 = vmax.f32 %v8107_v12, %v8115_v11  ;;  %8099 = vst.msk [vmem:[#allocation2 + $0x60] sm:$0xff] %vm1124_vm0, %v8083_v1  ;;  %vm8054_vm6 = vcmp.ge.f32.partialorder %v8038_v13, 0.0  ;;  %v8070_v58 = vmul.f32 0.02, %v8038_v13  ;;  %v2049_v42 = vpop.f32.mrf.mxu1  ;;  %v2139_v17 = vpop.f32.mrf.mxu0  ;;  %v9818_v28 = vld [vmem:[%s16904_s6] ss:$0 sm:$0xff] }
 0x320   : > { %vm8053_vm7 = vcmp.ge.f32.partialorder %v8037_v46, 0.0  ;;  %v8069_v45 = vmul.f32 0.02, %v8037_v46  ;;  %v14760_v61 = vld [vmem:[#allocation3 + $0x30] ss:$2 sm:$0x1f]  ;;  %v2053_v14 = vadd.f32 %v2049_v42, %v14652_v34 }
 0x321   : > { %v8086_v10 = vsel %vm8054_vm6, %v8038_v13, %v8070_v58  ;;  %v11190_v36 = vpop.f32.mrf.mxu1  ;;  %8131 = vst.msk [vmem:[#allocation3 + $0x20] sm:$0xff] %vm1124_vm0, %v8123_v16  ;;  %v11225_v6 = vpop.f32.mrf.mxu0  ;;  %v2252_v34 = vld [vmem:[%s16905_s7 + $0x38] sm:$0xff]  ;;  %v2251_v16 = vld [vmem:[%s16905_s7 + $0x30] sm:$0xff]  ;;  %v2250_v42 = vld [vmem:[%s16905_s7 + $0x28] sm:$0xff] }
 0x322   : > { %v8108_v47 = vld [vmem:[#allocation2 + $0x50] ss:$2 sm:$0xff]  ;;  %v8116_v9 = vld [vmem:[#allocation2 + $0x51] ss:$2 sm:$0xff]  ;;  %8102 = vst.msk [vmem:[#allocation2 + $0x78] sm:$0xf] %vm1140_vm15, %v8086_v10  ;;  %v8085_v7 = vsel %vm8053_vm7, %v8037_v46, %v8069_v45  ;;  %v2143_v2 = vadd.f32 %v2139_v17, %v2053_v14 }
 0x323   : > { %v8124_v52 = vmax.f32 %v8108_v47, %v8116_v9  ;;  %8101 = vst.msk [vmem:[#allocation2 + $0x70] sm:$0xff] %vm1124_vm0, %v8085_v7  ;;  %v9854_v46 = vld [vmem:[%s16905_s7 + $0x138] sm:$0xff]  ;;  %v9853_v58 = vld [vmem:[%s16905_s7 + $0x130] sm:$0xff]  ;;  %v9852_v45 = vld [vmem:[%s16905_s7 + $0x128] sm:$0xff] }
 0x324   : > { %v2249_v17 = vld [vmem:[%s16905_s7 + $0x20] sm:$0xff]  ;;  %v2248_v36 = vld [vmem:[%s16905_s7 + $0x18] sm:$0xff]  ;;  %v2247_v9 = vld [vmem:[%s16905_s7 + $0x10] sm:$0xff] }
 0x325   : > { %8132 = vst.msk [vmem:[#allocation3 + $0x28] sm:$0xff] %vm1124_vm0, %v8124_v52  ;;  %v9851_v10 = vld [vmem:[%s16905_s7 + $0x120] sm:$0xff]  ;;  %v9850_v47 = vld [vmem:[%s16905_s7 + $0x118] sm:$0xff]  ;;  %v9849_v7 = vld [vmem:[%s16905_s7 + $0x110] sm:$0xff] }
 0x326   : > { %v8109_v37 = vld [vmem:[#allocation2 + $0x60] ss:$2 sm:$0xff]  ;;  %v8117_v25 = vld [vmem:[#allocation2 + $0x61] ss:$2 sm:$0xff]  ;;  %v9844_v14 = vld [vmem:[%s16905_s7 + $0xf0] sm:$0xff] }
 0x327   : > { %v8125_v59 = vmax.f32 %v8109_v37, %v8117_v25  ;;  %v2246_v6 = vld [vmem:[%s16905_s7 + $0x8] sm:$0xff]  ;;  %v2245_v37 = vld [vmem:[%s16905_s7] sm:$0xff] }
 0x328   : > { %v9848_v52 = vld [vmem:[%s16905_s7 + $0x108] sm:$0xff]  ;;  %v9847_v25 = vld [vmem:[%s16905_s7 + $0x100] sm:$0xff] }
 0x329   : > { %8133 = vst.msk [vmem:[#allocation3 + $0x30] sm:$0xff] %vm1124_vm0, %v8125_v59  ;;  %v9866_v59 = vld [vmem:[%s16901_s3 + $0x38] sm:$0xff] }
 0x32a   : > { %v8110_v15 = vld [vmem:[#allocation2 + $0x70] ss:$2 sm:$0x3f]  ;;  %v8118_v48 = vld [vmem:[#allocation2 + $0x71] ss:$2 sm:$0x3f] }
 0x32b   : > { %v8126_v4 = vmax.f32 %v8110_v15, %v8118_v48  ;;  %v9845_v48 = vld [vmem:[%s16905_s7 + $0xf8] sm:$0xff] }
 0x32d   : > { %8134 = vst.msk [vmem:[#allocation3 + $0x38] sm:$0x3f] %vm1188_vm3, %v8126_v4  ;;  %v9865_v4 = vld [vmem:[%s16901_s3 + $0x30] sm:$0xff] }
 0x340   : > { %v2229_v23 = vpop.f32.mrf.mxu1 }
 0x341   : > { %v2233_v38 = vadd.f32 %v2229_v23, %v2143_v2  ;;  %v9864_v2 = vld [vmem:[%s16901_s3 + $0x28] sm:$0xff] }
 0x342   : > { %v11260_v39 = vpop.f32.mrf.mxu1  ;;  %v9843_v23 = vld [vmem:[%s16905_s7 + $0xe8] sm:$0xff] }
 0x343   : > { %v2241_v19 = vadd.f32 %v9818_v28, %v2233_v38  ;;  %v9863_v28 = vld [vmem:[%s16901_s3 + $0x20] sm:$0xff]  ;;  %v9878_v38 = vld [vmem:[%s16901_s3 + $0x58] sm:$0xff] }
 0x344   : > { %v9841_v39 = vld [vmem:[%s16905_s7 + $0xd8] sm:$0xff] }
 0x345   : > { %vm2242_vm15 = vcmp.ge.f32.partialorder %v2241_v19, 0.0  ;;  %v2243_v13 = vmul.f32 0.02, %v2241_v19 }
 0x347   : > { %v14770_v12 = vsel %vm2242_vm15, %v2241_v19, %v2243_v13  ;;  %v9877_v19 = vld [vmem:[%s16901_s3 + $0x50] sm:$0xff] }
 0x348   : > { %v2263_v11 = vrot.slane %v14770_v12, 1  ;;  %v2418_v1 = vrot.slane %v14770_v12, 2  ;;  %v2584_v15 = vrot.slane %v14770_v12, 4  ;;  %v9840_v13 = vld [vmem:[%s16905_s7 + $0xd0] sm:$0xff] }
 0x34a   : > { %11278 = vmatmul.mubr.msk.f32.vlgmr.msra.gmra.mxu0 %vm2264_vm8, %v2263_v11  ;;  %11316 = vmatmul.mubr.msk.f32.vlgmr.msra.gmra.mxu1 %vm2264_vm8, %v2418_v1  ;;  %v9839_v11 = vld [vmem:[%s16905_s7 + $0xc8] sm:$0xff]  ;;  %v9894_v1 = vld [vmem:[%s16901_s3 + $0x98] sm:$0xff] }
 0x34b   : > { %11281 = vmatpush3.msra.mxu0 %v2252_v34  ;;  %11338 = vmatpush3.msra.mxu1 %v9854_v46  ;;  %v9838_v34 = vld [vmem:[%s16905_s7 + $0xc0] sm:$0xff]  ;;  %v2664_v46 = vld [vmem:[%s16907_s9 + $0x8] sm:$0xff] }
 0x34c   : > { %11282 = vmatprep.subr.mxu0 %v16931_v0  ;;  %11339 = vmatprep.subr.mxu1 %v16931_v0 }
 0x34d   : > { %11283 = vmatpush3.msra.mxu0 %v2251_v16  ;;  %11340 = vmatpush3.msra.mxu1 %v9853_v58  ;;  %v2663_v16 = vld [vmem:[%s16907_s9] sm:$0xff]  ;;  %v3538_v58 = vld [vmem:[%s16901_s3 + $0x18] sm:$0xff] }
 0x34e   : > { %11284 = vmatprep.subr.mxu0 %v16931_v0  ;;  %11341 = vmatprep.subr.mxu1 %v16931_v0 }
 0x34f   : > { %11285 = vmatpush3.msra.mxu0 %v2250_v42  ;;  %11342 = vmatpush3.msra.mxu1 %v9852_v45 }
 0x350   : > { %11286 = vmatprep.subr.mxu0 %v16931_v0  ;;  %11343 = vmatprep.subr.mxu1 %v16931_v0 }
 0x351   : > { %11287 = vmatpush3.msra.mxu0 %v2249_v17  ;;  %11344 = vmatpush3.msra.mxu1 %v9851_v10 }
 0x352   : > { %11288 = vmatprep.subr.mxu0 %v16931_v0  ;;  %11345 = vmatprep.subr.mxu1 %v16931_v0 }
 0x353   : > { %11289 = vmatpush3.msra.mxu0 %v2248_v36  ;;  %11346 = vmatpush3.msra.mxu1 %v9850_v47 }
 0x354   : > { %11290 = vmatprep.subr.mxu0 %v16931_v0  ;;  %11347 = vmatprep.subr.mxu1 %v16931_v0 }
 0x355   : > { %11291 = vmatpush3.msra.mxu0 %v2247_v9  ;;  %11348 = vmatpush3.msra.mxu1 %v9849_v7 }
 0x356   : > { %11292 = vmatprep.subr.mxu0 %v16931_v0  ;;  %11349 = vmatprep.subr.mxu1 %v16931_v0 }
 0x357   : > { %11293 = vmatpush3.msra.mxu0 %v2246_v6  ;;  %11350 = vmatpush3.msra.mxu1 %v9848_v52 }
 0x358   : > { %11294 = vmatprep.subr.mxu0 %v16931_v0  ;;  %11351 = vmatprep.subr.mxu1 %v16931_v0 }
 0x359   : > { %11295 = vmatpush3.msra.mxu0 %v2245_v37  ;;  %11296 = vmatprep.mubr.msk.f32.mxu0 %vm12477_vm12, %v16931_v0 }
 0x35a   : > { %11352 = vmatpush3.msra.mxu1 %v9847_v25  ;;  %11353 = vmatprep.mubr.msk.f32.mxu1 %vm12477_vm12, %v16931_v0 }
 0x35b   : > { %11297 = vmatmul.mubr.msk.f32.vlgmr.msra.gmra.mxu0 %vm2264_vm8, %v14770_v12  ;;  %11318 = vmatprep.subr.mxu0 %v16931_v0 }
 0x35c   : > { %11354 = vmatmul.mubr.msk.f32.vlgmr.msra.gmra.mxu1 %vm2264_vm8, %v2584_v15  ;;  %11375 = vmatprep.subr.mxu1 %v9866_v59 }
 0x35d   : > { %11319 = vmatpush3.msra.mxu0 %v9845_v48  ;;  %11376 = vmatpush3.msra.mxu1 %v9866_v59  ;;  %v2658_v59 = vld [vmem:[%s16906_s8] sm:$0x1] }
 0x35e   : > { %11383 = vmatprep.mubr.msk.f32.mxu1 %vm1124_vm0, %v14074_v40  ;;  %11320 = vmatprep.subr.mxu0 %v16931_v0  ;;  %v9842_v40 = vld [vmem:[%s16905_s7 + $0xe0] sm:$0xff] }
 0x35f   : > { %11377 = vmatprep.subr.mxu1 %v9865_v4  ;;  %11321 = vmatpush3.msra.mxu0 %v9844_v14 }
 0x360   : > { %11378 = vmatpush3.msra.mxu1 %v9865_v4  ;;  %11322 = vmatprep.subr.mxu0 %v16931_v0 }
 0x361   : > { %11379 = vmatprep.subr.mxu1 %v9864_v2  ;;  %11323 = vmatpush3.msra.mxu0 %v9843_v23  ;;  %v3537_v23 = vld [vmem:[%s16901_s3 + $0x10] sm:$0xff] }
 0x362   : > { %11380 = vmatpush3.msra.mxu1 %v9864_v2  ;;  %11324 = vmatprep.subr.mxu0 %v16931_v0 }
 0x363   : > { %11381 = vmatprep.subr.mxu1 %v9863_v28  ;;  %11325 = vmatpush3.msra.mxu0 %v9842_v40  ;;  %v3535_v40 = vld [vmem:[%s16901_s3] sm:$0xff] }
 0x364   : > { %11382 = vmatpush3.msra.mxu1 %v9863_v28  ;;  %11326 = vmatprep.subr.mxu0 %v16931_v0  ;;  %v3536_v28 = vld [vmem:[%s16901_s3 + $0x8] sm:$0xff] }
 0x365   : > { %11384 = vmatmul.mubr.msk.f32.vlgmr.msra.gmra.mxu1 %vm1124_vm0, %v14216_v22  ;;  %11403 = vmatprep.subr.mxu1 %v9878_v38  ;;  %v9876_v22 = vld [vmem:[%s16901_s3 + $0x48] sm:$0xff] }
 0x366   : > { %11327 = vmatpush3.msra.mxu0 %v9841_v39  ;;  %11386 = vmatprep.mubr.msk.f32.mxu1 %vm1124_vm0, %v14352_v29  ;;  %v9875_v29 = vld [vmem:[%s16901_s3 + $0x40] sm:$0xff]  ;;  %v9884_v39 = vld [vmem:[%s16901_s3 + $0x68] sm:$0xff] }
 0x367   : > { %11404 = vmatpush3.msra.mxu1 %v9878_v38  ;;  %11328 = vmatprep.subr.mxu0 %v16931_v0  ;;  %v9886_v38 = vld [vmem:[%s16901_s3 + $0x78] sm:$0xff] }
 0x368   : > { %11405 = vmatprep.subr.mxu1 %v9877_v19  ;;  %11329 = vmatpush3.msra.mxu0 %v9840_v13  ;;  %v4118_v13 = vld [vmem:[%s16903_s5 + $0x70] sm:$0xff] }
 0x369   : > { %11406 = vmatpush3.msra.mxu1 %v9877_v19  ;;  %11330 = vmatprep.subr.mxu0 %v16931_v0  ;;  %v9883_v19 = vld [vmem:[%s16901_s3 + $0x60] sm:$0xff] }
 0x36a   : > { %11387 = vmatmul.mubr.msk.f32.gmra.mxu1 %vm1124_vm0, %v14401_v31  ;;  %11407 = vmatprep.subr.mxu1 %v9876_v22  ;;  %v2501_v31 = vrot.slane %v14770_v12, 3  ;;  %v9892_v12 = vld [vmem:[%s16901_s3 + $0x88] sm:$0xff] }
 0x36b   : > { %11331 = vmatpush3.msra.mxu0 %v9839_v11  ;;  %11408 = vmatpush3.msra.mxu1 %v9876_v22  ;;  %v9913_v22 = vld [vmem:[%s16903_s5 + $0xe8] sm:$0xff] }
 0x36c   : > { %11411 = vmatprep.mubr.msk.f32.mxu1 %vm1124_vm0, %v14079_v56  ;;  %11332 = vmatprep.subr.mxu0 %v16931_v0  ;;  %v9893_v56 = vld [vmem:[%s16901_s3 + $0x90] sm:$0xff]  ;;  %v4117_v11 = vld [vmem:[%s16903_s5 + $0x68] sm:$0xff] }
 0x36d   : > { %11409 = vmatprep.subr.mxu1 %v9875_v29  ;;  %11333 = vmatpush3.msra.mxu0 %v9838_v34  ;;  %v4116_v34 = vld [vmem:[%s16903_s5 + $0x60] sm:$0xff] }
 0x36e   : > { %11334 = vmatprep.mubr.msk.f32.mxu0 %vm12477_vm12, %v16931_v0  ;;  %11410 = vmatpush3.msra.mxu1 %v9875_v29  ;;  %v9912_v29 = vld [vmem:[%s16903_s5 + $0xe0] sm:$0xff] }
 0x36f   : > { %11335 = vmatmul.mubr.msk.f32.vlgmr.msra.gmra.mxu0 %vm2264_vm8, %v2501_v31  ;;  %11412 = vmatmul.mubr.msk.f32.vlgmr.msra.gmra.mxu1 %vm1124_vm0, %v14224_v55  ;;  %v9891_v55 = vld [vmem:[%s16901_s3 + $0x80] sm:$0xff]  ;;  %v9911_v31 = vld [vmem:[%s16903_s5 + $0xd8] sm:$0xff] }
 0x370   : > { %11431 = vmatprep.subr.mxu1 %v9894_v1  ;;  %11414 = vmatprep.mubr.msk.f32.mxu1 %vm1124_vm0, %v14354_v26  ;;  %v2668_v26 = vld [vmem:[%s16907_s9 + $0x28] sm:$0xff] }
 0x371   : > { %11432 = vmatpush3.msra.mxu1 %v9894_v1  ;;  %11356 = vmatprep.subr.mxu0 %v16931_v0  ;;  %v4115_v1 = vld [vmem:[%s16903_s5 + $0x58] sm:$0xff] }
 0x372   : > { %11433 = vmatprep.subr.mxu1 %v9893_v56  ;;  %11372 = vmatprep.mubr.msk.f32.mxu0 %vm12477_vm12, %v16931_v0 }
 0x373   : > { %11434 = vmatpush3.msra.mxu1 %v9893_v56  ;;  %v9910_v56 = vld [vmem:[%s16903_s5 + $0xd0] sm:$0xff] }
 0x374   : > { %11415 = vmatmul.mubr.msk.f32.gmra.mxu1 %vm1124_vm0, %v14403_v41  ;;  %11435 = vmatprep.subr.mxu1 %v9892_v12  ;;  %v2666_v41 = vld [vmem:[%s16907_s9 + $0x18] sm:$0xff] }
 0x375   : > { %11436 = vmatpush3.msra.mxu1 %v9892_v12  ;;  %11439 = vmatprep.mubr.msk.f32.mxu1 %vm1124_vm0, %v14092_v3  ;;  %v2670_v3 = vld [vmem:[%s16907_s9 + $0x38] sm:$0xff]  ;;  %v4114_v12 = vld [vmem:[%s16903_s5 + $0x50] sm:$0xff] }
 0x376   : > { %11437 = vmatprep.subr.mxu1 %v9891_v55  ;;  %11357 = vmatpush3.msra.mxu0 %v2670_v3  ;;  %v4113_v3 = vld [vmem:[%s16903_s5 + $0x48] sm:$0xff] }
 0x377   : > { %11438 = vmatpush3.msra.mxu1 %v9891_v55  ;;  %11358 = vmatprep.subr.mxu0 %v16931_v0  ;;  %v9909_v55 = vld [vmem:[%s16903_s5 + $0xc8] sm:$0xff] }
 0x378   : > { %11440 = vmatmul.mubr.msk.f32.vlgmr.msra.gmra.mxu1 %vm1124_vm0, %v14226_v43  ;;  %11480 = vmatprep.subr.mxu1 %v16931_v0  ;;  %v2669_v43 = vld [vmem:[%s16907_s9 + $0x30] sm:$0xff] }
 0x379   : > { %11442 = vmatprep.mubr.msk.f32.mxu1 %vm1124_vm0, %v14363_v24  ;;  %11359 = vmatpush3.msra.mxu0 %v2669_v43  ;;  %v2667_v24 = vld [vmem:[%s16907_s9 + $0x20] sm:$0xff] }
 0x37a   : > { %11360 = vmatprep.subr.mxu0 %v16931_v0  ;;  %v9908_v43 = vld [vmem:[%s16903_s5 + $0xc0] sm:$0xff] }
 0x37b   : > { %11361 = vmatpush3.msra.mxu0 %v2668_v26  ;;  %v4112_v26 = vld [vmem:[%s16903_s5 + $0x40] sm:$0xff] }
 0x37c   : > { %11443 = vmatmul.mubr.msk.f32.gmra.mxu1 %vm1124_vm0, %v14411_v54  ;;  %11362 = vmatprep.subr.mxu0 %v16931_v0  ;;  %v2665_v54 = vld [vmem:[%s16907_s9 + $0x10] sm:$0xff] }
 0x37d   : > { %11512 = vmatprep.mubr.msk.f32.mxu1 %vm12477_vm12, %v16931_v0  ;;  %11363 = vmatpush3.msra.mxu0 %v2667_v24  ;;  %v9907_v24 = vld [vmem:[%s16903_s5 + $0xb8] sm:$0xff] }
 0x37e   : > { %11364 = vmatprep.subr.mxu0 %v16931_v0 }
 0x37f   : > { %11365 = vmatpush3.msra.mxu0 %v2666_v41  ;;  %v4111_v41 = vld [vmem:[%s16903_s5 + $0x38] sm:$0xff] }
 0x380   : > { %11366 = vmatprep.subr.mxu0 %v16931_v0 }
 0x381   : > { %11367 = vmatpush3.msra.mxu0 %v2665_v54  ;;  %v9906_v54 = vld [vmem:[%s16903_s5 + $0xb0] sm:$0xff] }
 0x382   : > { %11368 = vmatprep.subr.mxu0 %v16931_v0 }
 0x383   : > { %11369 = vmatpush3.msra.mxu0 %v2664_v46  ;;  %v4110_v46 = vld [vmem:[%s16903_s5 + $0x30] sm:$0xff] }
 0x384   : > { %11370 = vmatprep.subr.mxu0 %v16931_v0 }
 0x385   : > { %11371 = vmatpush3.msra.mxu0 %v2663_v16  ;;  %v9905_v16 = vld [vmem:[%s16903_s5 + $0xa8] sm:$0xff] }
 0x386   : > { %11389 = vmatprep.subr.mxu0 %v3538_v58 }
 0x40a   : > { %v2333_v42 = vpop.f32.mrf.mxu0  ;;  %v2487_v45 = vpop.f32.mrf.mxu1 }
 0x40c   : > { %v11279_v17 = vpop.f32.mrf.mxu0  ;;  %v11317_v10 = vpop.f32.mrf.mxu1 }
 0x40d   : > { %v9903_v17 = vld [vmem:[%s16903_s5 + $0x98] sm:$0xff] }
 0x40e   : > { %v4107_v10 = vld [vmem:[%s16903_s5 + $0x18] sm:$0xff] }
 0x41b   : > { %v2405_v36 = vpop.f32.mrf.mxu0 }
 0x41c   : > { %v2653_v47 = vpop.f32.mrf.mxu1  ;;  %v2406_v6 = vadd.f32 %v2405_v36, %v2333_v42  ;;  %v9904_v42 = vld [vmem:[%s16903_s5 + $0xa0] sm:$0xff]  ;;  %v9902_v36 = vld [vmem:[%s16903_s5 + $0x90] sm:$0xff] }
 0x41d   : > { %v11298_v9 = vpop.f32.mrf.mxu0 }
 0x41e   : > { %v11355_v7 = vpop.f32.mrf.mxu1  ;;  %v2491_v52 = vadd.f32 %v2487_v45, %v2406_v6  ;;  %v4108_v45 = vld [vmem:[%s16903_s5 + $0x20] sm:$0xff]  ;;  %v9901_v9 = vld [vmem:[%s16903_s5 + $0x88] sm:$0xff] }
 0x41f   : > { %v4105_v7 = vld [vmem:[%s16903_s5 + $0x8] sm:$0xff]  ;;  %v9900_v6 = vld [vmem:[%s16903_s5 + $0x80] sm:$0xff] }
 0x42f   : > { %v2570_v37 = vpop.f32.mrf.mxu0 }
 0x430   : > { %v2574_v25 = vadd.f32 %v2570_v37, %v2491_v52  ;;  %v4104_v52 = vld [vmem:[%s16903_s5] sm:$0xff]  ;;  %v11385_v37 = vpop.f32.mrf.mxu1 }
 0x431   : > { %v11336_v15 = vpop.f32.mrf.mxu0 }
 0x432   : > { %v2657_v48 = vadd.f32 %v2653_v47, %v2574_v25  ;;  %v4106_v47 = vld [vmem:[%s16903_s5 + $0x10] sm:$0xff]  ;;  %v3625_v25 = vpop.f32.mrf.mxu1 }
 0x434   : > { %v2659_v4 = vadd.f32 %v2658_v59, %v2657_v48  ;;  %v11388_v59 = vpop.f32.mrf.mxu1 }
 0x436   : > { %v2661_v14 = vmul.f32 0.02, %v2659_v4  ;;  %vm2660_vm3 = vcmp.ge.f32.partialorder %v2659_v4, 0.0  ;;  %v3635_v15 = vpop.f32.mrf.mxu1 }
 0x438   : > { %v2662_v2 = vsel %vm2660_vm3, %v2659_v4, %v2661_v14  ;;  %v11413_v48 = vpop.f32.mrf.mxu1  ;;  %v2671_v4 = vld [vmem:[%s16908_s10] sm:$0x1] }
 0x439   : > { %11373 = vmatmul.mubr.msk.f32.vlgmr.msra.gmra.mxu0 %vm2264_vm8, %v2662_v2 }
 0x43a   : > { %11390 = vmatpush3.msra.mxu0 %v3538_v58  ;;  %11397 = vmatprep.mubr.msk.f32.mxu0 %vm1124_vm0, %v14081_v44  ;;  %v9885_v44 = vld [vmem:[%s16901_s3 + $0x70] sm:$0xff]  ;;  %v4109_v58 = vld [vmem:[%s16903_s5 + $0x28] sm:$0xff]  ;;  %v3827_v2 = vpop.f32.mrf.mxu1 }
 0x43b   : > { %11391 = vmatprep.subr.mxu0 %v3537_v23 }
 0x43c   : > { %11392 = vmatpush3.msra.mxu0 %v3537_v23 }
 0x43d   : > { %11393 = vmatprep.subr.mxu0 %v3536_v28 }
 0x43e   : > { %11394 = vmatpush3.msra.mxu0 %v3536_v28 }
 0x43f   : > { %11395 = vmatprep.subr.mxu0 %v3535_v40 }
 0x440   : > { %11396 = vmatpush3.msra.mxu0 %v3535_v40  ;;  %v11416_v40 = vpop.f32.mrf.mxu1 }
 0x441   : > { %11398 = vmatmul.mubr.msk.f32.vlgmr.msra.gmra.mxu0 %vm1124_vm0, %v14228_v49  ;;  %11417 = vmatprep.subr.mxu0 %v9886_v38  ;;  %v16943_v49 = vld [vmem:[#allocation6_spill] sm:$0xff] }
 0x442   : > { %11400 = vmatprep.mubr.msk.f32.mxu0 %vm1124_vm0, %v14356_v20  ;;  %11418 = vmatpush3.msra.mxu0 %v9886_v38  ;;  %v16944_v20 = vld [vmem:[#allocation7_spill] sm:$0xff] }
 0x443   : > { %11419 = vmatprep.subr.mxu0 %v9885_v44 }
 0x444   : > { %11420 = vmatpush3.msra.mxu0 %v9885_v44  ;;  %v3837_v44 = vpop.f32.mrf.mxu1 }
 0x445   : > { %11401 = vmatmul.mubr.msk.f32.gmra.mxu0 %vm1124_vm0, %v14415_v53  ;;  %11421 = vmatprep.subr.mxu0 %v9884_v39  ;;  %v4119_v53 = vld [vmem:[%s16903_s5 + $0x78] sm:$0xff] }
 0x446   : > { %11422 = vmatpush3.msra.mxu0 %v9884_v39  ;;  %11425 = vmatprep.mubr.msk.f32.mxu0 %vm1124_vm0, %v14094_v57  ;;  %v9915_v57 = vld [vmem:[%s16903_s5 + $0xf8] sm:$0xff] }
 0x447   : > { %11423 = vmatprep.subr.mxu0 %v9883_v19  ;;  %11481 = vmatpush3.msra.mxu1 %v4119_v53 }
 0x448   : > { %11424 = vmatpush3.msra.mxu0 %v9883_v19  ;;  %11482 = vmatprep.subr.mxu1 %v16931_v0 }
 0x449   : > { %11426 = vmatmul.mubr.msk.f32.vlgmr.msra.gmra.mxu0 %vm1124_vm0, %v14238_v5  ;;  %11445 = vmatprep.subr.mxu0 %v16931_v0  ;;  %v9914_v5 = vld [vmem:[%s16903_s5 + $0xf0] sm:$0xff] }
 0x44a   : > { %11428 = vmatprep.mubr.msk.f32.mxu0 %vm1124_vm0, %v16943_v49  ;;  %11446 = vmatpush3.msra.mxu0 %v9915_v57 }
 0x44b   : > { %11447 = vmatprep.subr.mxu0 %v16931_v0  ;;  %11483 = vmatpush3.msra.mxu1 %v4118_v13 }
 0x44c   : > { %11448 = vmatpush3.msra.mxu0 %v9914_v5  ;;  %11484 = vmatprep.subr.mxu1 %v16931_v0 }
 0x44d   : > { %11429 = vmatmul.mubr.msk.f32.gmra.mxu0 %vm1124_vm0, %v16944_v20  ;;  %11449 = vmatprep.subr.mxu0 %v16931_v0  ;;  %v11441_v20 = vpop.f32.mrf.mxu1 }
 0x44e   : > { %11477 = vmatprep.mubr.msk.f32.mxu0 %vm12477_vm12, %v16931_v0  ;;  %11450 = vmatpush3.msra.mxu0 %v9913_v22 }
 0x44f   : > { %11485 = vmatpush3.msra.mxu1 %v4117_v11  ;;  %11451 = vmatprep.subr.mxu0 %v16931_v0  ;;  %v4045_v11 = vpop.f32.mrf.mxu1 }
 0x450   : > { %11486 = vmatprep.subr.mxu1 %v16931_v0  ;;  %11452 = vmatpush3.msra.mxu0 %v9912_v29 }
 0x451   : > { %11487 = vmatpush3.msra.mxu1 %v4116_v34  ;;  %11453 = vmatprep.subr.mxu0 %v16931_v0 }
 0x452   : > { %11488 = vmatprep.subr.mxu1 %v16931_v0  ;;  %11454 = vmatpush3.msra.mxu0 %v9911_v31 }
 0x453   : > { %11489 = vmatpush3.msra.mxu1 %v4115_v1  ;;  %11455 = vmatprep.subr.mxu0 %v16931_v0  ;;  %v9899_v1 = vld [vmem:[%s16902_s4] ss:$0 sm:$0xff] }
 0x454   : > { %11490 = vmatprep.subr.mxu1 %v16931_v0  ;;  %11456 = vmatpush3.msra.mxu0 %v9910_v56 }
 0x455   : > { %11491 = vmatpush3.msra.mxu1 %v4114_v12  ;;  %11457 = vmatprep.subr.mxu0 %v16931_v0 }
 0x456   : > { %11492 = vmatprep.subr.mxu1 %v16931_v0  ;;  %11458 = vmatpush3.msra.mxu0 %v9909_v55 }
 0x457   : > { %11493 = vmatpush3.msra.mxu1 %v4113_v3  ;;  %11459 = vmatprep.subr.mxu0 %v16931_v0 }
 0x458   : > { %11494 = vmatprep.subr.mxu1 %v16931_v0  ;;  %11460 = vmatpush3.msra.mxu0 %v9908_v43 }
 0x459   : > { %11495 = vmatpush3.msra.mxu1 %v4112_v26  ;;  %11461 = vmatprep.subr.mxu0 %v16931_v0  ;;  %v11444_v26 = vpop.f32.mrf.mxu1 }
 0x45a   : > { %11496 = vmatprep.subr.mxu1 %v16931_v0  ;;  %11462 = vmatpush3.msra.mxu0 %v9907_v24 }
 0x45b   : > { %11497 = vmatpush3.msra.mxu1 %v4111_v41  ;;  %11463 = vmatprep.subr.mxu0 %v16931_v0 }
 0x45c   : > { %11498 = vmatprep.subr.mxu1 %v16931_v0  ;;  %11464 = vmatpush3.msra.mxu0 %v9906_v54 }
 0x45d   : > { %11499 = vmatpush3.msra.mxu1 %v4110_v46  ;;  %11465 = vmatprep.subr.mxu0 %v16931_v0 }
 0x45e   : > { %11500 = vmatprep.subr.mxu1 %v16931_v0  ;;  %11466 = vmatpush3.msra.mxu0 %v9905_v16 }
 0x45f   : > { %11501 = vmatpush3.msra.mxu1 %v4109_v58  ;;  %11467 = vmatprep.subr.mxu0 %v16931_v0 }
 0x460   : > { %11502 = vmatprep.subr.mxu1 %v16931_v0  ;;  %11468 = vmatpush3.msra.mxu0 %v9904_v42 }
 0x461   : > { %11503 = vmatpush3.msra.mxu1 %v4108_v45  ;;  %11469 = vmatprep.subr.mxu0 %v16931_v0 }
 0x462   : > { %11504 = vmatprep.subr.mxu1 %v16931_v0  ;;  %11470 = vmatpush3.msra.mxu0 %v9903_v17 }
 0x463   : > { %11505 = vmatpush3.msra.mxu1 %v4107_v10  ;;  %11471 = vmatprep.subr.mxu0 %v16931_v0  ;;  %v4055_v10 = vpop.f32.mrf.mxu1 }
 0x464   : > { %11506 = vmatprep.subr.mxu1 %v16931_v0  ;;  %11472 = vmatpush3.msra.mxu0 %v9902_v36 }
 0x465   : > { %11507 = vmatpush3.msra.mxu1 %v4106_v47  ;;  %11473 = vmatprep.subr.mxu0 %v16931_v0 }
 0x466   : > { %11508 = vmatprep.subr.mxu1 %v16931_v0  ;;  %11474 = vmatpush3.msra.mxu0 %v9901_v9 }
 0x467   : > { %11509 = vmatpush3.msra.mxu1 %v4105_v7  ;;  %11475 = vmatprep.subr.mxu0 %v16931_v0 }
 0x468   : > { %11510 = vmatprep.subr.mxu1 %v16931_v0  ;;  %11476 = vmatpush3.msra.mxu0 %v9900_v6 }
 0x469   : > { %11511 = vmatpush3.msra.mxu1 %v4104_v52  ;;  %11515 = vmatprep.subr.mxu0 %v16931_v0 }
 0x46a   : > { %11550 = vmatprep.subr.mxu1 %v16931_v0 }
 0x4f9   : > { %v2741_v14 = vpop.f32.mrf.mxu0 }
 0x4fa   : > { %v2742_v23 = vadd.f32 %v2741_v14, %v2671_v4 }
 0x4fb   : > { %v11374_v28 = vpop.f32.mrf.mxu0 }
 0x4fc   : > { %2746 = vst.msk [vmem:[%s15162_s21] sm:$0x1] %vm2745_vm9, %v2742_v23 }
 0x501   : > { %v11399_v38 = vpop.f32.mrf.mxu0 }
 0x502   : > { %v3728_v19 = vadd.f32 %v11399_v38, %v11385_v37  ;;  %v9947_v38 = vld [vmem:[%s16903_s5 + $0x1f8] sm:$0xff] }
 0x503   : > { %v3722_v39 = vpop.f32.mrf.mxu0 }
 0x504   : > { %v3723_v57 = vadd.f32 %v3722_v39, %v3625_v25  ;;  %v3847_v13 = vadd.f32 %v11413_v48, %v3728_v19  ;;  %v9930_v19 = vld [vmem:[%s16903_s5 + $0x170] sm:$0xff] }
 0x505   : > { %v11402_v49 = vpop.f32.mrf.mxu0 }
 0x506   : > { %v3738_v5 = vadd.f32 %v11402_v49, %v11388_v59  ;;  %v3846_v34 = vadd.f32 %v3827_v2, %v3723_v57  ;;  %v9946_v49 = vld [vmem:[%s16903_s5 + $0x1f0] sm:$0xff]  ;;  %v9945_v57 = vld [vmem:[%s16903_s5 + $0x1e8] sm:$0xff] }
 0x507   : > { %v3732_v53 = vpop.f32.mrf.mxu0 }
 0x508   : > { %v3733_v31 = vadd.f32 %v3732_v53, %v3635_v15  ;;  %v3849_v3 = vadd.f32 %v11416_v40, %v3738_v5  ;;  %v9931_v40 = vld [vmem:[%s16903_s5 + $0x178] sm:$0xff]  ;;  %v9928_v53 = vld [vmem:[%s16903_s5 + $0x160] sm:$0xff] }
 0x509   : > { %v11427_v22 = vpop.f32.mrf.mxu0  ;;  %v9944_v5 = vld [vmem:[%s16903_s5 + $0x1e0] sm:$0xff] }
 0x50a   : > { %v3956_v29 = vadd.f32 %v11427_v22, %v3847_v13  ;;  %v3848_v46 = vadd.f32 %v3837_v44, %v3733_v31  ;;  %v9927_v13 = vld [vmem:[%s16903_s5 + $0x158] sm:$0xff]  ;;  %v9941_v31 = vld [vmem:[%s16903_s5 + $0x1c8] sm:$0xff] }
 0x50b   : > { %v3936_v56 = vpop.f32.mrf.mxu0  ;;  %v9943_v22 = vld [vmem:[%s16903_s5 + $0x1d8] sm:$0xff] }
 0x50c   : > { %v4065_v12 = vadd.f32 %v11441_v20, %v3956_v29  ;;  %v3955_v55 = vadd.f32 %v3936_v56, %v3846_v34  ;;  %v9929_v20 = vld [vmem:[%s16903_s5 + $0x168] sm:$0xff]  ;;  %v9942_v29 = vld [vmem:[%s16903_s5 + $0x1d0] sm:$0xff]  ;;  %v9940_v56 = vld [vmem:[%s16903_s5 + $0x1c0] sm:$0xff] }
 0x50d   : > { %v11430_v43 = vpop.f32.mrf.mxu0  ;;  %v9925_v34 = vld [vmem:[%s16903_s5 + $0x148] sm:$0xff] }
 0x50e   : > { %v4076_v24 = vadd.f32 %v9899_v1, %v4065_v12  ;;  %v4064_v41 = vadd.f32 %v4045_v11, %v3955_v55  ;;  %v3958_v54 = vadd.f32 %v11430_v43, %v3849_v3  ;;  %v9926_v11 = vld [vmem:[%s16903_s5 + $0x150] sm:$0xff]  ;;  %v9923_v12 = vld [vmem:[%s16903_s5 + $0x138] sm:$0xff] }
 0x50f   : > { %v3946_v16 = vpop.f32.mrf.mxu0  ;;  %v9939_v55 = vld [vmem:[%s16903_s5 + $0x1b8] sm:$0xff]  ;;  %v9922_v3 = vld [vmem:[%s16903_s5 + $0x130] sm:$0xff] }
 0x510   : > { %vm4080_vm10 = vcmp.ge.f32.partialorder %v4076_v24, 0.0  ;;  %v4084_v58 = vmul.f32 0.02, %v4076_v24  ;;  %v4075_v42 = vadd.f32 %v9899_v1, %v4064_v41  ;;  %v4067_v45 = vadd.f32 %v11444_v26, %v3958_v54  ;;  %v9938_v43 = vld [vmem:[%s16903_s5 + $0x1b0] sm:$0xff]  ;;  %v9921_v26 = vld [vmem:[%s16903_s5 + $0x128] sm:$0xff]  ;;  %v9920_v41 = vld [vmem:[%s16903_s5 + $0x120] sm:$0xff] }
 0x511   : > { %v3957_v17 = vadd.f32 %v3946_v16, %v3848_v46  ;;  %v9936_v54 = vld [vmem:[%s16903_s5 + $0x1a0] sm:$0xff]  ;;  %v9919_v46 = vld [vmem:[%s16903_s5 + $0x118] sm:$0xff] }
 0x512   : > { %v4088_v36 = vsel %vm4080_vm10, %v4076_v24, %v4084_v58  ;;  %vm4079_vm11 = vcmp.ge.f32.partialorder %v4075_v42, 0.0  ;;  %v4083_v47 = vmul.f32 0.02, %v4075_v42  ;;  %v4078_v9 = vadd.f32 %v9899_v1, %v4067_v45  ;;  %v9937_v24 = vld [vmem:[%s16903_s5 + $0x1a8] sm:$0xff]  ;;  %v9935_v16 = vld [vmem:[%s16903_s5 + $0x198] sm:$0xff]  ;;  %v9918_v58 = vld [vmem:[%s16903_s5 + $0x110] sm:$0xff] }
 0x513   : > { %4092 = vst [vmem:[#allocation4 + $0x8] sm:$0xff] %v4088_v36  ;;  %v4066_v7 = vadd.f32 %v4055_v10, %v3957_v17  ;;  %v9917_v45 = vld [vmem:[%s16903_s5 + $0x108] sm:$0xff]  ;;  %v9916_v10 = vld [vmem:[%s16903_s5 + $0x100] sm:$0xff] }
 0x514   : > { %v4087_v6 = vsel %vm4079_vm11, %v4075_v42, %v4083_v47  ;;  %vm4082_vm13 = vcmp.ge.f32.partialorder %v4078_v9, 0.0  ;;  %v4086_v52 = vmul.f32 0.02, %v4078_v9  ;;  %v9934_v42 = vld [vmem:[%s16903_s5 + $0x190] sm:$0xff]  ;;  %v9933_v17 = vld [vmem:[%s16903_s5 + $0x188] sm:$0xff]  ;;  %v9932_v36 = vld [vmem:[%s16903_s5 + $0x180] sm:$0xff] }
 0x515   : > { %4091 = vst [vmem:[#allocation4] sm:$0xff] %v4087_v6  ;;  %v4077_v37 = vadd.f32 %v9899_v1, %v4066_v7  ;;  %v9924_v1 = vld [vmem:[%s16903_s5 + $0x140] sm:$0xff]  ;;  %v9963_v47 = vld [vmem:[%s16903_s5 + $0x278] sm:$0xff]  ;;  %v9962_v6 = vld [vmem:[%s16903_s5 + $0x270] sm:$0xff] }
 0x516   : > { %v4090_v25 = vsel %vm4082_vm13, %v4078_v9, %v4086_v52  ;;  %v9961_v52 = vld [vmem:[%s16903_s5 + $0x268] sm:$0xff] }
 0x517   : > { %4094 = vst [vmem:[#allocation4 + $0x18] sm:$0x1f] %v4090_v25  ;;  %vm4081_vm14 = vcmp.ge.f32.partialorder %v4077_v37, 0.0  ;;  %v4085_v59 = vmul.f32 0.02, %v4077_v37  ;;  %v9959_v25 = vld [vmem:[%s16903_s5 + $0x258] sm:$0xff] }
 0x519   : > { %v4089_v15 = vsel %vm4081_vm14, %v4077_v37, %v4085_v59  ;;  %v9960_v37 = vld [vmem:[%s16903_s5 + $0x260] sm:$0xff]  ;;  %v9958_v59 = vld [vmem:[%s16903_s5 + $0x250] sm:$0xff] }
 0x51a   : > { %4093 = vst [vmem:[#allocation4 + $0x10] sm:$0xff] %v4089_v15  ;;  %v9957_v15 = vld [vmem:[%s16903_s5 + $0x248] sm:$0xff] }
 0x51c   : > { %v4095_v48 = vld [vmem:[#allocation4] ss:$2 sm:$0xff]  ;;  %v4097_v4 = vld [vmem:[#allocation4 + $0x1] ss:$2 sm:$0xff] }
 0x51d   : > { %v4099_v14 = vmax.f32 %v4095_v48, %v4097_v4  ;;  %v9956_v48 = vld [vmem:[%s16903_s5 + $0x240] sm:$0xff]  ;;  %v9955_v4 = vld [vmem:[%s16903_s5 + $0x238] sm:$0xff] }
 0x51f   : > { %4101 = vst [vmem:[#allocation5] sm:$0xff] %v4099_v14  ;;  %v9954_v14 = vld [vmem:[%s16903_s5 + $0x230] sm:$0xff] }
 0x521   : > { %v4096_v2 = vld [vmem:[#allocation4 + $0x10] ss:$2 sm:$0x3f]  ;;  %v4098_v23 = vld [vmem:[#allocation4 + $0x11] ss:$2 sm:$0x3f] }
 0x522   : > { %v4100_v28 = vmax.f32 %v4096_v2, %v4098_v23  ;;  %v9953_v2 = vld [vmem:[%s16903_s5 + $0x228] sm:$0xff]  ;;  %v9952_v23 = vld [vmem:[%s16903_s5 + $0x220] sm:$0xff] }
 0x524   : > { %4102 = vst [vmem:[#allocation5 + $0x8] sm:$0x3f] %v4100_v28  ;;  %v9951_v28 = vld [vmem:[%s16903_s5 + $0x218] sm:$0xff] }
 0x52b   : > { %v4120_v44 = vld [vmem:[#allocation5 + $0x1] ss:$2 sm:$0x1f]  ;;  %v4103_v39 = vld [vmem:[#allocation5] ss:$2 sm:$0x1f] }
 0x52c   : > { %11478 = vmatmul.mubr.f32.vlgmr.msra.gmra.mxu0 %v4120_v44  ;;  %11513 = vmatmul.mubr.f32.vlgmr.msra.gmra.mxu1 %v4103_v39  ;;  %v4277_v9 = vld [vmem:[#allocation5 + $0x2] ss:$2 sm:$0x1f]  ;;  %v4365_v7 = vld [vmem:[#allocation5 + $0x3] ss:$2 sm:$0x1f] }
 0x52d   : > { %11516 = vmatpush3.msra.mxu0 %v9931_v40  ;;  %11551 = vmatpush3.msra.mxu1 %v9947_v38  ;;  %v9950_v40 = vld [vmem:[%s16903_s5 + $0x210] sm:$0xff]  ;;  %v9949_v38 = vld [vmem:[%s16903_s5 + $0x208] sm:$0xff]  ;;  %v9948_v44 = vld [vmem:[%s16903_s5 + $0x200] sm:$0xff] }
 0x52e   : > { %11517 = vmatprep.subr.mxu0 %v16931_v0  ;;  %11552 = vmatprep.subr.mxu1 %v16931_v0  ;;  %v4453_v39 = vld [vmem:[#allocation5 + $0x4] ss:$2 sm:$0x1f] }
 0x52f   : > { %11518 = vmatpush3.msra.mxu0 %v9930_v19  ;;  %11553 = vmatpush3.msra.mxu1 %v9946_v49  ;;  %v9972_v19 = vld [vmem:[%s16905_s7 + $0x78] sm:$0xff] }
 0x530   : > { %11519 = vmatprep.subr.mxu0 %v16931_v0  ;;  %11554 = vmatprep.subr.mxu1 %v16931_v0  ;;  %v9982_v49 = vld [vmem:[%s16905_s7 + $0xb8] sm:$0xff] }
 0x531   : > { %11520 = vmatpush3.msra.mxu0 %v9929_v20  ;;  %11555 = vmatpush3.msra.mxu1 %v9945_v57  ;;  %v9971_v20 = vld [vmem:[%s16905_s7 + $0x70] sm:$0xff] }
 0x532   : > { %11521 = vmatprep.subr.mxu0 %v16931_v0  ;;  %11556 = vmatprep.subr.mxu1 %v16931_v0  ;;  %v9981_v57 = vld [vmem:[%s16905_s7 + $0xb0] sm:$0xff] }
 0x533   : > { %11522 = vmatpush3.msra.mxu0 %v9928_v53  ;;  %11557 = vmatpush3.msra.mxu1 %v9944_v5  ;;  %v9970_v53 = vld [vmem:[%s16905_s7 + $0x68] sm:$0xff] }
 0x534   : > { %11523 = vmatprep.subr.mxu0 %v16931_v0  ;;  %11558 = vmatprep.subr.mxu1 %v16931_v0  ;;  %v9980_v5 = vld [vmem:[%s16905_s7 + $0xa8] sm:$0xff] }
 0x535   : > { %11524 = vmatpush3.msra.mxu0 %v9927_v13  ;;  %11559 = vmatpush3.msra.mxu1 %v9943_v22  ;;  %v9969_v13 = vld [vmem:[%s16905_s7 + $0x60] sm:$0xff] }
 0x536   : > { %11525 = vmatprep.subr.mxu0 %v16931_v0  ;;  %11560 = vmatprep.subr.mxu1 %v16931_v0  ;;  %v9979_v22 = vld [vmem:[%s16905_s7 + $0xa0] sm:$0xff] }
 0x537   : > { %11526 = vmatpush3.msra.mxu0 %v9926_v11  ;;  %11561 = vmatpush3.msra.mxu1 %v9942_v29  ;;  %v9968_v11 = vld [vmem:[%s16905_s7 + $0x58] sm:$0xff] }
 0x538   : > { %11527 = vmatprep.subr.mxu0 %v16931_v0  ;;  %11562 = vmatprep.subr.mxu1 %v16931_v0  ;;  %v9978_v29 = vld [vmem:[%s16905_s7 + $0x98] sm:$0xff] }
 0x539   : > { %11528 = vmatpush3.msra.mxu0 %v9925_v34  ;;  %11563 = vmatpush3.msra.mxu1 %v9941_v31  ;;  %v9967_v34 = vld [vmem:[%s16905_s7 + $0x50] sm:$0xff] }
 0x53a   : > { %11529 = vmatprep.subr.mxu0 %v16931_v0  ;;  %11564 = vmatprep.subr.mxu1 %v16931_v0  ;;  %v9977_v31 = vld [vmem:[%s16905_s7 + $0x90] sm:$0xff] }
 0x53b   : > { %11530 = vmatpush3.msra.mxu0 %v9924_v1  ;;  %11565 = vmatpush3.msra.mxu1 %v9940_v56  ;;  %v9966_v1 = vld [vmem:[%s16905_s7 + $0x48] sm:$0xff] }
 0x53c   : > { %11531 = vmatprep.subr.mxu0 %v16931_v0  ;;  %11566 = vmatprep.subr.mxu1 %v16931_v0  ;;  %v9976_v56 = vld [vmem:[%s16905_s7 + $0x88] sm:$0xff] }
 0x53d   : > { %11532 = vmatpush3.msra.mxu0 %v9923_v12  ;;  %11567 = vmatpush3.msra.mxu1 %v9939_v55  ;;  %v9965_v12 = vld [vmem:[%s16905_s7 + $0x40] sm:$0xff] }
 0x53e   : > { %11533 = vmatprep.subr.mxu0 %v16931_v0  ;;  %11568 = vmatprep.subr.mxu1 %v16931_v0  ;;  %v9975_v55 = vld [vmem:[%s16905_s7 + $0x80] sm:$0xff] }
 0x53f   : > { %11534 = vmatpush3.msra.mxu0 %v9922_v3  ;;  %11569 = vmatpush3.msra.mxu1 %v9938_v43 }
 0x540   : > { %11535 = vmatprep.subr.mxu0 %v16931_v0  ;;  %11570 = vmatprep.subr.mxu1 %v16931_v0 }
 0x541   : > { %11536 = vmatpush3.msra.mxu0 %v9921_v26  ;;  %11571 = vmatpush3.msra.mxu1 %v9937_v24 }
 0x542   : > { %11537 = vmatprep.subr.mxu0 %v16931_v0  ;;  %11572 = vmatprep.subr.mxu1 %v16931_v0 }
 0x543   : > { %11538 = vmatpush3.msra.mxu0 %v9920_v41  ;;  %11573 = vmatpush3.msra.mxu1 %v9936_v54 }
 0x544   : > { %11539 = vmatprep.subr.mxu0 %v16931_v0  ;;  %11574 = vmatprep.subr.mxu1 %v16931_v0 }
 0x545   : > { %11540 = vmatpush3.msra.mxu0 %v9919_v46  ;;  %11575 = vmatpush3.msra.mxu1 %v9935_v16 }
 0x546   : > { %11541 = vmatprep.subr.mxu0 %v16931_v0  ;;  %11576 = vmatprep.subr.mxu1 %v16931_v0 }
 0x547   : > { %11542 = vmatpush3.msra.mxu0 %v9918_v58  ;;  %11577 = vmatpush3.msra.mxu1 %v9934_v42 }
 0x548   : > { %11543 = vmatprep.subr.mxu0 %v16931_v0  ;;  %11578 = vmatprep.subr.mxu1 %v16931_v0 }
 0x549   : > { %11544 = vmatpush3.msra.mxu0 %v9917_v45  ;;  %11579 = vmatpush3.msra.mxu1 %v9933_v17 }
 0x54a   : > { %11545 = vmatprep.subr.mxu0 %v16931_v0  ;;  %11580 = vmatprep.subr.mxu1 %v16931_v0 }
 0x54b   : > { %11546 = vmatpush3.msra.mxu0 %v9916_v10  ;;  %11547 = vmatprep.mubr.msk.f32.mxu0 %vm12477_vm12, %v16931_v0  ;;  %v9964_v10 = vld [vmem:[%s16904_s6] ss:$0 sm:$0xff] }
 0x54c   : > { %11581 = vmatpush3.msra.mxu1 %v9932_v36  ;;  %11582 = vmatprep.mubr.msk.f32.mxu1 %vm12477_vm12, %v16931_v0 }
 0x54d   : > { %11548 = vmatmul.mubr.f32.vlgmr.msra.gmra.mxu0 %v4277_v9  ;;  %11583 = vmatmul.mubr.f32.vlgmr.msra.gmra.mxu1 %v4365_v7 }
 0x54e   : > { %11585 = vmatprep.subr.mxu0 %v16931_v0  ;;  %11617 = vmatprep.mubr.msk.f32.mxu0 %vm12477_vm12, %v16931_v0 }
 0x54f   : > { %11586 = vmatpush3.msra.mxu0 %v9963_v47  ;;  %11620 = vmatprep.subr.mxu1 %v16931_v0 }
 0x550   : > { %11587 = vmatprep.subr.mxu0 %v16931_v0  ;;  %11636 = vmatprep.mubr.msk.f32.mxu1 %vm12477_vm12, %v16931_v0 }
 0x551   : > { %11588 = vmatpush3.msra.mxu0 %v9962_v6  ;;  %11621 = vmatpush3.msra.mxu1 %v9972_v19  ;;  %v9994_v19 = vld [vmem:[%s16905_s7 + $0x108] sm:$0xff] }
 0x552   : > { %11589 = vmatprep.subr.mxu0 %v16931_v0  ;;  %11622 = vmatprep.subr.mxu1 %v16931_v0 }
 0x553   : > { %11590 = vmatpush3.msra.mxu0 %v9961_v52  ;;  %11623 = vmatpush3.msra.mxu1 %v9971_v20  ;;  %v9993_v20 = vld [vmem:[%s16905_s7 + $0x100] sm:$0xff] }
 0x554   : > { %11591 = vmatprep.subr.mxu0 %v16931_v0  ;;  %11624 = vmatprep.subr.mxu1 %v16931_v0 }
 0x555   : > { %11592 = vmatpush3.msra.mxu0 %v9960_v37  ;;  %11625 = vmatpush3.msra.mxu1 %v9970_v53  ;;  %v4559_v37 = vld [vmem:[%s16905_s7 + $0x38] sm:$0xff] }
 0x556   : > { %11593 = vmatprep.subr.mxu0 %v16931_v0  ;;  %11626 = vmatprep.subr.mxu1 %v16931_v0 }
 0x557   : > { %11594 = vmatpush3.msra.mxu0 %v9959_v25  ;;  %11627 = vmatpush3.msra.mxu1 %v9969_v13  ;;  %v10012_v13 = vld [vmem:[%s16901_s3 + $0x30] sm:$0xff] }
 0x558   : > { %11595 = vmatprep.subr.mxu0 %v16931_v0  ;;  %11628 = vmatprep.subr.mxu1 %v16931_v0 }
 0x559   : > { %11596 = vmatpush3.msra.mxu0 %v9958_v59  ;;  %11629 = vmatpush3.msra.mxu1 %v9968_v11  ;;  %v10000_v59 = vld [vmem:[%s16905_s7 + $0x138] sm:$0xff]  ;;  %v10011_v11 = vld [vmem:[%s16901_s3 + $0x28] sm:$0xff] }
 0x55a   : > { %11597 = vmatprep.subr.mxu0 %v16931_v0  ;;  %11630 = vmatprep.subr.mxu1 %v16931_v0 }
 0x55b   : > { %11598 = vmatpush3.msra.mxu0 %v9957_v15  ;;  %11631 = vmatpush3.msra.mxu1 %v9967_v34  ;;  %v4558_v15 = vld [vmem:[%s16905_s7 + $0x30] sm:$0xff]  ;;  %v10010_v34 = vld [vmem:[%s16901_s3 + $0x20] sm:$0xff] }
 0x55c   : > { %11599 = vmatprep.subr.mxu0 %v16931_v0  ;;  %11632 = vmatprep.subr.mxu1 %v16931_v0 }
 0x55d   : > { %11600 = vmatpush3.msra.mxu0 %v9956_v48  ;;  %11633 = vmatpush3.msra.mxu1 %v9966_v1  ;;  %v9999_v48 = vld [vmem:[%s16905_s7 + $0x130] sm:$0xff]  ;;  %v9987_v1 = vld [vmem:[%s16905_s7 + $0xd8] sm:$0xff] }
 0x55e   : > { %11601 = vmatprep.subr.mxu0 %v16931_v0  ;;  %11634 = vmatprep.subr.mxu1 %v16931_v0 }
 0x55f   : > { %11602 = vmatpush3.msra.mxu0 %v9955_v4  ;;  %11635 = vmatpush3.msra.mxu1 %v9965_v12  ;;  %v4557_v4 = vld [vmem:[%s16905_s7 + $0x28] sm:$0xff]  ;;  %v9986_v12 = vld [vmem:[%s16905_s7 + $0xd0] sm:$0xff] }
 0x560   : > { %11603 = vmatprep.subr.mxu0 %v16931_v0  ;;  %11639 = vmatprep.subr.mxu1 %v16931_v0 }
 0x561   : > { %11604 = vmatpush3.msra.mxu0 %v9954_v14  ;;  %v9998_v14 = vld [vmem:[%s16905_s7 + $0x128] sm:$0xff] }
 0x562   : > { %11605 = vmatprep.subr.mxu0 %v16931_v0 }
 0x563   : > { %11606 = vmatpush3.msra.mxu0 %v9953_v2  ;;  %v4556_v2 = vld [vmem:[%s16905_s7 + $0x20] sm:$0xff] }
 0x564   : > { %11607 = vmatprep.subr.mxu0 %v16931_v0 }
 0x565   : > { %11608 = vmatpush3.msra.mxu0 %v9952_v23  ;;  %v9997_v23 = vld [vmem:[%s16905_s7 + $0x120] sm:$0xff] }
 0x566   : > { %11609 = vmatprep.subr.mxu0 %v16931_v0 }
 0x567   : > { %11610 = vmatpush3.msra.mxu0 %v9951_v28  ;;  %v4555_v28 = vld [vmem:[%s16905_s7 + $0x18] sm:$0xff] }
 0x568   : > { %11611 = vmatprep.subr.mxu0 %v16931_v0 }
 0x569   : > { %11612 = vmatpush3.msra.mxu0 %v9950_v40  ;;  %v9996_v40 = vld [vmem:[%s16905_s7 + $0x118] sm:$0xff] }
 0x56a   : > { %11613 = vmatprep.subr.mxu0 %v16931_v0 }
 0x56b   : > { %11614 = vmatpush3.msra.mxu0 %v9949_v38  ;;  %v4554_v38 = vld [vmem:[%s16905_s7 + $0x10] sm:$0xff] }
 0x56c   : > { %11615 = vmatprep.subr.mxu0 %v16931_v0 }
 0x56d   : > { %11616 = vmatpush3.msra.mxu0 %v9948_v44  ;;  %v9995_v44 = vld [vmem:[%s16905_s7 + $0x110] sm:$0xff] }
 0x56e   : > { %11618 = vmatmul.mubr.f32.vlgmr.msra.gmra.mxu0 %v4453_v39  ;;  %11658 = vmatprep.subr.mxu0 %v16931_v0  ;;  %v4553_v39 = vld [vmem:[%s16905_s7 + $0x8] sm:$0xff] }
 0x56f   : > { %11674 = vmatprep.mubr.msk.f32.mxu0 %vm12477_vm12, %v16931_v0  ;;  %11659 = vmatpush3.msra.mxu0 %v9982_v49  ;;  %v4552_v49 = vld [vmem:[%s16905_s7] sm:$0xff] }
 0x570   : > { %11660 = vmatprep.subr.mxu0 %v16931_v0 }
 0x571   : > { %11661 = vmatpush3.msra.mxu0 %v9981_v57  ;;  %v10013_v57 = vld [vmem:[%s16901_s3 + $0x38] sm:$0xff] }
 0x572   : > { %11662 = vmatprep.subr.mxu0 %v16931_v0 }
 0x573   : > { %11663 = vmatpush3.msra.mxu0 %v9980_v5  ;;  %v9991_v5 = vld [vmem:[%s16905_s7 + $0xf8] sm:$0xff] }
 0x574   : > { %11664 = vmatprep.subr.mxu0 %v16931_v0 }
 0x575   : > { %11665 = vmatpush3.msra.mxu0 %v9979_v22  ;;  %v9990_v22 = vld [vmem:[%s16905_s7 + $0xf0] sm:$0xff] }
 0x576   : > { %11666 = vmatprep.subr.mxu0 %v16931_v0 }
 0x577   : > { %11667 = vmatpush3.msra.mxu0 %v9978_v29  ;;  %v9989_v29 = vld [vmem:[%s16905_s7 + $0xe8] sm:$0xff] }
 0x578   : > { %11668 = vmatprep.subr.mxu0 %v16931_v0 }
 0x579   : > { %11669 = vmatpush3.msra.mxu0 %v9977_v31  ;;  %v10025_v31 = vld [vmem:[%s16901_s3 + $0x58] sm:$0xff] }
 0x57a   : > { %11670 = vmatprep.subr.mxu0 %v16931_v0 }
 0x57b   : > { %11671 = vmatpush3.msra.mxu0 %v9976_v56  ;;  %v10024_v56 = vld [vmem:[%s16901_s3 + $0x50] sm:$0xff] }
 0x57c   : > { %11672 = vmatprep.subr.mxu0 %v16931_v0 }
 0x57d   : > { %11673 = vmatpush3.msra.mxu0 %v9975_v55  ;;  %v9985_v55 = vld [vmem:[%s16905_s7 + $0xc8] sm:$0xff] }
 0x57e   : > { %11696 = vmatprep.subr.mxu0 %v16931_v0 }
 0x5ec   : > { %v4203_v3 = vpop.f32.mrf.mxu0  ;;  %v4273_v43 = vpop.f32.mrf.mxu1 }
 0x5ed   : > { %v4274_v58 = vadd.f32 %v4273_v43, %v4203_v3  ;;  %v9984_v3 = vld [vmem:[%s16905_s7 + $0xc0] sm:$0xff]  ;;  %v10041_v43 = vld [vmem:[%s16901_s3 + $0x98] sm:$0xff] }
 0x5ee   : > { %v11479_v26 = vpop.f32.mrf.mxu0  ;;  %v11514_v24 = vpop.f32.mrf.mxu1 }
 0x5ef   : > { %v10039_v26 = vld [vmem:[%s16901_s3 + $0x88] sm:$0xff]  ;;  %v16946_v24 = vld [vmem:[#allocation12_spill] sm:$0xff] }
 0x60d   : > { %v4360_v41 = vpop.f32.mrf.mxu0  ;;  %v4448_v54 = vpop.f32.mrf.mxu1 }
 0x60e   : > { %v4364_v42 = vadd.f32 %v4360_v41, %v4274_v58  ;;  %v4971_v41 = vld [vmem:[%s16907_s9 + $0x30] sm:$0xff]  ;;  %v4965_v58 = vld [vmem:[%s16907_s9] sm:$0xff] }
 0x60f   : > { %v11549_v46 = vpop.f32.mrf.mxu0  ;;  %v11584_v16 = vpop.f32.mrf.mxu1 }
 0x610   : > { %v4452_v45 = vadd.f32 %v4448_v54, %v4364_v42  ;;  %v4968_v54 = vld [vmem:[%s16907_s9 + $0x18] sm:$0xff]  ;;  %v4967_v46 = vld [vmem:[%s16907_s9 + $0x10] sm:$0xff]  ;;  %v4966_v16 = vld [vmem:[%s16907_s9 + $0x8] sm:$0xff] }
 0x611   : > { %v5840_v42 = vld [vmem:[%s16901_s3 + $0x18] sm:$0xff] }
 0x62e   : > { %v4536_v17 = vpop.f32.mrf.mxu0 }
 0x62f   : > { %v4540_v36 = vadd.f32 %v4536_v17, %v4452_v45 }
 0x630   : > { %v11619_v47 = vpop.f32.mrf.mxu0 }
 0x631   : > { %v4548_v9 = vadd.f32 %v9964_v10, %v4540_v36 }
 0x633   : > { %vm4549_vm1 = vcmp.ge.f32.partialorder %v4548_v9, 0.0  ;;  %v4550_v7 = vmul.f32 0.02, %v4548_v9 }
 0x635   : > { %v15438_v6 = vsel %vm4549_vm1, %v4548_v9, %v4550_v7 }
 0x636   : > { %v4569_v52 = vrot.slane %v15438_v6, 1  ;;  %v4722_v25 = vrot.slane %v15438_v6, 2  ;;  %v4886_v53 = vrot.slane %v15438_v6, 4 }
 0x638   : > { %11637 = vmatmul.mubr.msk.f32.vlgmr.msra.gmra.mxu1 %vm2264_vm8, %v4569_v52  ;;  %11675 = vmatmul.mubr.msk.f32.vlgmr.msra.gmra.mxu0 %vm2264_vm8, %v4722_v25 }
 0x639   : > { %11640 = vmatpush3.msra.mxu1 %v4559_v37  ;;  %11697 = vmatpush3.msra.mxu0 %v10000_v59 }
 0x63a   : > { %11641 = vmatprep.subr.mxu1 %v16931_v0  ;;  %11698 = vmatprep.subr.mxu0 %v16931_v0 }
 0x63b   : > { %11642 = vmatpush3.msra.mxu1 %v4558_v15  ;;  %11699 = vmatpush3.msra.mxu0 %v9999_v48  ;;  %v4960_v15 = vld [vmem:[%s16906_s8] sm:$0x1] }
 0x63c   : > { %11643 = vmatprep.subr.mxu1 %v16931_v0  ;;  %11700 = vmatprep.subr.mxu0 %v16931_v0 }
 0x63d   : > { %11644 = vmatpush3.msra.mxu1 %v4557_v4  ;;  %11701 = vmatpush3.msra.mxu0 %v9998_v14 }
 0x63e   : > { %11645 = vmatprep.subr.mxu1 %v16931_v0  ;;  %11702 = vmatprep.subr.mxu0 %v16931_v0 }
 0x63f   : > { %11646 = vmatpush3.msra.mxu1 %v4556_v2  ;;  %11703 = vmatpush3.msra.mxu0 %v9997_v23 }
 0x640   : > { %11647 = vmatprep.subr.mxu1 %v16931_v0  ;;  %11704 = vmatprep.subr.mxu0 %v16931_v0 }
 0x641   : > { %11648 = vmatpush3.msra.mxu1 %v4555_v28  ;;  %11705 = vmatpush3.msra.mxu0 %v9996_v40  ;;  %v5839_v28 = vld [vmem:[%s16901_s3 + $0x10] sm:$0xff]  ;;  %v16947_v40 = vld [vmem:[#allocation9_spill] sm:$0xff] }
 0x642   : > { %11649 = vmatprep.subr.mxu1 %v16931_v0  ;;  %11706 = vmatprep.subr.mxu0 %v16931_v0 }
 0x643   : > { %11650 = vmatpush3.msra.mxu1 %v4554_v38  ;;  %11707 = vmatpush3.msra.mxu0 %v9995_v44  ;;  %v5838_v38 = vld [vmem:[%s16901_s3 + $0x8] sm:$0xff]  ;;  %v5837_v44 = vld [vmem:[%s16901_s3] sm:$0xff] }
 0x644   : > { %11651 = vmatprep.subr.mxu1 %v16931_v0  ;;  %11708 = vmatprep.subr.mxu0 %v16931_v0 }
 0x645   : > { %11652 = vmatpush3.msra.mxu1 %v4553_v39  ;;  %11709 = vmatpush3.msra.mxu0 %v9994_v19  ;;  %v10033_v39 = vld [vmem:[%s16901_s3 + $0x78] sm:$0xff]  ;;  %v10032_v19 = vld [vmem:[%s16901_s3 + $0x70] sm:$0xff] }
 0x646   : > { %11653 = vmatprep.subr.mxu1 %v16931_v0  ;;  %11710 = vmatprep.subr.mxu0 %v16931_v0 }
 0x647   : > { %11654 = vmatpush3.msra.mxu1 %v4552_v49  ;;  %11655 = vmatprep.mubr.msk.f32.mxu1 %vm12477_vm12, %v16931_v0  ;;  %v16948_v49 = vld [vmem:[#allocation11_spill] sm:$0xff] }
 0x648   : > { %11711 = vmatpush3.msra.mxu0 %v9993_v20  ;;  %11712 = vmatprep.mubr.msk.f32.mxu0 %vm12477_vm12, %v16931_v0  ;;  %v10031_v20 = vld [vmem:[%s16901_s3 + $0x68] sm:$0xff] }
 0x649   : > { %11656 = vmatmul.mubr.msk.f32.vlgmr.msra.gmra.mxu1 %vm2264_vm8, %v15438_v6  ;;  %11677 = vmatprep.subr.mxu1 %v16931_v0 }
 0x64a   : > { %11713 = vmatmul.mubr.msk.f32.vlgmr.msra.gmra.mxu0 %vm2264_vm8, %v4886_v53  ;;  %11734 = vmatprep.subr.mxu0 %v10013_v57  ;;  %v16949_v53 = vld [vmem:[#allocation10_spill] sm:$0xff] }
 0x64b   : > { %11678 = vmatpush3.msra.mxu1 %v9991_v5  ;;  %11735 = vmatpush3.msra.mxu0 %v10013_v57  ;;  %v10030_v57 = vld [vmem:[%s16901_s3 + $0x60] sm:$0xff]  ;;  %v6421_v5 = vld [vmem:[%s16903_s5 + $0x78] sm:$0xff] }
 0x64c   : > { %11742 = vmatprep.mubr.msk.f32.mxu0 %vm1124_vm0, %v14648_v51  ;;  %11679 = vmatprep.subr.mxu1 %v16931_v0  ;;  %v9988_v51 = vld [vmem:[%s16905_s7 + $0xe0] sm:$0xff] }
 0x64d   : > { %11736 = vmatprep.subr.mxu0 %v10012_v13  ;;  %11680 = vmatpush3.msra.mxu1 %v9990_v22  ;;  %v6419_v22 = vld [vmem:[%s16903_s5 + $0x68] sm:$0xff] }
 0x64e   : > { %11737 = vmatpush3.msra.mxu0 %v10012_v13  ;;  %11681 = vmatprep.subr.mxu1 %v16931_v0  ;;  %v10060_v13 = vld [vmem:[%s16903_s5 + $0xe8] sm:$0xff] }
 0x64f   : > { %11738 = vmatprep.subr.mxu0 %v10011_v11  ;;  %11682 = vmatpush3.msra.mxu1 %v9989_v29  ;;  %v6418_v29 = vld [vmem:[%s16903_s5 + $0x60] sm:$0xff] }
 0x650   : > { %11739 = vmatpush3.msra.mxu0 %v10011_v11  ;;  %11683 = vmatprep.subr.mxu1 %v16931_v0  ;;  %v10059_v11 = vld [vmem:[%s16903_s5 + $0xe0] sm:$0xff] }
 0x651   : > { %11740 = vmatprep.subr.mxu0 %v10010_v34  ;;  %11684 = vmatpush3.msra.mxu1 %v9988_v51  ;;  %v6417_v51 = vld [vmem:[%s16903_s5 + $0x58] sm:$0xff] }
 0x652   : > { %11741 = vmatpush3.msra.mxu0 %v10010_v34  ;;  %11685 = vmatprep.subr.mxu1 %v16931_v0  ;;  %v10058_v34 = vld [vmem:[%s16903_s5 + $0xd8] sm:$0xff] }
 0x653   : > { %11743 = vmatmul.mubr.msk.f32.vlgmr.msra.gmra.mxu0 %vm1124_vm0, %v14676_v62  ;;  %11762 = vmatprep.subr.mxu0 %v10025_v31  ;;  %v10023_v62 = vld [vmem:[%s16901_s3 + $0x48] sm:$0xff] }
 0x654   : > { %11686 = vmatpush3.msra.mxu1 %v9987_v1  ;;  %11745 = vmatprep.mubr.msk.f32.mxu0 %vm1124_vm0, %v14739_v32  ;;  %v10022_v32 = vld [vmem:[%s16901_s3 + $0x40] sm:$0xff]  ;;  %v6416_v1 = vld [vmem:[%s16903_s5 + $0x50] sm:$0xff] }
 0x655   : > { %11763 = vmatpush3.msra.mxu0 %v10025_v31  ;;  %11687 = vmatprep.subr.mxu1 %v16931_v0  ;;  %v10057_v31 = vld [vmem:[%s16903_s5 + $0xd0] sm:$0xff] }
 0x656   : > { %11764 = vmatprep.subr.mxu0 %v10024_v56  ;;  %11688 = vmatpush3.msra.mxu1 %v9986_v12  ;;  %v6415_v12 = vld [vmem:[%s16903_s5 + $0x48] sm:$0xff] }
 0x657   : > { %11765 = vmatpush3.msra.mxu0 %v10024_v56  ;;  %11689 = vmatprep.subr.mxu1 %v16931_v0  ;;  %v10056_v56 = vld [vmem:[%s16903_s5 + $0xc8] sm:$0xff] }
 0x658   : > { %11746 = vmatmul.mubr.msk.f32.gmra.mxu0 %vm1124_vm0, %v14754_v33  ;;  %11766 = vmatprep.subr.mxu0 %v10023_v62  ;;  %v4804_v33 = vrot.slane %v15438_v6, 3 }
 0x659   : > { %11690 = vmatpush3.msra.mxu1 %v9985_v55  ;;  %11767 = vmatpush3.msra.mxu0 %v10023_v62  ;;  %v10055_v62 = vld [vmem:[%s16903_s5 + $0xc0] sm:$0xff] }
 0x65a   : > { %11770 = vmatprep.mubr.msk.f32.mxu0 %vm1124_vm0, %v14654_v27  ;;  %11691 = vmatprep.subr.mxu1 %v16931_v0  ;;  %v10040_v27 = vld [vmem:[%s16901_s3 + $0x90] sm:$0xff]  ;;  %v6414_v55 = vld [vmem:[%s16903_s5 + $0x40] sm:$0xff] }
 0x65b   : > { %11768 = vmatprep.subr.mxu0 %v10022_v32  ;;  %11692 = vmatpush3.msra.mxu1 %v9984_v3  ;;  %v6413_v3 = vld [vmem:[%s16903_s5 + $0x38] sm:$0xff] }
 0x65c   : > { %11693 = vmatprep.mubr.msk.f32.mxu1 %vm12477_vm12, %v16931_v0  ;;  %11769 = vmatpush3.msra.mxu0 %v10022_v32  ;;  %v10054_v32 = vld [vmem:[%s16903_s5 + $0xb8] sm:$0xff] }
 0x65d   : > { %11694 = vmatmul.mubr.msk.f32.vlgmr.msra.gmra.mxu1 %vm2264_vm8, %v4804_v33  ;;  %11771 = vmatmul.mubr.msk.f32.vlgmr.msra.gmra.mxu0 %vm1124_vm0, %v14682_v8  ;;  %v10038_v8 = vld [vmem:[%s16901_s3 + $0x80] sm:$0xff]  ;;  %v10053_v33 = vld [vmem:[%s16903_s5 + $0xb0] sm:$0xff] }
 0x65e   : > { %11790 = vmatprep.subr.mxu0 %v10041_v43  ;;  %11773 = vmatprep.mubr.msk.f32.mxu0 %vm1124_vm0, %v14741_v21  ;;  %v16945_v21 = vld [vmem:[#allocation8_spill] sm:$0xff] }
 0x65f   : > { %11791 = vmatpush3.msra.mxu0 %v10041_v43  ;;  %11715 = vmatprep.subr.mxu1 %v16931_v0  ;;  %v6412_v43 = vld [vmem:[%s16903_s5 + $0x30] sm:$0xff] }
 0x660   : > { %11792 = vmatprep.subr.mxu0 %v10040_v27  ;;  %11731 = vmatprep.mubr.msk.f32.mxu1 %vm12477_vm12, %v16931_v0 }
 0x661   : > { %11793 = vmatpush3.msra.mxu0 %v10040_v27  ;;  %v10052_v27 = vld [vmem:[%s16903_s5 + $0xa8] sm:$0xff] }
 0x662   : > { %11774 = vmatmul.mubr.msk.f32.gmra.mxu0 %vm1124_vm0, %v14756_v60  ;;  %11794 = vmatprep.subr.mxu0 %v10039_v26  ;;  %v4972_v60 = vld [vmem:[%s16907_s9 + $0x38] sm:$0xff] }
 0x663   : > { %11795 = vmatpush3.msra.mxu0 %v10039_v26  ;;  %11798 = vmatprep.mubr.msk.f32.mxu0 %vm1124_vm0, %v16945_v21  ;;  %v6411_v26 = vld [vmem:[%s16903_s5 + $0x28] sm:$0xff]  ;;  %v6410_v21 = vld [vmem:[%s16903_s5 + $0x20] sm:$0xff] }
 0x664   : > { %11796 = vmatprep.subr.mxu0 %v10038_v8  ;;  %11716 = vmatpush3.msra.mxu1 %v4972_v60  ;;  %v6409_v60 = vld [vmem:[%s16903_s5 + $0x18] sm:$0xff] }
 0x665   : > { %11797 = vmatpush3.msra.mxu0 %v10038_v8  ;;  %11717 = vmatprep.subr.mxu1 %v16931_v0  ;;  %v10051_v8 = vld [vmem:[%s16903_s5 + $0xa0] sm:$0xff] }
 0x666   : > { %11799 = vmatmul.mubr.msk.f32.vlgmr.msra.gmra.mxu0 %vm1124_vm0, %v16946_v24  ;;  %11839 = vmatprep.subr.mxu0 %v16931_v0  ;;  %v10050_v24 = vld [vmem:[%s16903_s5 + $0x98] sm:$0xff] }
 0x667   : > { %11801 = vmatprep.mubr.msk.f32.mxu0 %vm1124_vm0, %v14746_v18  ;;  %11718 = vmatpush3.msra.mxu1 %v4971_v41  ;;  %v4970_v18 = vld [vmem:[%s16907_s9 + $0x28] sm:$0xff]  ;;  %v10049_v41 = vld [vmem:[%s16903_s5 + $0x90] sm:$0xff] }
 0x668   : > { %11719 = vmatprep.subr.mxu1 %v16931_v0  ;;  %11840 = vmatpush3.msra.mxu0 %v6421_v5 }
 0x669   : > { %11720 = vmatpush3.msra.mxu1 %v4970_v18  ;;  %11841 = vmatprep.subr.mxu0 %v16931_v0  ;;  %v6408_v18 = vld [vmem:[%s16903_s5 + $0x10] sm:$0xff] }
 0x66a   : > { %11802 = vmatmul.mubr.msk.f32.gmra.mxu0 %vm1124_vm0, %v14758_v50  ;;  %11721 = vmatprep.subr.mxu1 %v16931_v0  ;;  %v4969_v50 = vld [vmem:[%s16907_s9 + $0x20] sm:$0xff] }
 0x66b   : > { %11871 = vmatprep.mubr.msk.f32.mxu0 %vm12477_vm12, %v16931_v0  ;;  %11722 = vmatpush3.msra.mxu1 %v4969_v50  ;;  %v10048_v50 = vld [vmem:[%s16903_s5 + $0x88] sm:$0xff] }
 0x66c   : > { %11723 = vmatprep.subr.mxu1 %v16931_v0 }
 0x66d   : > { %11724 = vmatpush3.msra.mxu1 %v4968_v54  ;;  %v6407_v54 = vld [vmem:[%s16903_s5 + $0x8] sm:$0xff] }
 0x66e   : > { %11725 = vmatprep.subr.mxu1 %v16931_v0 }
 0x66f   : > { %11726 = vmatpush3.msra.mxu1 %v4967_v46  ;;  %v10047_v46 = vld [vmem:[%s16903_s5 + $0x80] sm:$0xff] }
 0x670   : > { %11727 = vmatprep.subr.mxu1 %v16931_v0 }
 0x671   : > { %11728 = vmatpush3.msra.mxu1 %v4966_v16  ;;  %v6406_v16 = vld [vmem:[%s16903_s5] sm:$0xff] }
 0x672   : > { %11729 = vmatprep.subr.mxu1 %v16931_v0 }
 0x673   : > { %11730 = vmatpush3.msra.mxu1 %v4965_v58 }
 0x674   : > { %11748 = vmatprep.subr.mxu1 %v5840_v42 }
 0x6f8   : > { %v4638_v45 = vpop.f32.mrf.mxu1  ;;  %v4791_v17 = vpop.f32.mrf.mxu0 }
 0x6fa   : > { %v11638_v10 = vpop.f32.mrf.mxu1  ;;  %v11676_v36 = vpop.f32.mrf.mxu0 }
 0x6fb   : > { %v4973_v36 = vld [vmem:[%s16908_s10] sm:$0x1] }
 0x709   : > { %v4710_v47 = vpop.f32.mrf.mxu1 }
 0x70a   : > { %v4955_v9 = vpop.f32.mrf.mxu0  ;;  %v4711_v52 = vadd.f32 %v4710_v47, %v4638_v45 }
 0x70b   : > { %v11657_v7 = vpop.f32.mrf.mxu1 }
 0x70c   : > { %v11714_v6 = vpop.f32.mrf.mxu0  ;;  %v4795_v37 = vadd.f32 %v4791_v17, %v4711_v52 }
 0x713   : > { %v11744_v58 = vpop.f32.mrf.mxu0 }
 0x71d   : > { %v4873_v25 = vpop.f32.mrf.mxu1 }
 0x71e   : > { %v4877_v59 = vadd.f32 %v4873_v25, %v4795_v37 }
 0x71f   : > { %v11695_v48 = vpop.f32.mrf.mxu1 }
 0x720   : > { %v4959_v4 = vadd.f32 %v4955_v9, %v4877_v59 }
 0x722   : > { %v4961_v14 = vadd.f32 %v4960_v15, %v4959_v4 }
 0x724   : > { %v4963_v2 = vmul.f32 0.02, %v4961_v14  ;;  %vm4962_vm2 = vcmp.ge.f32.partialorder %v4961_v14, 0.0 }
 0x726   : > { %v4964_v23 = vsel %vm4962_vm2, %v4961_v14, %v4963_v2 }
 0x727   : > { %11732 = vmatmul.mubr.msk.f32.vlgmr.msra.gmra.mxu1 %vm2264_vm8, %v4964_v23 }
 0x728   : > { %11749 = vmatpush3.msra.mxu1 %v5840_v42  ;;  %11756 = vmatprep.mubr.msk.f32.mxu1 %vm1124_vm0, %v16947_v40  ;;  %v5927_v42 = vpop.f32.mrf.mxu0 }
 0x729   : > { %11750 = vmatprep.subr.mxu1 %v5839_v28 }
 0x72a   : > { %11751 = vmatpush3.msra.mxu1 %v5839_v28  ;;  %v11747_v45 = vpop.f32.mrf.mxu0 }
 0x72b   : > { %11752 = vmatprep.subr.mxu1 %v5838_v38 }
 0x72c   : > { %11753 = vmatpush3.msra.mxu1 %v5838_v38  ;;  %v5937_v17 = vpop.f32.mrf.mxu0 }
 0x72d   : > { %11754 = vmatprep.subr.mxu1 %v5837_v44 }
 0x72e   : > { %11755 = vmatpush3.msra.mxu1 %v5837_v44  ;;  %v11772_v10 = vpop.f32.mrf.mxu0 }
 0x72f   : > { %11757 = vmatmul.mubr.msk.f32.vlgmr.msra.gmra.mxu1 %vm1124_vm0, %v16948_v49  ;;  %11776 = vmatprep.subr.mxu1 %v10033_v39  ;;  %v10046_v49 = vld [vmem:[%s16902_s4] ss:$0 sm:$0xff] }
 0x730   : > { %11759 = vmatprep.mubr.msk.f32.mxu1 %vm1124_vm0, %v14743_v35  ;;  %11777 = vmatpush3.msra.mxu1 %v10033_v39  ;;  %v16950_v35 = vld [vmem:[#allocation13_spill] sm:$0xff]  ;;  %v6129_v9 = vpop.f32.mrf.mxu0 }
 0x731   : > { %11778 = vmatprep.subr.mxu1 %v10032_v19 }
 0x732   : > { %11779 = vmatpush3.msra.mxu1 %v10032_v19  ;;  %v11775_v52 = vpop.f32.mrf.mxu0 }
 0x733   : > { %11760 = vmatmul.mubr.msk.f32.gmra.mxu1 %vm1124_vm0, %v14760_v61  ;;  %11780 = vmatprep.subr.mxu1 %v10031_v20  ;;  %v10062_v61 = vld [vmem:[%s16903_s5 + $0xf8] sm:$0xff] }
 0x734   : > { %11781 = vmatpush3.msra.mxu1 %v10031_v20  ;;  %11784 = vmatprep.mubr.msk.f32.mxu1 %vm1124_vm0, %v16949_v53  ;;  %v6139_v25 = vpop.f32.mrf.mxu0 }
 0x735   : > { %11782 = vmatprep.subr.mxu1 %v10030_v57 }
 0x736   : > { %11783 = vmatpush3.msra.mxu1 %v10030_v57  ;;  %v11800_v4 = vpop.f32.mrf.mxu0 }
 0x737   : > { %11785 = vmatmul.mubr.msk.f32.vlgmr.msra.gmra.mxu1 %vm1124_vm0, %v16950_v35  ;;  %11804 = vmatprep.subr.mxu1 %v16931_v0 }
 0x738   : > { %11787 = vmatprep.mubr.msk.f32.mxu1 %vm1124_vm0, %v14748_v30  ;;  %11805 = vmatpush3.msra.mxu1 %v10062_v61  ;;  %v10061_v30 = vld [vmem:[%s16903_s5 + $0xf0] sm:$0xff]  ;;  %v6347_v38 = vpop.f32.mrf.mxu0 }
 0x739   : > { %11806 = vmatprep.subr.mxu1 %v16931_v0 }
 0x73a   : > { %11807 = vmatpush3.msra.mxu1 %v10061_v30  ;;  %v11803_v5 = vpop.f32.mrf.mxu0 }
 0x73b   : > { %11788 = vmatmul.mubr.msk.f32.gmra.mxu1 %vm1124_vm0, %v14762_v63  ;;  %v6420_v63 = vld [vmem:[%s16903_s5 + $0x70] sm:$0xff]  ;;  %11808 = vmatprep.subr.mxu1 %v16931_v0 }
 0x73c   : > { %11836 = vmatprep.mubr.msk.f32.mxu1 %vm12477_vm12, %v16931_v0  ;;  %11842 = vmatpush3.msra.mxu0 %v6420_v63 }
 0x73d   : > { %11843 = vmatprep.subr.mxu0 %v16931_v0  ;;  %11809 = vmatpush3.msra.mxu1 %v10060_v13 }
 0x73e   : > { %11844 = vmatpush3.msra.mxu0 %v6419_v22  ;;  %11810 = vmatprep.subr.mxu1 %v16931_v0 }
 0x73f   : > { %11845 = vmatprep.subr.mxu0 %v16931_v0  ;;  %11811 = vmatpush3.msra.mxu1 %v10059_v11 }
 0x740   : > { %11846 = vmatpush3.msra.mxu0 %v6418_v29  ;;  %11812 = vmatprep.subr.mxu1 %v16931_v0 }
 0x741   : > { %11847 = vmatprep.subr.mxu0 %v16931_v0  ;;  %11813 = vmatpush3.msra.mxu1 %v10058_v34 }
 0x742   : > { %11848 = vmatpush3.msra.mxu0 %v6417_v51  ;;  %11814 = vmatprep.subr.mxu1 %v16931_v0 }
 0x743   : > { %11849 = vmatprep.subr.mxu0 %v16931_v0  ;;  %11815 = vmatpush3.msra.mxu1 %v10057_v31 }
 0x744   : > { %11850 = vmatpush3.msra.mxu0 %v6416_v1  ;;  %11816 = vmatprep.subr.mxu1 %v16931_v0  ;;  %v6357_v1 = vpop.f32.mrf.mxu0 }
 0x745   : > { %11851 = vmatprep.subr.mxu0 %v16931_v0  ;;  %11817 = vmatpush3.msra.mxu1 %v10056_v56 }
 0x746   : > { %11852 = vmatpush3.msra.mxu0 %v6415_v12  ;;  %11818 = vmatprep.subr.mxu1 %v16931_v0 }
 0x747   : > { %11853 = vmatprep.subr.mxu0 %v16931_v0  ;;  %11819 = vmatpush3.msra.mxu1 %v10055_v62 }
 0x748   : > { %11854 = vmatpush3.msra.mxu0 %v6414_v55  ;;  %11820 = vmatprep.subr.mxu1 %v16931_v0 }
 0x749   : > { %11855 = vmatprep.subr.mxu0 %v16931_v0  ;;  %11821 = vmatpush3.msra.mxu1 %v10054_v32 }
 0x74a   : > { %11856 = vmatpush3.msra.mxu0 %v6413_v3  ;;  %11822 = vmatprep.subr.mxu1 %v16931_v0 }
 0x74b   : > { %11857 = vmatprep.subr.mxu0 %v16931_v0  ;;  %11823 = vmatpush3.msra.mxu1 %v10053_v33 }
 0x74c   : > { %11858 = vmatpush3.msra.mxu0 %v6412_v43  ;;  %11824 = vmatprep.subr.mxu1 %v16931_v0 }
 0x74d   : > { %11859 = vmatprep.subr.mxu0 %v16931_v0  ;;  %11825 = vmatpush3.msra.mxu1 %v10052_v27 }
 0x74e   : > { %11860 = vmatpush3.msra.mxu0 %v6411_v26  ;;  %11826 = vmatprep.subr.mxu1 %v16931_v0 }
 0x74f   : > { %11861 = vmatprep.subr.mxu0 %v16931_v0  ;;  %11827 = vmatpush3.msra.mxu1 %v10051_v8 }
 0x750   : > { %11862 = vmatpush3.msra.mxu0 %v6410_v21  ;;  %11828 = vmatprep.subr.mxu1 %v16931_v0 }
 0x751   : > { %11863 = vmatprep.subr.mxu0 %v16931_v0  ;;  %11829 = vmatpush3.msra.mxu1 %v10050_v24 }
 0x752   : > { %11864 = vmatpush3.msra.mxu0 %v6409_v60  ;;  %11830 = vmatprep.subr.mxu1 %v16931_v0 }
 0x753   : > { %11865 = vmatprep.subr.mxu0 %v16931_v0  ;;  %11831 = vmatpush3.msra.mxu1 %v10049_v41 }
 0x754   : > { %11866 = vmatpush3.msra.mxu0 %v6408_v18  ;;  %11832 = vmatprep.subr.mxu1 %v16931_v0 }
 0x755   : > { %11867 = vmatprep.subr.mxu0 %v16931_v0  ;;  %11833 = vmatpush3.msra.mxu1 %v10048_v50  ;;  %v10078_v50 = vld [vmem:[%s16903_s5 + $0x178] sm:$0xff] }
 0x756   : > { %11868 = vmatpush3.msra.mxu0 %v6407_v54  ;;  %11834 = vmatprep.subr.mxu1 %v16931_v0  ;;  %v10094_v54 = vld [vmem:[%s16903_s5 + $0x1f8] sm:$0xff] }
 0x757   : > { %11869 = vmatprep.subr.mxu0 %v16931_v0  ;;  %11835 = vmatpush3.msra.mxu1 %v10047_v46 }
 0x758   : > { %11870 = vmatpush3.msra.mxu0 %v6406_v16  ;;  %11874 = vmatprep.subr.mxu1 %v16931_v0 }
 0x759   : > { %11909 = vmatprep.subr.mxu0 %v16931_v0 }
 0x7e7   : > { %v5043_v47 = vpop.f32.mrf.mxu1 }
 0x7e8   : > { %v5044_v7 = vadd.f32 %v5043_v47, %v4973_v36  ;;  %v10091_v36 = vld [vmem:[%s16903_s5 + $0x1e0] sm:$0xff]  ;;  %v10074_v47 = vld [vmem:[%s16903_s5 + $0x158] sm:$0xff] }
 0x7e9   : > { %v11733_v6 = vpop.f32.mrf.mxu1 }
 0x7ea   : > { %10003 = vst.msk [vmem:[%s15162_s21 + $0x1] sm:$0x1] %vm2745_vm9, %v5044_v7  ;;  %v10073_v7 = vld [vmem:[%s16903_s5 + $0x150] sm:$0xff] }
 0x7eb   : > { %v10089_v6 = vld [vmem:[%s16903_s5 + $0x1d0] sm:$0xff] }
 0x7ef   : > { %v11758_v37 = vpop.f32.mrf.mxu1 }
 0x7f0   : > { %v6030_v15 = vadd.f32 %v11758_v37, %v11744_v58  ;;  %v10077_v58 = vld [vmem:[%s16903_s5 + $0x170] sm:$0xff]  ;;  %v10088_v37 = vld [vmem:[%s16903_s5 + $0x1c8] sm:$0xff] }
 0x7f1   : > { %v6024_v59 = vpop.f32.mrf.mxu1 }
 0x7f2   : > { %v6025_v14 = vadd.f32 %v6024_v59, %v5927_v42  ;;  %v6149_v28 = vadd.f32 %v11772_v10, %v6030_v15  ;;  %v10093_v42 = vld [vmem:[%s16903_s5 + $0x1f0] sm:$0xff]  ;;  %v10075_v10 = vld [vmem:[%s16903_s5 + $0x160] sm:$0xff]  ;;  %v10070_v15 = vld [vmem:[%s16903_s5 + $0x138] sm:$0xff] }
 0x7f3   : > { %v11761_v48 = vpop.f32.mrf.mxu1  ;;  %v10087_v59 = vld [vmem:[%s16903_s5 + $0x1c0] sm:$0xff] }
 0x7f4   : > { %v6040_v23 = vadd.f32 %v11761_v48, %v11747_v45  ;;  %v6148_v39 = vadd.f32 %v6129_v9, %v6025_v14  ;;  %v10076_v45 = vld [vmem:[%s16903_s5 + $0x168] sm:$0xff]  ;;  %v10090_v9 = vld [vmem:[%s16903_s5 + $0x1d8] sm:$0xff]  ;;  %v10085_v14 = vld [vmem:[%s16903_s5 + $0x1b0] sm:$0xff] }
 0x7f5   : > { %v6034_v2 = vpop.f32.mrf.mxu1  ;;  %v10086_v48 = vld [vmem:[%s16903_s5 + $0x1b8] sm:$0xff] }
 0x7f6   : > { %v6035_v19 = vadd.f32 %v6034_v2, %v5937_v17  ;;  %v6151_v35 = vadd.f32 %v11775_v52, %v6040_v23  ;;  %v10092_v17 = vld [vmem:[%s16903_s5 + $0x1e8] sm:$0xff] }
 0x7f7   : > { %v11786_v40 = vpop.f32.mrf.mxu1  ;;  %v10072_v52 = vld [vmem:[%s16903_s5 + $0x148] sm:$0xff] }
 0x7f8   : > { %v6258_v44 = vadd.f32 %v11786_v40, %v6149_v28  ;;  %v6150_v22 = vadd.f32 %v6139_v25, %v6035_v19  ;;  %v10071_v25 = vld [vmem:[%s16903_s5 + $0x140] sm:$0xff]  ;;  %v10068_v2 = vld [vmem:[%s16903_s5 + $0x128] sm:$0xff]  ;;  %v10081_v19 = vld [vmem:[%s16903_s5 + $0x190] sm:$0xff] }
 0x7f9   : > { %v6238_v20 = vpop.f32.mrf.mxu1  ;;  %v10084_v23 = vld [vmem:[%s16903_s5 + $0x1a8] sm:$0xff]  ;;  %v10067_v28 = vld [vmem:[%s16903_s5 + $0x120] sm:$0xff] }
 0x7fa   : > { %v6367_v57 = vadd.f32 %v11800_v4, %v6258_v44  ;;  %v6257_v53 = vadd.f32 %v6238_v20, %v6148_v39  ;;  %v10069_v4 = vld [vmem:[%s16903_s5 + $0x130] sm:$0xff]  ;;  %v10083_v40 = vld [vmem:[%s16903_s5 + $0x1a0] sm:$0xff]  ;;  %v10082_v44 = vld [vmem:[%s16903_s5 + $0x198] sm:$0xff] }
 0x7fb   : > { %v11789_v61 = vpop.f32.mrf.mxu1  ;;  %v10065_v39 = vld [vmem:[%s16903_s5 + $0x110] sm:$0xff]  ;;  %v10080_v20 = vld [vmem:[%s16903_s5 + $0x188] sm:$0xff] }
 0x7fc   : > { %v6378_v30 = vadd.f32 %v10046_v49, %v6367_v57  ;;  %v6366_v63 = vadd.f32 %v6347_v38, %v6257_v53  ;;  %v6260_v13 = vadd.f32 %v11789_v61, %v6151_v35  ;;  %v10066_v38 = vld [vmem:[%s16903_s5 + $0x118] sm:$0xff]  ;;  %v10063_v57 = vld [vmem:[%s16903_s5 + $0x100] sm:$0xff] }
 0x7fd   : > { %v6248_v11 = vpop.f32.mrf.mxu1  ;;  %v10079_v53 = vld [vmem:[%s16903_s5 + $0x180] sm:$0xff]  ;;  %v10110_v35 = vld [vmem:[%s16903_s5 + $0x278] sm:$0xff] }
 0x7fe   : > { %vm6382_vm4 = vcmp.ge.f32.partialorder %v6378_v30, 0.0  ;;  %v6386_v29 = vmul.f32 0.02, %v6378_v30  ;;  %v6377_v34 = vadd.f32 %v10046_v49, %v6366_v63  ;;  %v6369_v51 = vadd.f32 %v11803_v5, %v6260_v13  ;;  %v10108_v63 = vld [vmem:[%s16903_s5 + $0x268] sm:$0xff]  ;;  %v10107_v13 = vld [vmem:[%s16903_s5 + $0x260] sm:$0xff] }
 0x7ff   : > { %v6259_v31 = vadd.f32 %v6248_v11, %v6150_v22  ;;  %v10106_v22 = vld [vmem:[%s16903_s5 + $0x258] sm:$0xff]  ;;  %v10105_v11 = vld [vmem:[%s16903_s5 + $0x250] sm:$0xff] }
 0x800   : > { %v6390_v56 = vsel %vm6382_vm4, %v6378_v30, %v6386_v29  ;;  %vm6381_vm5 = vcmp.ge.f32.partialorder %v6377_v34, 0.0  ;;  %v6385_v12 = vmul.f32 0.02, %v6377_v34  ;;  %v6380_v62 = vadd.f32 %v10046_v49, %v6369_v51  ;;  %v10109_v30 = vld [vmem:[%s16903_s5 + $0x270] sm:$0xff]  ;;  %v10104_v29 = vld [vmem:[%s16903_s5 + $0x248] sm:$0xff]  ;;  %v10102_v51 = vld [vmem:[%s16903_s5 + $0x238] sm:$0xff] }
 0x801   : > { %6394 = vst [vmem:[#allocation4 + $0x8] sm:$0xff] %v6390_v56  ;;  %v6368_v55 = vadd.f32 %v6357_v1, %v6259_v31  ;;  %v10101_v31 = vld [vmem:[%s16903_s5 + $0x230] sm:$0xff]  ;;  %v10100_v1 = vld [vmem:[%s16903_s5 + $0x228] sm:$0xff]  ;;  %v10099_v56 = vld [vmem:[%s16903_s5 + $0x220] sm:$0xff] }
 0x802   : > { %v6389_v32 = vsel %vm6381_vm5, %v6377_v34, %v6385_v12  ;;  %vm6384_vm6 = vcmp.ge.f32.partialorder %v6380_v62, 0.0  ;;  %v6388_v3 = vmul.f32 0.02, %v6380_v62  ;;  %v10103_v34 = vld [vmem:[%s16903_s5 + $0x240] sm:$0xff]  ;;  %v10098_v12 = vld [vmem:[%s16903_s5 + $0x218] sm:$0xff] }
 0x803   : > { %6393 = vst [vmem:[#allocation4] sm:$0xff] %v6389_v32  ;;  %v6379_v33 = vadd.f32 %v10046_v49, %v6368_v55  ;;  %v10064_v49 = vld [vmem:[%s16903_s5 + $0x108] sm:$0xff]  ;;  %v10095_v32 = vld [vmem:[%s16903_s5 + $0x200] sm:$0xff] }
 0x804   : > { %v6392_v43 = vsel %vm6384_vm6, %v6380_v62, %v6388_v3  ;;  %v10097_v62 = vld [vmem:[%s16903_s5 + $0x210] sm:$0xff]  ;;  %v10096_v55 = vld [vmem:[%s16903_s5 + $0x208] sm:$0xff] }
 0x805   : > { %6396 = vst [vmem:[#allocation4 + $0x18] sm:$0x1f] %v6392_v43  ;;  %vm6383_vm7 = vcmp.ge.f32.partialorder %v6379_v33, 0.0  ;;  %v6387_v27 = vmul.f32 0.02, %v6379_v33  ;;  %v10129_v43 = vld [vmem:[%s16905_s7 + $0xb8] sm:$0xff] }
 0x807   : > { %v6391_v26 = vsel %vm6383_vm7, %v6379_v33, %v6387_v27  ;;  %v10119_v33 = vld [vmem:[%s16905_s7 + $0x78] sm:$0xff]  ;;  %v10118_v27 = vld [vmem:[%s16905_s7 + $0x70] sm:$0xff] }
 0x808   : > { %6395 = vst [vmem:[#allocation4 + $0x10] sm:$0xff] %v6391_v26  ;;  %v10128_v26 = vld [vmem:[%s16905_s7 + $0xb0] sm:$0xff] }
 0x80a   : > { %v6397_v8 = vld [vmem:[#allocation4] ss:$2 sm:$0xff]  ;;  %v6399_v21 = vld [vmem:[#allocation4 + $0x1] ss:$2 sm:$0xff] }
 0x80b   : > { %v6401_v24 = vmax.f32 %v6397_v8, %v6399_v21  ;;  %v10117_v8 = vld [vmem:[%s16905_s7 + $0x68] sm:$0xff] }
 0x80c   : > { %v10127_v21 = vld [vmem:[%s16905_s7 + $0xa8] sm:$0xff] }
 0x80d   : > { %6403 = vst [vmem:[#allocation5] sm:$0xff] %v6401_v24  ;;  %v10116_v24 = vld [vmem:[%s16905_s7 + $0x60] sm:$0xff] }
 0x80f   : > { %v6398_v60 = vld [vmem:[#allocation4 + $0x10] ss:$2 sm:$0x3f]  ;;  %v6400_v41 = vld [vmem:[#allocation4 + $0x11] ss:$2 sm:$0x3f] }
 0x810   : > { %v6402_v18 = vmax.f32 %v6398_v60, %v6400_v41  ;;  %v10126_v60 = vld [vmem:[%s16905_s7 + $0xa0] sm:$0xff]  ;;  %v10115_v41 = vld [vmem:[%s16905_s7 + $0x58] sm:$0xff] }
 0x812   : > { %6404 = vst [vmem:[#allocation5 + $0x8] sm:$0x3f] %v6402_v18  ;;  %v10125_v18 = vld [vmem:[%s16905_s7 + $0x98] sm:$0xff] }
 0x819   : > { %v6422_v46 = vld [vmem:[#allocation5 + $0x1] ss:$2 sm:$0x1f]  ;;  %v6405_v16 = vld [vmem:[#allocation5] ss:$2 sm:$0x1f] }
 0x81a   : > { %11837 = vmatmul.mubr.f32.vlgmr.msra.gmra.mxu1 %v6422_v46  ;;  %11872 = vmatmul.mubr.f32.vlgmr.msra.gmra.mxu0 %v6405_v16  ;;  %v6579_v61 = vld [vmem:[#allocation5 + $0x2] ss:$2 sm:$0x1f]  ;;  %v6667_v5 = vld [vmem:[#allocation5 + $0x3] ss:$2 sm:$0x1f] }
 0x81b   : > { %11875 = vmatpush3.msra.mxu1 %v10078_v50  ;;  %11910 = vmatpush3.msra.mxu0 %v10094_v54  ;;  %v6755_v3 = vld [vmem:[#allocation5 + $0x4] ss:$2 sm:$0x1f]  ;;  %v10114_v50 = vld [vmem:[%s16905_s7 + $0x50] sm:$0xff] }
 0x81c   : > { %11876 = vmatprep.subr.mxu1 %v16931_v0  ;;  %11911 = vmatprep.subr.mxu0 %v16931_v0  ;;  %v10124_v54 = vld [vmem:[%s16905_s7 + $0x90] sm:$0xff]  ;;  %v10113_v46 = vld [vmem:[%s16905_s7 + $0x48] sm:$0xff] }
 0x81d   : > { %11877 = vmatpush3.msra.mxu1 %v10077_v58  ;;  %11912 = vmatpush3.msra.mxu0 %v10093_v42  ;;  %v10123_v16 = vld [vmem:[%s16905_s7 + $0x88] sm:$0xff]  ;;  %v10112_v58 = vld [vmem:[%s16905_s7 + $0x40] sm:$0xff] }
 0x81e   : > { %11878 = vmatprep.subr.mxu1 %v16931_v0  ;;  %11913 = vmatprep.subr.mxu0 %v16931_v0  ;;  %v10122_v42 = vld [vmem:[%s16905_s7 + $0x80] sm:$0xff] }
 0x81f   : > { %11879 = vmatpush3.msra.mxu1 %v10076_v45  ;;  %11914 = vmatpush3.msra.mxu0 %v10092_v17 }
 0x820   : > { %11880 = vmatprep.subr.mxu1 %v16931_v0  ;;  %11915 = vmatprep.subr.mxu0 %v16931_v0 }
 0x821   : > { %11881 = vmatpush3.msra.mxu1 %v10075_v10  ;;  %11916 = vmatpush3.msra.mxu0 %v10091_v36 }
 0x822   : > { %11882 = vmatprep.subr.mxu1 %v16931_v0  ;;  %11917 = vmatprep.subr.mxu0 %v16931_v0 }
 0x823   : > { %11883 = vmatpush3.msra.mxu1 %v10074_v47  ;;  %11918 = vmatpush3.msra.mxu0 %v10090_v9 }
 0x824   : > { %11884 = vmatprep.subr.mxu1 %v16931_v0  ;;  %11919 = vmatprep.subr.mxu0 %v16931_v0 }
 0x825   : > { %11885 = vmatpush3.msra.mxu1 %v10073_v7  ;;  %11920 = vmatpush3.msra.mxu0 %v10089_v6 }
 0x826   : > { %11886 = vmatprep.subr.mxu1 %v16931_v0  ;;  %11921 = vmatprep.subr.mxu0 %v16931_v0 }
 0x827   : > { %11887 = vmatpush3.msra.mxu1 %v10072_v52  ;;  %11922 = vmatpush3.msra.mxu0 %v10088_v37 }
 0x828   : > { %11888 = vmatprep.subr.mxu1 %v16931_v0  ;;  %11923 = vmatprep.subr.mxu0 %v16931_v0 }
 0x829   : > { %11889 = vmatpush3.msra.mxu1 %v10071_v25  ;;  %11924 = vmatpush3.msra.mxu0 %v10087_v59 }
 0x82a   : > { %11890 = vmatprep.subr.mxu1 %v16931_v0  ;;  %11925 = vmatprep.subr.mxu0 %v16931_v0 }
 0x82b   : > { %11891 = vmatpush3.msra.mxu1 %v10070_v15  ;;  %11926 = vmatpush3.msra.mxu0 %v10086_v48  ;;  %v10111_v15 = vld [vmem:[%s16904_s6] ss:$0 sm:$0xff] }
 0x82c   : > { %11892 = vmatprep.subr.mxu1 %v16931_v0  ;;  %11927 = vmatprep.subr.mxu0 %v16931_v0 }
 0x82d   : > { %11893 = vmatpush3.msra.mxu1 %v10069_v4  ;;  %11928 = vmatpush3.msra.mxu0 %v10085_v14 }
 0x82e   : > { %11894 = vmatprep.subr.mxu1 %v16931_v0  ;;  %11929 = vmatprep.subr.mxu0 %v16931_v0 }
 0x82f   : > { %11895 = vmatpush3.msra.mxu1 %v10068_v2  ;;  %11930 = vmatpush3.msra.mxu0 %v10084_v23 }
 0x830   : > { %11896 = vmatprep.subr.mxu1 %v16931_v0  ;;  %11931 = vmatprep.subr.mxu0 %v16931_v0 }
 0x831   : > { %11897 = vmatpush3.msra.mxu1 %v10067_v28  ;;  %11932 = vmatpush3.msra.mxu0 %v10083_v40  ;;  %v6861_v40 = vld [vmem:[%s16905_s7 + $0x38] sm:$0xff] }
 0x832   : > { %11898 = vmatprep.subr.mxu1 %v16931_v0  ;;  %11933 = vmatprep.subr.mxu0 %v16931_v0 }
 0x833   : > { %11899 = vmatpush3.msra.mxu1 %v10066_v38  ;;  %11934 = vmatpush3.msra.mxu0 %v10082_v44  ;;  %v10147_v44 = vld [vmem:[%s16905_s7 + $0x138] sm:$0xff] }
 0x834   : > { %11900 = vmatprep.subr.mxu1 %v16931_v0  ;;  %11935 = vmatprep.subr.mxu0 %v16931_v0 }
 0x835   : > { %11901 = vmatpush3.msra.mxu1 %v10065_v39  ;;  %11936 = vmatpush3.msra.mxu0 %v10081_v19  ;;  %v6860_v39 = vld [vmem:[%s16905_s7 + $0x30] sm:$0xff] }
 0x836   : > { %11902 = vmatprep.subr.mxu1 %v16931_v0  ;;  %11937 = vmatprep.subr.mxu0 %v16931_v0  ;;  %v10146_v19 = vld [vmem:[%s16905_s7 + $0x130] sm:$0xff] }
 0x837   : > { %11903 = vmatpush3.msra.mxu1 %v10064_v49  ;;  %11938 = vmatpush3.msra.mxu0 %v10080_v20  ;;  %v6859_v49 = vld [vmem:[%s16905_s7 + $0x28] sm:$0xff] }
 0x838   : > { %11904 = vmatprep.subr.mxu1 %v16931_v0  ;;  %11939 = vmatprep.subr.mxu0 %v16931_v0  ;;  %v10145_v20 = vld [vmem:[%s16905_s7 + $0x128] sm:$0xff] }
 0x839   : > { %11905 = vmatpush3.msra.mxu1 %v10063_v57  ;;  %11906 = vmatprep.mubr.msk.f32.mxu1 %vm12477_vm12, %v16931_v0  ;;  %v6858_v57 = vld [vmem:[%s16905_s7 + $0x20] sm:$0xff] }
 0x83a   : > { %11940 = vmatpush3.msra.mxu0 %v10079_v53  ;;  %11941 = vmatprep.mubr.msk.f32.mxu0 %vm12477_vm12, %v16931_v0  ;;  %v10144_v53 = vld [vmem:[%s16905_s7 + $0x120] sm:$0xff] }
 0x83b   : > { %11907 = vmatmul.mubr.f32.vlgmr.msra.gmra.mxu1 %v6579_v61  ;;  %11942 = vmatmul.mubr.f32.vlgmr.msra.gmra.mxu0 %v6667_v5  ;;  %v10143_v61 = vld [vmem:[%s16905_s7 + $0x118] sm:$0xff]  ;;  %v6856_v5 = vld [vmem:[%s16905_s7 + $0x10] sm:$0xff] }
 0x83c   : > { %11944 = vmatprep.subr.mxu1 %v16931_v0  ;;  %11976 = vmatprep.mubr.msk.f32.mxu1 %vm12477_vm12, %v16931_v0 }
 0x83d   : > { %11945 = vmatpush3.msra.mxu1 %v10110_v35  ;;  %11979 = vmatprep.subr.mxu0 %v16931_v0  ;;  %v6857_v35 = vld [vmem:[%s16905_s7 + $0x18] sm:$0xff] }
 0x83e   : > { %11946 = vmatprep.subr.mxu1 %v16931_v0  ;;  %11995 = vmatprep.mubr.msk.f32.mxu0 %vm12477_vm12, %v16931_v0 }
 0x83f   : > { %11947 = vmatpush3.msra.mxu1 %v10109_v30  ;;  %11980 = vmatpush3.msra.mxu0 %v10119_v33  ;;  %v10142_v30 = vld [vmem:[%s16905_s7 + $0x110] sm:$0xff]  ;;  %v10134_v33 = vld [vmem:[%s16905_s7 + $0xd8] sm:$0xff] }
 0x840   : > { %11948 = vmatprep.subr.mxu1 %v16931_v0  ;;  %11981 = vmatprep.subr.mxu0 %v16931_v0 }
 0x841   : > { %11949 = vmatpush3.msra.mxu1 %v10108_v63  ;;  %11982 = vmatpush3.msra.mxu0 %v10118_v27  ;;  %v6855_v63 = vld [vmem:[%s16905_s7 + $0x8] sm:$0xff] }
 0x842   : > { %11950 = vmatprep.subr.mxu1 %v16931_v0  ;;  %11983 = vmatprep.subr.mxu0 %v16931_v0  ;;  %v8145_v27 = vld [vmem:[#allocation3 + $0x21] ss:$2 sm:$0xff] }
 0x843   : > { %11951 = vmatpush3.msra.mxu1 %v10107_v13  ;;  %11984 = vmatpush3.msra.mxu0 %v10117_v8  ;;  %v10141_v13 = vld [vmem:[%s16905_s7 + $0x108] sm:$0xff]  ;;  %v10133_v8 = vld [vmem:[%s16905_s7 + $0xd0] sm:$0xff] }
 0x844   : > { %11952 = vmatprep.subr.mxu1 %v16931_v0  ;;  %11985 = vmatprep.subr.mxu0 %v16931_v0 }
 0x845   : > { %11953 = vmatpush3.msra.mxu1 %v10106_v22  ;;  %11986 = vmatpush3.msra.mxu0 %v10116_v24  ;;  %v6854_v22 = vld [vmem:[%s16905_s7] sm:$0xff]  ;;  %v10132_v24 = vld [vmem:[%s16905_s7 + $0xc8] sm:$0xff] }
 0x846   : > { %11954 = vmatprep.subr.mxu1 %v16931_v0  ;;  %11987 = vmatprep.subr.mxu0 %v16931_v0 }
 0x847   : > { %11955 = vmatpush3.msra.mxu1 %v10105_v11  ;;  %11988 = vmatpush3.msra.mxu0 %v10115_v41  ;;  %v10140_v11 = vld [vmem:[%s16905_s7 + $0x100] sm:$0xff] }
 0x848   : > { %11956 = vmatprep.subr.mxu1 %v16931_v0  ;;  %11989 = vmatprep.subr.mxu0 %v16931_v0  ;;  %v10169_v41 = vld [vmem:[%s16901_s3 + $0x40] sm:$0xff] }
 0x849   : > { %11957 = vmatpush3.msra.mxu1 %v10104_v29  ;;  %11990 = vmatpush3.msra.mxu0 %v10114_v50  ;;  %v10160_v29 = vld [vmem:[%s16901_s3 + $0x38] sm:$0xff]  ;;  %v8345_v50 = vld [vmem:[#allocation3 + $0x2] ss:$2 sm:$0xff] }
 0x84a   : > { %11958 = vmatprep.subr.mxu1 %v16931_v0  ;;  %11991 = vmatprep.subr.mxu0 %v16931_v0 }
 0x84b   : > { %11959 = vmatpush3.msra.mxu1 %v10103_v34  ;;  %11992 = vmatpush3.msra.mxu0 %v10113_v46  ;;  %v10188_v46 = vld [vmem:[%s16901_s3 + $0x98] sm:$0xff] }
 0x84c   : > { %11960 = vmatprep.subr.mxu1 %v16931_v0  ;;  %11993 = vmatprep.subr.mxu0 %v16931_v0 }
 0x84d   : > { %11961 = vmatpush3.msra.mxu1 %v10102_v51  ;;  %11994 = vmatpush3.msra.mxu0 %v10112_v58  ;;  %v10138_v51 = vld [vmem:[%s16905_s7 + $0xf8] sm:$0xff]  ;;  %v8347_v58 = vld [vmem:[#allocation3 + $0x22] ss:$2 sm:$0xff] }
 0x84e   : > { %11962 = vmatprep.subr.mxu1 %v16931_v0  ;;  %11998 = vmatprep.subr.mxu0 %v16931_v0 }
 0x84f   : > { %11963 = vmatpush3.msra.mxu1 %v10101_v31  ;;  %v10159_v31 = vld [vmem:[%s16901_s3 + $0x30] sm:$0xff] }
 0x850   : > { %11964 = vmatprep.subr.mxu1 %v16931_v0 }
 0x851   : > { %11965 = vmatpush3.msra.mxu1 %v10100_v1  ;;  %v10137_v1 = vld [vmem:[%s16905_s7 + $0xf0] sm:$0xff] }
 0x852   : > { %11966 = vmatprep.subr.mxu1 %v16931_v0 }
 0x853   : > { %11967 = vmatpush3.msra.mxu1 %v10099_v56  ;;  %v8143_v56 = vld [vmem:[#allocation3 + $0x1] ss:$2 sm:$0xff] }
 0x854   : > { %11968 = vmatprep.subr.mxu1 %v16931_v0 }
 0x855   : > { %11969 = vmatpush3.msra.mxu1 %v10098_v12  ;;  %v10158_v12 = vld [vmem:[%s16901_s3 + $0x28] sm:$0xff] }
 0x856   : > { %11970 = vmatprep.subr.mxu1 %v16931_v0 }
 0x857   : > { %11971 = vmatpush3.msra.mxu1 %v10097_v62  ;;  %v10136_v62 = vld [vmem:[%s16905_s7 + $0xe8] sm:$0xff] }
 0x858   : > { %11972 = vmatprep.subr.mxu1 %v16931_v0 }
 0x859   : > { %11973 = vmatpush3.msra.mxu1 %v10096_v55  ;;  %v10157_v55 = vld [vmem:[%s16901_s3 + $0x20] sm:$0xff] }
 0x85a   : > { %11974 = vmatprep.subr.mxu1 %v16931_v0 }
 0x85b   : > { %11975 = vmatpush3.msra.mxu1 %v10095_v32  ;;  %v10135_v32 = vld [vmem:[%s16905_s7 + $0xe0] sm:$0xff] }
 0x85c   : > { %11977 = vmatmul.mubr.f32.vlgmr.msra.gmra.mxu1 %v6755_v3  ;;  %12017 = vmatprep.subr.mxu1 %v16931_v0  ;;  %v10172_v3 = vld [vmem:[%s16901_s3 + $0x58] sm:$0xff] }
 0x85d   : > { %12033 = vmatprep.mubr.msk.f32.mxu1 %vm12477_vm12, %v16931_v0  ;;  %12018 = vmatpush3.msra.mxu1 %v10129_v43  ;;  %v8144_v43 = vld [vmem:[#allocation3 + $0x11] ss:$2 sm:$0xff] }
 0x85e   : > { %12019 = vmatprep.subr.mxu1 %v16931_v0 }
 0x85f   : > { %12020 = vmatpush3.msra.mxu1 %v10128_v26  ;;  %v10171_v26 = vld [vmem:[%s16901_s3 + $0x50] sm:$0xff] }
 0x860   : > { %12021 = vmatprep.subr.mxu1 %v16931_v0 }
 0x861   : > { %12022 = vmatpush3.msra.mxu1 %v10127_v21  ;;  %v10170_v21 = vld [vmem:[%s16901_s3 + $0x48] sm:$0xff] }
 0x862   : > { %12023 = vmatprep.subr.mxu1 %v16931_v0 }
 0x863   : > { %12024 = vmatpush3.msra.mxu1 %v10126_v60  ;;  %v8146_v60 = vld [vmem:[#allocation3 + $0x31] ss:$2 sm:$0x1f] }
 0x864   : > { %12025 = vmatprep.subr.mxu1 %v16931_v0 }
 0x865   : > { %12026 = vmatpush3.msra.mxu1 %v10125_v18  ;;  %v10131_v18 = vld [vmem:[%s16905_s7 + $0xc0] sm:$0xff] }
 0x866   : > { %12027 = vmatprep.subr.mxu1 %v16931_v0 }
 0x867   : > { %12028 = vmatpush3.msra.mxu1 %v10124_v54 }
 0x868   : > { %12029 = vmatprep.subr.mxu1 %v16931_v0 }
 0x869   : > { %12030 = vmatpush3.msra.mxu1 %v10123_v16  ;;  %v8346_v16 = vld [vmem:[#allocation3 + $0x12] ss:$2 sm:$0xff] }
 0x86a   : > { %12031 = vmatprep.subr.mxu1 %v16931_v0 }
 0x86b   : > { %12032 = vmatpush3.msra.mxu1 %v10122_v42  ;;  %v10187_v42 = vld [vmem:[%s16901_s3 + $0x90] sm:$0xff] }
 0x86c   : > { %12055 = vmatprep.subr.mxu1 %v16931_v0 }
 0x8da   : > { %v6505_v45 = vpop.f32.mrf.mxu1  ;;  %v6575_v17 = vpop.f32.mrf.mxu0 }
 0x8db   : > { %v6576_v52 = vadd.f32 %v6575_v17, %v6505_v45  ;;  %v10186_v45 = vld [vmem:[%s16901_s3 + $0x88] sm:$0xff]  ;;  %v8348_v17 = vld [vmem:[#allocation3 + $0x32] ss:$2 sm:$0x1f] }
 0x8dc   : > { %v11838_v10 = vpop.f32.mrf.mxu1  ;;  %v11873_v36 = vpop.f32.mrf.mxu0 }
 0x8dd   : > { %v10185_v10 = vld [vmem:[%s16901_s3 + $0x80] sm:$0xff] }
 0x8de   : > { %v8563_v36 = vld [vmem:[#allocation3 + $0x4] ss:$2 sm:$0xff] }
 0x8fb   : > { %v6662_v47 = vpop.f32.mrf.mxu1  ;;  %v6750_v9 = vpop.f32.mrf.mxu0 }
 0x8fc   : > { %v6666_v37 = vadd.f32 %v6662_v47, %v6576_v52  ;;  %v8564_v47 = vld [vmem:[#allocation3 + $0x14] ss:$2 sm:$0xff] }
 0x8fd   : > { %v11908_v7 = vpop.f32.mrf.mxu1  ;;  %v11943_v6 = vpop.f32.mrf.mxu0  ;;  %v7273_v52 = vld [vmem:[%s16907_s9 + $0x30] sm:$0xff] }
 0x8fe   : > { %v6754_v25 = vadd.f32 %v6750_v9, %v6666_v37  ;;  %v8565_v9 = vld [vmem:[#allocation3 + $0x24] ss:$2 sm:$0xff]  ;;  %v8566_v7 = vld [vmem:[#allocation3 + $0x34] ss:$2 sm:$0x1f] }
 0x8ff   : > { %v7274_v6 = vld [vmem:[%s16907_s9 + $0x38] sm:$0xff]  ;;  %v7272_v37 = vld [vmem:[%s16907_s9 + $0x28] sm:$0xff] }
 0x91c   : > { %v6838_v59 = vpop.f32.mrf.mxu1 }
 0x91d   : > { %v6842_v48 = vadd.f32 %v6838_v59, %v6754_v25  ;;  %v7271_v25 = vld [vmem:[%s16907_s9 + $0x20] sm:$0xff]  ;;  %v7270_v59 = vld [vmem:[%s16907_s9 + $0x18] sm:$0xff] }
 0x91e   : > { %v11978_v4 = vpop.f32.mrf.mxu1 }
 0x91f   : > { %v6850_v14 = vadd.f32 %v10111_v15, %v6842_v48  ;;  %v7269_v15 = vld [vmem:[%s16907_s9 + $0x10] sm:$0xff]  ;;  %v7268_v48 = vld [vmem:[%s16907_s9 + $0x8] sm:$0xff]  ;;  %v7267_v4 = vld [vmem:[%s16907_s9] sm:$0xff] }
 0x921   : > { %vm6851_vm15 = vcmp.ge.f32.partialorder %v6850_v14, 0.0  ;;  %v6852_v2 = vmul.f32 0.02, %v6850_v14 }
 0x923   : > { %v16099_v23 = vsel %vm6851_vm15, %v6850_v14, %v6852_v2  ;;  %v8142_v14 = vld [vmem:[%s16901_s3 + $0x18] sm:$0xff] }
 0x924   : > { %v6871_v28 = vrot.slane %v16099_v23, 1  ;;  %v7024_v38 = vrot.slane %v16099_v23, 2  ;;  %v7188_v34 = vrot.slane %v16099_v23, 4  ;;  %v7106_v54 = vrot.slane %v16099_v23, 3 }
 0x926   : > { %11996 = vmatmul.mubr.msk.f32.vlgmr.msra.gmra.mxu0 %vm2264_vm8, %v6871_v28  ;;  %12034 = vmatmul.mubr.msk.f32.vlgmr.msra.gmra.mxu1 %vm2264_vm8, %v7024_v38 }
 0x927   : > { %11999 = vmatpush3.msra.mxu0 %v6861_v40  ;;  %12056 = vmatpush3.msra.mxu1 %v10147_v44 }
 0x928   : > { %12000 = vmatprep.subr.mxu0 %v16931_v0  ;;  %12057 = vmatprep.subr.mxu1 %v16931_v0 }
 0x929   : > { %12001 = vmatpush3.msra.mxu0 %v6860_v39  ;;  %12058 = vmatpush3.msra.mxu1 %v10146_v19 }
 0x92a   : > { %12002 = vmatprep.subr.mxu0 %v16931_v0  ;;  %12059 = vmatprep.subr.mxu1 %v16931_v0 }
 0x92b   : > { %12003 = vmatpush3.msra.mxu0 %v6859_v49  ;;  %12060 = vmatpush3.msra.mxu1 %v10145_v20 }
 0x92c   : > { %12004 = vmatprep.subr.mxu0 %v16931_v0  ;;  %12061 = vmatprep.subr.mxu1 %v16931_v0 }
 0x92d   : > { %12005 = vmatpush3.msra.mxu0 %v6858_v57  ;;  %12062 = vmatpush3.msra.mxu1 %v10144_v53 }
 0x92e   : > { %12006 = vmatprep.subr.mxu0 %v16931_v0  ;;  %12063 = vmatprep.subr.mxu1 %v16931_v0 }
 0x92f   : > { %12007 = vmatpush3.msra.mxu0 %v6857_v35  ;;  %12064 = vmatpush3.msra.mxu1 %v10143_v61  ;;  %v7262_v35 = vld [vmem:[%s16906_s8] sm:$0x1] }
 0x930   : > { %12008 = vmatprep.subr.mxu0 %v16931_v0  ;;  %12065 = vmatprep.subr.mxu1 %v16931_v0 }
 0x931   : > { %12009 = vmatpush3.msra.mxu0 %v6856_v5  ;;  %12066 = vmatpush3.msra.mxu1 %v10142_v30 }
 0x932   : > { %12010 = vmatprep.subr.mxu0 %v16931_v0  ;;  %12067 = vmatprep.subr.mxu1 %v16931_v0 }
 0x933   : > { %12011 = vmatpush3.msra.mxu0 %v6855_v63  ;;  %12068 = vmatpush3.msra.mxu1 %v10141_v13 }
 0x934   : > { %12012 = vmatprep.subr.mxu0 %v16931_v0  ;;  %12069 = vmatprep.subr.mxu1 %v16931_v0 }
 0x935   : > { %12013 = vmatpush3.msra.mxu0 %v6854_v22  ;;  %12014 = vmatprep.mubr.msk.f32.mxu0 %vm12477_vm12, %v16931_v0  ;;  %v8141_v22 = vld [vmem:[%s16901_s3 + $0x10] sm:$0xff] }
 0x936   : > { %12070 = vmatpush3.msra.mxu1 %v10140_v11  ;;  %12071 = vmatprep.mubr.msk.f32.mxu1 %vm12477_vm12, %v16931_v0  ;;  %v8135_v11 = vld [vmem:[#allocation3] ss:$2 sm:$0xff] }
 0x937   : > { %12015 = vmatmul.mubr.msk.f32.vlgmr.msra.gmra.mxu0 %vm2264_vm8, %v16099_v23  ;;  %12036 = vmatprep.subr.mxu0 %v16931_v0 }
 0x938   : > { %12072 = vmatmul.mubr.msk.f32.vlgmr.msra.gmra.mxu1 %vm2264_vm8, %v7188_v34  ;;  %12093 = vmatprep.subr.mxu1 %v10160_v29  ;;  %v8139_v34 = vld [vmem:[%s16901_s3] sm:$0xff] }
 0x939   : > { %12037 = vmatpush3.msra.mxu0 %v10138_v51  ;;  %12094 = vmatpush3.msra.mxu1 %v10160_v29  ;;  %v8140_v29 = vld [vmem:[%s16901_s3 + $0x8] sm:$0xff]  ;;  %v10180_v51 = vld [vmem:[%s16901_s3 + $0x78] sm:$0xff] }
 0x93a   : > { %12101 = vmatprep.mubr.msk.f32.mxu1 %vm1124_vm0, %v8143_v56  ;;  %12038 = vmatprep.subr.mxu0 %v16931_v0  ;;  %v8137_v56 = vld [vmem:[#allocation3 + $0x20] ss:$2 sm:$0xff] }
 0x93b   : > { %12095 = vmatprep.subr.mxu1 %v10159_v31  ;;  %12039 = vmatpush3.msra.mxu0 %v10137_v1  ;;  %v10179_v1 = vld [vmem:[%s16901_s3 + $0x70] sm:$0xff] }
 0x93c   : > { %12096 = vmatpush3.msra.mxu1 %v10159_v31  ;;  %12040 = vmatprep.subr.mxu0 %v16931_v0  ;;  %v8136_v31 = vld [vmem:[#allocation3 + $0x10] ss:$2 sm:$0xff] }
 0x93d   : > { %12097 = vmatprep.subr.mxu1 %v10158_v12  ;;  %12041 = vmatpush3.msra.mxu0 %v10136_v62  ;;  %v8138_v62 = vld [vmem:[#allocation3 + $0x30] ss:$2 sm:$0x1f] }
 0x93e   : > { %12098 = vmatpush3.msra.mxu1 %v10158_v12  ;;  %12042 = vmatprep.subr.mxu0 %v16931_v0  ;;  %v10178_v12 = vld [vmem:[%s16901_s3 + $0x68] sm:$0xff] }
 0x93f   : > { %12099 = vmatprep.subr.mxu1 %v10157_v55  ;;  %12043 = vmatpush3.msra.mxu0 %v10135_v32  ;;  %v8454_v32 = vld [vmem:[#allocation3 + $0x3] ss:$2 sm:$0xff] }
 0x940   : > { %12100 = vmatpush3.msra.mxu1 %v10157_v55  ;;  %12044 = vmatprep.subr.mxu0 %v16931_v0  ;;  %v10177_v55 = vld [vmem:[%s16901_s3 + $0x60] sm:$0xff] }
 0x941   : > { %12102 = vmatmul.mubr.msk.f32.vlgmr.msra.gmra.mxu1 %vm1124_vm0, %v8144_v43  ;;  %12121 = vmatprep.subr.mxu1 %v10172_v3  ;;  %v8457_v43 = vld [vmem:[#allocation3 + $0x33] ss:$2 sm:$0x1f] }
 0x942   : > { %12045 = vmatpush3.msra.mxu0 %v10134_v33  ;;  %12104 = vmatprep.mubr.msk.f32.mxu1 %vm1124_vm0, %v8145_v27  ;;  %v8456_v33 = vld [vmem:[#allocation3 + $0x23] ss:$2 sm:$0xff]  ;;  %v10209_v27 = vld [vmem:[%s16903_s5 + $0xf8] sm:$0xff] }
 0x943   : > { %12122 = vmatpush3.msra.mxu1 %v10172_v3  ;;  %12046 = vmatprep.subr.mxu0 %v16931_v0  ;;  %v8455_v3 = vld [vmem:[#allocation3 + $0x13] ss:$2 sm:$0xff] }
 0x944   : > { %12123 = vmatprep.subr.mxu1 %v10171_v26  ;;  %12047 = vmatpush3.msra.mxu0 %v10133_v8  ;;  %v10208_v8 = vld [vmem:[%s16903_s5 + $0xf0] sm:$0xff] }
 0x945   : > { %12124 = vmatpush3.msra.mxu1 %v10171_v26  ;;  %12048 = vmatprep.subr.mxu0 %v16931_v0  ;;  %v8723_v26 = vld [vmem:[%s16903_s5 + $0x78] sm:$0xff] }
 0x946   : > { %12105 = vmatmul.mubr.msk.f32.gmra.mxu1 %vm1124_vm0, %v8146_v60  ;;  %12125 = vmatprep.subr.mxu1 %v10170_v21  ;;  %v8721_v60 = vld [vmem:[%s16903_s5 + $0x68] sm:$0xff] }
 0x947   : > { %12049 = vmatpush3.msra.mxu0 %v10132_v24  ;;  %12126 = vmatpush3.msra.mxu1 %v10170_v21  ;;  %v8722_v21 = vld [vmem:[%s16903_s5 + $0x70] sm:$0xff]  ;;  %v10207_v24 = vld [vmem:[%s16903_s5 + $0xe8] sm:$0xff] }
 0x948   : > { %12129 = vmatprep.mubr.msk.f32.mxu1 %vm1124_vm0, %v8345_v50  ;;  %12050 = vmatprep.subr.mxu0 %v16931_v0  ;;  %v10205_v50 = vld [vmem:[%s16903_s5 + $0xd8] sm:$0xff] }
 0x949   : > { %12127 = vmatprep.subr.mxu1 %v10169_v41  ;;  %12051 = vmatpush3.msra.mxu0 %v10131_v18  ;;  %v8720_v18 = vld [vmem:[%s16903_s5 + $0x60] sm:$0xff] }
 0x94a   : > { %12052 = vmatprep.mubr.msk.f32.mxu0 %vm12477_vm12, %v16931_v0  ;;  %12128 = vmatpush3.msra.mxu1 %v10169_v41  ;;  %v10206_v41 = vld [vmem:[%s16903_s5 + $0xe0] sm:$0xff] }
 0x94b   : > { %12053 = vmatmul.mubr.msk.f32.vlgmr.msra.gmra.mxu0 %vm2264_vm8, %v7106_v54  ;;  %12130 = vmatmul.mubr.msk.f32.vlgmr.msra.gmra.mxu1 %vm1124_vm0, %v8346_v16  ;;  %v8719_v54 = vld [vmem:[%s16903_s5 + $0x58] sm:$0xff]  ;;  %v8718_v16 = vld [vmem:[%s16903_s5 + $0x50] sm:$0xff] }
 0x94c   : > { %12149 = vmatprep.subr.mxu1 %v10188_v46  ;;  %12132 = vmatprep.mubr.msk.f32.mxu1 %vm1124_vm0, %v8347_v58  ;;  %v10203_v58 = vld [vmem:[%s16903_s5 + $0xc8] sm:$0xff] }
 0x94d   : > { %12150 = vmatpush3.msra.mxu1 %v10188_v46  ;;  %12074 = vmatprep.subr.mxu0 %v16931_v0  ;;  %v10204_v46 = vld [vmem:[%s16903_s5 + $0xd0] sm:$0xff] }
 0x94e   : > { %12151 = vmatprep.subr.mxu1 %v10187_v42  ;;  %12090 = vmatprep.mubr.msk.f32.mxu0 %vm12477_vm12, %v16931_v0 }
 0x94f   : > { %12152 = vmatpush3.msra.mxu1 %v10187_v42  ;;  %12075 = vmatpush3.msra.mxu0 %v7274_v6  ;;  %v8717_v42 = vld [vmem:[%s16903_s5 + $0x48] sm:$0xff] }
 0x950   : > { %12133 = vmatmul.mubr.msk.f32.gmra.mxu1 %vm1124_vm0, %v8348_v17  ;;  %12153 = vmatprep.subr.mxu1 %v10186_v45  ;;  %v8716_v17 = vld [vmem:[%s16903_s5 + $0x40] sm:$0xff]  ;;  %v8713_v6 = vld [vmem:[%s16903_s5 + $0x28] sm:$0xff] }
 0x951   : > { %12154 = vmatpush3.msra.mxu1 %v10186_v45  ;;  %12157 = vmatprep.mubr.msk.f32.mxu1 %vm1124_vm0, %v8563_v36  ;;  %v10202_v45 = vld [vmem:[%s16903_s5 + $0xc0] sm:$0xff]  ;;  %v8715_v36 = vld [vmem:[%s16903_s5 + $0x38] sm:$0xff] }
 0x952   : > { %12155 = vmatprep.subr.mxu1 %v10185_v10  ;;  %12076 = vmatprep.subr.mxu0 %v16931_v0 }
 0x953   : > { %12156 = vmatpush3.msra.mxu1 %v10185_v10  ;;  %12077 = vmatpush3.msra.mxu0 %v7273_v52  ;;  %v10201_v10 = vld [vmem:[%s16903_s5 + $0xb8] sm:$0xff]  ;;  %v10198_v52 = vld [vmem:[%s16903_s5 + $0xa0] sm:$0xff] }
 0x954   : > { %12158 = vmatmul.mubr.msk.f32.vlgmr.msra.gmra.mxu1 %vm1124_vm0, %v8564_v47  ;;  %12198 = vmatprep.subr.mxu1 %v16931_v0  ;;  %v10200_v47 = vld [vmem:[%s16903_s5 + $0xb0] sm:$0xff] }
 0x955   : > { %12160 = vmatprep.mubr.msk.f32.mxu1 %vm1124_vm0, %v8565_v9  ;;  %12078 = vmatprep.subr.mxu0 %v16931_v0  ;;  %v8714_v9 = vld [vmem:[%s16903_s5 + $0x30] sm:$0xff] }
 0x956   : > { %12079 = vmatpush3.msra.mxu0 %v7272_v37  ;;  %12199 = vmatpush3.msra.mxu1 %v8723_v26  ;;  %v8712_v37 = vld [vmem:[%s16903_s5 + $0x20] sm:$0xff] }
 0x957   : > { %12080 = vmatprep.subr.mxu0 %v16931_v0  ;;  %12200 = vmatprep.subr.mxu1 %v16931_v0 }
 0x958   : > { %12161 = vmatmul.mubr.msk.f32.gmra.mxu1 %vm1124_vm0, %v8566_v7  ;;  %12081 = vmatpush3.msra.mxu0 %v7271_v25  ;;  %v10199_v7 = vld [vmem:[%s16903_s5 + $0xa8] sm:$0xff]  ;;  %v10197_v25 = vld [vmem:[%s16903_s5 + $0x98] sm:$0xff] }
 0x959   : > { %12230 = vmatprep.mubr.msk.f32.mxu1 %vm12477_vm12, %v16931_v0  ;;  %12082 = vmatprep.subr.mxu0 %v16931_v0 }
 0x95a   : > { %12083 = vmatpush3.msra.mxu0 %v7270_v59  ;;  %12201 = vmatpush3.msra.mxu1 %v8722_v21  ;;  %v8711_v59 = vld [vmem:[%s16903_s5 + $0x18] sm:$0xff] }
 0x95b   : > { %12084 = vmatprep.subr.mxu0 %v16931_v0  ;;  %12202 = vmatprep.subr.mxu1 %v16931_v0 }
 0x95c   : > { %12085 = vmatpush3.msra.mxu0 %v7269_v15  ;;  %12203 = vmatpush3.msra.mxu1 %v8721_v60  ;;  %v10196_v15 = vld [vmem:[%s16903_s5 + $0x90] sm:$0xff] }
 0x95d   : > { %12086 = vmatprep.subr.mxu0 %v16931_v0  ;;  %12204 = vmatprep.subr.mxu1 %v16931_v0 }
 0x95e   : > { %12087 = vmatpush3.msra.mxu0 %v7268_v48  ;;  %12205 = vmatpush3.msra.mxu1 %v8720_v18  ;;  %v8710_v48 = vld [vmem:[%s16903_s5 + $0x10] sm:$0xff] }
 0x95f   : > { %12088 = vmatprep.subr.mxu0 %v16931_v0  ;;  %12206 = vmatprep.subr.mxu1 %v16931_v0 }
 0x960   : > { %12089 = vmatpush3.msra.mxu0 %v7267_v4  ;;  %12207 = vmatpush3.msra.mxu1 %v8719_v54  ;;  %v10195_v4 = vld [vmem:[%s16903_s5 + $0x88] sm:$0xff] }
 0x961   : > { %12107 = vmatprep.subr.mxu0 %v8142_v14  ;;  %12208 = vmatprep.subr.mxu1 %v16931_v0 }
 0x962   : > { %12209 = vmatpush3.msra.mxu1 %v8718_v16 }
 0x963   : > { %12210 = vmatprep.subr.mxu1 %v16931_v0 }
 0x964   : > { %12211 = vmatpush3.msra.mxu1 %v8717_v42 }
 0x965   : > { %12212 = vmatprep.subr.mxu1 %v16931_v0 }
 0x966   : > { %12213 = vmatpush3.msra.mxu1 %v8716_v17 }
 0x967   : > { %12214 = vmatprep.subr.mxu1 %v16931_v0 }
 0x968   : > { %12215 = vmatpush3.msra.mxu1 %v8715_v36 }
 0x969   : > { %12216 = vmatprep.subr.mxu1 %v16931_v0 }
 0x96a   : > { %12217 = vmatpush3.msra.mxu1 %v8714_v9 }
 0x96b   : > { %12218 = vmatprep.subr.mxu1 %v16931_v0 }
 0x96c   : > { %12219 = vmatpush3.msra.mxu1 %v8713_v6 }
 0x96d   : > { %12220 = vmatprep.subr.mxu1 %v16931_v0 }
 0x96e   : > { %12221 = vmatpush3.msra.mxu1 %v8712_v37 }
 0x96f   : > { %12222 = vmatprep.subr.mxu1 %v16931_v0 }
 0x970   : > { %12223 = vmatpush3.msra.mxu1 %v8711_v59 }
 0x971   : > { %12224 = vmatprep.subr.mxu1 %v16931_v0 }
 0x972   : > { %12225 = vmatpush3.msra.mxu1 %v8710_v48 }
 0x973   : > { %12226 = vmatprep.subr.mxu1 %v16931_v0 }
 0x9e6   : > { %v6940_v2 = vpop.f32.mrf.mxu0  ;;  %v7093_v23 = vpop.f32.mrf.mxu1 }
 0x9e8   : > { %v11997_v28 = vpop.f32.mrf.mxu0  ;;  %v12035_v40 = vpop.f32.mrf.mxu1 }
 0x9f7   : > { %v7012_v38 = vpop.f32.mrf.mxu0 }
 0x9f8   : > { %v7257_v44 = vpop.f32.mrf.mxu1  ;;  %v7013_v49 = vadd.f32 %v7012_v38, %v6940_v2  ;;  %v10194_v2 = vld [vmem:[%s16903_s5 + $0x80] sm:$0xff] }
 0x9f9   : > { %v12016_v39 = vpop.f32.mrf.mxu0 }
 0x9fa   : > { %v12073_v19 = vpop.f32.mrf.mxu1  ;;  %v7097_v20 = vadd.f32 %v7093_v23, %v7013_v49  ;;  %v8708_v23 = vld [vmem:[%s16903_s5] sm:$0xff] }
 0x9fb   : > { %v7275_v19 = vld [vmem:[%s16908_s10] sm:$0x1] }
 0xa01   : > { %v12103_v28 = vpop.f32.mrf.mxu1 }
 0xa03   : > { %v8229_v40 = vpop.f32.mrf.mxu1 }
 0xa06   : > { %v12106_v38 = vpop.f32.mrf.mxu1 }
 0xa0b   : > { %v7175_v57 = vpop.f32.mrf.mxu0 }
 0xa0c   : > { %v7179_v53 = vadd.f32 %v7175_v57, %v7097_v20 }
 0xa0d   : > { %v12054_v61 = vpop.f32.mrf.mxu0 }
 0xa0e   : > { %v7261_v5 = vadd.f32 %v7257_v44, %v7179_v53  ;;  %v8239_v44 = vpop.f32.mrf.mxu1 }
 0xa10   : > { %v7263_v30 = vadd.f32 %v7262_v35, %v7261_v5  ;;  %v12131_v39 = vpop.f32.mrf.mxu1 }
 0xa12   : > { %v7265_v63 = vmul.f32 0.02, %v7263_v30  ;;  %vm7264_vm3 = vcmp.ge.f32.partialorder %v7263_v30, 0.0  ;;  %v8431_v20 = vpop.f32.mrf.mxu1 }
 0xa14   : > { %v7266_v13 = vsel %vm7264_vm3, %v7263_v30, %v7265_v63  ;;  %v12134_v35 = vpop.f32.mrf.mxu1 }
 0xa15   : > { %12091 = vmatmul.mubr.msk.f32.vlgmr.msra.gmra.mxu0 %vm2264_vm8, %v7266_v13 }
 0xa16   : > { %12108 = vmatpush3.msra.mxu0 %v8142_v14  ;;  %12115 = vmatprep.mubr.msk.f32.mxu0 %vm1124_vm0, %v8135_v11  ;;  %v8709_v14 = vld [vmem:[%s16903_s5 + $0x8] sm:$0xff]  ;;  %v8441_v5 = vpop.f32.mrf.mxu1 }
 0xa17   : > { %12109 = vmatprep.subr.mxu0 %v8141_v22  ;;  %12227 = vmatpush3.msra.mxu1 %v8709_v14  ;;  %v10241_v14 = vld [vmem:[%s16903_s5 + $0x1f8] sm:$0xff] }
 0xa18   : > { %12110 = vmatpush3.msra.mxu0 %v8141_v22  ;;  %12228 = vmatprep.subr.mxu1 %v16931_v0  ;;  %v12159_v22 = vpop.f32.mrf.mxu1 }
 0xa19   : > { %12111 = vmatprep.subr.mxu0 %v8140_v29  ;;  %12229 = vmatpush3.msra.mxu1 %v8708_v23 }
 0xa1a   : > { %12112 = vmatpush3.msra.mxu0 %v8140_v29  ;;  %12268 = vmatprep.subr.mxu1 %v16931_v0 }
 0xa1b   : > { %12113 = vmatprep.subr.mxu0 %v8139_v34 }
 0xa1c   : > { %12114 = vmatpush3.msra.mxu0 %v8139_v34 }
 0xa1d   : > { %12116 = vmatmul.mubr.msk.f32.vlgmr.msra.gmra.mxu0 %vm1124_vm0, %v8136_v31  ;;  %12135 = vmatprep.subr.mxu0 %v10180_v51 }
 0xa1e   : > { %12118 = vmatprep.mubr.msk.f32.mxu0 %vm1124_vm0, %v8137_v56  ;;  %12136 = vmatpush3.msra.mxu0 %v10180_v51 }
 0xa1f   : > { %12137 = vmatprep.subr.mxu0 %v10179_v1 }
 0xa20   : > { %12138 = vmatpush3.msra.mxu0 %v10179_v1  ;;  %v8649_v1 = vpop.f32.mrf.mxu1 }
 0xa21   : > { %12119 = vmatmul.mubr.msk.f32.gmra.mxu0 %vm1124_vm0, %v8138_v62  ;;  %12139 = vmatprep.subr.mxu0 %v10178_v12 }
 0xa22   : > { %12140 = vmatpush3.msra.mxu0 %v10178_v12  ;;  %12143 = vmatprep.mubr.msk.f32.mxu0 %vm1124_vm0, %v8454_v32  ;;  %v12162_v26 = vpop.f32.mrf.mxu1 }
 0xa23   : > { %12141 = vmatprep.subr.mxu0 %v10177_v55 }
 0xa24   : > { %12142 = vmatpush3.msra.mxu0 %v10177_v55  ;;  %v10193_v55 = vld [vmem:[%s16902_s4] ss:$0 sm:$0xff]  ;;  %v8659_v16 = vpop.f32.mrf.mxu1 }
 0xa25   : > { %12144 = vmatmul.mubr.msk.f32.vlgmr.msra.gmra.mxu0 %vm1124_vm0, %v8455_v3  ;;  %12163 = vmatprep.subr.mxu0 %v16931_v0 }
 0xa26   : > { %12146 = vmatprep.mubr.msk.f32.mxu0 %vm1124_vm0, %v8456_v33  ;;  %12164 = vmatpush3.msra.mxu0 %v10209_v27 }
 0xa27   : > { %12165 = vmatprep.subr.mxu0 %v16931_v0 }
 0xa28   : > { %12166 = vmatpush3.msra.mxu0 %v10208_v8 }
 0xa29   : > { %12147 = vmatmul.mubr.msk.f32.gmra.mxu0 %vm1124_vm0, %v8457_v43  ;;  %12167 = vmatprep.subr.mxu0 %v16931_v0 }
 0xa2a   : > { %12195 = vmatprep.mubr.msk.f32.mxu0 %vm12477_vm12, %v16931_v0  ;;  %12168 = vmatpush3.msra.mxu0 %v10207_v24 }
 0xa2b   : > { %12169 = vmatprep.subr.mxu0 %v16931_v0 }
 0xa2c   : > { %12170 = vmatpush3.msra.mxu0 %v10206_v41 }
 0xa2d   : > { %12171 = vmatprep.subr.mxu0 %v16931_v0 }
 0xa2e   : > { %12172 = vmatpush3.msra.mxu0 %v10205_v50 }
 0xa2f   : > { %12173 = vmatprep.subr.mxu0 %v16931_v0 }
 0xa30   : > { %12174 = vmatpush3.msra.mxu0 %v10204_v46 }
 0xa31   : > { %12175 = vmatprep.subr.mxu0 %v16931_v0 }
 0xa32   : > { %12176 = vmatpush3.msra.mxu0 %v10203_v58 }
 0xa33   : > { %12177 = vmatprep.subr.mxu0 %v16931_v0 }
 0xa34   : > { %12178 = vmatpush3.msra.mxu0 %v10202_v45 }
 0xa35   : > { %12179 = vmatprep.subr.mxu0 %v16931_v0 }
 0xa36   : > { %12180 = vmatpush3.msra.mxu0 %v10201_v10 }
 0xa37   : > { %12181 = vmatprep.subr.mxu0 %v16931_v0 }
 0xa38   : > { %12182 = vmatpush3.msra.mxu0 %v10200_v47 }
 0xa39   : > { %12183 = vmatprep.subr.mxu0 %v16931_v0 }
 0xa3a   : > { %12184 = vmatpush3.msra.mxu0 %v10199_v7 }
 0xa3b   : > { %12185 = vmatprep.subr.mxu0 %v16931_v0 }
 0xa3c   : > { %12186 = vmatpush3.msra.mxu0 %v10198_v52 }
 0xa3d   : > { %12187 = vmatprep.subr.mxu0 %v16931_v0 }
 0xa3e   : > { %12188 = vmatpush3.msra.mxu0 %v10197_v25 }
 0xa3f   : > { %12189 = vmatprep.subr.mxu0 %v16931_v0 }
 0xa40   : > { %12190 = vmatpush3.msra.mxu0 %v10196_v15 }
 0xa41   : > { %12191 = vmatprep.subr.mxu0 %v16931_v0 }
 0xa42   : > { %12192 = vmatpush3.msra.mxu0 %v10195_v4  ;;  %v10225_v4 = vld [vmem:[%s16903_s5 + $0x178] sm:$0xff] }
 0xa43   : > { %12193 = vmatprep.subr.mxu0 %v16931_v0 }
 0xa44   : > { %12194 = vmatpush3.msra.mxu0 %v10194_v2 }
 0xa45   : > { %12233 = vmatprep.subr.mxu0 %v16931_v0 }
 0xad5   : > { %v7345_v49 = vpop.f32.mrf.mxu0 }
 0xad6   : > { %v7346_v57 = vadd.f32 %v7345_v49, %v7275_v19  ;;  %v10238_v19 = vld [vmem:[%s16903_s5 + $0x1e0] sm:$0xff]  ;;  %v10221_v49 = vld [vmem:[%s16903_s5 + $0x158] sm:$0xff] }
 0xad7   : > { %v12092_v53 = vpop.f32.mrf.mxu0 }
 0xad8   : > { %10150 = vst.msk [vmem:[%s15162_s21 + $0x2] sm:$0x1] %vm2745_vm9, %v7346_v57  ;;  %v10220_v57 = vld [vmem:[%s16903_s5 + $0x150] sm:$0xff] }
 0xad9   : > { %v10236_v53 = vld [vmem:[%s16903_s5 + $0x1d0] sm:$0xff] }
 0xadd   : > { %v12117_v61 = vpop.f32.mrf.mxu0 }
 0xade   : > { %v8332_v63 = vadd.f32 %v12117_v61, %v12103_v28  ;;  %v10224_v28 = vld [vmem:[%s16903_s5 + $0x170] sm:$0xff]  ;;  %v10235_v61 = vld [vmem:[%s16903_s5 + $0x1c8] sm:$0xff] }
 0xadf   : > { %v8326_v30 = vpop.f32.mrf.mxu0 }
 0xae0   : > { %v8327_v11 = vadd.f32 %v8326_v30, %v8229_v40  ;;  %v8451_v51 = vadd.f32 %v12131_v39, %v8332_v63  ;;  %v10240_v40 = vld [vmem:[%s16903_s5 + $0x1f0] sm:$0xff]  ;;  %v10222_v39 = vld [vmem:[%s16903_s5 + $0x160] sm:$0xff]  ;;  %v10217_v63 = vld [vmem:[%s16903_s5 + $0x138] sm:$0xff] }
 0xae1   : > { %v12120_v13 = vpop.f32.mrf.mxu0  ;;  %v10234_v30 = vld [vmem:[%s16903_s5 + $0x1c0] sm:$0xff] }
 0xae2   : > { %v8342_v34 = vadd.f32 %v12120_v13, %v12106_v38  ;;  %v8450_v12 = vadd.f32 %v8431_v20, %v8327_v11  ;;  %v10223_v38 = vld [vmem:[%s16903_s5 + $0x168] sm:$0xff]  ;;  %v10237_v20 = vld [vmem:[%s16903_s5 + $0x1d8] sm:$0xff]  ;;  %v10232_v11 = vld [vmem:[%s16903_s5 + $0x1b0] sm:$0xff] }
 0xae3   : > { %v8336_v29 = vpop.f32.mrf.mxu0  ;;  %v10233_v13 = vld [vmem:[%s16903_s5 + $0x1b8] sm:$0xff] }
 0xae4   : > { %v8337_v62 = vadd.f32 %v8336_v29, %v8239_v44  ;;  %v8453_v43 = vadd.f32 %v12134_v35, %v8342_v34  ;;  %v10239_v44 = vld [vmem:[%s16903_s5 + $0x1e8] sm:$0xff] }
 0xae5   : > { %v12145_v31 = vpop.f32.mrf.mxu0  ;;  %v10219_v35 = vld [vmem:[%s16903_s5 + $0x148] sm:$0xff] }
 0xae6   : > { %v8560_v56 = vadd.f32 %v12145_v31, %v8451_v51  ;;  %v8452_v60 = vadd.f32 %v8441_v5, %v8337_v62  ;;  %v10218_v5 = vld [vmem:[%s16903_s5 + $0x140] sm:$0xff]  ;;  %v10215_v29 = vld [vmem:[%s16903_s5 + $0x128] sm:$0xff]  ;;  %v10228_v62 = vld [vmem:[%s16903_s5 + $0x190] sm:$0xff] }
 0xae7   : > { %v8540_v32 = vpop.f32.mrf.mxu0  ;;  %v10231_v34 = vld [vmem:[%s16903_s5 + $0x1a8] sm:$0xff]  ;;  %v10214_v51 = vld [vmem:[%s16903_s5 + $0x120] sm:$0xff] }
 0xae8   : > { %v8669_v3 = vadd.f32 %v12159_v22, %v8560_v56  ;;  %v8559_v33 = vadd.f32 %v8540_v32, %v8450_v12  ;;  %v10216_v22 = vld [vmem:[%s16903_s5 + $0x130] sm:$0xff]  ;;  %v10230_v31 = vld [vmem:[%s16903_s5 + $0x1a0] sm:$0xff]  ;;  %v10229_v56 = vld [vmem:[%s16903_s5 + $0x198] sm:$0xff] }
 0xae9   : > { %v12148_v27 = vpop.f32.mrf.mxu0  ;;  %v10212_v12 = vld [vmem:[%s16903_s5 + $0x110] sm:$0xff]  ;;  %v10227_v32 = vld [vmem:[%s16903_s5 + $0x188] sm:$0xff] }
 0xaea   : > { %v8680_v8 = vadd.f32 %v10193_v55, %v8669_v3  ;;  %v8668_v21 = vadd.f32 %v8649_v1, %v8559_v33  ;;  %v8562_v24 = vadd.f32 %v12148_v27, %v8453_v43  ;;  %v10213_v1 = vld [vmem:[%s16903_s5 + $0x118] sm:$0xff]  ;;  %v10210_v3 = vld [vmem:[%s16903_s5 + $0x100] sm:$0xff] }
 0xaeb   : > { %v8550_v41 = vpop.f32.mrf.mxu0  ;;  %v10226_v33 = vld [vmem:[%s16903_s5 + $0x180] sm:$0xff]  ;;  %v10257_v43 = vld [vmem:[%s16903_s5 + $0x278] sm:$0xff] }
 0xaec   : > { %vm8684_vm0 = vcmp.ge.f32.partialorder %v8680_v8, 0.0  ;;  %v8688_v18 = vmul.f32 0.02, %v8680_v8  ;;  %v8679_v50 = vadd.f32 %v10193_v55, %v8668_v21  ;;  %v8671_v54 = vadd.f32 %v12162_v26, %v8562_v24  ;;  %v10255_v21 = vld [vmem:[%s16903_s5 + $0x268] sm:$0xff]  ;;  %v10254_v24 = vld [vmem:[%s16903_s5 + $0x260] sm:$0xff] }
 0xaed   : > { %v8561_v46 = vadd.f32 %v8550_v41, %v8452_v60  ;;  %v10253_v60 = vld [vmem:[%s16903_s5 + $0x258] sm:$0xff]  ;;  %v10252_v41 = vld [vmem:[%s16903_s5 + $0x250] sm:$0xff] }
 0xaee   : > { %v8692_v58 = vsel %vm8684_vm0, %v8680_v8, %v8688_v18  ;;  %vm8683_vm10 = vcmp.ge.f32.partialorder %v8679_v50, 0.0  ;;  %v8687_v42 = vmul.f32 0.02, %v8679_v50  ;;  %v8682_v45 = vadd.f32 %v10193_v55, %v8671_v54  ;;  %v10256_v8 = vld [vmem:[%s16903_s5 + $0x270] sm:$0xff]  ;;  %v10251_v18 = vld [vmem:[%s16903_s5 + $0x248] sm:$0xff]  ;;  %v10249_v54 = vld [vmem:[%s16903_s5 + $0x238] sm:$0xff] }
 0xaef   : > { %8696 = vst [vmem:[#allocation4 + $0x8] sm:$0xff] %v8692_v58  ;;  %v8670_v17 = vadd.f32 %v8659_v16, %v8561_v46  ;;  %v10248_v46 = vld [vmem:[%s16903_s5 + $0x230] sm:$0xff]  ;;  %v10247_v16 = vld [vmem:[%s16903_s5 + $0x228] sm:$0xff]  ;;  %v10246_v58 = vld [vmem:[%s16903_s5 + $0x220] sm:$0xff] }
 0xaf0   : > { %v8691_v10 = vsel %vm8683_vm10, %v8679_v50, %v8687_v42  ;;  %vm8686_vm11 = vcmp.ge.f32.partialorder %v8682_v45, 0.0  ;;  %v8690_v36 = vmul.f32 0.02, %v8682_v45  ;;  %v10250_v50 = vld [vmem:[%s16903_s5 + $0x240] sm:$0xff]  ;;  %v10245_v42 = vld [vmem:[%s16903_s5 + $0x218] sm:$0xff] }
 0xaf1   : > { %8695 = vst [vmem:[#allocation4] sm:$0xff] %v8691_v10  ;;  %v8681_v47 = vadd.f32 %v10193_v55, %v8670_v17  ;;  %v10211_v55 = vld [vmem:[%s16903_s5 + $0x108] sm:$0xff]  ;;  %v10242_v10 = vld [vmem:[%s16903_s5 + $0x200] sm:$0xff] }
 0xaf2   : > { %v8694_v9 = vsel %vm8686_vm11, %v8682_v45, %v8690_v36  ;;  %v10244_v45 = vld [vmem:[%s16903_s5 + $0x210] sm:$0xff]  ;;  %v10243_v17 = vld [vmem:[%s16903_s5 + $0x208] sm:$0xff] }
 0xaf3   : > { %8698 = vst [vmem:[#allocation4 + $0x18] sm:$0x1f] %v8694_v9  ;;  %vm8685_vm13 = vcmp.ge.f32.partialorder %v8681_v47, 0.0  ;;  %v8689_v7 = vmul.f32 0.02, %v8681_v47  ;;  %v10276_v9 = vld [vmem:[%s16905_s7 + $0xb8] sm:$0xff] }
 0xaf5   : > { %v8693_v6 = vsel %vm8685_vm13, %v8681_v47, %v8689_v7  ;;  %v10266_v47 = vld [vmem:[%s16905_s7 + $0x78] sm:$0xff]  ;;  %v10265_v7 = vld [vmem:[%s16905_s7 + $0x70] sm:$0xff] }
 0xaf6   : > { %8697 = vst [vmem:[#allocation4 + $0x10] sm:$0xff] %v8693_v6  ;;  %v10275_v6 = vld [vmem:[%s16905_s7 + $0xb0] sm:$0xff] }
 0xaf8   : > { %v8699_v52 = vld [vmem:[#allocation4] ss:$2 sm:$0xff]  ;;  %v8701_v37 = vld [vmem:[#allocation4 + $0x1] ss:$2 sm:$0xff] }
 0xaf9   : > { %v8703_v25 = vmax.f32 %v8699_v52, %v8701_v37  ;;  %v10264_v52 = vld [vmem:[%s16905_s7 + $0x68] sm:$0xff] }
 0xafa   : > { %v10274_v37 = vld [vmem:[%s16905_s7 + $0xa8] sm:$0xff] }
 0xafb   : > { %8705 = vst [vmem:[#allocation5] sm:$0xff] %v8703_v25  ;;  %v10263_v25 = vld [vmem:[%s16905_s7 + $0x60] sm:$0xff] }
 0xafd   : > { %v8700_v59 = vld [vmem:[#allocation4 + $0x10] ss:$2 sm:$0x3f]  ;;  %v8702_v15 = vld [vmem:[#allocation4 + $0x11] ss:$2 sm:$0x3f] }
 0xafe   : > { %v8704_v48 = vmax.f32 %v8700_v59, %v8702_v15  ;;  %v10273_v59 = vld [vmem:[%s16905_s7 + $0xa0] sm:$0xff]  ;;  %v10262_v15 = vld [vmem:[%s16905_s7 + $0x58] sm:$0xff] }
 0xb00   : > { %8706 = vst [vmem:[#allocation5 + $0x8] sm:$0x3f] %v8704_v48  ;;  %v10272_v48 = vld [vmem:[%s16905_s7 + $0x98] sm:$0xff] }
 0xb07   : > { %v8724_v2 = vld [vmem:[#allocation5 + $0x1] ss:$2 sm:$0x1f]  ;;  %v8707_v23 = vld [vmem:[#allocation5] ss:$2 sm:$0x1f] }
 0xb08   : > { %12196 = vmatmul.mubr.f32.vlgmr.msra.gmra.mxu0 %v8724_v2  ;;  %12231 = vmatmul.mubr.f32.vlgmr.msra.gmra.mxu1 %v8707_v23  ;;  %v8881_v27 = vld [vmem:[#allocation5 + $0x2] ss:$2 sm:$0x1f]  ;;  %v8969_v26 = vld [vmem:[#allocation5 + $0x3] ss:$2 sm:$0x1f] }
 0xb09   : > { %12234 = vmatpush3.msra.mxu0 %v10225_v4  ;;  %12269 = vmatpush3.msra.mxu1 %v10241_v14  ;;  %v9057_v36 = vld [vmem:[#allocation5 + $0x4] ss:$2 sm:$0x1f]  ;;  %v10261_v4 = vld [vmem:[%s16905_s7 + $0x50] sm:$0xff] }
 0xb0a   : > { %12235 = vmatprep.subr.mxu0 %v16931_v0  ;;  %12270 = vmatprep.subr.mxu1 %v16931_v0  ;;  %v10271_v14 = vld [vmem:[%s16905_s7 + $0x90] sm:$0xff]  ;;  %v10260_v2 = vld [vmem:[%s16905_s7 + $0x48] sm:$0xff] }
 0xb0b   : > { %12236 = vmatpush3.msra.mxu0 %v10224_v28  ;;  %12271 = vmatpush3.msra.mxu1 %v10240_v40  ;;  %v10270_v23 = vld [vmem:[%s16905_s7 + $0x88] sm:$0xff]  ;;  %v10259_v28 = vld [vmem:[%s16905_s7 + $0x40] sm:$0xff] }
 0xb0c   : > { %12237 = vmatprep.subr.mxu0 %v16931_v0  ;;  %12272 = vmatprep.subr.mxu1 %v16931_v0  ;;  %v10269_v40 = vld [vmem:[%s16905_s7 + $0x80] sm:$0xff] }
 0xb0d   : > { %12238 = vmatpush3.msra.mxu0 %v10223_v38  ;;  %12273 = vmatpush3.msra.mxu1 %v10239_v44 }
 0xb0e   : > { %12239 = vmatprep.subr.mxu0 %v16931_v0  ;;  %12274 = vmatprep.subr.mxu1 %v16931_v0 }
 0xb0f   : > { %12240 = vmatpush3.msra.mxu0 %v10222_v39  ;;  %12275 = vmatpush3.msra.mxu1 %v10238_v19 }
 0xb10   : > { %12241 = vmatprep.subr.mxu0 %v16931_v0  ;;  %12276 = vmatprep.subr.mxu1 %v16931_v0 }
 0xb11   : > { %12242 = vmatpush3.msra.mxu0 %v10221_v49  ;;  %12277 = vmatpush3.msra.mxu1 %v10237_v20 }
 0xb12   : > { %12243 = vmatprep.subr.mxu0 %v16931_v0  ;;  %12278 = vmatprep.subr.mxu1 %v16931_v0 }
 0xb13   : > { %12244 = vmatpush3.msra.mxu0 %v10220_v57  ;;  %12279 = vmatpush3.msra.mxu1 %v10236_v53 }
 0xb14   : > { %12245 = vmatprep.subr.mxu0 %v16931_v0  ;;  %12280 = vmatprep.subr.mxu1 %v16931_v0 }
 0xb15   : > { %12246 = vmatpush3.msra.mxu0 %v10219_v35  ;;  %12281 = vmatpush3.msra.mxu1 %v10235_v61 }
 0xb16   : > { %12247 = vmatprep.subr.mxu0 %v16931_v0  ;;  %12282 = vmatprep.subr.mxu1 %v16931_v0 }
 0xb17   : > { %12248 = vmatpush3.msra.mxu0 %v10218_v5  ;;  %12283 = vmatpush3.msra.mxu1 %v10234_v30 }
 0xb18   : > { %12249 = vmatprep.subr.mxu0 %v16931_v0  ;;  %12284 = vmatprep.subr.mxu1 %v16931_v0 }
 0xb19   : > { %12250 = vmatpush3.msra.mxu0 %v10217_v63  ;;  %12285 = vmatpush3.msra.mxu1 %v10233_v13  ;;  %v10258_v63 = vld [vmem:[%s16904_s6] ss:$0 sm:$0xff] }
 0xb1a   : > { %12251 = vmatprep.subr.mxu0 %v16931_v0  ;;  %12286 = vmatprep.subr.mxu1 %v16931_v0 }
 0xb1b   : > { %12252 = vmatpush3.msra.mxu0 %v10216_v22  ;;  %12287 = vmatpush3.msra.mxu1 %v10232_v11 }
 0xb1c   : > { %12253 = vmatprep.subr.mxu0 %v16931_v0  ;;  %12288 = vmatprep.subr.mxu1 %v16931_v0 }
 0xb1d   : > { %12254 = vmatpush3.msra.mxu0 %v10215_v29  ;;  %12289 = vmatpush3.msra.mxu1 %v10231_v34 }
 0xb1e   : > { %12255 = vmatprep.subr.mxu0 %v16931_v0  ;;  %12290 = vmatprep.subr.mxu1 %v16931_v0 }
 0xb1f   : > { %12256 = vmatpush3.msra.mxu0 %v10214_v51  ;;  %12291 = vmatpush3.msra.mxu1 %v10230_v31  ;;  %v9163_v31 = vld [vmem:[%s16905_s7 + $0x38] sm:$0xff] }
 0xb20   : > { %12257 = vmatprep.subr.mxu0 %v16931_v0  ;;  %12292 = vmatprep.subr.mxu1 %v16931_v0 }
 0xb21   : > { %12258 = vmatpush3.msra.mxu0 %v10213_v1  ;;  %12293 = vmatpush3.msra.mxu1 %v10229_v56  ;;  %v10294_v56 = vld [vmem:[%s16905_s7 + $0x138] sm:$0xff] }
 0xb22   : > { %12259 = vmatprep.subr.mxu0 %v16931_v0  ;;  %12294 = vmatprep.subr.mxu1 %v16931_v0 }
 0xb23   : > { %12260 = vmatpush3.msra.mxu0 %v10212_v12  ;;  %12295 = vmatpush3.msra.mxu1 %v10228_v62  ;;  %v9162_v12 = vld [vmem:[%s16905_s7 + $0x30] sm:$0xff] }
 0xb24   : > { %12261 = vmatprep.subr.mxu0 %v16931_v0  ;;  %12296 = vmatprep.subr.mxu1 %v16931_v0  ;;  %v10293_v62 = vld [vmem:[%s16905_s7 + $0x130] sm:$0xff] }
 0xb25   : > { %12262 = vmatpush3.msra.mxu0 %v10211_v55  ;;  %12297 = vmatpush3.msra.mxu1 %v10227_v32  ;;  %v9161_v55 = vld [vmem:[%s16905_s7 + $0x28] sm:$0xff] }
 0xb26   : > { %12263 = vmatprep.subr.mxu0 %v16931_v0  ;;  %12298 = vmatprep.subr.mxu1 %v16931_v0  ;;  %v10292_v32 = vld [vmem:[%s16905_s7 + $0x128] sm:$0xff] }
 0xb27   : > { %12264 = vmatpush3.msra.mxu0 %v10210_v3  ;;  %12265 = vmatprep.mubr.msk.f32.mxu0 %vm12477_vm12, %v16931_v0  ;;  %v9160_v3 = vld [vmem:[%s16905_s7 + $0x20] sm:$0xff] }
 0xb28   : > { %12299 = vmatpush3.msra.mxu1 %v10226_v33  ;;  %12300 = vmatprep.mubr.msk.f32.mxu1 %vm12477_vm12, %v16931_v0  ;;  %v10291_v33 = vld [vmem:[%s16905_s7 + $0x120] sm:$0xff] }
 0xb29   : > { %12266 = vmatmul.mubr.f32.vlgmr.msra.gmra.mxu0 %v8881_v27  ;;  %12301 = vmatmul.mubr.f32.vlgmr.msra.gmra.mxu1 %v8969_v26  ;;  %v10290_v27 = vld [vmem:[%s16905_s7 + $0x118] sm:$0xff]  ;;  %v9158_v26 = vld [vmem:[%s16905_s7 + $0x10] sm:$0xff] }
 0xb2a   : > { %12303 = vmatprep.subr.mxu0 %v16931_v0  ;;  %12335 = vmatprep.mubr.msk.f32.mxu0 %vm12477_vm12, %v16931_v0 }
 0xb2b   : > { %12304 = vmatpush3.msra.mxu0 %v10257_v43  ;;  %12338 = vmatprep.subr.mxu1 %v16931_v0  ;;  %v9159_v43 = vld [vmem:[%s16905_s7 + $0x18] sm:$0xff] }
 0xb2c   : > { %12305 = vmatprep.subr.mxu0 %v16931_v0  ;;  %12354 = vmatprep.mubr.msk.f32.mxu1 %vm12477_vm12, %v16931_v0 }
 0xb2d   : > { %12306 = vmatpush3.msra.mxu0 %v10256_v8  ;;  %12339 = vmatpush3.msra.mxu1 %v10266_v47  ;;  %v10289_v8 = vld [vmem:[%s16905_s7 + $0x110] sm:$0xff] }
 0xb2e   : > { %12307 = vmatprep.subr.mxu0 %v16931_v0  ;;  %12340 = vmatprep.subr.mxu1 %v16931_v0  ;;  %v9575_v47 = vld [vmem:[%s16907_s9 + $0x30] sm:$0xff] }
 0xb2f   : > { %12308 = vmatpush3.msra.mxu0 %v10255_v21  ;;  %12341 = vmatpush3.msra.mxu1 %v10265_v7  ;;  %v9157_v21 = vld [vmem:[%s16905_s7 + $0x8] sm:$0xff]  ;;  %v9573_v7 = vld [vmem:[%s16907_s9 + $0x20] sm:$0xff] }
 0xb30   : > { %12309 = vmatprep.subr.mxu0 %v16931_v0  ;;  %12342 = vmatprep.subr.mxu1 %v16931_v0 }
 0xb31   : > { %12310 = vmatpush3.msra.mxu0 %v10254_v24  ;;  %12343 = vmatpush3.msra.mxu1 %v10264_v52  ;;  %v10288_v24 = vld [vmem:[%s16905_s7 + $0x108] sm:$0xff]  ;;  %v9571_v52 = vld [vmem:[%s16907_s9 + $0x10] sm:$0xff] }
 0xb32   : > { %12311 = vmatprep.subr.mxu0 %v16931_v0  ;;  %12344 = vmatprep.subr.mxu1 %v16931_v0 }
 0xb33   : > { %12312 = vmatpush3.msra.mxu0 %v10253_v60  ;;  %12345 = vmatpush3.msra.mxu1 %v10263_v25  ;;  %v9156_v60 = vld [vmem:[%s16905_s7] sm:$0xff] }
 0xb34   : > { %12313 = vmatprep.subr.mxu0 %v16931_v0  ;;  %12346 = vmatprep.subr.mxu1 %v16931_v0  ;;  %v9569_v25 = vld [vmem:[%s16907_s9] sm:$0xff] }
 0xb35   : > { %12314 = vmatpush3.msra.mxu0 %v10252_v41  ;;  %12347 = vmatpush3.msra.mxu1 %v10262_v15  ;;  %v10287_v41 = vld [vmem:[%s16905_s7 + $0x100] sm:$0xff] }
 0xb36   : > { %12315 = vmatprep.subr.mxu0 %v16931_v0  ;;  %12348 = vmatprep.subr.mxu1 %v16931_v0 }
 0xb37   : > { %12316 = vmatpush3.msra.mxu0 %v10251_v18  ;;  %12349 = vmatpush3.msra.mxu1 %v10261_v4  ;;  %v10285_v18 = vld [vmem:[%s16905_s7 + $0xf8] sm:$0xff] }
 0xb38   : > { %12317 = vmatprep.subr.mxu0 %v16931_v0  ;;  %12350 = vmatprep.subr.mxu1 %v16931_v0 }
 0xb39   : > { %12318 = vmatpush3.msra.mxu0 %v10250_v50  ;;  %12351 = vmatpush3.msra.mxu1 %v10260_v2 }
 0xb3a   : > { %12319 = vmatprep.subr.mxu0 %v16931_v0  ;;  %12352 = vmatprep.subr.mxu1 %v16931_v0 }
 0xb3b   : > { %12320 = vmatpush3.msra.mxu0 %v10249_v54  ;;  %12353 = vmatpush3.msra.mxu1 %v10259_v28  ;;  %v10284_v54 = vld [vmem:[%s16905_s7 + $0xf0] sm:$0xff] }
 0xb3c   : > { %12321 = vmatprep.subr.mxu0 %v16931_v0  ;;  %12357 = vmatprep.subr.mxu1 %v16931_v0 }
 0xb3d   : > { %12322 = vmatpush3.msra.mxu0 %v10248_v46  ;;  %v10283_v46 = vld [vmem:[%s16905_s7 + $0xe8] sm:$0xff] }
 0xb3e   : > { %12323 = vmatprep.subr.mxu0 %v16931_v0 }
 0xb3f   : > { %12324 = vmatpush3.msra.mxu0 %v10247_v16  ;;  %v10282_v16 = vld [vmem:[%s16905_s7 + $0xe0] sm:$0xff] }
 0xb40   : > { %12325 = vmatprep.subr.mxu0 %v16931_v0 }
 0xb41   : > { %12326 = vmatpush3.msra.mxu0 %v10246_v58  ;;  %v10281_v58 = vld [vmem:[%s16905_s7 + $0xd8] sm:$0xff] }
 0xb42   : > { %12327 = vmatprep.subr.mxu0 %v16931_v0 }
 0xb43   : > { %12328 = vmatpush3.msra.mxu0 %v10245_v42  ;;  %v10280_v42 = vld [vmem:[%s16905_s7 + $0xd0] sm:$0xff] }
 0xb44   : > { %12329 = vmatprep.subr.mxu0 %v16931_v0 }
 0xb45   : > { %12330 = vmatpush3.msra.mxu0 %v10244_v45  ;;  %v10279_v45 = vld [vmem:[%s16905_s7 + $0xc8] sm:$0xff] }
 0xb46   : > { %12331 = vmatprep.subr.mxu0 %v16931_v0 }
 0xb47   : > { %12332 = vmatpush3.msra.mxu0 %v10243_v17  ;;  %v10278_v17 = vld [vmem:[%s16905_s7 + $0xc0] sm:$0xff] }
 0xb48   : > { %12333 = vmatprep.subr.mxu0 %v16931_v0 }
 0xb49   : > { %12334 = vmatpush3.msra.mxu0 %v10242_v10 }
 0xb4a   : > { %12336 = vmatmul.mubr.f32.vlgmr.msra.gmra.mxu0 %v9057_v36  ;;  %12376 = vmatprep.subr.mxu0 %v16931_v0  ;;  %v9576_v36 = vld [vmem:[%s16907_s9 + $0x38] sm:$0xff] }
 0xb4b   : > { %12392 = vmatprep.mubr.msk.f32.mxu0 %vm12477_vm12, %v16931_v0  ;;  %12377 = vmatpush3.msra.mxu0 %v10276_v9  ;;  %v9574_v9 = vld [vmem:[%s16907_s9 + $0x28] sm:$0xff] }
 0xb4c   : > { %12378 = vmatprep.subr.mxu0 %v16931_v0 }
 0xb4d   : > { %12379 = vmatpush3.msra.mxu0 %v10275_v6  ;;  %v9572_v6 = vld [vmem:[%s16907_s9 + $0x18] sm:$0xff] }
 0xb4e   : > { %12380 = vmatprep.subr.mxu0 %v16931_v0 }
 0xb4f   : > { %12381 = vmatpush3.msra.mxu0 %v10274_v37  ;;  %v9570_v37 = vld [vmem:[%s16907_s9 + $0x8] sm:$0xff] }
 0xb50   : > { %12382 = vmatprep.subr.mxu0 %v16931_v0 }
 0xb51   : > { %12383 = vmatpush3.msra.mxu0 %v10273_v59 }
 0xb52   : > { %12384 = vmatprep.subr.mxu0 %v16931_v0 }
 0xb53   : > { %12385 = vmatpush3.msra.mxu0 %v10272_v48 }
 0xb54   : > { %12386 = vmatprep.subr.mxu0 %v16931_v0 }
 0xb55   : > { %12387 = vmatpush3.msra.mxu0 %v10271_v14 }
 0xb56   : > { %12388 = vmatprep.subr.mxu0 %v16931_v0 }
 0xb57   : > { %12389 = vmatpush3.msra.mxu0 %v10270_v23 }
 0xb58   : > { %12390 = vmatprep.subr.mxu0 %v16931_v0 }
 0xb59   : > { %12391 = vmatpush3.msra.mxu0 %v10269_v40 }
 0xb5a   : > { %12414 = vmatprep.subr.mxu0 %v16931_v0 }
 0xbc8   : > { %v8807_v38 = vpop.f32.mrf.mxu0  ;;  %v8877_v44 = vpop.f32.mrf.mxu1 }
 0xbc9   : > { %v8878_v35 = vadd.f32 %v8877_v44, %v8807_v38 }
 0xbca   : > { %v12197_v39 = vpop.f32.mrf.mxu0  ;;  %v12232_v19 = vpop.f32.mrf.mxu1 }
 0xbcb   : > { %v9564_v19 = vld [vmem:[%s16906_s8] sm:$0x1] }
 0xbe9   : > { %v8964_v49 = vpop.f32.mrf.mxu0  ;;  %v9052_v20 = vpop.f32.mrf.mxu1 }
 0xbea   : > { %v8968_v61 = vadd.f32 %v8964_v49, %v8878_v35  ;;  %v9577_v35 = vld [vmem:[%s16908_s10] sm:$0x1] }
 0xbeb   : > { %v12267_v57 = vpop.f32.mrf.mxu0  ;;  %v12302_v53 = vpop.f32.mrf.mxu1 }
 0xbec   : > { %v9056_v5 = vadd.f32 %v9052_v20, %v8968_v61 }
 0xc0a   : > { %v9140_v30 = vpop.f32.mrf.mxu0 }
 0xc0b   : > { %v9144_v13 = vadd.f32 %v9140_v30, %v9056_v5 }
 0xc0c   : > { %v12337_v22 = vpop.f32.mrf.mxu0 }
 0xc0d   : > { %v9152_v11 = vadd.f32 %v10258_v63, %v9144_v13 }
 0xc0f   : > { %vm9153_vm14 = vcmp.ge.f32.partialorder %v9152_v11, 0.0  ;;  %v9154_v29 = vmul.f32 0.02, %v9152_v11 }
 0xc11   : > { %v16740_v34 = vsel %vm9153_vm14, %v9152_v11, %v9154_v29 }
 0xc12   : > { %v9173_v51 = vrot.slane %v16740_v34, 1  ;;  %v9326_v1 = vrot.slane %v16740_v34, 2  ;;  %v9490_v50 = vrot.slane %v16740_v34, 4  ;;  %v9408_v10 = vrot.slane %v16740_v34, 3 }
 0xc14   : > { %12355 = vmatmul.mubr.msk.f32.vlgmr.msra.gmra.mxu1 %vm2264_vm8, %v9173_v51  ;;  %12393 = vmatmul.mubr.msk.f32.vlgmr.msra.gmra.mxu0 %vm2264_vm8, %v9326_v1 }
 0xc15   : > { %12358 = vmatpush3.msra.mxu1 %v9163_v31  ;;  %12415 = vmatpush3.msra.mxu0 %v10294_v56 }
 0xc16   : > { %12359 = vmatprep.subr.mxu1 %v16931_v0  ;;  %12416 = vmatprep.subr.mxu0 %v16931_v0 }
 0xc17   : > { %12360 = vmatpush3.msra.mxu1 %v9162_v12  ;;  %12417 = vmatpush3.msra.mxu0 %v10293_v62 }
 0xc18   : > { %12361 = vmatprep.subr.mxu1 %v16931_v0  ;;  %12418 = vmatprep.subr.mxu0 %v16931_v0 }
 0xc19   : > { %12362 = vmatpush3.msra.mxu1 %v9161_v55  ;;  %12419 = vmatpush3.msra.mxu0 %v10292_v32 }
 0xc1a   : > { %12363 = vmatprep.subr.mxu1 %v16931_v0  ;;  %12420 = vmatprep.subr.mxu0 %v16931_v0 }
 0xc1b   : > { %12364 = vmatpush3.msra.mxu1 %v9160_v3  ;;  %12421 = vmatpush3.msra.mxu0 %v10291_v33 }
 0xc1c   : > { %12365 = vmatprep.subr.mxu1 %v16931_v0  ;;  %12422 = vmatprep.subr.mxu0 %v16931_v0 }
 0xc1d   : > { %12366 = vmatpush3.msra.mxu1 %v9159_v43  ;;  %12423 = vmatpush3.msra.mxu0 %v10290_v27 }
 0xc1e   : > { %12367 = vmatprep.subr.mxu1 %v16931_v0  ;;  %12424 = vmatprep.subr.mxu0 %v16931_v0 }
 0xc1f   : > { %12368 = vmatpush3.msra.mxu1 %v9158_v26  ;;  %12425 = vmatpush3.msra.mxu0 %v10289_v8 }
 0xc20   : > { %12369 = vmatprep.subr.mxu1 %v16931_v0  ;;  %12426 = vmatprep.subr.mxu0 %v16931_v0 }
 0xc21   : > { %12370 = vmatpush3.msra.mxu1 %v9157_v21  ;;  %12427 = vmatpush3.msra.mxu0 %v10288_v24 }
 0xc22   : > { %12371 = vmatprep.subr.mxu1 %v16931_v0  ;;  %12428 = vmatprep.subr.mxu0 %v16931_v0 }
 0xc23   : > { %12372 = vmatpush3.msra.mxu1 %v9156_v60  ;;  %12373 = vmatprep.mubr.msk.f32.mxu1 %vm12477_vm12, %v16931_v0 }
 0xc24   : > { %12429 = vmatpush3.msra.mxu0 %v10287_v41  ;;  %12430 = vmatprep.mubr.msk.f32.mxu0 %vm12477_vm12, %v16931_v0 }
 0xc25   : > { %12374 = vmatmul.mubr.msk.f32.vlgmr.msra.gmra.mxu1 %vm2264_vm8, %v16740_v34  ;;  %12395 = vmatprep.subr.mxu1 %v16931_v0 }
 0xc26   : > { %12431 = vmatmul.mubr.msk.f32.vlgmr.msra.gmra.mxu0 %vm2264_vm8, %v9490_v50  ;;  %12396 = vmatpush3.msra.mxu1 %v10285_v18 }
 0xc27   : > { %12397 = vmatprep.subr.mxu1 %v16931_v0  ;;  %12411 = vmatprep.mubr.msk.f32.mxu1 %vm12477_vm12, %v16931_v0 }
 0xc28   : > { %12398 = vmatpush3.msra.mxu1 %v10284_v54 }
 0xc29   : > { %12399 = vmatprep.subr.mxu1 %v16931_v0 }
 0xc2a   : > { %12400 = vmatpush3.msra.mxu1 %v10283_v46 }
 0xc2b   : > { %12401 = vmatprep.subr.mxu1 %v16931_v0 }
 0xc2c   : > { %12402 = vmatpush3.msra.mxu1 %v10282_v16 }
 0xc2d   : > { %12403 = vmatprep.subr.mxu1 %v16931_v0 }
 0xc2e   : > { %12404 = vmatpush3.msra.mxu1 %v10281_v58 }
 0xc2f   : > { %12405 = vmatprep.subr.mxu1 %v16931_v0 }
 0xc30   : > { %12406 = vmatpush3.msra.mxu1 %v10280_v42 }
 0xc31   : > { %12407 = vmatprep.subr.mxu1 %v16931_v0 }
 0xc32   : > { %12408 = vmatpush3.msra.mxu1 %v10279_v45 }
 0xc33   : > { %12409 = vmatprep.subr.mxu1 %v16931_v0 }
 0xc34   : > { %12410 = vmatpush3.msra.mxu1 %v10278_v17 }
 0xc35   : > { %12412 = vmatmul.mubr.msk.f32.vlgmr.msra.gmra.mxu1 %vm2264_vm8, %v9408_v10  ;;  %12433 = vmatprep.subr.mxu1 %v16931_v0 }
 0xc36   : > { %12449 = vmatprep.mubr.msk.f32.mxu1 %vm12477_vm12, %v16931_v0  ;;  %12434 = vmatpush3.msra.mxu1 %v9576_v36 }
 0xc37   : > { %12435 = vmatprep.subr.mxu1 %v16931_v0 }
 0xc38   : > { %12436 = vmatpush3.msra.mxu1 %v9575_v47 }
 0xc39   : > { %12437 = vmatprep.subr.mxu1 %v16931_v0 }
 0xc3a   : > { %12438 = vmatpush3.msra.mxu1 %v9574_v9 }
 0xc3b   : > { %12439 = vmatprep.subr.mxu1 %v16931_v0 }
 0xc3c   : > { %12440 = vmatpush3.msra.mxu1 %v9573_v7 }
 0xc3d   : > { %12441 = vmatprep.subr.mxu1 %v16931_v0 }
 0xc3e   : > { %12442 = vmatpush3.msra.mxu1 %v9572_v6 }
 0xc3f   : > { %12443 = vmatprep.subr.mxu1 %v16931_v0 }
 0xc40   : > { %12444 = vmatpush3.msra.mxu1 %v9571_v52 }
 0xc41   : > { %12445 = vmatprep.subr.mxu1 %v16931_v0 }
 0xc42   : > { %12446 = vmatpush3.msra.mxu1 %v9570_v37 }
 0xc43   : > { %12447 = vmatprep.subr.mxu1 %v16931_v0 }
 0xc44   : > { %12448 = vmatpush3.msra.mxu1 %v9569_v25 }
 0xcd4   : > { %v9242_v59 = vpop.f32.mrf.mxu1  ;;  %v9395_v15 = vpop.f32.mrf.mxu0 }
 0xcd6   : > { %v12356_v48 = vpop.f32.mrf.mxu1  ;;  %v12394_v4 = vpop.f32.mrf.mxu0 }
 0xce5   : > { %v9314_v14 = vpop.f32.mrf.mxu1 }
 0xce6   : > { %v9559_v2 = vpop.f32.mrf.mxu0  ;;  %v9315_v40 = vadd.f32 %v9314_v14, %v9242_v59 }
 0xce7   : > { %v12375_v23 = vpop.f32.mrf.mxu1 }
 0xce8   : > { %v12432_v28 = vpop.f32.mrf.mxu0  ;;  %v9399_v38 = vadd.f32 %v9395_v15, %v9315_v40 }
 0xcf5   : > { %v9477_v44 = vpop.f32.mrf.mxu1 }
 0xcf6   : > { %v9481_v39 = vadd.f32 %v9477_v44, %v9399_v38 }
 0xcf7   : > { %v12413_v49 = vpop.f32.mrf.mxu1 }
 0xcf8   : > { %v9563_v0 = vadd.f32 %v9559_v2, %v9481_v39 }
 0xcfa   : > { %v9565_v20 = vadd.f32 %v9564_v19, %v9563_v0 }
 0xcfc   : > { %v9567_v57 = vmul.f32 0.02, %v9565_v20  ;;  %vm9566_vm12 = vcmp.ge.f32.partialorder %v9565_v20, 0.0 }
 0xcfe   : > { %v9568_v53 = vsel %vm9566_vm12, %v9565_v20, %v9567_v57 }
 0xcff   : > { %12450 = vmatmul.mubr.msk.f32.vlgmr.msra.gmra.mxu1 %vm2264_vm8, %v9568_v53 }
 0xdbf   : > { %v9647_v61 = vpop.f32.mrf.mxu1 }
 0xdc0   : > { %v9648_v5 = vadd.f32 %v9647_v61, %v9577_v35 }
 0xdc1   : > { %v12451_v30 = vpop.f32.mrf.mxu1 }
 0xdc2   : > { %10297 = vst.msk [vmem:[%s15162_s21 + $0x3] sm:$0x1] %vm2745_vm9, %v9648_v5 }
 0xdc3 PF: > { %s21_s17 = sadd.s32 1, %s12473_s17  }
 0xdc4   : > { %p18_p5 = scmp.ge.s32.totalorder %s21_s17, 4  }
 0xdc6   :  { %20 = sbr.rel (!%p18_p5) target bundleno = 1 (0x1), region = 150 }

</bundles_post_ra>
